<compile_context>
chip_gen: v5e
topology: v5e:2x2
jax: 0.10.0
libtpu: 0.0.40
codegen_flags: <defaults>
</compile_context>

<pallas_src>
import math
import jax
import jax.numpy as jnp
from jax.experimental import pallas as pl
from jax.experimental.pallas import tpu as pltpu


def _round_up(x, m):
    return ((x + m - 1) // m) * m


# ---------------------------------------------------------------------------
# Pallas kernel 1: merged (subj, obj) fused Linear + BatchNorm1d (training-mode
# batch statistics) + ReLU.
# Grid = (2 groups [parallel], K // tk reduction steps [arbitrary, last]).
# f32 accumulator lives in VMEM scratch; the whole F dim is one lane-dense tile
# so every weight DMA is a contiguous (tk, F) slab.
# NOTE: BatchNorm statistics are computed over the B rows present in the block;
# this is only correct because the batch dimension is never tiled.
# ---------------------------------------------------------------------------
def _dual_linear_bn_relu_kernel(x_ref, w_ref, b_ref, g_ref, beta_ref,
                                o_ref, acc_ref):
    k = pl.program_id(1)

    @pl.when(k == 0)
    def _():
        acc_ref[...] = jnp.zeros_like(acc_ref)

    acc_ref[...] += jnp.dot(x_ref[0], w_ref[0],
                            preferred_element_type=jnp.float32)

    @pl.when(k == pl.num_programs(1) - 1)
    def _():
        y = acc_ref[...] + b_ref[0]                            # (B, F)
        # BatchNorm1d in training mode: biased batch statistics, eps=1e-5.
        mean = jnp.mean(y, axis=0, keepdims=True)
        var = jnp.mean((y - mean) ** 2, axis=0, keepdims=True)
        y_hat = (y - mean) * jax.lax.rsqrt(var + 1e-5)
        o_ref[0] = jnp.maximum(y_hat * g_ref[0] + beta_ref[0], 0.0)


def _pick_tk(K, cap=2048):
    """Largest 128-aligned tile size <= cap that divides K, else None (pad K)."""
    tk = cap
    while tk >= 128:
        if K % tk == 0:
            return tk
        tk //= 2
    return None


def dual_linear_bn_relu(x, w, b, gamma, beta, *, tk_cap=2048):
    """x: (2, B, K); w: (2, K, F); b/gamma/beta: (2, F) -> (2, B, F)."""
    G, B, K = x.shape
    F = w.shape[2]
    assert G == 2 and w.shape == (G, K, F)

    tk = _pick_tk(K, tk_cap)
    if tk is None:
        # Pad the contraction dim with zeros so a big lane-aligned tile divides
        # it; zero rows/cols contribute nothing to the accumulation.
        tk = 512
        Kp = _round_up(K, tk)
        x = jnp.pad(x, ((0, 0), (0, 0), (0, Kp - K)))
        w = jnp.pad(w, ((0, 0), (0, Kp - K), (0, 0)))
        K = Kp

    b3 = b.reshape(G, 1, F)
    g3 = gamma.reshape(G, 1, F)
    be3 = beta.reshape(G, 1, F)

    return pl.pallas_call(
        _dual_linear_bn_relu_kernel,
        out_shape=jax.ShapeDtypeStruct((G, B, F), jnp.float32),
        grid_spec=pltpu.PrefetchScalarGridSpec(
            num_scalar_prefetch=0,
            grid=(G, K // tk),
            in_specs=[
                pl.BlockSpec((1, B, tk), lambda g, k: (g, 0, k)),
                pl.BlockSpec((1, tk, F), lambda g, k: (g, k, 0)),  # contiguous slab
                pl.BlockSpec((1, 1, F), lambda g, k: (g, 0, 0)),
                pl.BlockSpec((1, 1, F), lambda g, k: (g, 0, 0)),
                pl.BlockSpec((1, 1, F), lambda g, k: (g, 0, 0)),
            ],
            out_specs=pl.BlockSpec((1, B, F), lambda g, k: (g, 0, 0)),
            scratch_shapes=[pltpu.VMEM((B, F), jnp.float32)],
        ),
        compiler_params=pltpu.CompilerParams(
            dimension_semantics=("parallel", "arbitrary"),
            vmem_limit_bytes=32 * 1024 * 1024,
        ),
    )(x, w, b3, g3, be3)


# ---------------------------------------------------------------------------
# Pallas kernel 2: fused VtransE head (single invocation, all operands in VMEM,
# every dim zero-padded up to a multiple of 128 so all matmuls / stores are
# lane-dense; padded lanes contribute exactly zero).
#   v_s = relu(x_s @ W_s + b_s); v_o = relu(x_o @ W_o + b_o)
#   out = ((v_o - v_s) @ W_p + b_p) * predicates     (reduced outside)
# ---------------------------------------------------------------------------
def _head_kernel(xs_ref, xo_ref, ws_ref, bs_ref, wo_ref, bo_ref,
                 wp_ref, bp_ref, pred_ref, out_ref):
    v_s = jnp.maximum(
        jnp.dot(xs_ref[...], ws_ref[...],
                preferred_element_type=jnp.float32) + bs_ref[...], 0.0)
    v_o = jnp.maximum(
        jnp.dot(xo_ref[...], wo_ref[...],
                preferred_element_type=jnp.float32) + bo_ref[...], 0.0)
    scores = jnp.dot(v_o - v_s, wp_ref[...],
                     preferred_element_type=jnp.float32) + bp_ref[...]
    out_ref[...] = scores * pred_ref[...]


def vtranse_head(x_s, x_o, ws, bs, wo, bo, wp, bp, predicates):
    B, D = x_s.shape
    E = ws.shape[1]
    N = wp.shape[1]
    Dp, Ep, Np = _round_up(D, 128), _round_up(E, 128), _round_up(N, 128)

    def pad2(a, r, c):
        return jnp.pad(a, ((0, r - a.shape[0]), (0, c - a.shape[1])))

    xs_p = pad2(x_s, B, Dp)
    xo_p = pad2(x_o, B, Dp)
    ws_p = pad2(ws, Dp, Ep)
    wo_p = pad2(wo, Dp, Ep)
    bs_p = pad2(bs.reshape(1, -1), 1, Ep)
    bo_p = pad2(bo.reshape(1, -1), 1, Ep)
    wp_p = pad2(wp, Ep, Np)
    bp_p = pad2(bp.reshape(1, -1), 1, Np)
    pred_p = pad2(predicates, B, Np)

    prod = pl.pallas_call(
        _head_kernel,
        out_shape=jax.ShapeDtypeStruct((B, Np), jnp.float32),
        in_specs=[pl.BlockSpec(memory_space=pltpu.MemorySpace.VMEM)] * 9,
        out_specs=pl.BlockSpec(memory_space=pltpu.MemorySpace.VMEM),
    )(xs_p, xo_p, ws_p, bs_p, wo_p, bo_p, wp_p, bp_p, pred_p)
    return jnp.sum(prod, axis=1)                     # padded lanes are zero


# ---------------------------------------------------------------------------
# Shape-static, vectorized ROI crop + bilinear resize (JAX glue).
# Matches torch fix_bbox + F.upsample(mode='bilinear', align_corners=False) on
# the cropped region, but fully traced (no per-bbox recompiles).
# ---------------------------------------------------------------------------
def fix_bbox_jax(bbox, size):
    """bbox: (B, 4) normalized [h0, h1, w0, w1] -> four (B,) int32 bounds."""
    b = bbox * size
    h0 = jnp.floor(b[:, 0]).astype(jnp.int32)
    h1 = jnp.minimum(size, jnp.ceil(b[:, 1])).astype(jnp.int32)
    w0 = jnp.floor(b[:, 2]).astype(jnp.int32)
    w1 = jnp.minimum(size, jnp.ceil(b[:, 3])).astype(jnp.int32)
    # TODO(synk): the torch reference asserts 0 <= lo < hi <= size host-side;
    # bounds are traced here, so validity of the bboxes is assumed.
    return h0, h1, w0, w1


def roi_bilinear_batch(fmap, h0, h1, w0, w1, out_size):
    """fmap: (B, C, H, W); bounds: (B,) int32 -> (B, C, out_size, out_size)."""
    o = jnp.arange(out_size, dtype=jnp.float32)

    def coords(lo, hi):
        size = (hi - lo).astype(jnp.float32)[:, None]              # (B, 1)
        src = (o[None, :] + 0.5) * (size / out_size) - 0.5          # (B, out)
        src = jnp.maximum(src, 0.0)
        i0 = jnp.floor(src)
        frac = src - i0
        i0i = i0.astype(jnp.int32)
        i1i = jnp.minimum(i0i + 1, (hi - lo - 1)[:, None])
        return i0i + lo[:, None], i1i + lo[:, None], frac

    h_lo, h_hi, h_f = coords(h0, h1)
    w_lo, w_hi, w_f = coords(w0, w1)

    def gather_h(idx):                                  # -> (B, C, out, W)
        return jnp.take_along_axis(fmap, idx[:, None, :, None], axis=2)

    x_h = (gather_h(h_lo) * (1.0 - h_f)[:, None, :, None]
           + gather_h(h_hi) * h_f[:, None, :, None])

    def gather_w(idx):                                  # -> (B, C, out, out)
        return jnp.take_along_axis(x_h, idx[:, None, None, :], axis=3)

    return (gather_w(w_lo) * (1.0 - w_f)[:, None, None, :]
            + gather_w(w_hi) * w_f[:, None, None, :])


# ---------------------------------------------------------------------------
# Full forward (mirrors VtransE.forward)
# ---------------------------------------------------------------------------
def vtranse_forward(params, subj, obj, img_feature_map, t_s, t_o,
                    bbox_s, bbox_o, predicates, visual_feature_size):
    # phrase_encoder (external module in the reference): Linear -> 300-d classeme
    classeme_subj = subj @ params["pe_w"] + params["pe_b"]
    classeme_obj = obj @ params["pe_w"] + params["pe_b"]

    # TODO(synk): pretrained resnet18 backbone is not reproduced here;
    # `img_feature_map` stands in for self.backbone(full_im) with shape (B, 512, 7, 7).

    B = img_feature_map.shape[0]
    hs0, hs1, ws0, ws1 = fix_bbox_jax(bbox_s, 7)
    ho0, ho1, wo0, wo1 = fix_bbox_jax(bbox_o, 7)
    subj_roi = roi_bilinear_batch(img_feature_map, hs0, hs1, ws0, ws1,
                                  visual_feature_size)
    obj_roi = roi_bilinear_batch(img_feature_map, ho0, ho1, wo0, wo1,
                                 visual_feature_size)
    subj_flat = subj_roi.reshape(B, -1)       # (B, 512*vfs*vfs), CHW order
    obj_flat = obj_roi.reshape(B, -1)

    # hot path: merged subj/obj fused Linear + BatchNorm + ReLU (Pallas kernel 1)
    x_stack = jnp.stack([subj_flat, obj_flat], axis=0)          # (2, B, K)
    y = dual_linear_bn_relu(x_stack, params["l12_w"], params["l12_b"],
                            params["bn12_g"], params["bn12_b"])
    subj_img_feature, obj_img_feature = y[0], y[1]

    sf = params["scale_factor"]
    x_s = jnp.concatenate([classeme_subj * sf[0], t_s * sf[1],
                           subj_img_feature * sf[2]], axis=1)
    x_o = jnp.concatenate([classeme_obj * sf[0], t_o * sf[1],
                           obj_img_feature * sf[2]], axis=1)

    # hot path: fused W_s / W_o / W_p + predicate product (Pallas kernel 2)
    return vtranse_head(x_s, x_o,
                        params["ws_w"], params["ws_b"],
                        params["wo_w"], params["wo_b"],
                        params["wp_w"], params["wp_b"], predicates)


# ---------------------------------------------------------------------------
# Deterministic parameter init (PyTorch Linear-style uniform bounds).
# linear1/linear2 params are pre-stacked along a leading axis of size 2 so the
# merged Pallas kernel streams them without a runtime concat.
# ---------------------------------------------------------------------------
def init_params(key, word_dim, visual_feature_size, predicate_embedding_dim):
    vfs2_512 = visual_feature_size ** 2 * 512
    vfs2_64 = visual_feature_size ** 2 * 64
    feature_dim = 300 + 4 + vfs2_64
    ks = jax.random.split(key, 7)

    def linear(k, fan_in, fan_out):
        bound = 1.0 / math.sqrt(fan_in)
        kw, kb = jax.random.split(k)
        w = jax.random.uniform(kw, (fan_in, fan_out), jnp.float32, -bound, bound)
        b = jax.random.uniform(kb, (fan_out,), jnp.float32, -bound, bound)
        return w, b

    pe_w, pe_b = linear(ks[0], word_dim, 300)
    l1_w, l1_b = linear(ks[1], vfs2_512, vfs2_64)
    l2_w, l2_b = linear(ks[2], vfs2_512, vfs2_64)
    ws_w, ws_b = linear(ks[3], feature_dim, predicate_embedding_dim)
    wo_w, wo_b = linear(ks[4], feature_dim, predicate_embedding_dim)
    wp_w, wp_b = linear(ks[5], predicate_embedding_dim, 9)
    scale_factor = jax.random.uniform(ks[6], (3,), jnp.float32)

    return dict(
        pe_w=pe_w, pe_b=pe_b,
        l12_w=jnp.stack([l1_w, l2_w]),                 # (2, K, F)
        l12_b=jnp.stack([l1_b, l2_b]),                 # (2, F)
        bn12_g=jnp.ones((2, vfs2_64), jnp.float32),
        bn12_b=jnp.zeros((2, vfs2_64), jnp.float32),
        ws_w=ws_w, ws_b=ws_b, wo_w=wo_w, wo_b=wo_b, wp_w=wp_w, wp_b=wp_b,
        scale_factor=scale_factor,
    )


if __name__ == "__main__":
    B = 2
    word_dim = 16
    visual_feature_size = 4          # -> Linear1/2: 8192 -> 1024
    predicate_embedding_dim = 128

    key = jax.random.PRNGKey(0)
    pkey, dkey = jax.random.split(key)
    params = init_params(pkey, word_dim, visual_feature_size, predicate_embedding_dim)

    dks = jax.random.split(dkey, 6)
    subj = jax.random.normal(dks[0], (B, word_dim), jnp.float32)
    obj = jax.random.normal(dks[1], (B, word_dim), jnp.float32)
    img_feature_map = jax.random.normal(dks[2], (B, 512, 7, 7), jnp.float32)  # NCHW
    t_s = jax.random.normal(dks[3], (B, 4), jnp.float32)
    t_o = jax.random.normal(dks[4], (B, 4), jnp.float32)
    predicates = jax.random.normal(dks[5], (B, 9), jnp.float32)

    # normalized bboxes [h0, h1, w0, w1]; processed as traced values (shape-static)
    bbox_s = jnp.array([[0.0, 0.6, 0.1, 0.9],
                        [0.2, 1.0, 0.0, 0.5]], dtype=jnp.float32)
    bbox_o = jnp.array([[0.1, 0.8, 0.3, 1.0],
                        [0.0, 0.4, 0.2, 0.7]], dtype=jnp.float32)

    fwd = jax.jit(vtranse_forward, static_argnames=("visual_feature_size",))
    out = fwd(params, subj, obj, img_feature_map, t_s, t_o,
              bbox_s, bbox_o, predicates, visual_feature_size=visual_feature_size)
    out = jax.block_until_ready(out)
    assert out.shape == (B,) and out.dtype == jnp.float32
    print("KERNEL_OK")
</pallas_src>

<mosaic_0001>
module attributes {stable_mosaic.version = 11 : i64} {
  func.func @_dual_linear_bn_relu_kernel(%arg0: i32, %arg1: i32, %arg2: memref<1x2x2048xf32, #tpu.memory_space<vmem>>, %arg3: memref<1x2048x1024xf32, #tpu.memory_space<vmem>>, %arg4: memref<1x1x1024xf32, #tpu.memory_space<vmem>>, %arg5: memref<1x1x1024xf32, #tpu.memory_space<vmem>>, %arg6: memref<1x1x1024xf32, #tpu.memory_space<vmem>>, %arg7: memref<1x2x1024xf32, #tpu.memory_space<vmem>>, %arg8: memref<2x1024xf32, #tpu.memory_space<vmem>>) attributes {dimension_semantics = [#tpu.dimension_semantics<parallel>, #tpu.dimension_semantics<arbitrary>], iteration_bounds = array<i64: 2, 4>, scalar_prefetch = 0 : i64, scratch_operands = 1 : i64, tpu.core_type = #tpu.core_type<tc>, window_params = [{transform_indices = @transform_0, window_bounds = array<i64: 1, 2, 2048>}, {transform_indices = @transform_1, window_bounds = array<i64: 1, 2048, 1024>}, {transform_indices = @transform_2, window_bounds = array<i64: 1, 1, 1024>}, {transform_indices = @transform_3, window_bounds = array<i64: 1, 1, 1024>}, {transform_indices = @transform_4, window_bounds = array<i64: 1, 1, 1024>}, {transform_indices = @transform_5, window_bounds = array<i64: 1, 2, 1024>}]} {
    %c0_i32 = arith.constant 0 : i32
    %0 = arith.cmpi eq, %arg1, %c0_i32 : i32
    %1 = arith.extui %0 : i1 to i32
    %c0_i32_0 = arith.constant 0 : i32
    %2 = arith.cmpi ne, %1, %c0_i32_0 : i32
    scf.if %2 {
      %cst_11 = arith.constant 0.000000e+00 : f32
      %14 = vector.broadcast %cst_11 : f32 to vector<2x1024xf32>
      %c0_12 = arith.constant 0 : index
      %c0_13 = arith.constant 0 : index
      %15 = vector.load %arg8[%c0_12, %c0_13] : memref<2x1024xf32, #tpu.memory_space<vmem>>, vector<2x1024xf32>
      tpu.vector_store %arg8[%c0_12, %c0_13], %14 {strides = array<i32>} : memref<2x1024xf32, #tpu.memory_space<vmem>>, vector<2x1024xf32>,
    } else {
    }
    %c0 = arith.constant 0 : index
    %c0_1 = arith.constant 0 : index
    %3 = vector.load %arg8[%c0, %c0_1] : memref<2x1024xf32, #tpu.memory_space<vmem>>, vector<2x1024xf32>
    %c0_2 = arith.constant 0 : index
    %c0_3 = arith.constant 0 : index
    %c0_4 = arith.constant 0 : index
    %4 = vector.load %arg2[%c0_2, %c0_3, %c0_4] : memref<1x2x2048xf32, #tpu.memory_space<vmem>>, vector<1x2x2048xf32>
    %5 = vector.shape_cast %4 : vector<1x2x2048xf32> to vector<2x2048xf32>
    %c0_5 = arith.constant 0 : index
    %c0_6 = arith.constant 0 : index
    %c0_7 = arith.constant 0 : index
    %6 = vector.load %arg3[%c0_5, %c0_6, %c0_7] : memref<1x2048x1024xf32, #tpu.memory_space<vmem>>, vector<1x2048x1024xf32>
    %7 = vector.shape_cast %6 : vector<1x2048x1024xf32> to vector<2048x1024xf32>
    %cst = arith.constant dense<0.000000e+00> : vector<2x1024xf32>
    %8 = tpu.matmul %5, %7, %cst {dimension_numbers = #tpu.dot_dimension_numbers<[1], [0], [0], [1], [0, 0, 1, 1], [], []>} : vector<2x2048xf32>, vector<2048x1024xf32>, vector<2x1024xf32> -> vector<2x1024xf32>
    %9 = arith.addf %3, %8 : vector<2x1024xf32>
    %c0_8 = arith.constant 0 : index
    %c0_9 = arith.constant 0 : index
    %10 = vector.load %arg8[%c0_8, %c0_9] : memref<2x1024xf32, #tpu.memory_space<vmem>>, vector<2x1024xf32>
    tpu.vector_store %arg8[%c0_8, %c0_9], %9 {strides = array<i32>} : memref<2x1024xf32, #tpu.memory_space<vmem>>, vector<2x1024xf32>,
    %c3_i32 = arith.constant 3 : i32
    %11 = arith.cmpi eq, %arg1, %c3_i32 : i32
    %12 = arith.extui %11 : i1 to i32
    %c0_i32_10 = arith.constant 0 : i32
    %13 = arith.cmpi ne, %12, %c0_i32_10 : i32
    scf.if %13 {
      %c0_11 = arith.constant 0 : index
      %c0_12 = arith.constant 0 : index
      %14 = vector.load %arg8[%c0_11, %c0_12] : memref<2x1024xf32, #tpu.memory_space<vmem>>, vector<2x1024xf32>
      %c0_13 = arith.constant 0 : index
      %c0_14 = arith.constant 0 : index
      %c0_15 = arith.constant 0 : index
      %15 = vector.load %arg4[%c0_13, %c0_14, %c0_15] : memref<1x1x1024xf32, #tpu.memory_space<vmem>>, vector<1x1x1024xf32>
      %16 = vector.shape_cast %15 : vector<1x1x1024xf32> to vector<1x1024xf32>
      %17 = vector.broadcast %16 : vector<1x1024xf32> to vector<2x1024xf32>
      %18 = arith.addf %14, %17 : vector<2x1024xf32>
      %cst_16 = arith.constant dense<0.000000e+00> : vector<1024xf32>
      %19 = vector.multi_reduction <add>, %18, %cst_16 [0] : vector<2x1024xf32> to vector<1024xf32>
      %20 = vector.shape_cast %19 : vector<1024xf32> to vector<1x1024xf32>
      %cst_17 = arith.constant 2.000000e+00 : f32
      %21 = vector.broadcast %cst_17 : f32 to vector<1x1024xf32>
      %22 = arith.divf %20, %21 : vector<1x1024xf32>
      %23 = vector.broadcast %22 : vector<1x1024xf32> to vector<2x1024xf32>
      %24 = arith.subf %18, %23 : vector<2x1024xf32>
      %25 = arith.mulf %24, %24 : vector<2x1024xf32>
      %cst_18 = arith.constant dense<0.000000e+00> : vector<1024xf32>
      %26 = vector.multi_reduction <add>, %25, %cst_18 [0] : vector<2x1024xf32> to vector<1024xf32>
      %27 = vector.shape_cast %26 : vector<1024xf32> to vector<1x1024xf32>
      %cst_19 = arith.constant 2.000000e+00 : f32
      %28 = vector.broadcast %cst_19 : f32 to vector<1x1024xf32>
      %29 = arith.divf %27, %28 : vector<1x1024xf32>
      %30 = vector.broadcast %22 : vector<1x1024xf32> to vector<2x1024xf32>
      %31 = arith.subf %18, %30 : vector<2x1024xf32>
      %cst_20 = arith.constant 9.99999974E-6 : f32
      %32 = vector.broadcast %cst_20 : f32 to vector<1x1024xf32>
      %33 = arith.addf %29, %32 : vector<1x1024xf32>
      %34 = math.rsqrt %33 : vector<1x1024xf32>
      %35 = vector.broadcast %34 : vector<1x1024xf32> to vector<2x1024xf32>
      %36 = arith.mulf %31, %35 : vector<2x1024xf32>
      %c0_21 = arith.constant 0 : index
      %c0_22 = arith.constant 0 : index
      %c0_23 = arith.constant 0 : index
      %37 = vector.load %arg5[%c0_21, %c0_22, %c0_23] : memref<1x1x1024xf32, #tpu.memory_space<vmem>>, vector<1x1x1024xf32>
      %38 = vector.shape_cast %37 : vector<1x1x1024xf32> to vector<1x1024xf32>
      %39 = vector.broadcast %38 : vector<1x1024xf32> to vector<2x1024xf32>
      %40 = arith.mulf %36, %39 : vector<2x1024xf32>
      %c0_24 = arith.constant 0 : index
      %c0_25 = arith.constant 0 : index
      %c0_26 = arith.constant 0 : index
      %41 = vector.load %arg6[%c0_24, %c0_25, %c0_26] : memref<1x1x1024xf32, #tpu.memory_space<vmem>>, vector<1x1x1024xf32>
      %42 = vector.shape_cast %41 : vector<1x1x1024xf32> to vector<1x1024xf32>
      %43 = vector.broadcast %42 : vector<1x1024xf32> to vector<2x1024xf32>
      %44 = arith.addf %40, %43 : vector<2x1024xf32>
      %cst_27 = arith.constant 0.000000e+00 : f32
      %45 = vector.broadcast %cst_27 : f32 to vector<2x1024xf32>
      %46 = arith.maximumf %44, %45 : vector<2x1024xf32>
      %c0_28 = arith.constant 0 : index
      %c0_29 = arith.constant 0 : index
      %c0_30 = arith.constant 0 : index
      %47 = vector.load %arg7[%c0_28, %c0_29, %c0_30] : memref<1x2x1024xf32, #tpu.memory_space<vmem>>, vector<1x2x1024xf32>
      %48 = vector.shape_cast %47 : vector<1x2x1024xf32> to vector<2x1024xf32>
      %49 = vector.shape_cast %46 : vector<2x1024xf32> to vector<1x2x1024xf32>
      tpu.vector_store %arg7[%c0_28, %c0_29, %c0_30], %49 {strides = array<i32>} : memref<1x2x1024xf32, #tpu.memory_space<vmem>>, vector<1x2x1024xf32>,
    } else {
    }
    return
  }
  func.func @transform_0(%arg0: i32, %arg1: i32) -> (i32, i32, i32) {
    %c0_i32 = arith.constant 0 : i32
    %c0_i32_0 = arith.constant 0 : i32
    return %arg0, %c0_i32, %arg1 : i32, i32, i32
  }
  func.func @transform_1(%arg0: i32, %arg1: i32) -> (i32, i32, i32) {
    %c0_i32 = arith.constant 0 : i32
    %c0_i32_0 = arith.constant 0 : i32
    return %arg0, %arg1, %c0_i32 : i32, i32, i32
  }
  func.func @transform_2(%arg0: i32, %arg1: i32) -> (i32, i32, i32) {
    %c0_i32 = arith.constant 0 : i32
    %c0_i32_0 = arith.constant 0 : i32
    %c0_i32_1 = arith.constant 0 : i32
    return %arg0, %c0_i32, %c0_i32_0 : i32, i32, i32
  }
  func.func @transform_3(%arg0: i32, %arg1: i32) -> (i32, i32, i32) {
    %c0_i32 = arith.constant 0 : i32
    %c0_i32_0 = arith.constant 0 : i32
    %c0_i32_1 = arith.constant 0 : i32
    return %arg0, %c0_i32, %c0_i32_0 : i32, i32, i32
  }
  func.func @transform_4(%arg0: i32, %arg1: i32) -> (i32, i32, i32) {
    %c0_i32 = arith.constant 0 : i32
    %c0_i32_0 = arith.constant 0 : i32
    %c0_i32_1 = arith.constant 0 : i32
    return %arg0, %c0_i32, %c0_i32_0 : i32, i32, i32
  }
  func.func @transform_5(%arg0: i32, %arg1: i32) -> (i32, i32, i32) {
    %c0_i32 = arith.constant 0 : i32
    %c0_i32_0 = arith.constant 0 : i32
    %c0_i32_1 = arith.constant 0 : i32
    return %arg0, %c0_i32, %c0_i32_0 : i32, i32, i32
  }
}

module attributes {stable_mosaic.version = 11 : i64} {
  func.func @_head_kernel(%arg0: memref<2x1408xf32, #tpu.memory_space<vmem>>, %arg1: memref<2x1408xf32, #tpu.memory_space<vmem>>, %arg2: memref<1408x128xf32, #tpu.memory_space<vmem>>, %arg3: memref<1x128xf32, #tpu.memory_space<vmem>>, %arg4: memref<1408x128xf32, #tpu.memory_space<vmem>>, %arg5: memref<1x128xf32, #tpu.memory_space<vmem>>, %arg6: memref<128x128xf32, #tpu.memory_space<vmem>>, %arg7: memref<1x128xf32, #tpu.memory_space<vmem>>, %arg8: memref<2x128xf32, #tpu.memory_space<vmem>>, %arg9: memref<2x128xf32, #tpu.memory_space<vmem>>) attributes {dimension_semantics = [], scalar_prefetch = 0 : i64, scratch_operands = 0 : i64, tpu.core_type = #tpu.core_type<tc>} {
    %c0 = arith.constant 0 : index
    %c0_0 = arith.constant 0 : index
    %0 = vector.load %arg0[%c0, %c0_0] : memref<2x1408xf32, #tpu.memory_space<vmem>>, vector<2x1408xf32>
    %c0_1 = arith.constant 0 : index
    %c0_2 = arith.constant 0 : index
    %1 = vector.load %arg2[%c0_1, %c0_2] : memref<1408x128xf32, #tpu.memory_space<vmem>>, vector<1408x128xf32>
    %cst = arith.constant dense<0.000000e+00> : vector<2x128xf32>
    %2 = tpu.matmul %0, %1, %cst {dimension_numbers = #tpu.dot_dimension_numbers<[1], [0], [0], [1], [0, 0, 1, 1], [], []>} : vector<2x1408xf32>, vector<1408x128xf32>, vector<2x128xf32> -> vector<2x128xf32>
    %c0_3 = arith.constant 0 : index
    %c0_4 = arith.constant 0 : index
    %3 = vector.load %arg3[%c0_3, %c0_4] : memref<1x128xf32, #tpu.memory_space<vmem>>, vector<1x128xf32>
    %4 = vector.broadcast %3 : vector<1x128xf32> to vector<2x128xf32>
    %5 = arith.addf %2, %4 : vector<2x128xf32>
    %cst_5 = arith.constant 0.000000e+00 : f32
    %6 = vector.broadcast %cst_5 : f32 to vector<2x128xf32>
    %7 = arith.maximumf %5, %6 : vector<2x128xf32>
    %c0_6 = arith.constant 0 : index
    %c0_7 = arith.constant 0 : index
    %8 = vector.load %arg1[%c0_6, %c0_7] : memref<2x1408xf32, #tpu.memory_space<vmem>>, vector<2x1408xf32>
    %c0_8 = arith.constant 0 : index
    %c0_9 = arith.constant 0 : index
    %9 = vector.load %arg4[%c0_8, %c0_9] : memref<1408x128xf32, #tpu.memory_space<vmem>>, vector<1408x128xf32>
    %cst_10 = arith.constant dense<0.000000e+00> : vector<2x128xf32>
    %10 = tpu.matmul %8, %9, %cst_10 {dimension_numbers = #tpu.dot_dimension_numbers<[1], [0], [0], [1], [0, 0, 1, 1], [], []>} : vector<2x1408xf32>, vector<1408x128xf32>, vector<2x128xf32> -> vector<2x128xf32>
    %c0_11 = arith.constant 0 : index
    %c0_12 = arith.constant 0 : index
    %11 = vector.load %arg5[%c0_11, %c0_12] : memref<1x128xf32, #tpu.memory_space<vmem>>, vector<1x128xf32>
    %12 = vector.broadcast %11 : vector<1x128xf32> to vector<2x128xf32>
    %13 = arith.addf %10, %12 : vector<2x128xf32>
    %cst_13 = arith.constant 0.000000e+00 : f32
    %14 = vector.broadcast %cst_13 : f32 to vector<2x128xf32>
    %15 = arith.maximumf %13, %14 : vector<2x128xf32>
    %16 = arith.subf %15, %7 : vector<2x128xf32>
    %c0_14 = arith.constant 0 : index
    %c0_15 = arith.constant 0 : index
    %17 = vector.load %arg6[%c0_14, %c0_15] : memref<128x128xf32, #tpu.memory_space<vmem>>, vector<128x128xf32>
    %cst_16 = arith.constant dense<0.000000e+00> : vector<2x128xf32>
    %18 = tpu.matmul %16, %17, %cst_16 {dimension_numbers = #tpu.dot_dimension_numbers<[1], [0], [0], [1], [0, 0, 1, 1], [], []>} : vector<2x128xf32>, vector<128x128xf32>, vector<2x128xf32> -> vector<2x128xf32>
    %c0_17 = arith.constant 0 : index
    %c0_18 = arith.constant 0 : index
    %19 = vector.load %arg7[%c0_17, %c0_18] : memref<1x128xf32, #tpu.memory_space<vmem>>, vector<1x128xf32>
    %20 = vector.broadcast %19 : vector<1x128xf32> to vector<2x128xf32>
    %21 = arith.addf %18, %20 : vector<2x128xf32>
    %c0_19 = arith.constant 0 : index
    %c0_20 = arith.constant 0 : index
    %22 = vector.load %arg8[%c0_19, %c0_20] : memref<2x128xf32, #tpu.memory_space<vmem>>, vector<2x128xf32>
    %23 = arith.mulf %21, %22 : vector<2x128xf32>
    %c0_21 = arith.constant 0 : index
    %c0_22 = arith.constant 0 : index
    %24 = vector.load %arg9[%c0_21, %c0_22] : memref<2x128xf32, #tpu.memory_space<vmem>>, vector<2x128xf32>
    tpu.vector_store %arg9[%c0_21, %c0_22], %23 {strides = array<i32>} : memref<2x128xf32, #tpu.memory_space<vmem>>, vector<2x128xf32>,
    return
  }
}

</mosaic_0001>

<bundles_post_ra>
// kernel: vtranse_forward.3
= control target key start
LH: loop header
LB: loop body
LE: loop exit
PB: predicated region body
PF: predicated region fallthrough
CT: control target
= control target key end

     0   :  { %s2175_s2 = inlined_call_operand.vmem [shape: f32[1408,128], index: 2, kind: input, shape index: {}]   ;;  %s2176_s0 = inlined_call_operand.vmem [shape: f32[2,1408], index: 0, kind: input, shape index: {}]   ;;  %s2177_s1 = inlined_call_operand.vmem [shape: f32[2,1408], index: 1, kind: input, shape index: {}]   ;;  %s2178_s4 = inlined_call_operand.vmem [shape: f32[1408,128], index: 4, kind: input, shape index: {}]   ;;  %s2179_s3 = inlined_call_operand.vmem [shape: f32[1,128], index: 3, kind: input, shape index: {}]   ;;  %s2180_s5 = inlined_call_operand.vmem [shape: f32[1,128], index: 5, kind: input, shape index: {}]   ;;  %s2181_s7 = inlined_call_operand.vmem [shape: f32[1,128], index: 7, kind: input, shape index: {}]   ;;  %s2182_s6 = inlined_call_operand.vmem [shape: f32[128,128], index: 6, kind: input, shape index: {}]   ;;  %s2183_s8 = inlined_call_operand.vmem [shape: f32[2,128], index: 8, kind: input, shape index: {}]   ;;  %s2184_s9 = inlined_call_operand.vmem [shape: f32[2,128], index: 9, kind: output, shape index: {}]  }
   0x1   :  { %v50_v0 = vld [vmem:[%s2175_s2 + $0x78] sm:$0xff]  ;;  %v49_v2 = vld [vmem:[%s2175_s2 + $0x70] sm:$0xff]  ;;  %v48_v5 = vld [vmem:[%s2175_s2 + $0x68] sm:$0xff] }
   0x2   :  { %v82_v1 = vld [vmem:[%s2175_s2 + $0x178] sm:$0xff]  ;;  %244 = vmatpush.msra.mxu0 %v50_v0  ;;  %v81_v4 = vld [vmem:[%s2175_s2 + $0x170] sm:$0xff]  ;;  %v80_v7 = vld [vmem:[%s2175_s2 + $0x168] sm:$0xff] }
   0x3   :  { %284 = vmatpush.msra.mxu2 %v82_v1  ;;  %v66_v3 = vld [vmem:[%s2175_s2 + $0xf8] sm:$0xff]  ;;  %v65_v6 = vld [vmem:[%s2175_s2 + $0xf0] sm:$0xff]  ;;  %v64_v8 = vld [vmem:[%s2175_s2 + $0xe8] sm:$0xff] }
   0x4   :  { %264 = vmatpush.msra.mxu1 %v66_v3  ;;  %245 = vmatpush.msra.mxu0 %v49_v2  ;;  %v47_v9 = vld [vmem:[%s2175_s2 + $0x60] sm:$0xff]  ;;  %v98_v11 = vld [vmem:[%s2175_s2 + $0x1f8] sm:$0xff]  ;;  %v97_v15 = vld [vmem:[%s2175_s2 + $0x1f0] sm:$0xff] }
   0x5   :  { %285 = vmatpush.msra.mxu2 %v81_v4  ;;  %v79_v10 = vld [vmem:[%s2175_s2 + $0x160] sm:$0xff]  ;;  %v46_v13 = vld [vmem:[%s2175_s2 + $0x58] sm:$0xff]  ;;  %304 = vmatpush.msra.mxu3 %v98_v11  ;;  %v96_v17 = vld [vmem:[%s2175_s2 + $0x1e8] sm:$0xff] }
   0x6   :  { %265 = vmatpush.msra.mxu1 %v65_v6  ;;  %246 = vmatpush.msra.mxu0 %v48_v5  ;;  %v63_v12 = vld [vmem:[%s2175_s2 + $0xe0] sm:$0xff]  ;;  %v78_v14 = vld [vmem:[%s2175_s2 + $0x158] sm:$0xff]  ;;  %v45_v18 = vld [vmem:[%s2175_s2 + $0x50] sm:$0xff] }
   0x7   :  { %286 = vmatpush.msra.mxu2 %v80_v7  ;;  %v62_v16 = vld [vmem:[%s2175_s2 + $0xd8] sm:$0xff]  ;;  %v77_v19 = vld [vmem:[%s2175_s2 + $0x150] sm:$0xff]  ;;  %305 = vmatpush.msra.mxu3 %v97_v15  ;;  %v95_v21 = vld [vmem:[%s2175_s2 + $0x1e0] sm:$0xff] }
   0x8   :  { %266 = vmatpush.msra.mxu1 %v64_v8  ;;  %247 = vmatpush.msra.mxu0 %v47_v9  ;;  %v61_v20 = vld [vmem:[%s2175_s2 + $0xd0] sm:$0xff]  ;;  %v44_v22 = vld [vmem:[%s2175_s2 + $0x48] sm:$0xff]  ;;  %v94_v25 = vld [vmem:[%s2175_s2 + $0x1d8] sm:$0xff] }
   0x9   :  { %287 = vmatpush.msra.mxu2 %v79_v10  ;;  %v76_v23 = vld [vmem:[%s2175_s2 + $0x148] sm:$0xff]  ;;  %306 = vmatpush.msra.mxu3 %v96_v17  ;;  %v43_v26 = vld [vmem:[%s2175_s2 + $0x40] sm:$0xff]  ;;  %v93_v29 = vld [vmem:[%s2175_s2 + $0x1d0] sm:$0xff] }
   0xa   :  { %267 = vmatpush.msra.mxu1 %v63_v12  ;;  %248 = vmatpush.msra.mxu0 %v46_v13  ;;  %v60_v24 = vld [vmem:[%s2175_s2 + $0xc8] sm:$0xff]  ;;  %v75_v27 = vld [vmem:[%s2175_s2 + $0x140] sm:$0xff]  ;;  %v42_v30 = vld [vmem:[%s2175_s2 + $0x38] sm:$0xff] }
   0xb   :  { %288 = vmatpush.msra.mxu2 %v78_v14  ;;  %307 = vmatpush.msra.mxu3 %v95_v21  ;;  %v59_v28 = vld [vmem:[%s2175_s2 + $0xc0] sm:$0xff]  ;;  %v74_v31 = vld [vmem:[%s2175_s2 + $0x138] sm:$0xff]  ;;  %v92_v33 = vld [vmem:[%s2175_s2 + $0x1c8] sm:$0xff] }
   0xc   :  { %268 = vmatpush.msra.mxu1 %v62_v16  ;;  %249 = vmatpush.msra.mxu0 %v45_v18  ;;  %v58_v32 = vld [vmem:[%s2175_s2 + $0xb8] sm:$0xff]  ;;  %v41_v34 = vld [vmem:[%s2175_s2 + $0x30] sm:$0xff]  ;;  %v91_v37 = vld [vmem:[%s2175_s2 + $0x1c0] sm:$0xff] }
   0xd   :  { %289 = vmatpush.msra.mxu2 %v77_v19  ;;  %308 = vmatpush.msra.mxu3 %v94_v25  ;;  %v73_v35 = vld [vmem:[%s2175_s2 + $0x130] sm:$0xff]  ;;  %v40_v38 = vld [vmem:[%s2175_s2 + $0x28] sm:$0xff]  ;;  %v90_v41 = vld [vmem:[%s2175_s2 + $0x1b8] sm:$0xff] }
   0xe   :  { %269 = vmatpush.msra.mxu1 %v61_v20  ;;  %250 = vmatpush.msra.mxu0 %v44_v22  ;;  %v57_v36 = vld [vmem:[%s2175_s2 + $0xb0] sm:$0xff]  ;;  %v72_v39 = vld [vmem:[%s2175_s2 + $0x128] sm:$0xff]  ;;  %v39_v42 = vld [vmem:[%s2175_s2 + $0x20] sm:$0xff] }
   0xf   :  { %290 = vmatpush.msra.mxu2 %v76_v23  ;;  %309 = vmatpush.msra.mxu3 %v93_v29  ;;  %v56_v40 = vld [vmem:[%s2175_s2 + $0xa8] sm:$0xff]  ;;  %v71_v43 = vld [vmem:[%s2175_s2 + $0x120] sm:$0xff]  ;;  %v89_v45 = vld [vmem:[%s2175_s2 + $0x1b0] sm:$0xff] }
  0x10   :  { %270 = vmatpush.msra.mxu1 %v60_v24  ;;  %251 = vmatpush.msra.mxu0 %v43_v26  ;;  %v55_v44 = vld [vmem:[%s2175_s2 + $0xa0] sm:$0xff]  ;;  %v38_v46 = vld [vmem:[%s2175_s2 + $0x18] sm:$0xff]  ;;  %v88_v49 = vld [vmem:[%s2175_s2 + $0x1a8] sm:$0xff] }
  0x11   :  { %291 = vmatpush.msra.mxu2 %v75_v27  ;;  %310 = vmatpush.msra.mxu3 %v92_v33  ;;  %v70_v47 = vld [vmem:[%s2175_s2 + $0x118] sm:$0xff]  ;;  %v37_v50 = vld [vmem:[%s2175_s2 + $0x10] sm:$0xff]  ;;  %v87_v53 = vld [vmem:[%s2175_s2 + $0x1a0] sm:$0xff] }
  0x12   :  { %271 = vmatpush.msra.mxu1 %v59_v28  ;;  %252 = vmatpush.msra.mxu0 %v42_v30  ;;  %v54_v48 = vld [vmem:[%s2175_s2 + $0x98] sm:$0xff]  ;;  %v69_v51 = vld [vmem:[%s2175_s2 + $0x110] sm:$0xff]  ;;  %v36_v54 = vld [vmem:[%s2175_s2 + $0x8] sm:$0xff] }
  0x13   :  { %292 = vmatpush.msra.mxu2 %v74_v31  ;;  %311 = vmatpush.msra.mxu3 %v91_v37  ;;  %v53_v52 = vld [vmem:[%s2175_s2 + $0x90] sm:$0xff]  ;;  %v68_v55 = vld [vmem:[%s2175_s2 + $0x108] sm:$0xff]  ;;  %v86_v57 = vld [vmem:[%s2175_s2 + $0x198] sm:$0xff] }
  0x14   :  { %272 = vmatpush.msra.mxu1 %v58_v32  ;;  %253 = vmatpush.msra.mxu0 %v41_v34  ;;  %v52_v56 = vld [vmem:[%s2175_s2 + $0x88] sm:$0xff]  ;;  %v35_v58 = vld [vmem:[%s2175_s2] sm:$0xff]  ;;  %v114_v60 = vld [vmem:[%s2175_s2 + $0x278] sm:$0xff] }
  0x15   :  { %293 = vmatpush.msra.mxu2 %v73_v35  ;;  %312 = vmatpush.msra.mxu3 %v90_v41  ;;  %v67_v59 = vld [vmem:[%s2175_s2 + $0x100] sm:$0xff]  ;;  %v146_v61 = vld [vmem:[%s2175_s2 + $0x378] sm:$0xff]  ;;  %v85_v63 = vld [vmem:[%s2175_s2 + $0x190] sm:$0xff] }
  0x16   :  { %273 = vmatpush.msra.mxu1 %v57_v36  ;;  %254 = vmatpush.msra.mxu0 %v40_v38  ;;  %v51_v62 = vld [vmem:[%s2175_s2 + $0x80] sm:$0xff]  ;;  %v113_v0 = vld [vmem:[%s2175_s2 + $0x270] sm:$0xff]  ;;  %v130_v1 = vld [vmem:[%s2175_s2 + $0x2f8] sm:$0xff] }
  0x17   :  { %294 = vmatpush.msra.mxu2 %v72_v39  ;;  %313 = vmatpush.msra.mxu3 %v89_v45  ;;  %v145_v2 = vld [vmem:[%s2175_s2 + $0x370] sm:$0xff]  ;;  %v84_v3 = vld [vmem:[%s2175_s2 + $0x188] sm:$0xff]  ;;  %v83_v7 = vld [vmem:[%s2175_s2 + $0x180] sm:$0xff] }
  0x18   :  { %274 = vmatpush.msra.mxu1 %v56_v40  ;;  %255 = vmatpush.msra.mxu0 %v39_v42  ;;  %v112_v4 = vld [vmem:[%s2175_s2 + $0x268] sm:$0xff]  ;;  %v129_v5 = vld [vmem:[%s2175_s2 + $0x2f0] sm:$0xff]  ;;  %v111_v8 = vld [vmem:[%s2175_s2 + $0x260] sm:$0xff] }
  0x19   :  { %295 = vmatpush.msra.mxu2 %v71_v43  ;;  %314 = vmatpush.msra.mxu3 %v88_v49  ;;  %v144_v6 = vld [vmem:[%s2175_s2 + $0x368] sm:$0xff]  ;;  %v143_v10 = vld [vmem:[%s2175_s2 + $0x360] sm:$0xff]  ;;  %v162_v11 = vld [vmem:[%s2175_s2 + $0x3f8] sm:$0xff] }
  0x1a   :  { %275 = vmatpush.msra.mxu1 %v55_v44  ;;  %256 = vmatpush.msra.mxu0 %v38_v46  ;;  %v128_v9 = vld [vmem:[%s2175_s2 + $0x2e8] sm:$0xff]  ;;  %v110_v12 = vld [vmem:[%s2175_s2 + $0x258] sm:$0xff]  ;;  %v127_v13 = vld [vmem:[%s2175_s2 + $0x2e0] sm:$0xff] }
  0x1b   :  { %296 = vmatpush.msra.mxu2 %v70_v47  ;;  %315 = vmatpush.msra.mxu3 %v87_v53  ;;  %v142_v14 = vld [vmem:[%s2175_s2 + $0x358] sm:$0xff]  ;;  %v161_v15 = vld [vmem:[%s2175_s2 + $0x3f0] sm:$0xff]  ;;  %v32_v18 = vld [vmem:[%s2176_s0] sm:$0xff] }
  0x1c   :  { %276 = vmatpush.msra.mxu1 %v54_v48  ;;  %257 = vmatpush.msra.mxu0 %v37_v50  ;;  %v109_v16 = vld [vmem:[%s2175_s2 + $0x250] sm:$0xff]  ;;  %v126_v17 = vld [vmem:[%s2175_s2 + $0x2d8] sm:$0xff]  ;;  %v160_v20 = vld [vmem:[%s2175_s2 + $0x3e8] sm:$0xff]  ;;  %218 = vst [vmem:[#allocation1] ss:$4 sm:$0xff] %v32_v18 }
  0x1d   :  { %297 = vmatpush.msra.mxu2 %v69_v51  ;;  %316 = vmatpush.msra.mxu3 %v86_v57  ;;  %v141_v19 = vld [vmem:[%s2175_s2 + $0x350] sm:$0xff]  ;;  %v108_v21 = vld [vmem:[%s2175_s2 + $0x248] sm:$0xff]  ;;  %v107_v24 = vld [vmem:[%s2175_s2 + $0x240] sm:$0xff] }
  0x1e   :  { %277 = vmatpush.msra.mxu1 %v53_v52  ;;  %258 = vmatpush.msra.mxu0 %v36_v54  ;;  %v125_v22 = vld [vmem:[%s2175_s2 + $0x2d0] sm:$0xff]  ;;  %v140_v23 = vld [vmem:[%s2175_s2 + $0x348] sm:$0xff]  ;;  %v159_v25 = vld [vmem:[%s2175_s2 + $0x3e0] sm:$0xff] }
  0x1f   :  { %298 = vmatpush.msra.mxu2 %v68_v55  ;;  %317 = vmatpush.msra.mxu3 %v85_v63  ;;  %v124_v26 = vld [vmem:[%s2175_s2 + $0x2c8] sm:$0xff]  ;;  %v139_v27 = vld [vmem:[%s2175_s2 + $0x340] sm:$0xff]  ;;  %v106_v28 = vld [vmem:[%s2175_s2 + $0x238] sm:$0xff] }
  0x20   :  { %278 = vmatpush.msra.mxu1 %v52_v56  ;;  %259 = vmatpush.msra.mxu0 %v35_v58  ;;  %v123_v29 = vld [vmem:[%s2175_s2 + $0x2c0] sm:$0xff]  ;;  %v138_v30 = vld [vmem:[%s2175_s2 + $0x338] sm:$0xff]  ;;  %v105_v32 = vld [vmem:[%s2175_s2 + $0x230] sm:$0xff] }
  0x21   :  { %299 = vmatpush.msra.mxu2 %v67_v59  ;;  %318 = vmatpush.msra.mxu3 %v84_v3  ;;  %v158_v31 = vld [vmem:[%s2175_s2 + $0x3d8] sm:$0xff]  ;;  %v33_v34 = vld [vmem:[%s2176_s0 + $0x8] sm:$0xff]  ;;  %v137_v35 = vld [vmem:[%s2175_s2 + $0x330] sm:$0xff] }
  0x22   :  { %324 = vmatpush.msrb.mxu0 %v114_v60  ;;  %279 = vmatpush.msra.mxu1 %v51_v62  ;;  %v122_v33 = vld [vmem:[%s2175_s2 + $0x2b8] sm:$0xff]  ;;  %v157_v36 = vld [vmem:[%s2175_s2 + $0x3d0] sm:$0xff]  ;;  %v156_v37 = vld [vmem:[%s2175_s2 + $0x3c8] sm:$0xff]  ;;  %220 = vst [vmem:[#allocation1 + $0x20] ss:$4 sm:$0xff] %v33_v34 }
  0x23   :  { %364 = vmatpush.msrb.mxu2 %v146_v61  ;;  %319 = vmatpush.msra.mxu3 %v83_v7  ;;  %v34_v38 = vld [vmem:[%s2176_s0 + $0x10] sm:$0x3f]  ;;  %v1308_v40 = vld.sshfl [vmem:[#allocation1] sm:$0xff pattern:$0x73625140]  ;;  %v104_v43 = vld [vmem:[%s2175_s2 + $0x228] sm:$0xff] }
  0x24   :  { %325 = vmatpush.msrb.mxu0 %v113_v0  ;;  %344 = vmatpush.msrb.mxu1 %v130_v1  ;;  %v223_v39 = vld.sshfl [vmem:[#allocation1 + $0x10] sm:$0xff pattern:$0x73625140]  ;;  %v1310_v41 = vld.sshfl [vmem:[#allocation1 + $0x18] sm:$0xff pattern:$0x73625140] }
  0x25   :  { %365 = vmatpush.msrb.mxu2 %v145_v2  ;;  %384 = vmatpush.msrb.mxu3 %v162_v11  ;;  %v1312_v42 = vld.sshfl [vmem:[#allocation1 + $0x8] sm:$0xff pattern:$0x73625140]  ;;  %v121_v44 = vld [vmem:[%s2175_s2 + $0x2b0] sm:$0xff]  ;;  %v103_v46 = vld [vmem:[%s2175_s2 + $0x220] sm:$0xff] }
  0x26   :  { %326 = vmatpush.msrb.mxu0 %v112_v4  ;;  %345 = vmatpush.msrb.mxu1 %v129_v5  ;;  %v136_v45 = vld [vmem:[%s2175_s2 + $0x328] sm:$0xff]  ;;  %229 = vst [vmem:[#allocation1] ss:$4 sm:$0xff] %v34_v38  ;;  %v155_v48 = vld [vmem:[%s2175_s2 + $0x3c0] sm:$0xff]  ;;  %v102_v50 = vld [vmem:[%s2175_s2 + $0x218] sm:$0xff] }
  0x27   :  { %366 = vmatpush.msrb.mxu2 %v144_v6  ;;  %385 = vmatpush.msrb.mxu3 %v161_v15  ;;  %v120_v47 = vld [vmem:[%s2175_s2 + $0x2a8] sm:$0xff]  ;;  %v135_v49 = vld [vmem:[%s2175_s2 + $0x320] sm:$0xff]  ;;  %v134_v52 = vld [vmem:[%s2175_s2 + $0x318] sm:$0xff] }
  0x28   :  { %327 = vmatpush.msrb.mxu0 %v111_v8  ;;  %346 = vmatpush.msrb.mxu1 %v128_v9  ;;  %v119_v51 = vld [vmem:[%s2175_s2 + $0x2a0] sm:$0xff]  ;;  %v154_v53 = vld [vmem:[%s2175_s2 + $0x3b8] sm:$0xff]  ;;  %v153_v54 = vld [vmem:[%s2175_s2 + $0x3b0] sm:$0xff] }
  0x29   :  { %367 = vmatpush.msrb.mxu2 %v143_v10  ;;  %386 = vmatpush.msrb.mxu3 %v160_v20  ;;  %v466_v55 = vld [vmem:[%s2177_s1 + $0x8] sm:$0xff]  ;;  %v1353_v56 = vld.sshfl [vmem:[#allocation1 + $0x30] sm:$0xff pattern:$0x73625140]  ;;  %v118_v61 = vld [vmem:[%s2175_s2 + $0x298] sm:$0xff] }
  0x2a   :  { %328 = vmatpush.msrb.mxu0 %v110_v12  ;;  %347 = vmatpush.msrb.mxu1 %v127_v13  ;;  %v1355_v57 = vld.sshfl [vmem:[#allocation1 + $0x20] sm:$0xff pattern:$0x73625140]  ;;  %v1357_v58 = vld.sshfl [vmem:[#allocation1 + $0x38] sm:$0xff pattern:$0x73625140] }
  0x2b   :  { %368 = vmatpush.msrb.mxu2 %v142_v14  ;;  %387 = vmatpush.msrb.mxu3 %v159_v25  ;;  %v1359_v59 = vld.sshfl [vmem:[#allocation1 + $0x28] sm:$0xff pattern:$0x73625140]  ;;  %v101_v60 = vld [vmem:[%s2175_s2 + $0x210] sm:$0xff]  ;;  %v151_v3 = vld [vmem:[%s2175_s2 + $0x3a0] sm:$0xff] }
  0x2c   :  { %329 = vmatpush.msrb.mxu0 %v109_v16  ;;  %348 = vmatpush.msrb.mxu1 %v126_v17  ;;  %653 = vst [vmem:[#allocation1 + $0x20] ss:$4 sm:$0xff] %v466_v55  ;;  %v133_v62 = vld [vmem:[%s2175_s2 + $0x310] sm:$0xff]  ;;  %v152_v63 = vld [vmem:[%s2175_s2 + $0x3a8] sm:$0xff]  ;;  %v99_v4 = vld [vmem:[%s2175_s2 + $0x200] sm:$0xff] }
  0x2d   :  { %369 = vmatpush.msrb.mxu2 %v141_v19  ;;  %388 = vmatpush.msrb.mxu3 %v158_v31  ;;  %v100_v0 = vld [vmem:[%s2175_s2 + $0x208] sm:$0xff]  ;;  %v117_v1 = vld [vmem:[%s2175_s2 + $0x290] sm:$0xff]  ;;  %v131_v6 = vld [vmem:[%s2175_s2 + $0x300] sm:$0xff] }
  0x2e   :  { %330 = vmatpush.msrb.mxu0 %v108_v21  ;;  %349 = vmatpush.msrb.mxu1 %v125_v22  ;;  %v132_v2 = vld [vmem:[%s2175_s2 + $0x308] sm:$0xff]  ;;  %v178_v7 = vld [vmem:[%s2175_s2 + $0x478] sm:$0xff]  ;;  %v115_v9 = vld [vmem:[%s2175_s2 + $0x280] sm:$0xff] }
  0x2f   :  { %370 = vmatpush.msrb.mxu2 %v140_v23  ;;  %389 = vmatpush.msrb.mxu3 %v157_v36  ;;  %v116_v5 = vld [vmem:[%s2175_s2 + $0x288] sm:$0xff]  ;;  %v210_v8 = vld [vmem:[%s2175_s2 + $0x578] sm:$0xff]  ;;  %v177_v11 = vld [vmem:[%s2175_s2 + $0x470] sm:$0xff] }
  0x30   :  { %331 = vmatpush.msrb.mxu0 %v107_v24  ;;  %350 = vmatpush.msrb.mxu1 %v124_v26  ;;  %v150_v10 = vld [vmem:[%s2175_s2 + $0x398] sm:$0xff]  ;;  %v209_v13 = vld [vmem:[%s2175_s2 + $0x570] sm:$0xff]  ;;  %v176_v15 = vld [vmem:[%s2175_s2 + $0x468] sm:$0xff] }
  0x31   :  { %371 = vmatpush.msrb.mxu2 %v139_v27  ;;  %390 = vmatpush.msrb.mxu3 %v156_v37  ;;  %v194_v12 = vld [vmem:[%s2175_s2 + $0x4f8] sm:$0xff]  ;;  %v149_v14 = vld [vmem:[%s2175_s2 + $0x390] sm:$0xff]  ;;  %v208_v17 = vld [vmem:[%s2175_s2 + $0x568] sm:$0xff] }
  0x32   :  { %332 = vmatpush.msrb.mxu0 %v106_v28  ;;  %351 = vmatpush.msrb.mxu1 %v123_v29  ;;  %v193_v16 = vld [vmem:[%s2175_s2 + $0x4f0] sm:$0xff]  ;;  %v148_v18 = vld [vmem:[%s2175_s2 + $0x388] sm:$0xff]  ;;  %v175_v19 = vld [vmem:[%s2175_s2 + $0x460] sm:$0xff] }
  0x33   :  { %372 = vmatpush.msrb.mxu2 %v138_v30  ;;  %391 = vmatpush.msrb.mxu3 %v155_v48  ;;  %v192_v20 = vld [vmem:[%s2175_s2 + $0x4e8] sm:$0xff]  ;;  %v465_v21 = vld [vmem:[%s2177_s1] sm:$0xff]  ;;  %v1450_v25 = vld.sshfl [vmem:[#allocation1 + $0x10] sm:$0xff pattern:$0x73625140] }
  0x34   :  { %333 = vmatpush.msrb.mxu0 %v105_v32  ;;  %352 = vmatpush.msrb.mxu1 %v122_v33  ;;  %v207_v22 = vld [vmem:[%s2175_s2 + $0x560] sm:$0xff]  ;;  %v1452_v26 = vld.sshfl [vmem:[#allocation1 + $0x8] sm:$0xff pattern:$0x73625140]  ;;  %v174_v27 = vld [vmem:[%s2175_s2 + $0x458] sm:$0xff] }
  0x35   :  { %373 = vmatpush.msrb.mxu2 %v137_v35  ;;  %392 = vmatpush.msrb.mxu3 %v154_v53  ;;  %v147_v23 = vld [vmem:[%s2175_s2 + $0x380] sm:$0xff]  ;;  %v206_v29 = vld [vmem:[%s2175_s2 + $0x558] sm:$0xff]  ;;  %v173_v31 = vld [vmem:[%s2175_s2 + $0x450] sm:$0xff] }
  0x36   :  { %334 = vmatpush.msrb.mxu0 %v104_v43  ;;  %353 = vmatpush.msrb.mxu1 %v121_v44  ;;  %v1448_v24 = vld.sshfl [vmem:[#allocation1] sm:$0xff pattern:$0x73625140]  ;;  %v483_v30 = vld [vmem:[%s2178_s4 + $0x78] sm:$0xff]  ;;  %v205_v33 = vld [vmem:[%s2175_s2 + $0x550] sm:$0xff] }
  0x37   :  { %374 = vmatpush.msrb.mxu2 %v136_v45  ;;  %393 = vmatpush.msrb.mxu3 %v153_v54  ;;  %651 = vst [vmem:[#allocation1] ss:$4 sm:$0xff] %v465_v21  ;;  %v191_v28 = vld [vmem:[%s2175_s2 + $0x4e0] sm:$0xff]  ;;  %v190_v32 = vld [vmem:[%s2175_s2 + $0x4d8] sm:$0xff]  ;;  %v482_v34 = vld [vmem:[%s2178_s4 + $0x70] sm:$0xff] }
  0x38   :  { %335 = vmatpush.msrb.mxu0 %v103_v46  ;;  %354 = vmatpush.msrb.mxu1 %v120_v47  ;;  %v172_v35 = vld [vmem:[%s2175_s2 + $0x448] sm:$0xff]  ;;  %v189_v36 = vld [vmem:[%s2175_s2 + $0x4d0] sm:$0xff]  ;;  %v170_v43 = vld [vmem:[%s2175_s2 + $0x438] sm:$0xff] }
  0x39   :  { %375 = vmatpush.msrb.mxu2 %v135_v49  ;;  %394 = vmatpush.msrb.mxu3 %v152_v63  ;;  %v204_v37 = vld [vmem:[%s2175_s2 + $0x548] sm:$0xff]  ;;  %v187_v44 = vld [vmem:[%s2175_s2 + $0x4c0] sm:$0xff]  ;;  %v202_v45 = vld [vmem:[%s2175_s2 + $0x538] sm:$0xff] }
  0x3a   :  { %336 = vmatpush.msrb.mxu0 %v102_v50  ;;  %355 = vmatpush.msrb.mxu1 %v119_v51  ;;  %v481_v38 = vld [vmem:[%s2178_s4 + $0x68] sm:$0xff]  ;;  %v479_v46 = vld [vmem:[%s2178_s4 + $0x58] sm:$0xff]  ;;  %v169_v47 = vld [vmem:[%s2175_s2 + $0x430] sm:$0xff] }
  0x3b   :  { %376 = vmatpush.msrb.mxu2 %v134_v52  ;;  %395 = vmatpush.msrb.mxu3 %v151_v3  ;;  %v186_v48 = vld [vmem:[%s2175_s2 + $0x4b8] sm:$0xff]  ;;  %v201_v49 = vld [vmem:[%s2175_s2 + $0x530] sm:$0xff]  ;;  %v168_v51 = vld [vmem:[%s2175_s2 + $0x428] sm:$0xff] }
  0x3c   :  { %337 = vmatpush.msrb.mxu0 %v101_v60  ;;  %356 = vmatpush.msrb.mxu1 %v118_v61  ;;  %v478_v50 = vld [vmem:[%s2178_s4 + $0x50] sm:$0xff]  ;;  %v200_v53 = vld [vmem:[%s2175_s2 + $0x528] sm:$0xff]  ;;  %v167_v55 = vld [vmem:[%s2175_s2 + $0x420] sm:$0xff] }
  0x3d   :  { %377 = vmatpush.msrb.mxu2 %v133_v62  ;;  %260 = vmatmul.f32.vlgmr.msra.gmra.mxu0 %v1308_v40  ;;  %v188_v40 = vld [vmem:[%s2175_s2 + $0x4c8] sm:$0xff]  ;;  %v185_v52 = vld [vmem:[%s2175_s2 + $0x4b0] sm:$0xff]  ;;  %v183_v60 = vld [vmem:[%s2175_s2 + $0x4a0] sm:$0xff] }
  0x3e   :  { %338 = vmatpush.msrb.mxu0 %v100_v0  ;;  %357 = vmatpush.msrb.mxu1 %v117_v1  ;;  %v477_v54 = vld [vmem:[%s2178_s4 + $0x48] sm:$0xff]  ;;  %v198_v61 = vld [vmem:[%s2175_s2 + $0x518] sm:$0xff]  ;;  %v165_v63 = vld [vmem:[%s2175_s2 + $0x410] sm:$0xff] }
  0x3f   :  { %378 = vmatpush.msrb.mxu2 %v132_v2  ;;  %320 = vmatmul.f32.vlgmr.msra.gmra.mxu3 %v1310_v41  ;;  %v203_v41 = vld [vmem:[%s2175_s2 + $0x540] sm:$0xff]  ;;  %v475_v62 = vld [vmem:[%s2178_s4 + $0x38] sm:$0xff]  ;;  %v197_v1 = vld [vmem:[%s2175_s2 + $0x510] sm:$0xff] }
  0x40   :  { %300 = vmatmul.f32.vlgmr.msra.gmra.mxu2 %v223_v39  ;;  %339 = vmatpush.msrb.mxu0 %v99_v4  ;;  %v171_v39 = vld [vmem:[%s2175_s2 + $0x440] sm:$0xff]  ;;  %v182_v0 = vld [vmem:[%s2175_s2 + $0x498] sm:$0xff]  ;;  %v474_v2 = vld [vmem:[%s2178_s4 + $0x30] sm:$0xff] }
  0x41   :  { %358 = vmatpush.msrb.mxu1 %v116_v5  ;;  %379 = vmatpush.msrb.mxu2 %v131_v6  ;;  %v164_v3 = vld [vmem:[%s2175_s2 + $0x408] sm:$0xff]  ;;  %v181_v4 = vld [vmem:[%s2175_s2 + $0x490] sm:$0xff]  ;;  %v496_v21 = vld [vmem:[%s2178_s4 + $0xe0] sm:$0xff] }
  0x42   :  { %404 = vmatpush.msra.mxu0 %v178_v7  ;;  %396 = vmatpush.msrb.mxu3 %v150_v10  ;;  %v196_v5 = vld [vmem:[%s2175_s2 + $0x508] sm:$0xff]  ;;  %v163_v7 = vld [vmem:[%s2175_s2 + $0x400] sm:$0xff] }
  0x43   :  { %444 = vmatpush.msra.mxu2 %v210_v8  ;;  %359 = vmatpush.msrb.mxu1 %v115_v9  ;;  %v473_v6 = vld [vmem:[%s2178_s4 + $0x28] sm:$0xff]  ;;  %v195_v9 = vld [vmem:[%s2175_s2 + $0x500] sm:$0xff] }
  0x44   :  { %280 = vmatmul.f32.vlgmr.msra.gmra.mxu1 %v1312_v42  ;;  %405 = vmatpush.msra.mxu0 %v177_v11  ;;  %v480_v42 = vld [vmem:[%s2178_s4 + $0x60] sm:$0xff]  ;;  %v180_v8 = vld [vmem:[%s2175_s2 + $0x488] sm:$0xff]  ;;  %v499_v11 = vld [vmem:[%s2178_s4 + $0xf8] sm:$0xff] }
  0x45   :  { %424 = vmatpush.msra.mxu1 %v194_v12  ;;  %445 = vmatpush.msra.mxu2 %v209_v13  ;;  %v472_v10 = vld [vmem:[%s2178_s4 + $0x20] sm:$0xff]  ;;  %v471_v13 = vld [vmem:[%s2178_s4 + $0x18] sm:$0xff] }
  0x46   :  { %397 = vmatpush.msrb.mxu3 %v149_v14  ;;  %406 = vmatpush.msra.mxu0 %v176_v15  ;;  %v179_v12 = vld [vmem:[%s2175_s2 + $0x480] sm:$0xff]  ;;  %v498_v14 = vld [vmem:[%s2178_s4 + $0xf0] sm:$0xff]  ;;  %v515_v15 = vld [vmem:[%s2178_s4 + $0x178] sm:$0xff] }
  0x47   :  { %425 = vmatpush.msra.mxu1 %v193_v16  ;;  %446 = vmatpush.msra.mxu2 %v208_v17  ;;  %v470_v16 = vld [vmem:[%s2178_s4 + $0x10] sm:$0xff]  ;;  %v497_v17 = vld [vmem:[%s2178_s4 + $0xe8] sm:$0xff] }
  0x48   :  { %398 = vmatpush.msrb.mxu3 %v148_v18  ;;  %380 = vmatmul.f32.vlgmr.msrb.gmra.mxu2 %v1353_v56  ;;  %v184_v56 = vld [vmem:[%s2175_s2 + $0x4a8] sm:$0xff]  ;;  %v531_v18 = vld [vmem:[%s2178_s4 + $0x1f8] sm:$0xff] }
  0x49   :  { %407 = vmatpush.msra.mxu0 %v175_v19  ;;  %426 = vmatpush.msra.mxu1 %v192_v20  ;;  %v514_v19 = vld [vmem:[%s2178_s4 + $0x170] sm:$0xff]  ;;  %v469_v20 = vld [vmem:[%s2178_s4 + $0x8] sm:$0xff] }
  0x4a   :  { %447 = vmatpush.msra.mxu2 %v207_v22  ;;  %399 = vmatpush.msrb.mxu3 %v147_v23  ;;  %v530_v22 = vld [vmem:[%s2178_s4 + $0x1f0] sm:$0xff]  ;;  %v513_v23 = vld [vmem:[%s2178_s4 + $0x168] sm:$0xff] }
  0x4b   :  { %340 = vmatmul.f32.vlgmr.msrb.gmra.mxu0 %v1355_v57  ;;  %400 = vmatmul.f32.vlgmr.msrb.gmra.mxu3 %v1357_v58  ;;  %v199_v57 = vld [vmem:[%s2175_s2 + $0x520] sm:$0xff] }
  0x4c   :  { %408 = vmatpush.msra.mxu0 %v174_v27  ;;  %427 = vmatpush.msra.mxu1 %v191_v28  ;;  %v476_v58 = vld [vmem:[%s2178_s4 + $0x40] sm:$0xff]  ;;  %v529_v28 = vld [vmem:[%s2178_s4 + $0x1e8] sm:$0xff] }
  0x4d   :  { %448 = vmatpush.msra.mxu2 %v206_v29  ;;  %677 = vmatpush.msra.mxu3 %v483_v30  ;;  %v512_v27 = vld [vmem:[%s2178_s4 + $0x160] sm:$0xff]  ;;  %v494_v29 = vld [vmem:[%s2178_s4 + $0xd0] sm:$0xff] }
  0x4e   :  { %360 = vmatmul.f32.vlgmr.msrb.gmra.mxu1 %v1359_v59  ;;  %409 = vmatpush.msra.mxu0 %v173_v31  ;;  %v166_v59 = vld [vmem:[%s2175_s2 + $0x418] sm:$0xff]  ;;  %v546_v30 = vld [vmem:[%s2178_s4 + $0x270] sm:$0xff] }
  0x4f   :  { %428 = vmatpush.msra.mxu1 %v190_v32  ;;  %449 = vmatpush.msra.mxu2 %v205_v33  ;;  %v511_v31 = vld [vmem:[%s2178_s4 + $0x158] sm:$0xff]  ;;  %v528_v32 = vld [vmem:[%s2178_s4 + $0x1e0] sm:$0xff]  ;;  %v493_v33 = vld [vmem:[%s2178_s4 + $0xc8] sm:$0xff] }
  0x50   :  { %678 = vmatpush.msra.mxu3 %v482_v34  ;;  %410 = vmatpush.msra.mxu0 %v172_v35  ;;  %v545_v34 = vld [vmem:[%s2178_s4 + $0x268] sm:$0xff]  ;;  %v510_v35 = vld [vmem:[%s2178_s4 + $0x150] sm:$0xff] }
  0x51   :  { %429 = vmatpush.msra.mxu1 %v189_v36  ;;  %450 = vmatpush.msra.mxu2 %v204_v37  ;;  %v527_v36 = vld [vmem:[%s2178_s4 + $0x1d8] sm:$0xff]  ;;  %v492_v37 = vld [vmem:[%s2178_s4 + $0xc0] sm:$0xff] }
  0x52   :  { %679 = vmatpush.msra.mxu3 %v481_v38  ;;  %411 = vmatpush.msra.mxu0 %v171_v39  ;;  %v544_v38 = vld [vmem:[%s2178_s4 + $0x260] sm:$0xff]  ;;  %v509_v39 = vld [vmem:[%s2178_s4 + $0x148] sm:$0xff] }
  0x53   :  { %430 = vmatpush.msra.mxu1 %v188_v40  ;;  %451 = vmatpush.msra.mxu2 %v203_v41  ;;  %v526_v40 = vld [vmem:[%s2178_s4 + $0x1d0] sm:$0xff]  ;;  %v491_v41 = vld [vmem:[%s2178_s4 + $0xb8] sm:$0xff] }
  0x54   :  { %680 = vmatpush.msra.mxu3 %v480_v42  ;;  %412 = vmatpush.msra.mxu0 %v170_v43  ;;  %v543_v42 = vld [vmem:[%s2178_s4 + $0x258] sm:$0xff]  ;;  %v508_v43 = vld [vmem:[%s2178_s4 + $0x140] sm:$0xff] }
  0x55   :  { %431 = vmatpush.msra.mxu1 %v187_v44  ;;  %452 = vmatpush.msra.mxu2 %v202_v45  ;;  %v525_v44 = vld [vmem:[%s2178_s4 + $0x1c8] sm:$0xff]  ;;  %v490_v45 = vld [vmem:[%s2178_s4 + $0xb0] sm:$0xff] }
  0x56   :  { %681 = vmatpush.msra.mxu3 %v479_v46  ;;  %413 = vmatpush.msra.mxu0 %v169_v47  ;;  %v542_v46 = vld [vmem:[%s2178_s4 + $0x250] sm:$0xff]  ;;  %v507_v47 = vld [vmem:[%s2178_s4 + $0x138] sm:$0xff] }
  0x57   :  { %432 = vmatpush.msra.mxu1 %v186_v48  ;;  %453 = vmatpush.msra.mxu2 %v201_v49  ;;  %v524_v48 = vld [vmem:[%s2178_s4 + $0x1c0] sm:$0xff]  ;;  %v489_v49 = vld [vmem:[%s2178_s4 + $0xa8] sm:$0xff] }
  0x58   :  { %682 = vmatpush.msra.mxu3 %v478_v50  ;;  %414 = vmatpush.msra.mxu0 %v168_v51  ;;  %v541_v50 = vld [vmem:[%s2178_s4 + $0x248] sm:$0xff]  ;;  %v506_v51 = vld [vmem:[%s2178_s4 + $0x130] sm:$0xff] }
  0x59   :  { %433 = vmatpush.msra.mxu1 %v185_v52  ;;  %454 = vmatpush.msra.mxu2 %v200_v53  ;;  %v523_v52 = vld [vmem:[%s2178_s4 + $0x1b8] sm:$0xff]  ;;  %v488_v53 = vld [vmem:[%s2178_s4 + $0xa0] sm:$0xff] }
  0x5a   :  { %683 = vmatpush.msra.mxu3 %v477_v54  ;;  %415 = vmatpush.msra.mxu0 %v167_v55  ;;  %v540_v54 = vld [vmem:[%s2178_s4 + $0x240] sm:$0xff]  ;;  %v505_v55 = vld [vmem:[%s2178_s4 + $0x128] sm:$0xff] }
  0x5b   :  { %434 = vmatpush.msra.mxu1 %v184_v56  ;;  %455 = vmatpush.msra.mxu2 %v199_v57  ;;  %v522_v56 = vld [vmem:[%s2178_s4 + $0x1b0] sm:$0xff]  ;;  %v487_v57 = vld [vmem:[%s2178_s4 + $0x98] sm:$0xff] }
  0x5c   :  { %684 = vmatpush.msra.mxu3 %v476_v58  ;;  %416 = vmatpush.msra.mxu0 %v166_v59  ;;  %v539_v58 = vld [vmem:[%s2178_s4 + $0x238] sm:$0xff]  ;;  %v504_v59 = vld [vmem:[%s2178_s4 + $0x120] sm:$0xff] }
  0x5d   :  { %435 = vmatpush.msra.mxu1 %v183_v60  ;;  %456 = vmatpush.msra.mxu2 %v198_v61  ;;  %v521_v60 = vld [vmem:[%s2178_s4 + $0x1a8] sm:$0xff]  ;;  %v486_v61 = vld [vmem:[%s2178_s4 + $0x90] sm:$0xff] }
  0x5e   :  { %685 = vmatpush.msra.mxu3 %v475_v62  ;;  %417 = vmatpush.msra.mxu0 %v165_v63  ;;  %v538_v62 = vld [vmem:[%s2178_s4 + $0x230] sm:$0xff]  ;;  %v503_v63 = vld [vmem:[%s2178_s4 + $0x118] sm:$0xff] }
  0x5f   :  { %436 = vmatpush.msra.mxu1 %v182_v0  ;;  %457 = vmatpush.msra.mxu2 %v197_v1  ;;  %v520_v0 = vld [vmem:[%s2178_s4 + $0x1a0] sm:$0xff]  ;;  %v485_v1 = vld [vmem:[%s2178_s4 + $0x88] sm:$0xff] }
  0x60   :  { %686 = vmatpush.msra.mxu3 %v474_v2  ;;  %418 = vmatpush.msra.mxu0 %v164_v3  ;;  %v537_v2 = vld [vmem:[%s2178_s4 + $0x228] sm:$0xff]  ;;  %v502_v3 = vld [vmem:[%s2178_s4 + $0x110] sm:$0xff] }
  0x61   :  { %437 = vmatpush.msra.mxu1 %v181_v4  ;;  %458 = vmatpush.msra.mxu2 %v196_v5  ;;  %v519_v4 = vld [vmem:[%s2178_s4 + $0x198] sm:$0xff]  ;;  %v484_v5 = vld [vmem:[%s2178_s4 + $0x80] sm:$0xff] }
  0x62   :  { %687 = vmatpush.msra.mxu3 %v473_v6  ;;  %419 = vmatpush.msra.mxu0 %v163_v7  ;;  %v536_v6 = vld [vmem:[%s2178_s4 + $0x220] sm:$0xff]  ;;  %v501_v7 = vld [vmem:[%s2178_s4 + $0x108] sm:$0xff] }
  0x63   :  { %438 = vmatpush.msra.mxu1 %v180_v8  ;;  %459 = vmatpush.msra.mxu2 %v195_v9  ;;  %v563_v8 = vld [vmem:[%s2178_s4 + $0x2f8] sm:$0xff]  ;;  %v518_v9 = vld [vmem:[%s2178_s4 + $0x190] sm:$0xff] }
  0x64   :  { %688 = vmatpush.msra.mxu3 %v472_v10  ;;  %420 = vmatmul.f32.vlgmr.msra.gmra.mxu0 %v1448_v24  ;;  %v468_v24 = vld [vmem:[%s2178_s4] sm:$0xff]  ;;  %v535_v10 = vld [vmem:[%s2178_s4 + $0x218] sm:$0xff] }
  0x65   :  { %460 = vmatmul.f32.vlgmr.msra.gmra.mxu2 %v1450_v25  ;;  %697 = vmatpush.msrb.mxu0 %v499_v11  ;;  %v495_v25 = vld [vmem:[%s2178_s4 + $0xd8] sm:$0xff]  ;;  %v467_v11 = vld [vmem:[%s2177_s1 + $0x10] sm:$0x3f] }
  0x66   :  { %439 = vmatpush.msra.mxu1 %v179_v12  ;;  %689 = vmatpush.msra.mxu3 %v471_v13  ;;  %v500_v12 = vld [vmem:[%s2178_s4 + $0x100] sm:$0xff]  ;;  %v562_v13 = vld [vmem:[%s2178_s4 + $0x2f0] sm:$0xff] }
  0x67   :  { %440 = vmatmul.f32.vlgmr.msra.gmra.mxu1 %v1452_v26  ;;  %698 = vmatpush.msrb.mxu0 %v498_v14  ;;  %v547_v26 = vld [vmem:[%s2178_s4 + $0x278] sm:$0xff] }
  0x68   :  { %717 = vmatpush.msrb.mxu1 %v515_v15  ;;  %690 = vmatpush.msra.mxu3 %v470_v16  ;;  %v579_v14 = vld [vmem:[%s2178_s4 + $0x378] sm:$0xff]  ;;  %v517_v15 = vld [vmem:[%s2178_s4 + $0x188] sm:$0xff]  ;;  %v534_v16 = vld [vmem:[%s2178_s4 + $0x210] sm:$0xff] }
  0x69   :  { %699 = vmatpush.msrb.mxu0 %v497_v17  ;;  %737 = vmatpush.msrb.mxu2 %v531_v18  ;;  %v561_v17 = vld [vmem:[%s2178_s4 + $0x2e8] sm:$0xff]  ;;  %v578_v18 = vld [vmem:[%s2178_s4 + $0x370] sm:$0xff] }
  0x6a   :  { %718 = vmatpush.msrb.mxu1 %v514_v19  ;;  %691 = vmatpush.msra.mxu3 %v469_v20  ;;  %v516_v19 = vld [vmem:[%s2178_s4 + $0x180] sm:$0xff]  ;;  %v1824_v20 = vld.sshfl [vmem:[#allocation1 + $0x8] sm:$0xff pattern:$0x73625140] }
  0x6b   :  { %700 = vmatpush.msrb.mxu0 %v496_v21  ;;  %738 = vmatpush.msrb.mxu2 %v530_v22  ;;  %v533_v21 = vld [vmem:[%s2178_s4 + $0x208] sm:$0xff]  ;;  %v560_v22 = vld [vmem:[%s2178_s4 + $0x2e0] sm:$0xff] }
  0x6c   :  { %719 = vmatpush.msrb.mxu1 %v513_v23  ;;  %692 = vmatpush.msra.mxu3 %v468_v24  ;;  %v654_v23 = vld.sshfl [vmem:[#allocation1] sm:$0xff pattern:$0x73625140]  ;;  %v1832_v24 = vld.sshfl [vmem:[#allocation1 + $0x18] sm:$0xff pattern:$0x73625140] }
  0x6d   :  { %701 = vmatpush.msrb.mxu0 %v495_v25  ;;  %739 = vmatpush.msrb.mxu2 %v529_v28  ;;  %v1834_v25 = vld.sshfl [vmem:[#allocation1 + $0x10] sm:$0xff pattern:$0x73625140]  ;;  %v532_v28 = vld [vmem:[%s2178_s4 + $0x200] sm:$0xff] }
  0x6e   :  { %757 = vmatpush.msrb.mxu3 %v547_v26  ;;  %720 = vmatpush.msrb.mxu1 %v512_v27  ;;  %v577_v26 = vld [vmem:[%s2178_s4 + $0x368] sm:$0xff]  ;;  %v595_v27 = vld [vmem:[%s2178_s4 + $0x3f8] sm:$0xff]  ;;  %662 = vst [vmem:[#allocation1] ss:$4 sm:$0xff] %v467_v11 }
  0x6f   :  { %702 = vmatpush.msrb.mxu0 %v494_v29  ;;  %740 = vmatpush.msrb.mxu2 %v528_v32  ;;  %v559_v29 = vld [vmem:[%s2178_s4 + $0x2d8] sm:$0xff] }
  0x70   :  { %758 = vmatpush.msrb.mxu3 %v546_v30  ;;  %721 = vmatpush.msrb.mxu1 %v511_v31  ;;  %v576_v30 = vld [vmem:[%s2178_s4 + $0x360] sm:$0xff]  ;;  %v594_v31 = vld [vmem:[%s2178_s4 + $0x3f0] sm:$0xff]  ;;  %v611_v32 = vld [vmem:[%s2178_s4 + $0x478] sm:$0xff] }
  0x71   :  { %703 = vmatpush.msrb.mxu0 %v493_v33  ;;  %741 = vmatpush.msrb.mxu2 %v527_v36  ;;  %v558_v33 = vld [vmem:[%s2178_s4 + $0x2d0] sm:$0xff]  ;;  %v583_v11 = vld [vmem:[%s2178_s4 + $0x398] sm:$0xff] }
  0x72   :  { %759 = vmatpush.msrb.mxu3 %v545_v34  ;;  %722 = vmatpush.msrb.mxu1 %v510_v35  ;;  %v575_v34 = vld [vmem:[%s2178_s4 + $0x358] sm:$0xff]  ;;  %v593_v35 = vld [vmem:[%s2178_s4 + $0x3e8] sm:$0xff]  ;;  %v610_v36 = vld [vmem:[%s2178_s4 + $0x470] sm:$0xff] }
  0x73   :  { %704 = vmatpush.msrb.mxu0 %v492_v37  ;;  %742 = vmatpush.msrb.mxu2 %v526_v40  ;;  %v557_v37 = vld [vmem:[%s2178_s4 + $0x2c8] sm:$0xff] }
  0x74   :  { %760 = vmatpush.msrb.mxu3 %v544_v38  ;;  %723 = vmatpush.msrb.mxu1 %v509_v39  ;;  %v574_v38 = vld [vmem:[%s2178_s4 + $0x350] sm:$0xff]  ;;  %v592_v39 = vld [vmem:[%s2178_s4 + $0x3e0] sm:$0xff]  ;;  %v609_v40 = vld [vmem:[%s2178_s4 + $0x468] sm:$0xff] }
  0x75   :  { %705 = vmatpush.msrb.mxu0 %v491_v41  ;;  %743 = vmatpush.msrb.mxu2 %v525_v44  ;;  %v556_v41 = vld [vmem:[%s2178_s4 + $0x2c0] sm:$0xff] }
  0x76   :  { %761 = vmatpush.msrb.mxu3 %v543_v42  ;;  %724 = vmatpush.msrb.mxu1 %v508_v43  ;;  %v573_v42 = vld [vmem:[%s2178_s4 + $0x348] sm:$0xff]  ;;  %v591_v43 = vld [vmem:[%s2178_s4 + $0x3d8] sm:$0xff]  ;;  %v608_v44 = vld [vmem:[%s2178_s4 + $0x460] sm:$0xff] }
  0x77   :  { %706 = vmatpush.msrb.mxu0 %v490_v45  ;;  %744 = vmatpush.msrb.mxu2 %v524_v48  ;;  %v555_v45 = vld [vmem:[%s2178_s4 + $0x2b8] sm:$0xff] }
  0x78   :  { %762 = vmatpush.msrb.mxu3 %v542_v46  ;;  %725 = vmatpush.msrb.mxu1 %v507_v47  ;;  %v572_v46 = vld [vmem:[%s2178_s4 + $0x340] sm:$0xff]  ;;  %v590_v47 = vld [vmem:[%s2178_s4 + $0x3d0] sm:$0xff]  ;;  %v607_v48 = vld [vmem:[%s2178_s4 + $0x458] sm:$0xff] }
  0x79   :  { %707 = vmatpush.msrb.mxu0 %v489_v49  ;;  %745 = vmatpush.msrb.mxu2 %v523_v52  ;;  %v554_v49 = vld [vmem:[%s2178_s4 + $0x2b0] sm:$0xff] }
  0x7a   :  { %763 = vmatpush.msrb.mxu3 %v541_v50  ;;  %726 = vmatpush.msrb.mxu1 %v506_v51  ;;  %v571_v50 = vld [vmem:[%s2178_s4 + $0x338] sm:$0xff]  ;;  %v589_v51 = vld [vmem:[%s2178_s4 + $0x3c8] sm:$0xff]  ;;  %v606_v52 = vld [vmem:[%s2178_s4 + $0x450] sm:$0xff] }
  0x7b   :  { %708 = vmatpush.msrb.mxu0 %v488_v53  ;;  %746 = vmatpush.msrb.mxu2 %v522_v56  ;;  %v553_v53 = vld [vmem:[%s2178_s4 + $0x2a8] sm:$0xff] }
  0x7c   :  { %764 = vmatpush.msrb.mxu3 %v540_v54  ;;  %727 = vmatpush.msrb.mxu1 %v505_v55  ;;  %v570_v54 = vld [vmem:[%s2178_s4 + $0x330] sm:$0xff]  ;;  %v588_v55 = vld [vmem:[%s2178_s4 + $0x3c0] sm:$0xff]  ;;  %v605_v56 = vld [vmem:[%s2178_s4 + $0x448] sm:$0xff] }
  0x7d   :  { %709 = vmatpush.msrb.mxu0 %v487_v57  ;;  %747 = vmatpush.msrb.mxu2 %v521_v60  ;;  %v552_v57 = vld [vmem:[%s2178_s4 + $0x2a0] sm:$0xff] }
  0x7e   :  { %765 = vmatpush.msrb.mxu3 %v539_v58  ;;  %728 = vmatpush.msrb.mxu1 %v504_v59  ;;  %v569_v58 = vld [vmem:[%s2178_s4 + $0x328] sm:$0xff]  ;;  %v587_v59 = vld [vmem:[%s2178_s4 + $0x3b8] sm:$0xff]  ;;  %v604_v60 = vld [vmem:[%s2178_s4 + $0x440] sm:$0xff] }
  0x7f   :  { %710 = vmatpush.msrb.mxu0 %v486_v61  ;;  %748 = vmatpush.msrb.mxu2 %v520_v0  ;;  %v551_v61 = vld [vmem:[%s2178_s4 + $0x298] sm:$0xff] }
  0x80   :  { %766 = vmatpush.msrb.mxu3 %v538_v62  ;;  %729 = vmatpush.msrb.mxu1 %v503_v63  ;;  %v568_v62 = vld [vmem:[%s2178_s4 + $0x320] sm:$0xff]  ;;  %v586_v63 = vld [vmem:[%s2178_s4 + $0x3b0] sm:$0xff]  ;;  %v603_v0 = vld [vmem:[%s2178_s4 + $0x438] sm:$0xff] }
  0x81   :  { %711 = vmatpush.msrb.mxu0 %v485_v1  ;;  %749 = vmatpush.msrb.mxu2 %v519_v4  ;;  %v550_v1 = vld [vmem:[%s2178_s4 + $0x290] sm:$0xff] }
  0x82   :  { %767 = vmatpush.msrb.mxu3 %v537_v2  ;;  %730 = vmatpush.msrb.mxu1 %v502_v3  ;;  %v567_v2 = vld [vmem:[%s2178_s4 + $0x318] sm:$0xff]  ;;  %v585_v3 = vld [vmem:[%s2178_s4 + $0x3a8] sm:$0xff]  ;;  %v602_v4 = vld [vmem:[%s2178_s4 + $0x430] sm:$0xff] }
  0x83   :  { %712 = vmatpush.msrb.mxu0 %v484_v5  ;;  %750 = vmatpush.msrb.mxu2 %v518_v9  ;;  %v549_v5 = vld [vmem:[%s2178_s4 + $0x288] sm:$0xff]  ;;  %v548_v9 = vld [vmem:[%s2178_s4 + $0x280] sm:$0xff] }
  0x84   :  { %768 = vmatpush.msrb.mxu3 %v536_v6  ;;  %731 = vmatpush.msrb.mxu1 %v501_v7  ;;  %v566_v6 = vld [vmem:[%s2178_s4 + $0x310] sm:$0xff]  ;;  %v584_v7 = vld [vmem:[%s2178_s4 + $0x3a0] sm:$0xff] }
  0x85   :  { %777 = vmatpush.msra.mxu0 %v563_v8  ;;  %751 = vmatpush.msrb.mxu2 %v517_v15  ;;  %v601_v8 = vld [vmem:[%s2178_s4 + $0x428] sm:$0xff]  ;;  %v564_v15 = vld [vmem:[%s2178_s4 + $0x300] sm:$0xff] }
  0x86   :  { %769 = vmatpush.msrb.mxu3 %v535_v10  ;;  %732 = vmatpush.msrb.mxu1 %v500_v12  ;;  %v565_v10 = vld [vmem:[%s2178_s4 + $0x308] sm:$0xff]  ;;  %v600_v12 = vld [vmem:[%s2178_s4 + $0x420] sm:$0xff] }
  0x87   :  { %778 = vmatpush.msra.mxu0 %v562_v13  ;;  %752 = vmatpush.msrb.mxu2 %v516_v19  ;;  %v658_v13 = vld.sshfl [vmem:[#allocation1 + $0x20] sm:$0xff pattern:$0x73625140]  ;;  %v643_v19 = vld [vmem:[%s2178_s4 + $0x578] sm:$0xff] }
  0x88   :  { %797 = vmatpush.msra.mxu1 %v579_v14  ;;  %770 = vmatpush.msrb.mxu3 %v534_v16  ;;  %v627_v14 = vld [vmem:[%s2178_s4 + $0x4f8] sm:$0xff]  ;;  %v582_v16 = vld [vmem:[%s2178_s4 + $0x390] sm:$0xff] }
  0x89   :  { %779 = vmatpush.msra.mxu0 %v561_v17  ;;  %817 = vmatpush.msra.mxu2 %v595_v27  ;;  %v599_v17 = vld [vmem:[%s2178_s4 + $0x418] sm:$0xff]  ;;  %v624_v27 = vld [vmem:[%s2178_s4 + $0x4e0] sm:$0xff] }
  0x8a   :  { %798 = vmatpush.msra.mxu1 %v578_v18  ;;  %771 = vmatpush.msrb.mxu3 %v533_v21  ;;  %v626_v18 = vld [vmem:[%s2178_s4 + $0x4f0] sm:$0xff] }
  0x8b   :  { %780 = vmatpush.msra.mxu0 %v560_v22  ;;  %693 = vmatmul.f32.vlgmr.msra.gmra.mxu3 %v654_v23  ;;  %v598_v21 = vld [vmem:[%s2178_s4 + $0x410] sm:$0xff]  ;;  %v625_v22 = vld [vmem:[%s2178_s4 + $0x4e8] sm:$0xff] }
  0x8c   :  { %799 = vmatpush.msra.mxu1 %v577_v26  ;;  %772 = vmatpush.msrb.mxu3 %v532_v28  ;;  %v642_v23 = vld [vmem:[%s2178_s4 + $0x570] sm:$0xff]  ;;  %v597_v26 = vld [vmem:[%s2178_s4 + $0x408] sm:$0xff] }
  0x8d   :  { %781 = vmatpush.msra.mxu0 %v559_v29  ;;  %818 = vmatpush.msra.mxu2 %v594_v31  ;;  %v641_v28 = vld [vmem:[%s2178_s4 + $0x568] sm:$0xff]  ;;  %v596_v29 = vld [vmem:[%s2178_s4 + $0x400] sm:$0xff] }
  0x8e   :  { %800 = vmatpush.msra.mxu1 %v576_v30  ;;  %837 = vmatpush.msra.mxu3 %v611_v32  ;;  %v659_v30 = vld.sshfl [vmem:[#allocation1 + $0x28] sm:$0xff pattern:$0x73625140]  ;;  %v663_v31 = vld.sshfl [vmem:[#allocation1] sm:$0xff pattern:$0x73625140] }
  0x8f   :  { %782 = vmatpush.msra.mxu0 %v558_v33  ;;  %819 = vmatpush.msra.mxu2 %v593_v35  ;;  %v623_v32 = vld [vmem:[%s2178_s4 + $0x4d8] sm:$0xff]  ;;  %v640_v33 = vld [vmem:[%s2178_s4 + $0x560] sm:$0xff]  ;;  %v622_v35 = vld [vmem:[%s2178_s4 + $0x4d0] sm:$0xff] }
  0x90   :  { %801 = vmatpush.msra.mxu1 %v575_v34  ;;  %838 = vmatpush.msra.mxu3 %v610_v36  ;;  %v660_v34 = vld.sshfl [vmem:[#allocation1 + $0x30] sm:$0xff pattern:$0x73625140]  ;;  %v639_v36 = vld [vmem:[%s2178_s4 + $0x558] sm:$0xff] }
  0x91   :  { %783 = vmatpush.msra.mxu0 %v557_v37  ;;  %820 = vmatpush.msra.mxu2 %v592_v39  ;;  %v621_v37 = vld [vmem:[%s2178_s4 + $0x4c8] sm:$0xff]  ;;  %v620_v39 = vld [vmem:[%s2178_s4 + $0x4c0] sm:$0xff] }
  0x92   :  { %802 = vmatpush.msra.mxu1 %v574_v38  ;;  %839 = vmatpush.msra.mxu3 %v609_v40  ;;  %v638_v38 = vld [vmem:[%s2178_s4 + $0x550] sm:$0xff]  ;;  %v637_v40 = vld [vmem:[%s2178_s4 + $0x548] sm:$0xff] }
  0x93   :  { %784 = vmatpush.msra.mxu0 %v556_v41  ;;  %821 = vmatpush.msra.mxu2 %v591_v43  ;;  %v619_v41 = vld [vmem:[%s2178_s4 + $0x4b8] sm:$0xff]  ;;  %v618_v43 = vld [vmem:[%s2178_s4 + $0x4b0] sm:$0xff] }
  0x94   :  { %803 = vmatpush.msra.mxu1 %v573_v42  ;;  %840 = vmatpush.msra.mxu3 %v608_v44  ;;  %v636_v42 = vld [vmem:[%s2178_s4 + $0x540] sm:$0xff]  ;;  %v635_v44 = vld [vmem:[%s2178_s4 + $0x538] sm:$0xff] }
  0x95   :  { %785 = vmatpush.msra.mxu0 %v555_v45  ;;  %822 = vmatpush.msra.mxu2 %v590_v47  ;;  %v617_v45 = vld [vmem:[%s2178_s4 + $0x4a8] sm:$0xff]  ;;  %v616_v47 = vld [vmem:[%s2178_s4 + $0x4a0] sm:$0xff] }
  0x96   :  { %804 = vmatpush.msra.mxu1 %v572_v46  ;;  %841 = vmatpush.msra.mxu3 %v607_v48  ;;  %v634_v46 = vld [vmem:[%s2178_s4 + $0x530] sm:$0xff]  ;;  %v633_v48 = vld [vmem:[%s2178_s4 + $0x528] sm:$0xff] }
  0x97   :  { %786 = vmatpush.msra.mxu0 %v554_v49  ;;  %823 = vmatpush.msra.mxu2 %v589_v51  ;;  %v615_v49 = vld [vmem:[%s2178_s4 + $0x498] sm:$0xff]  ;;  %v614_v51 = vld [vmem:[%s2178_s4 + $0x490] sm:$0xff] }
  0x98   :  { %805 = vmatpush.msra.mxu1 %v571_v50  ;;  %842 = vmatpush.msra.mxu3 %v606_v52  ;;  %v632_v50 = vld [vmem:[%s2178_s4 + $0x520] sm:$0xff]  ;;  %v631_v52 = vld [vmem:[%s2178_s4 + $0x518] sm:$0xff] }
  0x99   :  { %787 = vmatpush.msra.mxu0 %v553_v53  ;;  %824 = vmatpush.msra.mxu2 %v588_v55  ;;  %v613_v53 = vld [vmem:[%s2178_s4 + $0x488] sm:$0xff]  ;;  %v612_v55 = vld [vmem:[%s2178_s4 + $0x480] sm:$0xff] }
  0x9a   :  { %806 = vmatpush.msra.mxu1 %v570_v54  ;;  %843 = vmatpush.msra.mxu3 %v605_v56  ;;  %v630_v54 = vld [vmem:[%s2178_s4 + $0x510] sm:$0xff]  ;;  %v629_v56 = vld [vmem:[%s2178_s4 + $0x508] sm:$0xff] }
  0x9b   :  { %788 = vmatpush.msra.mxu0 %v552_v57  ;;  %825 = vmatpush.msra.mxu2 %v587_v59  ;;  %v664_v57 = vld.sshfl [vmem:[#allocation1 + $0x8] sm:$0xff pattern:$0x73625140]  ;;  %v665_v59 = vld.sshfl [vmem:[#allocation1 + $0x10] sm:$0xff pattern:$0x73625140] }
  0x9c   :  { %807 = vmatpush.msra.mxu1 %v569_v58  ;;  %844 = vmatpush.msra.mxu3 %v604_v60  ;;  %v628_v58 = vld [vmem:[%s2178_s4 + $0x500] sm:$0xff] }
  0x9d   :  { %789 = vmatpush.msra.mxu0 %v551_v61  ;;  %826 = vmatpush.msra.mxu2 %v586_v63  ;;  %v914_v61 = vld [vmem:[%s2182_s6 + $0x78] sm:$0xff] }
  0x9e   :  { %808 = vmatpush.msra.mxu1 %v568_v62  ;;  %845 = vmatpush.msra.mxu3 %v603_v0  ;;  %v913_v0 = vld [vmem:[%s2182_s6 + $0x70] sm:$0xff] }
  0x9f   :  { %790 = vmatpush.msra.mxu0 %v550_v1  ;;  %827 = vmatpush.msra.mxu2 %v585_v3  ;;  %v912_v1 = vld [vmem:[%s2182_s6 + $0x68] sm:$0xff]  ;;  %v911_v3 = vld [vmem:[%s2182_s6 + $0x60] sm:$0xff] }
  0xa0   :  { %809 = vmatpush.msra.mxu1 %v567_v2  ;;  %846 = vmatpush.msra.mxu3 %v602_v4  ;;  %v910_v4 = vld [vmem:[%s2182_s6 + $0x58] sm:$0xff] }
  0xa1   :  { %791 = vmatpush.msra.mxu0 %v549_v5  ;;  %828 = vmatpush.msra.mxu2 %v584_v7  ;;  %v908_v7 = vld [vmem:[%s2182_s6 + $0x48] sm:$0xff] }
  0xa2   :  { %810 = vmatpush.msra.mxu1 %v566_v6  ;;  %847 = vmatpush.msra.mxu3 %v601_v8  ;;  %v909_v6 = vld [vmem:[%s2182_s6 + $0x50] sm:$0xff] }
  0xa3   :  { %753 = vmatmul.f32.vlgmr.msrb.gmra.mxu2 %v1832_v24  ;;  %792 = vmatpush.msra.mxu0 %v548_v9  ;;  %v580_v24 = vld [vmem:[%s2178_s4 + $0x380] sm:$0xff] }
  0xa4   :  { %811 = vmatpush.msra.mxu1 %v565_v10  ;;  %829 = vmatpush.msra.mxu2 %v583_v11  ;;  %v907_v10 = vld [vmem:[%s2182_s6 + $0x40] sm:$0xff]  ;;  %v906_v11 = vld [vmem:[%s2182_s6 + $0x38] sm:$0xff] }
  0xa5   :  { %848 = vmatpush.msra.mxu3 %v600_v12  ;;  %713 = vmatmul.f32.vlgmr.msrb.gmra.mxu0 %v1824_v20  ;;  %v581_v20 = vld [vmem:[%s2178_s4 + $0x388] sm:$0xff] }
  0xa6   :  { %773 = vmatmul.f32.vlgmr.msrb.gmra.mxu3 %v658_v13  ;;  %857 = vmatpush.msrb.mxu0 %v627_v14  ;;  %v946_v14 = vld [vmem:[%s2179_s3] ss:$0 sm:$0xff] }
  0xa7   :  { %812 = vmatpush.msra.mxu1 %v564_v15  ;;  %830 = vmatpush.msra.mxu2 %v582_v16  ;;  %v905_v15 = vld [vmem:[%s2182_s6 + $0x30] sm:$0xff]  ;;  %v947_v16 = vld [vmem:[%s2180_s5] ss:$0 sm:$0xff] }
  0xa8   :  { %849 = vmatpush.msra.mxu3 %v599_v17  ;;  %733 = vmatmul.f32.vlgmr.msrb.gmra.mxu1 %v1834_v25  ;;  %v661_v25 = vld.sshfl [vmem:[#allocation1 + $0x38] sm:$0xff pattern:$0x73625140]  ;;  %v904_v17 = vld [vmem:[%s2182_s6 + $0x28] sm:$0xff] }
  0xa9   :  { %858 = vmatpush.msrb.mxu0 %v626_v18  ;;  %877 = vmatpush.msrb.mxu1 %v643_v19 }
  0xaa   :  { %831 = vmatpush.msra.mxu2 %v581_v20  ;;  %850 = vmatpush.msra.mxu3 %v598_v21 }
  0xab   :  { %859 = vmatpush.msrb.mxu0 %v625_v22  ;;  %878 = vmatpush.msrb.mxu1 %v642_v23  ;;  %v903_v22 = vld [vmem:[%s2182_s6 + $0x20] sm:$0xff] }
  0xac   :  { %832 = vmatpush.msra.mxu2 %v580_v24  ;;  %851 = vmatpush.msra.mxu3 %v597_v26 }
  0xad   :  { %833 = vmatmul.f32.vlgmr.msra.gmra.mxu2 %v661_v25  ;;  %860 = vmatpush.msrb.mxu0 %v624_v27  ;;  %v902_v25 = vld [vmem:[%s2182_s6 + $0x18] sm:$0xff] }
  0xae   :  { %879 = vmatpush.msrb.mxu1 %v641_v28  ;;  %852 = vmatpush.msra.mxu3 %v596_v29  ;;  %v901_v28 = vld [vmem:[%s2182_s6 + $0x10] sm:$0xff] }
  0xaf   :  { %793 = vmatmul.f32.vlgmr.msra.gmra.mxu0 %v659_v30  ;;  %853 = vmatmul.f32.vlgmr.msra.gmra.mxu3 %v663_v31  ;;  %v900_v31 = vld [vmem:[%s2182_s6 + $0x8] sm:$0xff] }
  0xb0   :  { %861 = vmatpush.msrb.mxu0 %v623_v32  ;;  %880 = vmatpush.msrb.mxu1 %v640_v33  ;;  %v899_v33 = vld [vmem:[%s2182_s6] sm:$0xff] }
  0xb1   :  { %813 = vmatmul.f32.vlgmr.msra.gmra.mxu1 %v660_v34  ;;  %919 = vmatpush.msrb.mxu2 %v914_v61  ;;  %v948_v61 = vld [vmem:[%s2181_s7] ss:$0 sm:$0xff] }
  0xb2   :  { %862 = vmatpush.msrb.mxu0 %v622_v35  ;;  %881 = vmatpush.msrb.mxu1 %v639_v36 }
  0xb3   :  { %920 = vmatpush.msrb.mxu2 %v913_v0 }
  0xb4   :  { %863 = vmatpush.msrb.mxu0 %v621_v37  ;;  %882 = vmatpush.msrb.mxu1 %v638_v38 }
  0xb5   :  { %921 = vmatpush.msrb.mxu2 %v912_v1 }
  0xb6   :  { %864 = vmatpush.msrb.mxu0 %v620_v39  ;;  %883 = vmatpush.msrb.mxu1 %v637_v40 }
  0xb7   :  { %922 = vmatpush.msrb.mxu2 %v911_v3 }
  0xb8   :  { %865 = vmatpush.msrb.mxu0 %v619_v41  ;;  %884 = vmatpush.msrb.mxu1 %v636_v42 }
  0xb9   :  { %923 = vmatpush.msrb.mxu2 %v910_v4 }
  0xba   :  { %866 = vmatpush.msrb.mxu0 %v618_v43  ;;  %885 = vmatpush.msrb.mxu1 %v635_v44  ;;  %v261_v60 = vpop.f32.mrf.mxu0 }
  0xbb   :  { %924 = vmatpush.msrb.mxu2 %v909_v6  ;;  %v262_v20 = vadd.f32 %v946_v14, %v261_v60 }
  0xbc   :  { %867 = vmatpush.msrb.mxu0 %v617_v45  ;;  %886 = vmatpush.msrb.mxu1 %v634_v46 }
  0xbd   :  { %925 = vmatpush.msrb.mxu2 %v908_v7 }
  0xbe   :  { %868 = vmatpush.msrb.mxu0 %v616_v47  ;;  %887 = vmatpush.msrb.mxu1 %v633_v48 }
  0xbf   :  { %926 = vmatpush.msrb.mxu2 %v907_v10 }
  0xc0   :  { %869 = vmatpush.msrb.mxu0 %v615_v49  ;;  %888 = vmatpush.msrb.mxu1 %v632_v50 }
  0xc1   :  { %v281_v62 = vpop.f32.mrf.mxu1  ;;  %927 = vmatpush.msrb.mxu2 %v906_v11 }
  0xc2   :  { %870 = vmatpush.msrb.mxu0 %v614_v51  ;;  %889 = vmatpush.msrb.mxu1 %v631_v52  ;;  %v321_v63 = vpop.f32.mrf.mxu3  ;;  %v282_v26 = vadd.f32 %v281_v62, %v262_v20 }
  0xc3   :  { %v301_v2 = vpop.f32.mrf.mxu2  ;;  %928 = vmatpush.msrb.mxu2 %v905_v15 }
  0xc4   :  { %871 = vmatpush.msrb.mxu0 %v613_v53  ;;  %890 = vmatpush.msrb.mxu1 %v630_v54  ;;  %v302_v30 = vadd.f32 %v301_v2, %v282_v26 }
  0xc5   :  { %929 = vmatpush.msrb.mxu2 %v904_v17 }
  0xc6   :  { %872 = vmatpush.msrb.mxu0 %v612_v55  ;;  %891 = vmatpush.msrb.mxu1 %v629_v56  ;;  %v322_v35 = vadd.f32 %v321_v63, %v302_v30  ;;  %v939_v63 = vld [vmem:[%s2183_s8] sm:$0x3] }
  0xc7   :  { %873 = vmatmul.f32.vlgmr.msrb.gmra.mxu0 %v664_v57  ;;  %930 = vmatpush.msrb.mxu2 %v903_v22 }
  0xc8   :  { %892 = vmatpush.msrb.mxu1 %v628_v58  ;;  %v341_v5 = vpop.f32.mrf.mxu0 }
  0xc9   :  { %893 = vmatmul.f32.vlgmr.msrb.gmra.mxu1 %v665_v59  ;;  %931 = vmatpush.msrb.mxu2 %v902_v25  ;;  %v342_v38 = vadd.f32 %v341_v5, %v322_v35 }
  0xcb   :  { %v361_v8 = vpop.f32.mrf.mxu1  ;;  %v381_v12 = vpop.f32.mrf.mxu2  ;;  %932 = vmatpush.msrb.mxu2 %v901_v28 }
  0xcc   :  { %v362_v41 = vadd.f32 %v361_v8, %v342_v38 }
  0xcd   :  { %933 = vmatpush.msrb.mxu2 %v900_v31 }
  0xce   :  { %v401_v9 = vpop.f32.mrf.mxu3  ;;  %v382_v44 = vadd.f32 %v381_v12, %v362_v41 }
  0xcf   :  { %934 = vmatpush.msrb.mxu2 %v899_v33 }
  0xd0   :  { %v402_v47 = vadd.f32 %v401_v9, %v382_v44 }
  0xe1   :  { %v421_v13 = vpop.f32.mrf.mxu0 }
  0xe2   :  { %v422_v48 = vadd.f32 %v421_v13, %v402_v47 }
  0xe4   :  { %v441_v18 = vpop.f32.mrf.mxu1 }
  0xe5   :  { %v442_v51 = vadd.f32 %v441_v18, %v422_v48 }
  0xe8   :  { %v461_v23 = vpop.f32.mrf.mxu2 }
  0xe9   :  { %v462_v54 = vadd.f32 %v461_v23, %v442_v51 }
  0xeb   :  { %v464_v58 = vmax.f32 %v462_v54, 0.0 }
 0x10e   :  { %v694_v19 = vpop.f32.mrf.mxu3 }
 0x10f   :  { %v695_v21 = vadd.f32 %v947_v16, %v694_v19 }
 0x122   :  { %v714_v24 = vpop.f32.mrf.mxu0 }
 0x123   :  { %v715_v27 = vadd.f32 %v714_v24, %v695_v21 }
 0x125   :  { %v734_v29 = vpop.f32.mrf.mxu1 }
 0x126   :  { %v735_v32 = vadd.f32 %v734_v29, %v715_v27  ;;  %v754_v34 = vpop.f32.mrf.mxu2 }
 0x128   :  { %v755_v36 = vadd.f32 %v754_v34, %v735_v32 }
 0x129   :  { %v774_v37 = vpop.f32.mrf.mxu3 }
 0x12a   :  { %v775_v39 = vadd.f32 %v774_v37, %v755_v36 }
 0x12c   :  { %v794_v40 = vpop.f32.mrf.mxu0 }
 0x12d   :  { %v795_v42 = vadd.f32 %v794_v40, %v775_v39 }
 0x12e   :  { %v814_v43 = vpop.f32.mrf.mxu1 }
 0x12f   :  { %v815_v45 = vadd.f32 %v814_v43, %v795_v42 }
 0x130   :  { %v834_v46 = vpop.f32.mrf.mxu2 }
 0x131   :  { %v835_v49 = vadd.f32 %v834_v46, %v815_v45 }
 0x132   :  { %v854_v50 = vpop.f32.mrf.mxu3 }
 0x133   :  { %v855_v52 = vadd.f32 %v854_v50, %v835_v49 }
 0x144   :  { %v874_v53 = vpop.f32.mrf.mxu0 }
 0x145   :  { %v875_v55 = vadd.f32 %v874_v53, %v855_v52 }
 0x146   :  { %v894_v56 = vpop.f32.mrf.mxu1 }
 0x147   :  { %v895_v57 = vadd.f32 %v894_v56, %v875_v55 }
 0x149   :  { %v897_v59 = vmax.f32 %v895_v57, 0.0 }
 0x14b   :  { %v898_v60 = vsub.f32 %v897_v59, %v464_v58 }
 0x14d   :  { %935 = vmatmul.f32.vlgmr.msrb.gmra.mxu2 %v898_v60 }
 0x1d0   :  { %v936_v62 = vpop.f32.mrf.mxu2 }
 0x1d1   :  { %v937_v0 = vadd.f32 %v948_v61, %v936_v62 }
 0x1d3   :  { %v940_v1 = vmul.f32 %v939_v63, %v937_v0 }
 0x1d5   :  { %941 = vst [vmem:[%s2184_s9] sm:$0x3] %v940_v1 }

// kernel: vtranse_forward.2
= control target key start
LH: loop header
LB: loop body
LE: loop exit
PB: predicated region body
PF: predicated region fallthrough
CT: control target
= control target key end

     0   :  { %s8526_s0 = inlined_call_operand.vmem [shape: f32[2,2,8192], index: 0, kind: input, shape index: {}]   ;;  %s8527_s1 = inlined_call_operand.hbm [shape: f32[2,8192,1024], index: 1, kind: input, shape index: {}]   ;;  %s8528_s2 = inlined_call_operand.vmem [shape: f32[2,1,1024], index: 2, kind: input, shape index: {}]   ;;  %s8529_s3 = inlined_call_operand.vmem [shape: f32[2,1,1024], index: 3, kind: input, shape index: {}]   ;;  %s8530_s4 = inlined_call_operand.vmem [shape: f32[2,1,1024], index: 4, kind: input, shape index: {}]   ;;  %s8531_s5 = inlined_call_operand.vmem [shape: f32[2,2,1024], index: 5, kind: output, shape index: {}]  }
   0x1   :  { %8545 = sst [smem:[#allocation14_spill]] %s8527_s1 }
   0x2   :  { %10 = vsyncpa [#allocation4], 0 }
   0x3   :  { %12 = vsyncpa [#allocation4 + $0x1], 0  ;;  %s5886_s18 = smov 0   ;;  %s5888_s19 = smov 0  }
   0x4   :  { %s5890_s20 = smov 0   ;;  %s5892_s21 = smov 0  }
   0x5   :  { %s5894_s22 = smov 0   ;;  %s5896_s23 = smov 0  }
   0x6   :  { %s5898_s24 = smov 0   ;;  %s5900_s25 = smov 0  }
   0x7 LB: > { %8546 = sst [smem:[#allocation6_spill]] %s5846_s24  ;;  %s5580_s26 = sadd.s32 4294967295, %s5850_s25   ;;  %s5850_s25 = sphi %s5900_s25, %s18_s25   ;;  %s5846_s24 = sphi %s5898_s24, %s8566_s24   ;;  %s5842_s23 = sphi %s5896_s23, %s8571_s23   ;;  %s5838_s22 = sphi %s5894_s22, %s8564_s22   ;;  %s5834_s21 = sphi %s5892_s21, %s8570_s21   ;;  %s5830_s20 = sphi %s5890_s20, %s8569_s20   ;;  %s5826_s19 = sphi %s5888_s19, %s8568_s19   ;;  %s5822_s18 = sphi %s5886_s18, %s8567_s18  }
   0x8   : > { %s27_s27 = sadd.s32 1, %s5842_s23  ;;  %s30_s28 = sadd.s32 1, %s5846_s24 }
   0x9   : > { %p28_p0 = scmp.ge.s32.totalorder %s27_s27, 4  ;;  %s67_s29 = sadd.s32 1, %s5830_s20 }
   0xa   : > { %p74_p1 = scmp.ne.s32.totalorder %s5830_s20, %s5826_s19  ;;  %p75_p2 = scmp.eq.s32.totalorder %s5850_s25, 0 }
   0xb   : > { %s8573_s27 = smov (%p28_p0, %s27_s27), 0  ;;  %s8575_s28 = smov (!%p28_p0, %s30_s28), %s5846_s24 }
   0xc   : > { %8547 = sst [smem:[#allocation7_spill]] %s8573_s27  ;;  %s63_s30 = ssub.s32 %s5842_s23, %s8573_s27 }
   0xd   : > { %p32_p3 = scmp.ge.s32.totalorder %s8575_s28, 2  ;;  %p80_p4 = scmp.ne.s32.totalorder %s5826_s19, %s5822_s18 }
   0xe   : > { %p5937_p5 = por %p75_p2, %p74_p1  ;;  %p81_p6 = scmp.eq.s32.totalorder %s5580_s26, 0 }
   0xf   : > { %s8577_s28 = smov (%p32_p3, %s8575_s28), 0  ;;  %p5611_p8 = scmp.lt.s32.totalorder %s5850_s25, 8 }
  0x10   : > { %8549 = sst [smem:[#allocation8_spill]] %s8577_s28  ;;  %p5943_p7 = por %p81_p6, %p80_p4 }
  0x11   : > { %s62_s8 = ssub.s32 %s5846_s24, %s8577_s28  ;;  %s221_s10 = sand.u32 1, %s5830_s20  }
  0x12   : > { %s64_s9 = sor.u32 %s63_s30, %s62_s8  ;;  %s5584_s11 = sshll.u32 %s221_s10, 14 }
  0x13   : > { %p65_p9 = scmp.eq.s32.totalorder %s64_s9, 0  ;;  %s5603_s12 = sshll.u32 %s5842_s23, 11 }
  0x14   : > { %s5587_s14 = sshll.u32 %s5846_s24, 13  ;;  %s225_s16 = scalar_lea.vmem [#allocation3], %s5584_s11 }
  0x15   : > { %s5953_s13 = scalar_select %p65_p9, %s5830_s20, %s67_s29  }
  0x16   : > { %s231_s15 = sadd.s32 %s5603_s12, %s5587_s14  ;;  %s236_s17 = sshll.u32 %s225_s16, 4  ;;  %s237_s17 = int_to_ptr.vmem [resolvable:$true] %s236_s17 }
  0x17   : > { %s5588_s18 = sshll.u32 %s231_s15, 3  ;;  %s8551_s1 = sld [smem:[#allocation14_spill]] }
  0x18   : > { %p5608_p10 = pnand %p5611_p8, %p5937_p5  ;;  %p5589_p11 = scmp.ge.s32.totalorder %s5850_s25, 1 }
  0x19   : > { %s222_s8 = scalar_lea.sflag [#allocation4], %s221_s10  ;;  %s5852_s29 = smov 1024  }
  0x1a   : > { %s5853_s9 = smov 64   ;;  %p265_p12 = scmp.lt.s32.totalorder %s5850_s25, 9 }
  0x1c   : > { %p266_p13 = pnand %p5589_p11, %p265_p12 }
  0x1d   : > { %s233_s28 = scalar_lea.hbm %s8551_s1, %s5588_s18 }
  0x1e   : > { %s234_s30 = sshll.u32 %s233_s28, 4  ;;  %269 = sbr.rel (%p266_p13) target bundleno = 2044 (0x7fc), region = 40  ;;  %s235_s30 = int_to_ptr.hbm [resolvable:$true] %s234_s30 }
  0x1f   : > { %5610 = dma.hbm_to_vmem [thread:$0]  (!%p5608_p10), %s235_s30, 262144, %s237_s17, %s222_s8, %s5852_s29, %s5852_s29, %s5853_s9  }
  0x23   : > { %s271_s11 = sand.u32 1, %s5826_s19  }
  0x24   : > { %s5590_s12 = sshll.u32 %s271_s11, 14  ;;  %s272_s14 = scalar_lea.sflag [#allocation4], %s271_s11 }
  0x25   : > { %s5966_s27 = scalar_lea.vmem [#allocation3], %s5590_s12 }
  0x26   : > { %5817 = dma.done.wait (%p5943_p7), %s272_s14, 262144  }
  0x27   : > { %5819 = vsyncadd (%p5943_p7), %s272_s14, 4294705152  ;;  %s5591_s28 = sshll.u32 %s5834_s21, 4  ;;  %p325_p0 = scmp.lt.s32.totalorder %s5838_s22, 1 }
  0x28   : > { %p327_p1 = scmp.lt.s32.totalorder %s5591_s28, 63  ;;  %p5599_p2 = scmp.ne.s32.totalorder %s5834_s21, 0 }
  0x29   : > { %s8579_s22 = smov (!%p325_p0, %s5838_s22), 1 }
  0x2a   : > { %s8581_s28 = smov (!%p327_p1, %s5591_s28), 63  ;;  %s5592_s6 = sshll.u32 %s8579_s22, 6 }
  0x2b   : > { %s5975_s10 = sshll.u32 %s8579_s22, 3  ;;  %s330_s15 = sadd.s32 %s5592_s6, %s8581_s28 }
  0x2c   : > { %s338_s7 = scalar_lea.vmem %s8528_s2, %s5975_s10  ;;  %s5593_s18 = sshll.u32 %s330_s15, 1 }
  0x2d   : > { %s342_s8 = scalar_lea.vmem %s8529_s3, %s5975_s10  ;;  %s5988_s11 = scalar_lea.vmem %s8526_s0, %s5593_s18 }
  0x2e   : > { %s346_s1 = scalar_lea.vmem %s8530_s4, %s5975_s10  ;;  %s5604_s24 = sshll.u32 %s8579_s22, 4 }
  0x2f   : > { %s5997_s16 = scalar_lea.vmem %s8531_s5, %s5604_s24  ;;  %355 = sbr.rel (%p5599_p2) target bundleno = 55 (0x37), region = 48 }
  0x34   : > { %v5854_v0 = vmov 0.0  }
  0x35   : > { %356 = vst [vmem:[#allocation2] sm:$0xff] %v5854_v0 }
  0x36   : > { %357 = vst [vmem:[#allocation2 + $0x8] sm:$0xff] %v5854_v0 }
  0x37 PF: > { %v484_v1 = vld [vmem:[%s5966_s27 + $0x3c0] sm:$0xff]  ;;  %vm5027_vm0 = vcmask 1041408   ;;  %vm5029_vm1 = vcmask 1045508   ;;  %vm5031_vm2 = vcmask 1043456   ;;  %p5600_p3 = scmp.ne.s32.totalorder %s5834_s21, 3 }
  0x38   : > { %v740_v2 = vld [vmem:[%s5966_s27 + $0xbc0] sm:$0xff]  ;;  %2453 = vmatpush.msra.mxu0 %v484_v1 }
  0x39   : > { %v476_v3 = vld [vmem:[%s5966_s27 + $0x380] sm:$0xff]  ;;  %2493 = vmatpush.msra.mxu2 %v740_v2 }
  0x3a   : > { %v612_v4 = vld [vmem:[%s5966_s27 + $0x7c0] sm:$0xff]  ;;  %2454 = vmatpush.msra.mxu0 %v476_v3 }
  0x3b   : > { %v732_v5 = vld [vmem:[%s5966_s27 + $0xb80] sm:$0xff]  ;;  %2473 = vmatpush.msra.mxu1 %v612_v4 }
  0x3c   : > { %v868_v6 = vld [vmem:[%s5966_s27 + $0xfc0] sm:$0xff]  ;;  %2494 = vmatpush.msra.mxu2 %v732_v5 }
  0x3d   : > { %2513 = vmatpush.msra.mxu3 %v868_v6  ;;  %v468_v7 = vld [vmem:[%s5966_s27 + $0x340] sm:$0xff] }
  0x3e   : > { %v604_v8 = vld [vmem:[%s5966_s27 + $0x780] sm:$0xff]  ;;  %2455 = vmatpush.msra.mxu0 %v468_v7 }
  0x3f   : > { %v724_v9 = vld [vmem:[%s5966_s27 + $0xb40] sm:$0xff]  ;;  %2474 = vmatpush.msra.mxu1 %v604_v8 }
  0x40   : > { %v860_v10 = vld [vmem:[%s5966_s27 + $0xf80] sm:$0xff]  ;;  %2495 = vmatpush.msra.mxu2 %v724_v9 }
  0x41   : > { %v596_v11 = vld [vmem:[%s5966_s27 + $0x740] sm:$0xff]  ;;  %2514 = vmatpush.msra.mxu3 %v860_v10 }
  0x42   : > { %v460_v12 = vld [vmem:[%s5966_s27 + $0x300] sm:$0xff]  ;;  %2475 = vmatpush.msra.mxu1 %v596_v11 }
  0x43   : > { %v716_v13 = vld [vmem:[%s5966_s27 + $0xb00] sm:$0xff]  ;;  %2456 = vmatpush.msra.mxu0 %v460_v12 }
  0x44   : > { %v852_v14 = vld [vmem:[%s5966_s27 + $0xf40] sm:$0xff]  ;;  %2496 = vmatpush.msra.mxu2 %v716_v13 }
  0x45   : > { %v588_v15 = vld [vmem:[%s5966_s27 + $0x700] sm:$0xff]  ;;  %2515 = vmatpush.msra.mxu3 %v852_v14 }
  0x46   : > { %v844_v16 = vld [vmem:[%s5966_s27 + $0xf00] sm:$0xff]  ;;  %2476 = vmatpush.msra.mxu1 %v588_v15 }
  0x47   : > { %v452_v17 = vld [vmem:[%s5966_s27 + $0x2c0] sm:$0xff]  ;;  %2516 = vmatpush.msra.mxu3 %v844_v16 }
  0x48   : > { %v708_v18 = vld [vmem:[%s5966_s27 + $0xac0] sm:$0xff]  ;;  %2457 = vmatpush.msra.mxu0 %v452_v17 }
  0x49   : > { %v580_v19 = vld [vmem:[%s5966_s27 + $0x6c0] sm:$0xff]  ;;  %2497 = vmatpush.msra.mxu2 %v708_v18 }
  0x4a   : > { %v836_v20 = vld [vmem:[%s5966_s27 + $0xec0] sm:$0xff]  ;;  %2477 = vmatpush.msra.mxu1 %v580_v19 }
  0x4b   : > { %v444_v21 = vld [vmem:[%s5966_s27 + $0x280] sm:$0xff]  ;;  %2517 = vmatpush.msra.mxu3 %v836_v20 }
  0x4c   : > { %v700_v22 = vld [vmem:[%s5966_s27 + $0xa80] sm:$0xff]  ;;  %2458 = vmatpush.msra.mxu0 %v444_v21 }
  0x4d   : > { %v572_v23 = vld [vmem:[%s5966_s27 + $0x680] sm:$0xff]  ;;  %2498 = vmatpush.msra.mxu2 %v700_v22 }
  0x4e   : > { %v828_v24 = vld [vmem:[%s5966_s27 + $0xe80] sm:$0xff]  ;;  %2478 = vmatpush.msra.mxu1 %v572_v23  ;;  %v360_v23 = vld [vmem:[%s5988_s11] sm:$0xff] }
  0x4f   : > { %v436_v25 = vld [vmem:[%s5966_s27 + $0x240] sm:$0xff]  ;;  %2518 = vmatpush.msra.mxu3 %v828_v24  ;;  %2416 = vst [vmem:[#allocation1] ss:$4 sm:$0xff] %v360_v23 }
  0x50   : > { %v692_v26 = vld [vmem:[%s5966_s27 + $0xa40] sm:$0xff]  ;;  %2459 = vmatpush.msra.mxu0 %v436_v25 }
  0x51   : > { %v564_v27 = vld [vmem:[%s5966_s27 + $0x640] sm:$0xff]  ;;  %2499 = vmatpush.msra.mxu2 %v692_v26 }
  0x52   : > { %v820_v28 = vld [vmem:[%s5966_s27 + $0xe40] sm:$0xff]  ;;  %2479 = vmatpush.msra.mxu1 %v564_v27 }
  0x53   : > { %v428_v29 = vld [vmem:[%s5966_s27 + $0x200] sm:$0xff]  ;;  %2519 = vmatpush.msra.mxu3 %v820_v28 }
  0x54   : > { %v684_v30 = vld [vmem:[%s5966_s27 + $0xa00] sm:$0xff]  ;;  %2460 = vmatpush.msra.mxu0 %v428_v29 }
  0x55   : > { %v556_v31 = vld [vmem:[%s5966_s27 + $0x600] sm:$0xff]  ;;  %2500 = vmatpush.msra.mxu2 %v684_v30 }
  0x56   : > { %v812_v32 = vld [vmem:[%s5966_s27 + $0xe00] sm:$0xff]  ;;  %2480 = vmatpush.msra.mxu1 %v556_v31 }
  0x57   : > { %v420_v33 = vld [vmem:[%s5966_s27 + $0x1c0] sm:$0xff]  ;;  %2520 = vmatpush.msra.mxu3 %v812_v32 }
  0x58   : > { %v676_v34 = vld [vmem:[%s5966_s27 + $0x9c0] sm:$0xff]  ;;  %2461 = vmatpush.msra.mxu0 %v420_v33 }
  0x59   : > { %v548_v35 = vld [vmem:[%s5966_s27 + $0x5c0] sm:$0xff]  ;;  %2501 = vmatpush.msra.mxu2 %v676_v34 }
  0x5a   : > { %v804_v36 = vld [vmem:[%s5966_s27 + $0xdc0] sm:$0xff]  ;;  %2481 = vmatpush.msra.mxu1 %v548_v35 }
  0x5b   : > { %v412_v37 = vld [vmem:[%s5966_s27 + $0x180] sm:$0xff]  ;;  %2521 = vmatpush.msra.mxu3 %v804_v36 }
  0x5c   : > { %v668_v38 = vld [vmem:[%s5966_s27 + $0x980] sm:$0xff]  ;;  %2462 = vmatpush.msra.mxu0 %v412_v37 }
  0x5d   : > { %v540_v39 = vld [vmem:[%s5966_s27 + $0x580] sm:$0xff]  ;;  %2502 = vmatpush.msra.mxu2 %v668_v38 }
  0x5e   : > { %v796_v40 = vld [vmem:[%s5966_s27 + $0xd80] sm:$0xff]  ;;  %2482 = vmatpush.msra.mxu1 %v540_v39 }
  0x5f   : > { %v404_v41 = vld [vmem:[%s5966_s27 + $0x140] sm:$0xff]  ;;  %2522 = vmatpush.msra.mxu3 %v796_v40  ;;  %v361_v40 = vld [vmem:[%s5988_s11 + $0x8] sm:$0xff] }
  0x60   : > { %v660_v42 = vld [vmem:[%s5966_s27 + $0x940] sm:$0xff]  ;;  %2463 = vmatpush.msra.mxu0 %v404_v41  ;;  %2418 = vst [vmem:[#allocation1 + $0x20] ss:$4 sm:$0xff] %v361_v40 }
  0x61   : > { %v532_v43 = vld [vmem:[%s5966_s27 + $0x540] sm:$0xff]  ;;  %2503 = vmatpush.msra.mxu2 %v660_v42 }
  0x62   : > { %v788_v44 = vld [vmem:[%s5966_s27 + $0xd40] sm:$0xff]  ;;  %2483 = vmatpush.msra.mxu1 %v532_v43  ;;  %v362_v43 = vld [vmem:[%s5988_s11 + $0x10] sm:$0xff] }
  0x63   : > { %v396_v45 = vld [vmem:[%s5966_s27 + $0x100] sm:$0xff]  ;;  %2523 = vmatpush.msra.mxu3 %v788_v44 }
  0x64   : > { %v652_v46 = vld [vmem:[%s5966_s27 + $0x900] sm:$0xff]  ;;  %2464 = vmatpush.msra.mxu0 %v396_v45  ;;  %v6108_v45 = vld.sshfl [vmem:[#allocation1 + $0x10] sm:$0xff pattern:$0x73625140] }
  0x65   : > { %v524_v47 = vld [vmem:[%s5966_s27 + $0x500] sm:$0xff]  ;;  %2504 = vmatpush.msra.mxu2 %v652_v46  ;;  %v6110_v46 = vld.sshfl [vmem:[#allocation1] sm:$0xff pattern:$0x73625140] }
  0x66   : > { %v780_v48 = vld [vmem:[%s5966_s27 + $0xd00] sm:$0xff]  ;;  %2484 = vmatpush.msra.mxu1 %v524_v47 }
  0x67   : > { %v388_v49 = vld [vmem:[%s5966_s27 + $0xc0] sm:$0xff]  ;;  %2524 = vmatpush.msra.mxu3 %v780_v48  ;;  %v6114_v48 = vld.sshfl [vmem:[#allocation1 + $0x8] sm:$0xff pattern:$0x73625140] }
  0x68   : > { %v644_v50 = vld [vmem:[%s5966_s27 + $0x8c0] sm:$0xff]  ;;  %2465 = vmatpush.msra.mxu0 %v388_v49  ;;  %8552 = vst [vmem:[#allocation9_spill] sm:$0xff] %v6114_v48 }
  0x69   : > { %v516_v51 = vld [vmem:[%s5966_s27 + $0x4c0] sm:$0xff]  ;;  %2505 = vmatpush.msra.mxu2 %v644_v50 }
  0x6a   : > { %v772_v52 = vld [vmem:[%s5966_s27 + $0xcc0] sm:$0xff]  ;;  %2485 = vmatpush.msra.mxu1 %v516_v51 }
  0x6b   : > { %v380_v53 = vld [vmem:[%s5966_s27 + $0x80] sm:$0xff]  ;;  %2525 = vmatpush.msra.mxu3 %v772_v52 }
  0x6c   : > { %v636_v54 = vld [vmem:[%s5966_s27 + $0x880] sm:$0xff]  ;;  %2466 = vmatpush.msra.mxu0 %v380_v53 }
  0x6d   : > { %v508_v55 = vld [vmem:[%s5966_s27 + $0x480] sm:$0xff]  ;;  %2506 = vmatpush.msra.mxu2 %v636_v54 }
  0x6e   : > { %v764_v56 = vld [vmem:[%s5966_s27 + $0xc80] sm:$0xff]  ;;  %2486 = vmatpush.msra.mxu1 %v508_v55 }
  0x6f   : > { %v372_v57 = vld [vmem:[%s5966_s27 + $0x40] sm:$0xff]  ;;  %2526 = vmatpush.msra.mxu3 %v764_v56 }
  0x70   : > { %v628_v58 = vld [vmem:[%s5966_s27 + $0x840] sm:$0xff]  ;;  %2467 = vmatpush.msra.mxu0 %v372_v57 }
  0x71   : > { %v500_v59 = vld [vmem:[%s5966_s27 + $0x440] sm:$0xff]  ;;  %2507 = vmatpush.msra.mxu2 %v628_v58 }
  0x72   : > { %v756_v60 = vld [vmem:[%s5966_s27 + $0xc40] sm:$0xff]  ;;  %2487 = vmatpush.msra.mxu1 %v500_v59 }
  0x73   : > { %v364_v61 = vld [vmem:[%s5966_s27] sm:$0xff]  ;;  %2527 = vmatpush.msra.mxu3 %v756_v60 }
  0x74   : > { %v620_v62 = vld [vmem:[%s5966_s27 + $0x800] sm:$0xff]  ;;  %2468 = vmatpush.msra.mxu0 %v364_v61  ;;  %v6128_v61 = vld.sshfl [vmem:[#allocation1 + $0x30] sm:$0xff pattern:$0x73625140] }
  0x75   : > { %v996_v63 = vld [vmem:[%s5966_s27 + $0x13c0] sm:$0xff]  ;;  %2508 = vmatpush.msra.mxu2 %v620_v62  ;;  %8553 = vst [vmem:[#allocation10_spill] sm:$0xff] %v6128_v61  ;;  %v6130_v62 = vld.sshfl [vmem:[#allocation1 + $0x20] sm:$0xff pattern:$0x73625140]  ;;  %2469 = vmatmul.f32.vlgmr.msra.gmra.mxu0 %v6110_v46 }
  0x76   : > { %v1252_v0 = vld [vmem:[%s5966_s27 + $0x1bc0] sm:$0xff]  ;;  %2533 = vmatpush.msrb.mxu0 %v996_v63  ;;  %8554 = vst [vmem:[#allocation11_spill] sm:$0xff] %v6130_v62  ;;  %2509 = vmatmul.f32.vlgmr.msra.gmra.mxu2 %v6108_v45 }
  0x77   : > { %v492_v1 = vld [vmem:[%s5966_s27 + $0x400] sm:$0xff]  ;;  %2573 = vmatpush.msrb.mxu2 %v1252_v0  ;;  %v6134_v0 = vld.sshfl [vmem:[#allocation1 + $0x28] sm:$0xff pattern:$0x73625140] }
  0x78   : > { %v748_v2 = vld [vmem:[%s5966_s27 + $0xc00] sm:$0xff]  ;;  %2488 = vmatpush.msra.mxu1 %v492_v1  ;;  %8556 = vst [vmem:[#allocation13_spill] sm:$0xff] %v6134_v0 }
  0x79   : > { %v988_v3 = vld [vmem:[%s5966_s27 + $0x1380] sm:$0xff]  ;;  %2528 = vmatpush.msra.mxu3 %v748_v2  ;;  %2489 = vmatmul.f32.vlgmr.msra.gmra.mxu1 %v6114_v48 }
  0x7a   : > { %v1124_v4 = vld [vmem:[%s5966_s27 + $0x17c0] sm:$0xff]  ;;  %2534 = vmatpush.msrb.mxu0 %v988_v3 }
  0x7b   : > { %v1244_v5 = vld [vmem:[%s5966_s27 + $0x1b80] sm:$0xff]  ;;  %2553 = vmatpush.msrb.mxu1 %v1124_v4 }
  0x7c   : > { %v1380_v6 = vld [vmem:[%s5966_s27 + $0x1fc0] sm:$0xff]  ;;  %2574 = vmatpush.msrb.mxu2 %v1244_v5 }
  0x7d   : > { %v980_v7 = vld [vmem:[%s5966_s27 + $0x1340] sm:$0xff]  ;;  %2593 = vmatpush.msrb.mxu3 %v1380_v6 }
  0x7e   : > { %v1116_v8 = vld [vmem:[%s5966_s27 + $0x1780] sm:$0xff]  ;;  %2535 = vmatpush.msrb.mxu0 %v980_v7 }
  0x7f   : > { %v1236_v9 = vld [vmem:[%s5966_s27 + $0x1b40] sm:$0xff]  ;;  %2554 = vmatpush.msrb.mxu1 %v1116_v8 }
  0x80   : > { %v1372_v10 = vld [vmem:[%s5966_s27 + $0x1f80] sm:$0xff]  ;;  %2575 = vmatpush.msrb.mxu2 %v1236_v9 }
  0x81   : > { %v972_v11 = vld [vmem:[%s5966_s27 + $0x1300] sm:$0xff]  ;;  %2594 = vmatpush.msrb.mxu3 %v1372_v10 }
  0x82   : > { %v1108_v12 = vld [vmem:[%s5966_s27 + $0x1740] sm:$0xff]  ;;  %2536 = vmatpush.msrb.mxu0 %v972_v11 }
  0x83   : > { %v1228_v13 = vld [vmem:[%s5966_s27 + $0x1b00] sm:$0xff]  ;;  %2555 = vmatpush.msrb.mxu1 %v1108_v12 }
  0x84   : > { %v1364_v14 = vld [vmem:[%s5966_s27 + $0x1f40] sm:$0xff]  ;;  %2576 = vmatpush.msrb.mxu2 %v1228_v13 }
  0x85   : > { %v964_v15 = vld [vmem:[%s5966_s27 + $0x12c0] sm:$0xff]  ;;  %2595 = vmatpush.msrb.mxu3 %v1364_v14 }
  0x86   : > { %v1100_v16 = vld [vmem:[%s5966_s27 + $0x1700] sm:$0xff]  ;;  %2537 = vmatpush.msrb.mxu0 %v964_v15 }
  0x87   : > { %v1220_v17 = vld [vmem:[%s5966_s27 + $0x1ac0] sm:$0xff]  ;;  %2556 = vmatpush.msrb.mxu1 %v1100_v16 }
  0x88   : > { %v1356_v18 = vld [vmem:[%s5966_s27 + $0x1f00] sm:$0xff]  ;;  %2577 = vmatpush.msrb.mxu2 %v1220_v17 }
  0x89   : > { %v956_v19 = vld [vmem:[%s5966_s27 + $0x1280] sm:$0xff]  ;;  %2596 = vmatpush.msrb.mxu3 %v1356_v18 }
  0x8a   : > { %v1092_v20 = vld [vmem:[%s5966_s27 + $0x16c0] sm:$0xff]  ;;  %2538 = vmatpush.msrb.mxu0 %v956_v19 }
  0x8b   : > { %v1212_v21 = vld [vmem:[%s5966_s27 + $0x1a80] sm:$0xff]  ;;  %2557 = vmatpush.msrb.mxu1 %v1092_v20 }
  0x8c   : > { %v1348_v22 = vld [vmem:[%s5966_s27 + $0x1ec0] sm:$0xff]  ;;  %2578 = vmatpush.msrb.mxu2 %v1212_v21 }
  0x8d   : > { %v948_v24 = vld [vmem:[%s5966_s27 + $0x1240] sm:$0xff]  ;;  %2597 = vmatpush.msrb.mxu3 %v1348_v22 }
  0x8e   : > { %v1084_v25 = vld [vmem:[%s5966_s27 + $0x1680] sm:$0xff]  ;;  %2539 = vmatpush.msrb.mxu0 %v948_v24 }
  0x8f   : > { %v1204_v26 = vld [vmem:[%s5966_s27 + $0x1a40] sm:$0xff]  ;;  %2558 = vmatpush.msrb.mxu1 %v1084_v25 }
  0x90   : > { %v1340_v27 = vld [vmem:[%s5966_s27 + $0x1e80] sm:$0xff]  ;;  %2579 = vmatpush.msrb.mxu2 %v1204_v26 }
  0x91   : > { %v940_v28 = vld [vmem:[%s5966_s27 + $0x1200] sm:$0xff]  ;;  %2598 = vmatpush.msrb.mxu3 %v1340_v27 }
  0x92   : > { %v1076_v29 = vld [vmem:[%s5966_s27 + $0x1640] sm:$0xff]  ;;  %2540 = vmatpush.msrb.mxu0 %v940_v28 }
  0x93   : > { %v1196_v30 = vld [vmem:[%s5966_s27 + $0x1a00] sm:$0xff]  ;;  %2559 = vmatpush.msrb.mxu1 %v1076_v29 }
  0x94   : > { %v1332_v31 = vld [vmem:[%s5966_s27 + $0x1e40] sm:$0xff]  ;;  %2580 = vmatpush.msrb.mxu2 %v1196_v30 }
  0x95   : > { %v932_v32 = vld [vmem:[%s5966_s27 + $0x11c0] sm:$0xff]  ;;  %2599 = vmatpush.msrb.mxu3 %v1332_v31 }
  0x96   : > { %v1068_v33 = vld [vmem:[%s5966_s27 + $0x1600] sm:$0xff]  ;;  %2541 = vmatpush.msrb.mxu0 %v932_v32 }
  0x97   : > { %v1188_v34 = vld [vmem:[%s5966_s27 + $0x19c0] sm:$0xff]  ;;  %2560 = vmatpush.msrb.mxu1 %v1068_v33 }
  0x98   : > { %v1324_v35 = vld [vmem:[%s5966_s27 + $0x1e00] sm:$0xff]  ;;  %2581 = vmatpush.msrb.mxu2 %v1188_v34 }
  0x99   : > { %v924_v36 = vld [vmem:[%s5966_s27 + $0x1180] sm:$0xff]  ;;  %2600 = vmatpush.msrb.mxu3 %v1324_v35 }
  0x9a   : > { %v1060_v37 = vld [vmem:[%s5966_s27 + $0x15c0] sm:$0xff]  ;;  %2542 = vmatpush.msrb.mxu0 %v924_v36 }
  0x9b   : > { %v1180_v38 = vld [vmem:[%s5966_s27 + $0x1980] sm:$0xff]  ;;  %2561 = vmatpush.msrb.mxu1 %v1060_v37 }
  0x9c   : > { %v1316_v39 = vld [vmem:[%s5966_s27 + $0x1dc0] sm:$0xff]  ;;  %2582 = vmatpush.msrb.mxu2 %v1180_v38 }
  0x9d   : > { %v916_v41 = vld [vmem:[%s5966_s27 + $0x1140] sm:$0xff]  ;;  %2601 = vmatpush.msrb.mxu3 %v1316_v39 }
  0x9e   : > { %v1052_v42 = vld [vmem:[%s5966_s27 + $0x1580] sm:$0xff]  ;;  %2543 = vmatpush.msrb.mxu0 %v916_v41 }
  0x9f   : > { %v1172_v44 = vld [vmem:[%s5966_s27 + $0x1940] sm:$0xff]  ;;  %2562 = vmatpush.msrb.mxu1 %v1052_v42 }
  0xa0   : > { %v6112_v47 = vld.sshfl [vmem:[#allocation1 + $0x18] sm:$0xff pattern:$0x73625140]  ;;  %2583 = vmatpush.msrb.mxu2 %v1172_v44 }
  0xa1   : > { %v1308_v49 = vld [vmem:[%s5966_s27 + $0x1d80] sm:$0xff]  ;;  %2427 = vst [vmem:[#allocation1] ss:$4 sm:$0xff] %v362_v43  ;;  %2529 = vmatmul.f32.vlgmr.msra.gmra.mxu3 %v6112_v47 }
  0xa2   : > { %v908_v50 = vld [vmem:[%s5966_s27 + $0x1100] sm:$0xff]  ;;  %2602 = vmatpush.msrb.mxu3 %v1308_v49 }
  0xa3   : > { %v1044_v51 = vld [vmem:[%s5966_s27 + $0x1540] sm:$0xff]  ;;  %2544 = vmatpush.msrb.mxu0 %v908_v50 }
  0xa4   : > { %v1164_v52 = vld [vmem:[%s5966_s27 + $0x1900] sm:$0xff]  ;;  %2563 = vmatpush.msrb.mxu1 %v1044_v51 }
  0xa5   : > { %v1300_v53 = vld [vmem:[%s5966_s27 + $0x1d40] sm:$0xff]  ;;  %2584 = vmatpush.msrb.mxu2 %v1164_v52 }
  0xa6   : > { %v900_v54 = vld [vmem:[%s5966_s27 + $0x10c0] sm:$0xff]  ;;  %2603 = vmatpush.msrb.mxu3 %v1300_v53 }
  0xa7   : > { %v1036_v55 = vld [vmem:[%s5966_s27 + $0x1500] sm:$0xff]  ;;  %2545 = vmatpush.msrb.mxu0 %v900_v54 }
  0xa8   : > { %v1156_v56 = vld [vmem:[%s5966_s27 + $0x18c0] sm:$0xff]  ;;  %2564 = vmatpush.msrb.mxu1 %v1036_v55 }
  0xa9   : > { %v1292_v57 = vld [vmem:[%s5966_s27 + $0x1d00] sm:$0xff]  ;;  %2585 = vmatpush.msrb.mxu2 %v1156_v56 }
  0xaa   : > { %v892_v58 = vld [vmem:[%s5966_s27 + $0x1080] sm:$0xff]  ;;  %2604 = vmatpush.msrb.mxu3 %v1292_v57 }
  0xab   : > { %v1028_v59 = vld [vmem:[%s5966_s27 + $0x14c0] sm:$0xff]  ;;  %2546 = vmatpush.msrb.mxu0 %v892_v58 }
  0xac   : > { %v363_v60 = vld [vmem:[%s5988_s11 + $0x18] sm:$0xff]  ;;  %2565 = vmatpush.msrb.mxu1 %v1028_v59 }
  0xad   : > { %v6132_v63 = vld.sshfl [vmem:[#allocation1 + $0x38] sm:$0xff pattern:$0x73625140] }
  0xae   : > { %8555 = vst [vmem:[#allocation12_spill] sm:$0xff] %v6132_v63  ;;  %v1148_v1 = vld [vmem:[%s5966_s27 + $0x1880] sm:$0xff] }
  0xaf   : > { %v1284_v2 = vld [vmem:[%s5966_s27 + $0x1cc0] sm:$0xff]  ;;  %2428 = vst [vmem:[#allocation1 + $0x20] ss:$4 sm:$0xff] %v363_v60  ;;  %2586 = vmatpush.msrb.mxu2 %v1148_v1 }
  0xb0   : > { %v884_v3 = vld [vmem:[%s5966_s27 + $0x1040] sm:$0xff]  ;;  %2605 = vmatpush.msrb.mxu3 %v1284_v2 }
  0xb1   : > { %v1020_v4 = vld [vmem:[%s5966_s27 + $0x1480] sm:$0xff]  ;;  %2547 = vmatpush.msrb.mxu0 %v884_v3 }
  0xb2   : > { %v1140_v5 = vld [vmem:[%s5966_s27 + $0x1840] sm:$0xff]  ;;  %2566 = vmatpush.msrb.mxu1 %v1020_v4 }
  0xb3   : > { %v1276_v6 = vld [vmem:[%s5966_s27 + $0x1c80] sm:$0xff]  ;;  %2587 = vmatpush.msrb.mxu2 %v1140_v5 }
  0xb4   : > { %v876_v7 = vld [vmem:[%s5966_s27 + $0x1000] sm:$0xff]  ;;  %2606 = vmatpush.msrb.mxu3 %v1276_v6 }
  0xb5   : > { %v1012_v8 = vld [vmem:[%s5966_s27 + $0x1440] sm:$0xff]  ;;  %2548 = vmatpush.msrb.mxu0 %v876_v7 }
  0xb6   : > { %v1132_v9 = vld [vmem:[%s5966_s27 + $0x1800] sm:$0xff]  ;;  %2567 = vmatpush.msrb.mxu1 %v1012_v8  ;;  %2549 = vmatmul.f32.vlgmr.msrb.gmra.mxu0 %v6130_v62 }
  0xb7   : > { %v1268_v10 = vld [vmem:[%s5966_s27 + $0x1c40] sm:$0xff]  ;;  %2588 = vmatpush.msrb.mxu2 %v1132_v9 }
  0xb8   : > { %v1508_v11 = vld [vmem:[%s5966_s27 + $0x23c0] sm:$0xff]  ;;  %2607 = vmatpush.msrb.mxu3 %v1268_v10  ;;  %2589 = vmatmul.f32.vlgmr.msrb.gmra.mxu2 %v6128_v61 }
  0xb9   : > { %v1764_v12 = vld [vmem:[%s5966_s27 + $0x2bc0] sm:$0xff]  ;;  %2613 = vmatpush.msra.mxu0 %v1508_v11 }
  0xba   : > { %v1004_v13 = vld [vmem:[%s5966_s27 + $0x1400] sm:$0xff]  ;;  %2653 = vmatpush.msra.mxu2 %v1764_v12 }
  0xbb   : > { %v1260_v14 = vld [vmem:[%s5966_s27 + $0x1c00] sm:$0xff]  ;;  %2568 = vmatpush.msrb.mxu1 %v1004_v13 }
  0xbc   : > { %v1500_v15 = vld [vmem:[%s5966_s27 + $0x2380] sm:$0xff]  ;;  %2608 = vmatpush.msrb.mxu3 %v1260_v14  ;;  %2569 = vmatmul.f32.vlgmr.msrb.gmra.mxu1 %v6134_v0 }
  0xbd   : > { %v1636_v16 = vld [vmem:[%s5966_s27 + $0x27c0] sm:$0xff]  ;;  %2614 = vmatpush.msra.mxu0 %v1500_v15  ;;  %2609 = vmatmul.f32.vlgmr.msrb.gmra.mxu3 %v6132_v63 }
  0xbe   : > { %v1756_v17 = vld [vmem:[%s5966_s27 + $0x2b80] sm:$0xff]  ;;  %2633 = vmatpush.msra.mxu1 %v1636_v16 }
  0xbf   : > { %v1892_v18 = vld [vmem:[%s5966_s27 + $0x2fc0] sm:$0xff]  ;;  %2654 = vmatpush.msra.mxu2 %v1756_v17 }
  0xc0   : > { %v1492_v19 = vld [vmem:[%s5966_s27 + $0x2340] sm:$0xff]  ;;  %2673 = vmatpush.msra.mxu3 %v1892_v18 }
  0xc1   : > { %v1628_v20 = vld [vmem:[%s5966_s27 + $0x2780] sm:$0xff]  ;;  %2615 = vmatpush.msra.mxu0 %v1492_v19  ;;  %v2429_v19 = vld.sshfl [vmem:[#allocation1] sm:$0xff pattern:$0x73625140] }
  0xc2   : > { %v1748_v21 = vld [vmem:[%s5966_s27 + $0x2b40] sm:$0xff]  ;;  %2634 = vmatpush.msra.mxu1 %v1628_v20  ;;  %v2431_v20 = vld.sshfl [vmem:[#allocation1 + $0x10] sm:$0xff pattern:$0x73625140] }
  0xc3   : > { %v1884_v22 = vld [vmem:[%s5966_s27 + $0x2f80] sm:$0xff]  ;;  %2655 = vmatpush.msra.mxu2 %v1748_v21 }
  0xc4   : > { %v1484_v23 = vld [vmem:[%s5966_s27 + $0x2300] sm:$0xff]  ;;  %2674 = vmatpush.msra.mxu3 %v1884_v22 }
  0xc5   : > { %v1620_v24 = vld [vmem:[%s5966_s27 + $0x2740] sm:$0xff]  ;;  %2616 = vmatpush.msra.mxu0 %v1484_v23 }
  0xc6   : > { %v1740_v25 = vld [vmem:[%s5966_s27 + $0x2b00] sm:$0xff]  ;;  %2635 = vmatpush.msra.mxu1 %v1620_v24 }
  0xc7   : > { %v1876_v26 = vld [vmem:[%s5966_s27 + $0x2f40] sm:$0xff]  ;;  %2656 = vmatpush.msra.mxu2 %v1740_v25  ;;  %v2430_v25 = vld.sshfl [vmem:[#allocation1 + $0x8] sm:$0xff pattern:$0x73625140] }
  0xc8   : > { %v1476_v27 = vld [vmem:[%s5966_s27 + $0x22c0] sm:$0xff]  ;;  %2675 = vmatpush.msra.mxu3 %v1876_v26 }
  0xc9   : > { %v1612_v28 = vld [vmem:[%s5966_s27 + $0x2700] sm:$0xff]  ;;  %2617 = vmatpush.msra.mxu0 %v1476_v27 }
  0xca   : > { %v1732_v29 = vld [vmem:[%s5966_s27 + $0x2ac0] sm:$0xff]  ;;  %2636 = vmatpush.msra.mxu1 %v1612_v28 }
  0xcb   : > { %v1868_v30 = vld [vmem:[%s5966_s27 + $0x2f00] sm:$0xff]  ;;  %2657 = vmatpush.msra.mxu2 %v1732_v29 }
  0xcc   : > { %v1468_v31 = vld [vmem:[%s5966_s27 + $0x2280] sm:$0xff]  ;;  %2676 = vmatpush.msra.mxu3 %v1868_v30 }
  0xcd   : > { %v1604_v32 = vld [vmem:[%s5966_s27 + $0x26c0] sm:$0xff]  ;;  %2618 = vmatpush.msra.mxu0 %v1468_v31 }
  0xce   : > { %v1724_v33 = vld [vmem:[%s5966_s27 + $0x2a80] sm:$0xff]  ;;  %2637 = vmatpush.msra.mxu1 %v1604_v32 }
  0xcf   : > { %v1860_v34 = vld [vmem:[%s5966_s27 + $0x2ec0] sm:$0xff]  ;;  %2658 = vmatpush.msra.mxu2 %v1724_v33 }
  0xd0   : > { %v1460_v35 = vld [vmem:[%s5966_s27 + $0x2240] sm:$0xff]  ;;  %2677 = vmatpush.msra.mxu3 %v1860_v34 }
  0xd1   : > { %v1596_v36 = vld [vmem:[%s5966_s27 + $0x2680] sm:$0xff]  ;;  %2619 = vmatpush.msra.mxu0 %v1460_v35 }
  0xd2   : > { %v1716_v37 = vld [vmem:[%s5966_s27 + $0x2a40] sm:$0xff]  ;;  %2638 = vmatpush.msra.mxu1 %v1596_v36 }
  0xd3   : > { %v1852_v38 = vld [vmem:[%s5966_s27 + $0x2e80] sm:$0xff]  ;;  %2659 = vmatpush.msra.mxu2 %v1716_v37 }
  0xd4   : > { %v1452_v39 = vld [vmem:[%s5966_s27 + $0x2200] sm:$0xff]  ;;  %2678 = vmatpush.msra.mxu3 %v1852_v38 }
  0xd5   : > { %v1588_v40 = vld [vmem:[%s5966_s27 + $0x2640] sm:$0xff]  ;;  %2620 = vmatpush.msra.mxu0 %v1452_v39 }
  0xd6   : > { %v1708_v41 = vld [vmem:[%s5966_s27 + $0x2a00] sm:$0xff]  ;;  %2639 = vmatpush.msra.mxu1 %v1588_v40 }
  0xd7   : > { %v1844_v42 = vld [vmem:[%s5966_s27 + $0x2e40] sm:$0xff]  ;;  %2660 = vmatpush.msra.mxu2 %v1708_v41 }
  0xd8   : > { %v1444_v43 = vld [vmem:[%s5966_s27 + $0x21c0] sm:$0xff]  ;;  %2679 = vmatpush.msra.mxu3 %v1844_v42 }
  0xd9   : > { %v1580_v44 = vld [vmem:[%s5966_s27 + $0x2600] sm:$0xff]  ;;  %2621 = vmatpush.msra.mxu0 %v1444_v43 }
  0xda   : > { %v1700_v49 = vld [vmem:[%s5966_s27 + $0x29c0] sm:$0xff]  ;;  %2640 = vmatpush.msra.mxu1 %v1580_v44 }
  0xdb   : > { %v1836_v50 = vld [vmem:[%s5966_s27 + $0x2e00] sm:$0xff]  ;;  %2661 = vmatpush.msra.mxu2 %v1700_v49 }
  0xdc   : > { %v1436_v51 = vld [vmem:[%s5966_s27 + $0x2180] sm:$0xff]  ;;  %2680 = vmatpush.msra.mxu3 %v1836_v50 }
  0xdd   : > { %v1572_v52 = vld [vmem:[%s5966_s27 + $0x25c0] sm:$0xff]  ;;  %2622 = vmatpush.msra.mxu0 %v1436_v51 }
  0xde   : > { %v1692_v53 = vld [vmem:[%s5966_s27 + $0x2980] sm:$0xff]  ;;  %2641 = vmatpush.msra.mxu1 %v1572_v52 }
  0xdf   : > { %v1828_v54 = vld [vmem:[%s5966_s27 + $0x2dc0] sm:$0xff]  ;;  %2662 = vmatpush.msra.mxu2 %v1692_v53 }
  0xe0   : > { %v1428_v55 = vld [vmem:[%s5966_s27 + $0x2140] sm:$0xff]  ;;  %2681 = vmatpush.msra.mxu3 %v1828_v54 }
  0xe1   : > { %v1564_v56 = vld [vmem:[%s5966_s27 + $0x2580] sm:$0xff]  ;;  %2623 = vmatpush.msra.mxu0 %v1428_v55 }
  0xe2   : > { %v1684_v57 = vld [vmem:[%s5966_s27 + $0x2940] sm:$0xff]  ;;  %2642 = vmatpush.msra.mxu1 %v1564_v56 }
  0xe3   : > { %v1820_v58 = vld [vmem:[%s5966_s27 + $0x2d80] sm:$0xff]  ;;  %2663 = vmatpush.msra.mxu2 %v1684_v57 }
  0xe4   : > { %v1420_v59 = vld [vmem:[%s5966_s27 + $0x2100] sm:$0xff]  ;;  %2682 = vmatpush.msra.mxu3 %v1820_v58 }
  0xe5   : > { %v1556_v60 = vld [vmem:[%s5966_s27 + $0x2540] sm:$0xff]  ;;  %2624 = vmatpush.msra.mxu0 %v1420_v59 }
  0xe6   : > { %v1676_v1 = vld [vmem:[%s5966_s27 + $0x2900] sm:$0xff]  ;;  %2643 = vmatpush.msra.mxu1 %v1556_v60 }
  0xe7   : > { %v1812_v2 = vld [vmem:[%s5966_s27 + $0x2d40] sm:$0xff]  ;;  %2664 = vmatpush.msra.mxu2 %v1676_v1 }
  0xe8   : > { %v1412_v3 = vld [vmem:[%s5966_s27 + $0x20c0] sm:$0xff]  ;;  %2683 = vmatpush.msra.mxu3 %v1812_v2 }
  0xe9   : > { %v1548_v4 = vld [vmem:[%s5966_s27 + $0x2500] sm:$0xff]  ;;  %2625 = vmatpush.msra.mxu0 %v1412_v3 }
  0xea   : > { %v1668_v5 = vld [vmem:[%s5966_s27 + $0x28c0] sm:$0xff]  ;;  %2644 = vmatpush.msra.mxu1 %v1548_v4 }
  0xeb   : > { %v1804_v6 = vld [vmem:[%s5966_s27 + $0x2d00] sm:$0xff]  ;;  %2665 = vmatpush.msra.mxu2 %v1668_v5 }
  0xec   : > { %v1404_v7 = vld [vmem:[%s5966_s27 + $0x2080] sm:$0xff]  ;;  %2684 = vmatpush.msra.mxu3 %v1804_v6 }
  0xed   : > { %v1540_v8 = vld [vmem:[%s5966_s27 + $0x24c0] sm:$0xff]  ;;  %2626 = vmatpush.msra.mxu0 %v1404_v7 }
  0xee   : > { %v1660_v9 = vld [vmem:[%s5966_s27 + $0x2880] sm:$0xff]  ;;  %2645 = vmatpush.msra.mxu1 %v1540_v8 }
  0xef   : > { %v1796_v10 = vld [vmem:[%s5966_s27 + $0x2cc0] sm:$0xff]  ;;  %2666 = vmatpush.msra.mxu2 %v1660_v9 }
  0xf0   : > { %v1396_v11 = vld [vmem:[%s5966_s27 + $0x2040] sm:$0xff]  ;;  %2685 = vmatpush.msra.mxu3 %v1796_v10 }
  0xf1   : > { %v1532_v12 = vld [vmem:[%s5966_s27 + $0x2480] sm:$0xff]  ;;  %2627 = vmatpush.msra.mxu0 %v1396_v11 }
  0xf2   : > { %v1652_v13 = vld [vmem:[%s5966_s27 + $0x2840] sm:$0xff]  ;;  %2646 = vmatpush.msra.mxu1 %v1532_v12 }
  0xf3   : > { %v1788_v14 = vld [vmem:[%s5966_s27 + $0x2c80] sm:$0xff]  ;;  %2667 = vmatpush.msra.mxu2 %v1652_v13 }
  0xf4   : > { %v1388_v15 = vld [vmem:[%s5966_s27 + $0x2000] sm:$0xff]  ;;  %2686 = vmatpush.msra.mxu3 %v1788_v14 }
  0xf5   : > { %v1524_v16 = vld [vmem:[%s5966_s27 + $0x2440] sm:$0xff]  ;;  %2628 = vmatpush.msra.mxu0 %v1388_v15 }
  0xf6   : > { %v1644_v17 = vld [vmem:[%s5966_s27 + $0x2800] sm:$0xff]  ;;  %2647 = vmatpush.msra.mxu1 %v1524_v16  ;;  %2629 = vmatmul.f32.vlgmr.msra.gmra.mxu0 %v2429_v19 }
  0xf7   : > { %v1780_v18 = vld [vmem:[%s5966_s27 + $0x2c40] sm:$0xff]  ;;  %2668 = vmatpush.msra.mxu2 %v1644_v17 }
  0xf8   : > { %v2020_v21 = vld [vmem:[%s5966_s27 + $0x33c0] sm:$0xff]  ;;  %2687 = vmatpush.msra.mxu3 %v1780_v18  ;;  %2669 = vmatmul.f32.vlgmr.msra.gmra.mxu2 %v2431_v20 }
  0xf9   : > { %v2276_v22 = vld [vmem:[%s5966_s27 + $0x3bc0] sm:$0xff]  ;;  %2693 = vmatpush.msrb.mxu0 %v2020_v21 }
  0xfa   : > { %v1516_v23 = vld [vmem:[%s5966_s27 + $0x2400] sm:$0xff]  ;;  %2733 = vmatpush.msrb.mxu2 %v2276_v22 }
  0xfb   : > { %v1772_v24 = vld [vmem:[%s5966_s27 + $0x2c00] sm:$0xff]  ;;  %2648 = vmatpush.msra.mxu1 %v1516_v23 }
  0xfc   : > { %v2432_v26 = vld.sshfl [vmem:[#allocation1 + $0x18] sm:$0xff pattern:$0x73625140]  ;;  %2688 = vmatpush.msra.mxu3 %v1772_v24  ;;  %2649 = vmatmul.f32.vlgmr.msra.gmra.mxu1 %v2430_v25 }
  0xfd   : > { %v2012_v27 = vld [vmem:[%s5966_s27 + $0x3380] sm:$0xff]  ;;  %2689 = vmatmul.f32.vlgmr.msra.gmra.mxu3 %v2432_v26 }
  0xfe   : > { %v2148_v28 = vld [vmem:[%s5966_s27 + $0x37c0] sm:$0xff]  ;;  %2694 = vmatpush.msrb.mxu0 %v2012_v27 }
  0xff   : > { %v2268_v29 = vld [vmem:[%s5966_s27 + $0x3b80] sm:$0xff]  ;;  %2713 = vmatpush.msrb.mxu1 %v2148_v28 }
 0x100   : > { %v2404_v30 = vld [vmem:[%s5966_s27 + $0x3fc0] sm:$0xff]  ;;  %2734 = vmatpush.msrb.mxu2 %v2268_v29 }
 0x101   : > { %v2004_v31 = vld [vmem:[%s5966_s27 + $0x3340] sm:$0xff]  ;;  %2753 = vmatpush.msrb.mxu3 %v2404_v30 }
 0x102   : > { %v2140_v32 = vld [vmem:[%s5966_s27 + $0x3780] sm:$0xff]  ;;  %2695 = vmatpush.msrb.mxu0 %v2004_v31  ;;  %v2433_v31 = vld.sshfl [vmem:[#allocation1 + $0x20] sm:$0xff pattern:$0x73625140] }
 0x103   : > { %v2260_v33 = vld [vmem:[%s5966_s27 + $0x3b40] sm:$0xff]  ;;  %2714 = vmatpush.msrb.mxu1 %v2140_v32  ;;  %v2435_v32 = vld.sshfl [vmem:[#allocation1 + $0x30] sm:$0xff pattern:$0x73625140] }
 0x104   : > { %v2396_v34 = vld [vmem:[%s5966_s27 + $0x3f80] sm:$0xff]  ;;  %2735 = vmatpush.msrb.mxu2 %v2260_v33  ;;  %v485_v33 = vld [vmem:[%s5966_s27 + $0x3c8] sm:$0xff] }
 0x105   : > { %v1996_v35 = vld [vmem:[%s5966_s27 + $0x3300] sm:$0xff]  ;;  %2754 = vmatpush.msrb.mxu3 %v2396_v34  ;;  %v741_v34 = vld [vmem:[%s5966_s27 + $0xbc8] sm:$0xff] }
 0x106   : > { %v2132_v36 = vld [vmem:[%s5966_s27 + $0x3740] sm:$0xff]  ;;  %2696 = vmatpush.msrb.mxu0 %v1996_v35 }
 0x107   : > { %v2252_v37 = vld [vmem:[%s5966_s27 + $0x3b00] sm:$0xff]  ;;  %2715 = vmatpush.msrb.mxu1 %v2132_v36 }
 0x108   : > { %v2388_v38 = vld [vmem:[%s5966_s27 + $0x3f40] sm:$0xff]  ;;  %2736 = vmatpush.msrb.mxu2 %v2252_v37  ;;  %v2434_v37 = vld.sshfl [vmem:[#allocation1 + $0x28] sm:$0xff pattern:$0x73625140] }
 0x109   : > { %v1988_v39 = vld [vmem:[%s5966_s27 + $0x32c0] sm:$0xff]  ;;  %2755 = vmatpush.msrb.mxu3 %v2388_v38 }
 0x10a   : > { %v2124_v40 = vld [vmem:[%s5966_s27 + $0x3700] sm:$0xff]  ;;  %2697 = vmatpush.msrb.mxu0 %v1988_v39  ;;  %v477_v39 = vld [vmem:[%s5966_s27 + $0x388] sm:$0xff] }
 0x10b   : > { %v2244_v41 = vld [vmem:[%s5966_s27 + $0x3ac0] sm:$0xff]  ;;  %2716 = vmatpush.msrb.mxu1 %v2124_v40  ;;  %v613_v40 = vld [vmem:[%s5966_s27 + $0x7c8] sm:$0xff] }
 0x10c   : > { %v2380_v42 = vld [vmem:[%s5966_s27 + $0x3f00] sm:$0xff]  ;;  %2737 = vmatpush.msrb.mxu2 %v2244_v41  ;;  %v733_v41 = vld [vmem:[%s5966_s27 + $0xb88] sm:$0xff] }
 0x10d   : > { %v1980_v43 = vld [vmem:[%s5966_s27 + $0x3280] sm:$0xff]  ;;  %2756 = vmatpush.msrb.mxu3 %v2380_v42  ;;  %v869_v42 = vld [vmem:[%s5966_s27 + $0xfc8] sm:$0xff] }
 0x10e   : > { %v2116_v44 = vld [vmem:[%s5966_s27 + $0x36c0] sm:$0xff]  ;;  %2698 = vmatpush.msrb.mxu0 %v1980_v43  ;;  %v469_v43 = vld [vmem:[%s5966_s27 + $0x348] sm:$0xff] }
 0x10f   : > { %v2236_v49 = vld [vmem:[%s5966_s27 + $0x3a80] sm:$0xff]  ;;  %2717 = vmatpush.msrb.mxu1 %v2116_v44  ;;  %v605_v44 = vld [vmem:[%s5966_s27 + $0x788] sm:$0xff] }
 0x110   : > { %v2372_v50 = vld [vmem:[%s5966_s27 + $0x3ec0] sm:$0xff]  ;;  %2738 = vmatpush.msrb.mxu2 %v2236_v49  ;;  %v725_v49 = vld [vmem:[%s5966_s27 + $0xb48] sm:$0xff] }
 0x111   : > { %v1972_v51 = vld [vmem:[%s5966_s27 + $0x3240] sm:$0xff]  ;;  %2757 = vmatpush.msrb.mxu3 %v2372_v50  ;;  %v861_v50 = vld [vmem:[%s5966_s27 + $0xf88] sm:$0xff] }
 0x112   : > { %v2108_v52 = vld [vmem:[%s5966_s27 + $0x3680] sm:$0xff]  ;;  %2699 = vmatpush.msrb.mxu0 %v1972_v51  ;;  %v461_v51 = vld [vmem:[%s5966_s27 + $0x308] sm:$0xff] }
 0x113   : > { %v2228_v53 = vld [vmem:[%s5966_s27 + $0x3a40] sm:$0xff]  ;;  %2718 = vmatpush.msrb.mxu1 %v2108_v52  ;;  %v597_v52 = vld [vmem:[%s5966_s27 + $0x748] sm:$0xff] }
 0x114   : > { %v2364_v54 = vld [vmem:[%s5966_s27 + $0x3e80] sm:$0xff]  ;;  %2739 = vmatpush.msrb.mxu2 %v2228_v53  ;;  %v717_v53 = vld [vmem:[%s5966_s27 + $0xb08] sm:$0xff] }
 0x115   : > { %v1964_v55 = vld [vmem:[%s5966_s27 + $0x3200] sm:$0xff]  ;;  %2758 = vmatpush.msrb.mxu3 %v2364_v54  ;;  %v853_v54 = vld [vmem:[%s5966_s27 + $0xf48] sm:$0xff] }
 0x116   : > { %v2100_v56 = vld [vmem:[%s5966_s27 + $0x3640] sm:$0xff]  ;;  %2700 = vmatpush.msrb.mxu0 %v1964_v55  ;;  %v453_v55 = vld [vmem:[%s5966_s27 + $0x2c8] sm:$0xff] }
 0x117   : > { %v2220_v57 = vld [vmem:[%s5966_s27 + $0x3a00] sm:$0xff]  ;;  %2719 = vmatpush.msrb.mxu1 %v2100_v56  ;;  %v589_v56 = vld [vmem:[%s5966_s27 + $0x708] sm:$0xff] }
 0x118   : > { %v2356_v58 = vld [vmem:[%s5966_s27 + $0x3e40] sm:$0xff]  ;;  %2740 = vmatpush.msrb.mxu2 %v2220_v57  ;;  %v709_v57 = vld [vmem:[%s5966_s27 + $0xac8] sm:$0xff] }
 0x119   : > { %v1956_v59 = vld [vmem:[%s5966_s27 + $0x31c0] sm:$0xff]  ;;  %2759 = vmatpush.msrb.mxu3 %v2356_v58  ;;  %v845_v58 = vld [vmem:[%s5966_s27 + $0xf08] sm:$0xff] }
 0x11a   : > { %v2092_v60 = vld [vmem:[%s5966_s27 + $0x3600] sm:$0xff]  ;;  %2701 = vmatpush.msrb.mxu0 %v1956_v59  ;;  %v445_v59 = vld [vmem:[%s5966_s27 + $0x288] sm:$0xff] }
 0x11b   : > { %v2212_v1 = vld [vmem:[%s5966_s27 + $0x39c0] sm:$0xff]  ;;  %2720 = vmatpush.msrb.mxu1 %v2092_v60  ;;  %v581_v60 = vld [vmem:[%s5966_s27 + $0x6c8] sm:$0xff] }
 0x11c   : > { %v2348_v2 = vld [vmem:[%s5966_s27 + $0x3e00] sm:$0xff]  ;;  %2741 = vmatpush.msrb.mxu2 %v2212_v1  ;;  %v701_v1 = vld [vmem:[%s5966_s27 + $0xa88] sm:$0xff] }
 0x11d   : > { %v1948_v3 = vld [vmem:[%s5966_s27 + $0x3180] sm:$0xff]  ;;  %2760 = vmatpush.msrb.mxu3 %v2348_v2  ;;  %v837_v2 = vld [vmem:[%s5966_s27 + $0xec8] sm:$0xff] }
 0x11e   : > { %v2084_v4 = vld [vmem:[%s5966_s27 + $0x35c0] sm:$0xff]  ;;  %2702 = vmatpush.msrb.mxu0 %v1948_v3  ;;  %v437_v3 = vld [vmem:[%s5966_s27 + $0x248] sm:$0xff] }
 0x11f   : > { %v2204_v5 = vld [vmem:[%s5966_s27 + $0x3980] sm:$0xff]  ;;  %2721 = vmatpush.msrb.mxu1 %v2084_v4  ;;  %v573_v4 = vld [vmem:[%s5966_s27 + $0x688] sm:$0xff] }
 0x120   : > { %v2340_v6 = vld [vmem:[%s5966_s27 + $0x3dc0] sm:$0xff]  ;;  %2742 = vmatpush.msrb.mxu2 %v2204_v5  ;;  %v693_v5 = vld [vmem:[%s5966_s27 + $0xa48] sm:$0xff] }
 0x121   : > { %v1940_v7 = vld [vmem:[%s5966_s27 + $0x3140] sm:$0xff]  ;;  %2761 = vmatpush.msrb.mxu3 %v2340_v6  ;;  %v829_v6 = vld [vmem:[%s5966_s27 + $0xe88] sm:$0xff] }
 0x122   : > { %v2076_v8 = vld [vmem:[%s5966_s27 + $0x3580] sm:$0xff]  ;;  %2703 = vmatpush.msrb.mxu0 %v1940_v7  ;;  %v429_v7 = vld [vmem:[%s5966_s27 + $0x208] sm:$0xff] }
 0x123   : > { %v2196_v9 = vld [vmem:[%s5966_s27 + $0x3940] sm:$0xff]  ;;  %2722 = vmatpush.msrb.mxu1 %v2076_v8  ;;  %v565_v8 = vld [vmem:[%s5966_s27 + $0x648] sm:$0xff] }
 0x124   : > { %v2332_v10 = vld [vmem:[%s5966_s27 + $0x3d80] sm:$0xff]  ;;  %2743 = vmatpush.msrb.mxu2 %v2196_v9  ;;  %v685_v9 = vld [vmem:[%s5966_s27 + $0xa08] sm:$0xff] }
 0x125   : > { %v1932_v11 = vld [vmem:[%s5966_s27 + $0x3100] sm:$0xff]  ;;  %2762 = vmatpush.msrb.mxu3 %v2332_v10  ;;  %v821_v10 = vld [vmem:[%s5966_s27 + $0xe48] sm:$0xff] }
 0x126   : > { %v2068_v12 = vld [vmem:[%s5966_s27 + $0x3540] sm:$0xff]  ;;  %2704 = vmatpush.msrb.mxu0 %v1932_v11  ;;  %v421_v11 = vld [vmem:[%s5966_s27 + $0x1c8] sm:$0xff] }
 0x127   : > { %v2188_v13 = vld [vmem:[%s5966_s27 + $0x3900] sm:$0xff]  ;;  %2723 = vmatpush.msrb.mxu1 %v2068_v12  ;;  %v557_v12 = vld [vmem:[%s5966_s27 + $0x608] sm:$0xff] }
 0x128   : > { %v2324_v14 = vld [vmem:[%s5966_s27 + $0x3d40] sm:$0xff]  ;;  %2744 = vmatpush.msrb.mxu2 %v2188_v13  ;;  %v677_v13 = vld [vmem:[%s5966_s27 + $0x9c8] sm:$0xff] }
 0x129   : > { %v1924_v15 = vld [vmem:[%s5966_s27 + $0x30c0] sm:$0xff]  ;;  %2763 = vmatpush.msrb.mxu3 %v2324_v14  ;;  %v813_v14 = vld [vmem:[%s5966_s27 + $0xe08] sm:$0xff] }
 0x12a   : > { %v2060_v16 = vld [vmem:[%s5966_s27 + $0x3500] sm:$0xff]  ;;  %2705 = vmatpush.msrb.mxu0 %v1924_v15  ;;  %v413_v15 = vld [vmem:[%s5966_s27 + $0x188] sm:$0xff] }
 0x12b   : > { %v2180_v17 = vld [vmem:[%s5966_s27 + $0x38c0] sm:$0xff]  ;;  %2724 = vmatpush.msrb.mxu1 %v2060_v16  ;;  %v549_v16 = vld [vmem:[%s5966_s27 + $0x5c8] sm:$0xff] }
 0x12c   : > { %v2316_v18 = vld [vmem:[%s5966_s27 + $0x3d00] sm:$0xff]  ;;  %2745 = vmatpush.msrb.mxu2 %v2180_v17  ;;  %v669_v17 = vld [vmem:[%s5966_s27 + $0x988] sm:$0xff] }
 0x12d   : > { %v1916_v19 = vld [vmem:[%s5966_s27 + $0x3080] sm:$0xff]  ;;  %2764 = vmatpush.msrb.mxu3 %v2316_v18  ;;  %v805_v18 = vld [vmem:[%s5966_s27 + $0xdc8] sm:$0xff] }
 0x12e   : > { %v2052_v20 = vld [vmem:[%s5966_s27 + $0x34c0] sm:$0xff]  ;;  %2706 = vmatpush.msrb.mxu0 %v1916_v19  ;;  %v405_v19 = vld [vmem:[%s5966_s27 + $0x148] sm:$0xff] }
 0x12f   : > { %v2172_v21 = vld [vmem:[%s5966_s27 + $0x3880] sm:$0xff]  ;;  %2725 = vmatpush.msrb.mxu1 %v2052_v20  ;;  %v541_v20 = vld [vmem:[%s5966_s27 + $0x588] sm:$0xff] }
 0x130   : > { %v2308_v22 = vld [vmem:[%s5966_s27 + $0x3cc0] sm:$0xff]  ;;  %2746 = vmatpush.msrb.mxu2 %v2172_v21  ;;  %v661_v21 = vld [vmem:[%s5966_s27 + $0x948] sm:$0xff] }
 0x131   : > { %v1908_v23 = vld [vmem:[%s5966_s27 + $0x3040] sm:$0xff]  ;;  %2765 = vmatpush.msrb.mxu3 %v2308_v22  ;;  %v797_v22 = vld [vmem:[%s5966_s27 + $0xd88] sm:$0xff] }
 0x132   : > { %v2044_v24 = vld [vmem:[%s5966_s27 + $0x3480] sm:$0xff]  ;;  %2707 = vmatpush.msrb.mxu0 %v1908_v23  ;;  %v397_v23 = vld [vmem:[%s5966_s27 + $0x108] sm:$0xff] }
 0x133   : > { %v2164_v25 = vld [vmem:[%s5966_s27 + $0x3840] sm:$0xff]  ;;  %2726 = vmatpush.msrb.mxu1 %v2044_v24  ;;  %v533_v24 = vld [vmem:[%s5966_s27 + $0x548] sm:$0xff] }
 0x134   : > { %v2300_v26 = vld [vmem:[%s5966_s27 + $0x3c80] sm:$0xff]  ;;  %2747 = vmatpush.msrb.mxu2 %v2164_v25  ;;  %v653_v25 = vld [vmem:[%s5966_s27 + $0x908] sm:$0xff] }
 0x135   : > { %v1900_v27 = vld [vmem:[%s5966_s27 + $0x3000] sm:$0xff]  ;;  %2766 = vmatpush.msrb.mxu3 %v2300_v26  ;;  %v789_v26 = vld [vmem:[%s5966_s27 + $0xd48] sm:$0xff] }
 0x136   : > { %v2036_v28 = vld [vmem:[%s5966_s27 + $0x3440] sm:$0xff]  ;;  %2708 = vmatpush.msrb.mxu0 %v1900_v27  ;;  %v389_v27 = vld [vmem:[%s5966_s27 + $0xc8] sm:$0xff] }
 0x137   : > { %v2156_v29 = vld [vmem:[%s5966_s27 + $0x3800] sm:$0xff]  ;;  %2727 = vmatpush.msrb.mxu1 %v2036_v28  ;;  %2709 = vmatmul.f32.vlgmr.msrb.gmra.mxu0 %v2433_v31  ;;  %v525_v28 = vld [vmem:[%s5966_s27 + $0x508] sm:$0xff] }
 0x138   : > { %v2292_v30 = vld [vmem:[%s5966_s27 + $0x3c40] sm:$0xff]  ;;  %2748 = vmatpush.msrb.mxu2 %v2156_v29  ;;  %2773 = vmatpush.msra.mxu0 %v485_v33  ;;  %v645_v29 = vld [vmem:[%s5966_s27 + $0x8c8] sm:$0xff] }
 0x139   : > { %2767 = vmatpush.msrb.mxu3 %v2292_v30  ;;  %v2028_v35 = vld [vmem:[%s5966_s27 + $0x3400] sm:$0xff]  ;;  %2749 = vmatmul.f32.vlgmr.msrb.gmra.mxu2 %v2435_v32  ;;  %v781_v30 = vld [vmem:[%s5966_s27 + $0xd08] sm:$0xff] }
 0x13a   : > { %v2284_v36 = vld [vmem:[%s5966_s27 + $0x3c00] sm:$0xff]  ;;  %2813 = vmatpush.msra.mxu2 %v741_v34  ;;  %2728 = vmatpush.msrb.mxu1 %v2028_v35  ;;  %v381_v31 = vld [vmem:[%s5966_s27 + $0x88] sm:$0xff] }
 0x13b   : > { %v2436_v38 = vld.sshfl [vmem:[#allocation1 + $0x38] sm:$0xff pattern:$0x73625140]  ;;  %2768 = vmatpush.msrb.mxu3 %v2284_v36  ;;  %2729 = vmatmul.f32.vlgmr.msrb.gmra.mxu1 %v2434_v37  ;;  %v517_v32 = vld [vmem:[%s5966_s27 + $0x4c8] sm:$0xff] }
 0x13c   : > { %2769 = vmatmul.f32.vlgmr.msrb.gmra.mxu3 %v2436_v38  ;;  %2774 = vmatpush.msra.mxu0 %v477_v39  ;;  %v637_v33 = vld [vmem:[%s5966_s27 + $0x888] sm:$0xff] }
 0x13d   : > { %2793 = vmatpush.msra.mxu1 %v613_v40  ;;  %2814 = vmatpush.msra.mxu2 %v733_v41  ;;  %v773_v34 = vld [vmem:[%s5966_s27 + $0xcc8] sm:$0xff] }
 0x13e   : > { %2833 = vmatpush.msra.mxu3 %v869_v42  ;;  %2775 = vmatpush.msra.mxu0 %v469_v43  ;;  %v373_v35 = vld [vmem:[%s5966_s27 + $0x48] sm:$0xff] }
 0x13f   : > { %2794 = vmatpush.msra.mxu1 %v605_v44  ;;  %2815 = vmatpush.msra.mxu2 %v725_v49  ;;  %v509_v36 = vld [vmem:[%s5966_s27 + $0x488] sm:$0xff] }
 0x140   : > { %2834 = vmatpush.msra.mxu3 %v861_v50  ;;  %2776 = vmatpush.msra.mxu0 %v461_v51  ;;  %v629_v37 = vld [vmem:[%s5966_s27 + $0x848] sm:$0xff] }
 0x141   : > { %2795 = vmatpush.msra.mxu1 %v597_v52  ;;  %2816 = vmatpush.msra.mxu2 %v717_v53  ;;  %v765_v38 = vld [vmem:[%s5966_s27 + $0xc88] sm:$0xff] }
 0x142   : > { %2835 = vmatpush.msra.mxu3 %v853_v54  ;;  %2777 = vmatpush.msra.mxu0 %v453_v55  ;;  %v365_v39 = vld [vmem:[%s5966_s27 + $0x8] sm:$0xff] }
 0x143   : > { %2796 = vmatpush.msra.mxu1 %v589_v56  ;;  %2817 = vmatpush.msra.mxu2 %v709_v57  ;;  %v501_v40 = vld [vmem:[%s5966_s27 + $0x448] sm:$0xff] }
 0x144   : > { %2836 = vmatpush.msra.mxu3 %v845_v58  ;;  %2778 = vmatpush.msra.mxu0 %v445_v59  ;;  %v621_v41 = vld [vmem:[%s5966_s27 + $0x808] sm:$0xff] }
 0x145   : > { %2797 = vmatpush.msra.mxu1 %v581_v60  ;;  %2818 = vmatpush.msra.mxu2 %v701_v1  ;;  %v757_v42 = vld [vmem:[%s5966_s27 + $0xc48] sm:$0xff] }
 0x146   : > { %2837 = vmatpush.msra.mxu3 %v837_v2  ;;  %2779 = vmatpush.msra.mxu0 %v437_v3  ;;  %v997_v43 = vld [vmem:[%s5966_s27 + $0x13c8] sm:$0xff] }
 0x147   : > { %2798 = vmatpush.msra.mxu1 %v573_v4  ;;  %2819 = vmatpush.msra.mxu2 %v693_v5  ;;  %v1253_v44 = vld [vmem:[%s5966_s27 + $0x1bc8] sm:$0xff] }
 0x148   : > { %2838 = vmatpush.msra.mxu3 %v829_v6  ;;  %2780 = vmatpush.msra.mxu0 %v429_v7  ;;  %v493_v49 = vld [vmem:[%s5966_s27 + $0x408] sm:$0xff] }
 0x149   : > { %2799 = vmatpush.msra.mxu1 %v565_v8  ;;  %2820 = vmatpush.msra.mxu2 %v685_v9  ;;  %v749_v50 = vld [vmem:[%s5966_s27 + $0xc08] sm:$0xff] }
 0x14a   : > { %2839 = vmatpush.msra.mxu3 %v821_v10  ;;  %2781 = vmatpush.msra.mxu0 %v421_v11  ;;  %v989_v51 = vld [vmem:[%s5966_s27 + $0x1388] sm:$0xff] }
 0x14b   : > { %2800 = vmatpush.msra.mxu1 %v557_v12  ;;  %2821 = vmatpush.msra.mxu2 %v677_v13  ;;  %v1125_v52 = vld [vmem:[%s5966_s27 + $0x17c8] sm:$0xff] }
 0x14c   : > { %2840 = vmatpush.msra.mxu3 %v813_v14  ;;  %2782 = vmatpush.msra.mxu0 %v413_v15  ;;  %v1245_v53 = vld [vmem:[%s5966_s27 + $0x1b88] sm:$0xff] }
 0x14d   : > { %2801 = vmatpush.msra.mxu1 %v549_v16  ;;  %2822 = vmatpush.msra.mxu2 %v669_v17  ;;  %v1381_v54 = vld [vmem:[%s5966_s27 + $0x1fc8] sm:$0xff] }
 0x14e   : > { %2841 = vmatpush.msra.mxu3 %v805_v18  ;;  %2783 = vmatpush.msra.mxu0 %v405_v19  ;;  %v981_v55 = vld [vmem:[%s5966_s27 + $0x1348] sm:$0xff] }
 0x14f   : > { %2802 = vmatpush.msra.mxu1 %v541_v20  ;;  %2823 = vmatpush.msra.mxu2 %v661_v21  ;;  %v1117_v56 = vld [vmem:[%s5966_s27 + $0x1788] sm:$0xff] }
 0x150   : > { %2842 = vmatpush.msra.mxu3 %v797_v22  ;;  %2784 = vmatpush.msra.mxu0 %v397_v23  ;;  %v1237_v57 = vld [vmem:[%s5966_s27 + $0x1b48] sm:$0xff] }
 0x151   : > { %2803 = vmatpush.msra.mxu1 %v533_v24  ;;  %2824 = vmatpush.msra.mxu2 %v653_v25  ;;  %v1373_v58 = vld [vmem:[%s5966_s27 + $0x1f88] sm:$0xff] }
 0x152   : > { %2843 = vmatpush.msra.mxu3 %v789_v26  ;;  %2785 = vmatpush.msra.mxu0 %v389_v27  ;;  %v973_v59 = vld [vmem:[%s5966_s27 + $0x1308] sm:$0xff] }
 0x153   : > { %2804 = vmatpush.msra.mxu1 %v525_v28  ;;  %2825 = vmatpush.msra.mxu2 %v645_v29  ;;  %v1109_v60 = vld [vmem:[%s5966_s27 + $0x1748] sm:$0xff] }
 0x154   : > { %2844 = vmatpush.msra.mxu3 %v781_v30  ;;  %2786 = vmatpush.msra.mxu0 %v381_v31  ;;  %v1229_v1 = vld [vmem:[%s5966_s27 + $0x1b08] sm:$0xff] }
 0x155   : > { %2805 = vmatpush.msra.mxu1 %v517_v32  ;;  %2826 = vmatpush.msra.mxu2 %v637_v33  ;;  %v1365_v2 = vld [vmem:[%s5966_s27 + $0x1f48] sm:$0xff] }
 0x156   : > { %2845 = vmatpush.msra.mxu3 %v773_v34  ;;  %2787 = vmatpush.msra.mxu0 %v373_v35  ;;  %v965_v3 = vld [vmem:[%s5966_s27 + $0x12c8] sm:$0xff] }
 0x157   : > { %2806 = vmatpush.msra.mxu1 %v509_v36  ;;  %2827 = vmatpush.msra.mxu2 %v629_v37  ;;  %v1101_v4 = vld [vmem:[%s5966_s27 + $0x1708] sm:$0xff] }
 0x158   : > { %2846 = vmatpush.msra.mxu3 %v765_v38  ;;  %2788 = vmatpush.msra.mxu0 %v365_v39  ;;  %v1221_v5 = vld [vmem:[%s5966_s27 + $0x1ac8] sm:$0xff] }
 0x159   : > { %2807 = vmatpush.msra.mxu1 %v501_v40  ;;  %2828 = vmatpush.msra.mxu2 %v621_v41  ;;  %v1357_v6 = vld [vmem:[%s5966_s27 + $0x1f08] sm:$0xff] }
 0x15a   : > { %2847 = vmatpush.msra.mxu3 %v757_v42  ;;  %2853 = vmatpush.msrb.mxu0 %v997_v43  ;;  %v957_v7 = vld [vmem:[%s5966_s27 + $0x1288] sm:$0xff] }
 0x15b   : > { %2893 = vmatpush.msrb.mxu2 %v1253_v44  ;;  %2808 = vmatpush.msra.mxu1 %v493_v49  ;;  %v1093_v8 = vld [vmem:[%s5966_s27 + $0x16c8] sm:$0xff] }
 0x15c   : > { %2848 = vmatpush.msra.mxu3 %v749_v50  ;;  %2854 = vmatpush.msrb.mxu0 %v989_v51  ;;  %v1213_v9 = vld [vmem:[%s5966_s27 + $0x1a88] sm:$0xff] }
 0x15d   : > { %2873 = vmatpush.msrb.mxu1 %v1125_v52  ;;  %2894 = vmatpush.msrb.mxu2 %v1245_v53  ;;  %v1349_v10 = vld [vmem:[%s5966_s27 + $0x1ec8] sm:$0xff] }
 0x15e   : > { %2913 = vmatpush.msrb.mxu3 %v1381_v54  ;;  %2855 = vmatpush.msrb.mxu0 %v981_v55  ;;  %v949_v11 = vld [vmem:[%s5966_s27 + $0x1248] sm:$0xff] }
 0x15f   : > { %2874 = vmatpush.msrb.mxu1 %v1117_v56  ;;  %2895 = vmatpush.msrb.mxu2 %v1237_v57  ;;  %v1085_v12 = vld [vmem:[%s5966_s27 + $0x1688] sm:$0xff] }
 0x160   : > { %2914 = vmatpush.msrb.mxu3 %v1373_v58  ;;  %2856 = vmatpush.msrb.mxu0 %v973_v59  ;;  %v1205_v13 = vld [vmem:[%s5966_s27 + $0x1a48] sm:$0xff] }
 0x161   : > { %2875 = vmatpush.msrb.mxu1 %v1109_v60  ;;  %2896 = vmatpush.msrb.mxu2 %v1229_v1  ;;  %v1341_v14 = vld [vmem:[%s5966_s27 + $0x1e88] sm:$0xff] }
 0x162   : > { %2915 = vmatpush.msrb.mxu3 %v1365_v2  ;;  %2857 = vmatpush.msrb.mxu0 %v965_v3  ;;  %v941_v15 = vld [vmem:[%s5966_s27 + $0x1208] sm:$0xff] }
 0x163   : > { %2876 = vmatpush.msrb.mxu1 %v1101_v4  ;;  %2897 = vmatpush.msrb.mxu2 %v1221_v5  ;;  %v1077_v16 = vld [vmem:[%s5966_s27 + $0x1648] sm:$0xff] }
 0x164   : > { %2916 = vmatpush.msrb.mxu3 %v1357_v6  ;;  %2858 = vmatpush.msrb.mxu0 %v957_v7  ;;  %v1197_v17 = vld [vmem:[%s5966_s27 + $0x1a08] sm:$0xff] }
 0x165   : > { %2877 = vmatpush.msrb.mxu1 %v1093_v8  ;;  %2898 = vmatpush.msrb.mxu2 %v1213_v9  ;;  %v1333_v18 = vld [vmem:[%s5966_s27 + $0x1e48] sm:$0xff] }
 0x166   : > { %2917 = vmatpush.msrb.mxu3 %v1349_v10  ;;  %2859 = vmatpush.msrb.mxu0 %v949_v11  ;;  %v933_v19 = vld [vmem:[%s5966_s27 + $0x11c8] sm:$0xff] }
 0x167   : > { %2878 = vmatpush.msrb.mxu1 %v1085_v12  ;;  %2899 = vmatpush.msrb.mxu2 %v1205_v13  ;;  %v1069_v20 = vld [vmem:[%s5966_s27 + $0x1608] sm:$0xff] }
 0x168   : > { %2918 = vmatpush.msrb.mxu3 %v1341_v14  ;;  %2860 = vmatpush.msrb.mxu0 %v941_v15  ;;  %v1189_v21 = vld [vmem:[%s5966_s27 + $0x19c8] sm:$0xff] }
 0x169   : > { %2879 = vmatpush.msrb.mxu1 %v1077_v16  ;;  %v1325_v22 = vld [vmem:[%s5966_s27 + $0x1e08] sm:$0xff]  ;;  %2900 = vmatpush.msrb.mxu2 %v1197_v17 }
 0x16a   : > { %2919 = vmatpush.msrb.mxu3 %v1333_v18  ;;  %v925_v23 = vld [vmem:[%s5966_s27 + $0x1188] sm:$0xff]  ;;  %2861 = vmatpush.msrb.mxu0 %v933_v19 }
 0x16b   : > { %v1061_v24 = vld [vmem:[%s5966_s27 + $0x15c8] sm:$0xff]  ;;  %2880 = vmatpush.msrb.mxu1 %v1069_v20  ;;  %2901 = vmatpush.msrb.mxu2 %v1189_v21 }
 0x16c   : > { %v1181_v25 = vld [vmem:[%s5966_s27 + $0x1988] sm:$0xff]  ;;  %2920 = vmatpush.msrb.mxu3 %v1325_v22  ;;  %2862 = vmatpush.msrb.mxu0 %v925_v23 }
 0x16d   : > { %v1317_v26 = vld [vmem:[%s5966_s27 + $0x1dc8] sm:$0xff]  ;;  %2881 = vmatpush.msrb.mxu1 %v1061_v24  ;;  %2902 = vmatpush.msrb.mxu2 %v1181_v25 }
 0x16e   : > { %v917_v27 = vld [vmem:[%s5966_s27 + $0x1148] sm:$0xff]  ;;  %2921 = vmatpush.msrb.mxu3 %v1317_v26  ;;  %2829 = vmatmul.f32.vlgmr.msra.gmra.mxu2 %v6108_v45 }
 0x16f   : > { %v1053_v28 = vld [vmem:[%s5966_s27 + $0x1588] sm:$0xff]  ;;  %2863 = vmatpush.msrb.mxu0 %v917_v27  ;;  %2849 = vmatmul.f32.vlgmr.msra.gmra.mxu3 %v6112_v47 }
 0x170   : > { %v1173_v29 = vld [vmem:[%s5966_s27 + $0x1948] sm:$0xff]  ;;  %2882 = vmatpush.msrb.mxu1 %v1053_v28  ;;  %2789 = vmatmul.f32.vlgmr.msra.gmra.mxu0 %v6110_v46 }
 0x171   : > { %v1309_v30 = vld [vmem:[%s5966_s27 + $0x1d88] sm:$0xff]  ;;  %2903 = vmatpush.msrb.mxu2 %v1173_v29  ;;  %2809 = vmatmul.f32.vlgmr.msra.gmra.mxu1 %v6114_v48 }
 0x172   : > { %v909_v31 = vld [vmem:[%s5966_s27 + $0x1108] sm:$0xff]  ;;  %2922 = vmatpush.msrb.mxu3 %v1309_v30 }
 0x173   : > { %v1045_v32 = vld [vmem:[%s5966_s27 + $0x1548] sm:$0xff]  ;;  %2864 = vmatpush.msrb.mxu0 %v909_v31 }
 0x174   : > { %v1165_v33 = vld [vmem:[%s5966_s27 + $0x1908] sm:$0xff]  ;;  %2883 = vmatpush.msrb.mxu1 %v1045_v32 }
 0x175   : > { %v1301_v34 = vld [vmem:[%s5966_s27 + $0x1d48] sm:$0xff]  ;;  %2904 = vmatpush.msrb.mxu2 %v1165_v33 }
 0x176   : > { %v901_v35 = vld [vmem:[%s5966_s27 + $0x10c8] sm:$0xff]  ;;  %2923 = vmatpush.msrb.mxu3 %v1301_v34 }
 0x177   : > { %v1037_v36 = vld [vmem:[%s5966_s27 + $0x1508] sm:$0xff]  ;;  %2865 = vmatpush.msrb.mxu0 %v901_v35 }
 0x178   : > { %v1157_v37 = vld [vmem:[%s5966_s27 + $0x18c8] sm:$0xff]  ;;  %2884 = vmatpush.msrb.mxu1 %v1037_v36 }
 0x179   : > { %v1293_v38 = vld [vmem:[%s5966_s27 + $0x1d08] sm:$0xff]  ;;  %2905 = vmatpush.msrb.mxu2 %v1157_v37 }
 0x17a   : > { %v893_v39 = vld [vmem:[%s5966_s27 + $0x1088] sm:$0xff]  ;;  %2924 = vmatpush.msrb.mxu3 %v1293_v38 }
 0x17b   : > { %v1029_v40 = vld [vmem:[%s5966_s27 + $0x14c8] sm:$0xff]  ;;  %2866 = vmatpush.msrb.mxu0 %v893_v39 }
 0x17c   : > { %v1149_v41 = vld [vmem:[%s5966_s27 + $0x1888] sm:$0xff]  ;;  %2885 = vmatpush.msrb.mxu1 %v1029_v40 }
 0x17d   : > { %v1285_v42 = vld [vmem:[%s5966_s27 + $0x1cc8] sm:$0xff]  ;;  %2906 = vmatpush.msrb.mxu2 %v1149_v41 }
 0x17e   : > { %v885_v43 = vld [vmem:[%s5966_s27 + $0x1048] sm:$0xff]  ;;  %2925 = vmatpush.msrb.mxu3 %v1285_v42 }
 0x17f   : > { %v1021_v44 = vld [vmem:[%s5966_s27 + $0x1488] sm:$0xff]  ;;  %2867 = vmatpush.msrb.mxu0 %v885_v43 }
 0x180   : > { %v1141_v49 = vld [vmem:[%s5966_s27 + $0x1848] sm:$0xff]  ;;  %2886 = vmatpush.msrb.mxu1 %v1021_v44 }
 0x181   : > { %v1277_v50 = vld [vmem:[%s5966_s27 + $0x1c88] sm:$0xff]  ;;  %2907 = vmatpush.msrb.mxu2 %v1141_v49 }
 0x182   : > { %v877_v51 = vld [vmem:[%s5966_s27 + $0x1008] sm:$0xff]  ;;  %2926 = vmatpush.msrb.mxu3 %v1277_v50 }
 0x183   : > { %v1013_v52 = vld [vmem:[%s5966_s27 + $0x1448] sm:$0xff]  ;;  %2868 = vmatpush.msrb.mxu0 %v877_v51 }
 0x184   : > { %v1133_v53 = vld [vmem:[%s5966_s27 + $0x1808] sm:$0xff]  ;;  %2887 = vmatpush.msrb.mxu1 %v1013_v52  ;;  %2869 = vmatmul.f32.vlgmr.msrb.gmra.mxu0 %v6130_v62 }
 0x185   : > { %v1269_v54 = vld [vmem:[%s5966_s27 + $0x1c48] sm:$0xff]  ;;  %2908 = vmatpush.msrb.mxu2 %v1133_v53 }
 0x186   : > { %v1509_v55 = vld [vmem:[%s5966_s27 + $0x23c8] sm:$0xff]  ;;  %2927 = vmatpush.msrb.mxu3 %v1269_v54  ;;  %2909 = vmatmul.f32.vlgmr.msrb.gmra.mxu2 %v6128_v61 }
 0x187   : > { %v1765_v56 = vld [vmem:[%s5966_s27 + $0x2bc8] sm:$0xff]  ;;  %2933 = vmatpush.msra.mxu0 %v1509_v55 }
 0x188   : > { %v1005_v57 = vld [vmem:[%s5966_s27 + $0x1408] sm:$0xff]  ;;  %2973 = vmatpush.msra.mxu2 %v1765_v56 }
 0x189   : > { %v1261_v58 = vld [vmem:[%s5966_s27 + $0x1c08] sm:$0xff]  ;;  %2888 = vmatpush.msrb.mxu1 %v1005_v57 }
 0x18a   : > { %v1501_v59 = vld [vmem:[%s5966_s27 + $0x2388] sm:$0xff]  ;;  %2928 = vmatpush.msrb.mxu3 %v1261_v58  ;;  %2889 = vmatmul.f32.vlgmr.msrb.gmra.mxu1 %v6134_v0 }
 0x18b   : > { %v1637_v60 = vld [vmem:[%s5966_s27 + $0x27c8] sm:$0xff]  ;;  %2934 = vmatpush.msra.mxu0 %v1501_v59  ;;  %2929 = vmatmul.f32.vlgmr.msrb.gmra.mxu3 %v6132_v63 }
 0x18c   : > { %v1757_v1 = vld [vmem:[%s5966_s27 + $0x2b88] sm:$0xff]  ;;  %2953 = vmatpush.msra.mxu1 %v1637_v60 }
 0x18d   : > { %v1893_v2 = vld [vmem:[%s5966_s27 + $0x2fc8] sm:$0xff]  ;;  %2974 = vmatpush.msra.mxu2 %v1757_v1 }
 0x18e   : > { %v1493_v3 = vld [vmem:[%s5966_s27 + $0x2348] sm:$0xff]  ;;  %2993 = vmatpush.msra.mxu3 %v1893_v2 }
 0x18f   : > { %v1629_v4 = vld [vmem:[%s5966_s27 + $0x2788] sm:$0xff]  ;;  %2935 = vmatpush.msra.mxu0 %v1493_v3 }
 0x190   : > { %v1749_v5 = vld [vmem:[%s5966_s27 + $0x2b48] sm:$0xff]  ;;  %2954 = vmatpush.msra.mxu1 %v1629_v4 }
 0x191   : > { %v1885_v6 = vld [vmem:[%s5966_s27 + $0x2f88] sm:$0xff]  ;;  %2975 = vmatpush.msra.mxu2 %v1749_v5 }
 0x192   : > { %v1485_v7 = vld [vmem:[%s5966_s27 + $0x2308] sm:$0xff]  ;;  %2994 = vmatpush.msra.mxu3 %v1885_v6 }
 0x193   : > { %v1621_v8 = vld [vmem:[%s5966_s27 + $0x2748] sm:$0xff]  ;;  %2936 = vmatpush.msra.mxu0 %v1485_v7 }
 0x194   : > { %v1741_v9 = vld [vmem:[%s5966_s27 + $0x2b08] sm:$0xff]  ;;  %2955 = vmatpush.msra.mxu1 %v1621_v8  ;;  %v5681_v8 = vld.sshfl [vmem:[#allocation1 + $0x10] sm:$0xff pattern:$0x73625140] }
 0x195   : > { %v1877_v10 = vld [vmem:[%s5966_s27 + $0x2f48] sm:$0xff]  ;;  %2976 = vmatpush.msra.mxu2 %v1741_v9 }
 0x196   : > { %v1477_v11 = vld [vmem:[%s5966_s27 + $0x22c8] sm:$0xff]  ;;  %2995 = vmatpush.msra.mxu3 %v1877_v10 }
 0x197   : > { %v1613_v12 = vld [vmem:[%s5966_s27 + $0x2708] sm:$0xff]  ;;  %2937 = vmatpush.msra.mxu0 %v1477_v11 }
 0x198   : > { %v1733_v13 = vld [vmem:[%s5966_s27 + $0x2ac8] sm:$0xff]  ;;  %2956 = vmatpush.msra.mxu1 %v1613_v12 }
 0x199   : > { %v1869_v14 = vld [vmem:[%s5966_s27 + $0x2f08] sm:$0xff]  ;;  %2977 = vmatpush.msra.mxu2 %v1733_v13  ;;  %v5682_v13 = vld.sshfl [vmem:[#allocation1 + $0x8] sm:$0xff pattern:$0x73625140] }
 0x19a   : > { %v1469_v15 = vld [vmem:[%s5966_s27 + $0x2288] sm:$0xff]  ;;  %2996 = vmatpush.msra.mxu3 %v1869_v14  ;;  %v5683_v14 = vld.sshfl [vmem:[#allocation1 + $0x18] sm:$0xff pattern:$0x73625140] }
 0x19b   : > { %v1605_v16 = vld [vmem:[%s5966_s27 + $0x26c8] sm:$0xff]  ;;  %2938 = vmatpush.msra.mxu0 %v1469_v15 }
 0x19c   : > { %v1725_v17 = vld [vmem:[%s5966_s27 + $0x2a88] sm:$0xff]  ;;  %2957 = vmatpush.msra.mxu1 %v1605_v16 }
 0x19d   : > { %v1861_v18 = vld [vmem:[%s5966_s27 + $0x2ec8] sm:$0xff]  ;;  %2978 = vmatpush.msra.mxu2 %v1725_v17 }
 0x19e   : > { %v1461_v19 = vld [vmem:[%s5966_s27 + $0x2248] sm:$0xff]  ;;  %2997 = vmatpush.msra.mxu3 %v1861_v18 }
 0x19f   : > { %v1597_v20 = vld [vmem:[%s5966_s27 + $0x2688] sm:$0xff]  ;;  %2939 = vmatpush.msra.mxu0 %v1461_v19 }
 0x1a0   : > { %v1717_v21 = vld [vmem:[%s5966_s27 + $0x2a48] sm:$0xff]  ;;  %2958 = vmatpush.msra.mxu1 %v1597_v20 }
 0x1a1   : > { %v1853_v22 = vld [vmem:[%s5966_s27 + $0x2e88] sm:$0xff]  ;;  %2979 = vmatpush.msra.mxu2 %v1717_v21 }
 0x1a2   : > { %v1453_v23 = vld [vmem:[%s5966_s27 + $0x2208] sm:$0xff]  ;;  %2998 = vmatpush.msra.mxu3 %v1853_v22 }
 0x1a3   : > { %v1589_v24 = vld [vmem:[%s5966_s27 + $0x2648] sm:$0xff]  ;;  %2940 = vmatpush.msra.mxu0 %v1453_v23 }
 0x1a4   : > { %v1709_v25 = vld [vmem:[%s5966_s27 + $0x2a08] sm:$0xff]  ;;  %2959 = vmatpush.msra.mxu1 %v1589_v24 }
 0x1a5   : > { %v1845_v26 = vld [vmem:[%s5966_s27 + $0x2e48] sm:$0xff]  ;;  %2980 = vmatpush.msra.mxu2 %v1709_v25 }
 0x1a6   : > { %v1445_v27 = vld [vmem:[%s5966_s27 + $0x21c8] sm:$0xff]  ;;  %2999 = vmatpush.msra.mxu3 %v1845_v26 }
 0x1a7   : > { %v1581_v28 = vld [vmem:[%s5966_s27 + $0x2608] sm:$0xff]  ;;  %2941 = vmatpush.msra.mxu0 %v1445_v27 }
 0x1a8   : > { %v1701_v29 = vld [vmem:[%s5966_s27 + $0x29c8] sm:$0xff]  ;;  %2960 = vmatpush.msra.mxu1 %v1581_v28 }
 0x1a9   : > { %v1837_v30 = vld [vmem:[%s5966_s27 + $0x2e08] sm:$0xff]  ;;  %2981 = vmatpush.msra.mxu2 %v1701_v29 }
 0x1aa   : > { %v1437_v31 = vld [vmem:[%s5966_s27 + $0x2188] sm:$0xff]  ;;  %3000 = vmatpush.msra.mxu3 %v1837_v30 }
 0x1ab   : > { %v1573_v32 = vld [vmem:[%s5966_s27 + $0x25c8] sm:$0xff]  ;;  %2942 = vmatpush.msra.mxu0 %v1437_v31 }
 0x1ac   : > { %v1693_v33 = vld [vmem:[%s5966_s27 + $0x2988] sm:$0xff]  ;;  %2961 = vmatpush.msra.mxu1 %v1573_v32 }
 0x1ad   : > { %v1829_v34 = vld [vmem:[%s5966_s27 + $0x2dc8] sm:$0xff]  ;;  %2982 = vmatpush.msra.mxu2 %v1693_v33 }
 0x1ae   : > { %v1429_v35 = vld [vmem:[%s5966_s27 + $0x2148] sm:$0xff]  ;;  %3001 = vmatpush.msra.mxu3 %v1829_v34 }
 0x1af   : > { %v1565_v36 = vld [vmem:[%s5966_s27 + $0x2588] sm:$0xff]  ;;  %2943 = vmatpush.msra.mxu0 %v1429_v35 }
 0x1b0   : > { %v1685_v37 = vld [vmem:[%s5966_s27 + $0x2948] sm:$0xff]  ;;  %2962 = vmatpush.msra.mxu1 %v1565_v36 }
 0x1b1   : > { %v1821_v38 = vld [vmem:[%s5966_s27 + $0x2d88] sm:$0xff]  ;;  %2983 = vmatpush.msra.mxu2 %v1685_v37 }
 0x1b2   : > { %v1421_v39 = vld [vmem:[%s5966_s27 + $0x2108] sm:$0xff]  ;;  %3002 = vmatpush.msra.mxu3 %v1821_v38 }
 0x1b3   : > { %v1557_v40 = vld [vmem:[%s5966_s27 + $0x2548] sm:$0xff]  ;;  %2944 = vmatpush.msra.mxu0 %v1421_v39 }
 0x1b4   : > { %v1677_v41 = vld [vmem:[%s5966_s27 + $0x2908] sm:$0xff]  ;;  %2963 = vmatpush.msra.mxu1 %v1557_v40 }
 0x1b5   : > { %v1813_v42 = vld [vmem:[%s5966_s27 + $0x2d48] sm:$0xff]  ;;  %2984 = vmatpush.msra.mxu2 %v1677_v41 }
 0x1b6   : > { %v1413_v43 = vld [vmem:[%s5966_s27 + $0x20c8] sm:$0xff]  ;;  %3003 = vmatpush.msra.mxu3 %v1813_v42 }
 0x1b7   : > { %v1549_v44 = vld [vmem:[%s5966_s27 + $0x2508] sm:$0xff]  ;;  %2945 = vmatpush.msra.mxu0 %v1413_v43 }
 0x1b8   : > { %v1669_v49 = vld [vmem:[%s5966_s27 + $0x28c8] sm:$0xff]  ;;  %2964 = vmatpush.msra.mxu1 %v1549_v44 }
 0x1b9   : > { %v1805_v50 = vld [vmem:[%s5966_s27 + $0x2d08] sm:$0xff]  ;;  %2985 = vmatpush.msra.mxu2 %v1669_v49 }
 0x1ba   : > { %v1405_v51 = vld [vmem:[%s5966_s27 + $0x2088] sm:$0xff]  ;;  %3004 = vmatpush.msra.mxu3 %v1805_v50 }
 0x1bb   : > { %v1541_v52 = vld [vmem:[%s5966_s27 + $0x24c8] sm:$0xff]  ;;  %2946 = vmatpush.msra.mxu0 %v1405_v51 }
 0x1bc   : > { %v1661_v53 = vld [vmem:[%s5966_s27 + $0x2888] sm:$0xff]  ;;  %2965 = vmatpush.msra.mxu1 %v1541_v52 }
 0x1bd   : > { %v1797_v54 = vld [vmem:[%s5966_s27 + $0x2cc8] sm:$0xff]  ;;  %2986 = vmatpush.msra.mxu2 %v1661_v53 }
 0x1be   : > { %v1397_v55 = vld [vmem:[%s5966_s27 + $0x2048] sm:$0xff]  ;;  %3005 = vmatpush.msra.mxu3 %v1797_v54 }
 0x1bf   : > { %v1533_v56 = vld [vmem:[%s5966_s27 + $0x2488] sm:$0xff]  ;;  %2947 = vmatpush.msra.mxu0 %v1397_v55 }
 0x1c0   : > { %v1653_v57 = vld [vmem:[%s5966_s27 + $0x2848] sm:$0xff]  ;;  %2966 = vmatpush.msra.mxu1 %v1533_v56 }
 0x1c1   : > { %v1789_v58 = vld [vmem:[%s5966_s27 + $0x2c88] sm:$0xff]  ;;  %2987 = vmatpush.msra.mxu2 %v1653_v57 }
 0x1c2   : > { %v1389_v59 = vld [vmem:[%s5966_s27 + $0x2008] sm:$0xff]  ;;  %3006 = vmatpush.msra.mxu3 %v1789_v58 }
 0x1c3   : > { %v1525_v60 = vld [vmem:[%s5966_s27 + $0x2448] sm:$0xff]  ;;  %2948 = vmatpush.msra.mxu0 %v1389_v59 }
 0x1c4   : > { %v1645_v1 = vld [vmem:[%s5966_s27 + $0x2808] sm:$0xff]  ;;  %2967 = vmatpush.msra.mxu1 %v1525_v60 }
 0x1c5   : > { %v1781_v2 = vld [vmem:[%s5966_s27 + $0x2c48] sm:$0xff]  ;;  %2988 = vmatpush.msra.mxu2 %v1645_v1 }
 0x1c6   : > { %v2021_v3 = vld [vmem:[%s5966_s27 + $0x33c8] sm:$0xff]  ;;  %3007 = vmatpush.msra.mxu3 %v1781_v2  ;;  %2989 = vmatmul.f32.vlgmr.msra.gmra.mxu2 %v5681_v8 }
 0x1c7   : > { %v2277_v4 = vld [vmem:[%s5966_s27 + $0x3bc8] sm:$0xff]  ;;  %3013 = vmatpush.msrb.mxu0 %v2021_v3 }
 0x1c8   : > { %v1517_v5 = vld [vmem:[%s5966_s27 + $0x2408] sm:$0xff]  ;;  %3053 = vmatpush.msrb.mxu2 %v2277_v4 }
 0x1c9   : > { %v1773_v6 = vld [vmem:[%s5966_s27 + $0x2c08] sm:$0xff]  ;;  %2968 = vmatpush.msra.mxu1 %v1517_v5 }
 0x1ca   : > { %v5680_v7 = vld.sshfl [vmem:[#allocation1] sm:$0xff pattern:$0x73625140]  ;;  %3008 = vmatpush.msra.mxu3 %v1773_v6  ;;  %2969 = vmatmul.f32.vlgmr.msra.gmra.mxu1 %v5682_v13 }
 0x1cb   : > { %2949 = vmatmul.f32.vlgmr.msra.gmra.mxu0 %v5680_v7  ;;  %v2013_v9 = vld [vmem:[%s5966_s27 + $0x3388] sm:$0xff]  ;;  %3009 = vmatmul.f32.vlgmr.msra.gmra.mxu3 %v5683_v14 }
 0x1cc   : > { %v2149_v10 = vld [vmem:[%s5966_s27 + $0x37c8] sm:$0xff]  ;;  %3014 = vmatpush.msrb.mxu0 %v2013_v9 }
 0x1cd   : > { %v2269_v11 = vld [vmem:[%s5966_s27 + $0x3b88] sm:$0xff]  ;;  %3033 = vmatpush.msrb.mxu1 %v2149_v10 }
 0x1ce   : > { %v2405_v12 = vld [vmem:[%s5966_s27 + $0x3fc8] sm:$0xff]  ;;  %3054 = vmatpush.msrb.mxu2 %v2269_v11 }
 0x1cf   : > { %v2005_v15 = vld [vmem:[%s5966_s27 + $0x3348] sm:$0xff]  ;;  %3073 = vmatpush.msrb.mxu3 %v2405_v12 }
 0x1d0   : > { %v2141_v16 = vld [vmem:[%s5966_s27 + $0x3788] sm:$0xff]  ;;  %3015 = vmatpush.msrb.mxu0 %v2005_v15  ;;  %v486_v15 = vld [vmem:[%s5966_s27 + $0x3d0] sm:$0xff] }
 0x1d1   : > { %v2261_v17 = vld [vmem:[%s5966_s27 + $0x3b48] sm:$0xff]  ;;  %3034 = vmatpush.msrb.mxu1 %v2141_v16  ;;  %v742_v16 = vld [vmem:[%s5966_s27 + $0xbd0] sm:$0xff] }
 0x1d2   : > { %v2397_v18 = vld [vmem:[%s5966_s27 + $0x3f88] sm:$0xff]  ;;  %3055 = vmatpush.msrb.mxu2 %v2261_v17 }
 0x1d3   : > { %v1997_v19 = vld [vmem:[%s5966_s27 + $0x3308] sm:$0xff]  ;;  %3074 = vmatpush.msrb.mxu3 %v2397_v18 }
 0x1d4   : > { %v2133_v20 = vld [vmem:[%s5966_s27 + $0x3748] sm:$0xff]  ;;  %3016 = vmatpush.msrb.mxu0 %v1997_v19 }
 0x1d5   : > { %v2253_v21 = vld [vmem:[%s5966_s27 + $0x3b08] sm:$0xff]  ;;  %3035 = vmatpush.msrb.mxu1 %v2133_v20  ;;  %v5685_v20 = vld.sshfl [vmem:[#allocation1 + $0x30] sm:$0xff pattern:$0x73625140] }
 0x1d6   : > { %v2389_v22 = vld [vmem:[%s5966_s27 + $0x3f48] sm:$0xff]  ;;  %3056 = vmatpush.msrb.mxu2 %v2253_v21  ;;  %v478_v21 = vld [vmem:[%s5966_s27 + $0x390] sm:$0xff] }
 0x1d7   : > { %v1989_v23 = vld [vmem:[%s5966_s27 + $0x32c8] sm:$0xff]  ;;  %3075 = vmatpush.msrb.mxu3 %v2389_v22  ;;  %v614_v22 = vld [vmem:[%s5966_s27 + $0x7d0] sm:$0xff] }
 0x1d8   : > { %v2125_v24 = vld [vmem:[%s5966_s27 + $0x3708] sm:$0xff]  ;;  %3017 = vmatpush.msrb.mxu0 %v1989_v23  ;;  %v734_v23 = vld [vmem:[%s5966_s27 + $0xb90] sm:$0xff] }
 0x1d9   : > { %v2245_v25 = vld [vmem:[%s5966_s27 + $0x3ac8] sm:$0xff]  ;;  %3036 = vmatpush.msrb.mxu1 %v2125_v24  ;;  %v870_v24 = vld [vmem:[%s5966_s27 + $0xfd0] sm:$0xff] }
 0x1da   : > { %v2381_v26 = vld [vmem:[%s5966_s27 + $0x3f08] sm:$0xff]  ;;  %3057 = vmatpush.msrb.mxu2 %v2245_v25  ;;  %v5686_v25 = vld.sshfl [vmem:[#allocation1 + $0x28] sm:$0xff pattern:$0x73625140] }
 0x1db   : > { %v1981_v27 = vld [vmem:[%s5966_s27 + $0x3288] sm:$0xff]  ;;  %3076 = vmatpush.msrb.mxu3 %v2381_v26  ;;  %v5687_v26 = vld.sshfl [vmem:[#allocation1 + $0x38] sm:$0xff pattern:$0x73625140] }
 0x1dc   : > { %v2117_v28 = vld [vmem:[%s5966_s27 + $0x36c8] sm:$0xff]  ;;  %3018 = vmatpush.msrb.mxu0 %v1981_v27  ;;  %v470_v27 = vld [vmem:[%s5966_s27 + $0x350] sm:$0xff] }
 0x1dd   : > { %v2237_v29 = vld [vmem:[%s5966_s27 + $0x3a88] sm:$0xff]  ;;  %3037 = vmatpush.msrb.mxu1 %v2117_v28  ;;  %v606_v28 = vld [vmem:[%s5966_s27 + $0x790] sm:$0xff] }
 0x1de   : > { %v2373_v30 = vld [vmem:[%s5966_s27 + $0x3ec8] sm:$0xff]  ;;  %3058 = vmatpush.msrb.mxu2 %v2237_v29  ;;  %v726_v29 = vld [vmem:[%s5966_s27 + $0xb50] sm:$0xff] }
 0x1df   : > { %v1973_v31 = vld [vmem:[%s5966_s27 + $0x3248] sm:$0xff]  ;;  %3077 = vmatpush.msrb.mxu3 %v2373_v30  ;;  %v862_v30 = vld [vmem:[%s5966_s27 + $0xf90] sm:$0xff] }
 0x1e0   : > { %v2109_v32 = vld [vmem:[%s5966_s27 + $0x3688] sm:$0xff]  ;;  %3019 = vmatpush.msrb.mxu0 %v1973_v31  ;;  %v462_v31 = vld [vmem:[%s5966_s27 + $0x310] sm:$0xff] }
 0x1e1   : > { %v2229_v33 = vld [vmem:[%s5966_s27 + $0x3a48] sm:$0xff]  ;;  %3038 = vmatpush.msrb.mxu1 %v2109_v32  ;;  %v598_v32 = vld [vmem:[%s5966_s27 + $0x750] sm:$0xff] }
 0x1e2   : > { %v2365_v34 = vld [vmem:[%s5966_s27 + $0x3e88] sm:$0xff]  ;;  %3059 = vmatpush.msrb.mxu2 %v2229_v33  ;;  %v718_v33 = vld [vmem:[%s5966_s27 + $0xb10] sm:$0xff] }
 0x1e3   : > { %v1965_v35 = vld [vmem:[%s5966_s27 + $0x3208] sm:$0xff]  ;;  %3078 = vmatpush.msrb.mxu3 %v2365_v34  ;;  %v854_v34 = vld [vmem:[%s5966_s27 + $0xf50] sm:$0xff] }
 0x1e4   : > { %v2101_v36 = vld [vmem:[%s5966_s27 + $0x3648] sm:$0xff]  ;;  %3020 = vmatpush.msrb.mxu0 %v1965_v35  ;;  %v454_v35 = vld [vmem:[%s5966_s27 + $0x2d0] sm:$0xff] }
 0x1e5   : > { %v2221_v37 = vld [vmem:[%s5966_s27 + $0x3a08] sm:$0xff]  ;;  %3039 = vmatpush.msrb.mxu1 %v2101_v36  ;;  %v590_v36 = vld [vmem:[%s5966_s27 + $0x710] sm:$0xff] }
 0x1e6   : > { %v2357_v38 = vld [vmem:[%s5966_s27 + $0x3e48] sm:$0xff]  ;;  %3060 = vmatpush.msrb.mxu2 %v2221_v37  ;;  %v710_v37 = vld [vmem:[%s5966_s27 + $0xad0] sm:$0xff] }
 0x1e7   : > { %v1957_v39 = vld [vmem:[%s5966_s27 + $0x31c8] sm:$0xff]  ;;  %3079 = vmatpush.msrb.mxu3 %v2357_v38  ;;  %v846_v38 = vld [vmem:[%s5966_s27 + $0xf10] sm:$0xff] }
 0x1e8   : > { %v2093_v40 = vld [vmem:[%s5966_s27 + $0x3608] sm:$0xff]  ;;  %3021 = vmatpush.msrb.mxu0 %v1957_v39  ;;  %v446_v39 = vld [vmem:[%s5966_s27 + $0x290] sm:$0xff] }
 0x1e9   : > { %v2213_v41 = vld [vmem:[%s5966_s27 + $0x39c8] sm:$0xff]  ;;  %3040 = vmatpush.msrb.mxu1 %v2093_v40  ;;  %v582_v40 = vld [vmem:[%s5966_s27 + $0x6d0] sm:$0xff] }
 0x1ea   : > { %v2349_v42 = vld [vmem:[%s5966_s27 + $0x3e08] sm:$0xff]  ;;  %3061 = vmatpush.msrb.mxu2 %v2213_v41  ;;  %v702_v41 = vld [vmem:[%s5966_s27 + $0xa90] sm:$0xff] }
 0x1eb   : > { %v1949_v43 = vld [vmem:[%s5966_s27 + $0x3188] sm:$0xff]  ;;  %3080 = vmatpush.msrb.mxu3 %v2349_v42  ;;  %v838_v42 = vld [vmem:[%s5966_s27 + $0xed0] sm:$0xff] }
 0x1ec   : > { %v2085_v44 = vld [vmem:[%s5966_s27 + $0x35c8] sm:$0xff]  ;;  %3022 = vmatpush.msrb.mxu0 %v1949_v43  ;;  %v438_v43 = vld [vmem:[%s5966_s27 + $0x250] sm:$0xff] }
 0x1ed   : > { %v2205_v49 = vld [vmem:[%s5966_s27 + $0x3988] sm:$0xff]  ;;  %3041 = vmatpush.msrb.mxu1 %v2085_v44  ;;  %v574_v44 = vld [vmem:[%s5966_s27 + $0x690] sm:$0xff] }
 0x1ee   : > { %v2341_v50 = vld [vmem:[%s5966_s27 + $0x3dc8] sm:$0xff]  ;;  %3062 = vmatpush.msrb.mxu2 %v2205_v49  ;;  %v694_v49 = vld [vmem:[%s5966_s27 + $0xa50] sm:$0xff] }
 0x1ef   : > { %v1941_v51 = vld [vmem:[%s5966_s27 + $0x3148] sm:$0xff]  ;;  %3081 = vmatpush.msrb.mxu3 %v2341_v50  ;;  %v830_v50 = vld [vmem:[%s5966_s27 + $0xe90] sm:$0xff] }
 0x1f0   : > { %v2077_v52 = vld [vmem:[%s5966_s27 + $0x3588] sm:$0xff]  ;;  %3023 = vmatpush.msrb.mxu0 %v1941_v51  ;;  %v430_v51 = vld [vmem:[%s5966_s27 + $0x210] sm:$0xff] }
 0x1f1   : > { %v2197_v53 = vld [vmem:[%s5966_s27 + $0x3948] sm:$0xff]  ;;  %3042 = vmatpush.msrb.mxu1 %v2077_v52  ;;  %v566_v52 = vld [vmem:[%s5966_s27 + $0x650] sm:$0xff] }
 0x1f2   : > { %v2333_v54 = vld [vmem:[%s5966_s27 + $0x3d88] sm:$0xff]  ;;  %3063 = vmatpush.msrb.mxu2 %v2197_v53  ;;  %v686_v53 = vld [vmem:[%s5966_s27 + $0xa10] sm:$0xff] }
 0x1f3   : > { %v1933_v55 = vld [vmem:[%s5966_s27 + $0x3108] sm:$0xff]  ;;  %3082 = vmatpush.msrb.mxu3 %v2333_v54  ;;  %v822_v54 = vld [vmem:[%s5966_s27 + $0xe50] sm:$0xff] }
 0x1f4   : > { %v2069_v56 = vld [vmem:[%s5966_s27 + $0x3548] sm:$0xff]  ;;  %3024 = vmatpush.msrb.mxu0 %v1933_v55  ;;  %v422_v55 = vld [vmem:[%s5966_s27 + $0x1d0] sm:$0xff] }
 0x1f5   : > { %v2189_v57 = vld [vmem:[%s5966_s27 + $0x3908] sm:$0xff]  ;;  %3043 = vmatpush.msrb.mxu1 %v2069_v56  ;;  %v558_v56 = vld [vmem:[%s5966_s27 + $0x610] sm:$0xff] }
 0x1f6   : > { %v2325_v58 = vld [vmem:[%s5966_s27 + $0x3d48] sm:$0xff]  ;;  %3064 = vmatpush.msrb.mxu2 %v2189_v57  ;;  %v678_v57 = vld [vmem:[%s5966_s27 + $0x9d0] sm:$0xff] }
 0x1f7   : > { %v1925_v59 = vld [vmem:[%s5966_s27 + $0x30c8] sm:$0xff]  ;;  %3083 = vmatpush.msrb.mxu3 %v2325_v58  ;;  %v814_v58 = vld [vmem:[%s5966_s27 + $0xe10] sm:$0xff] }
 0x1f8   : > { %v2061_v60 = vld [vmem:[%s5966_s27 + $0x3508] sm:$0xff]  ;;  %3025 = vmatpush.msrb.mxu0 %v1925_v59  ;;  %v414_v59 = vld [vmem:[%s5966_s27 + $0x190] sm:$0xff] }
 0x1f9   : > { %v2181_v1 = vld [vmem:[%s5966_s27 + $0x38c8] sm:$0xff]  ;;  %3044 = vmatpush.msrb.mxu1 %v2061_v60  ;;  %v550_v60 = vld [vmem:[%s5966_s27 + $0x5d0] sm:$0xff] }
 0x1fa   : > { %v2317_v2 = vld [vmem:[%s5966_s27 + $0x3d08] sm:$0xff]  ;;  %3065 = vmatpush.msrb.mxu2 %v2181_v1  ;;  %v670_v1 = vld [vmem:[%s5966_s27 + $0x990] sm:$0xff] }
 0x1fb   : > { %v1917_v3 = vld [vmem:[%s5966_s27 + $0x3088] sm:$0xff]  ;;  %3084 = vmatpush.msrb.mxu3 %v2317_v2  ;;  %v806_v2 = vld [vmem:[%s5966_s27 + $0xdd0] sm:$0xff] }
 0x1fc   : > { %v2053_v4 = vld [vmem:[%s5966_s27 + $0x34c8] sm:$0xff]  ;;  %3026 = vmatpush.msrb.mxu0 %v1917_v3  ;;  %v406_v3 = vld [vmem:[%s5966_s27 + $0x150] sm:$0xff] }
 0x1fd   : > { %v2173_v5 = vld [vmem:[%s5966_s27 + $0x3888] sm:$0xff]  ;;  %3045 = vmatpush.msrb.mxu1 %v2053_v4  ;;  %v542_v4 = vld [vmem:[%s5966_s27 + $0x590] sm:$0xff] }
 0x1fe   : > { %v2309_v6 = vld [vmem:[%s5966_s27 + $0x3cc8] sm:$0xff]  ;;  %3066 = vmatpush.msrb.mxu2 %v2173_v5  ;;  %v662_v5 = vld [vmem:[%s5966_s27 + $0x950] sm:$0xff] }
 0x1ff   : > { %v1909_v7 = vld [vmem:[%s5966_s27 + $0x3048] sm:$0xff]  ;;  %3085 = vmatpush.msrb.mxu3 %v2309_v6  ;;  %v798_v6 = vld [vmem:[%s5966_s27 + $0xd90] sm:$0xff] }
 0x200   : > { %v2045_v8 = vld [vmem:[%s5966_s27 + $0x3488] sm:$0xff]  ;;  %3027 = vmatpush.msrb.mxu0 %v1909_v7  ;;  %v398_v7 = vld [vmem:[%s5966_s27 + $0x110] sm:$0xff] }
 0x201   : > { %v2165_v9 = vld [vmem:[%s5966_s27 + $0x3848] sm:$0xff]  ;;  %3046 = vmatpush.msrb.mxu1 %v2045_v8  ;;  %v534_v8 = vld [vmem:[%s5966_s27 + $0x550] sm:$0xff] }
 0x202   : > { %v2301_v10 = vld [vmem:[%s5966_s27 + $0x3c88] sm:$0xff]  ;;  %3067 = vmatpush.msrb.mxu2 %v2165_v9  ;;  %v654_v9 = vld [vmem:[%s5966_s27 + $0x910] sm:$0xff] }
 0x203   : > { %v1901_v11 = vld [vmem:[%s5966_s27 + $0x3008] sm:$0xff]  ;;  %3086 = vmatpush.msrb.mxu3 %v2301_v10  ;;  %v790_v10 = vld [vmem:[%s5966_s27 + $0xd50] sm:$0xff] }
 0x204   : > { %v2037_v12 = vld [vmem:[%s5966_s27 + $0x3448] sm:$0xff]  ;;  %3028 = vmatpush.msrb.mxu0 %v1901_v11  ;;  %v390_v11 = vld [vmem:[%s5966_s27 + $0xd0] sm:$0xff] }
 0x205   : > { %v2157_v13 = vld [vmem:[%s5966_s27 + $0x3808] sm:$0xff]  ;;  %3047 = vmatpush.msrb.mxu1 %v2037_v12  ;;  %v526_v12 = vld [vmem:[%s5966_s27 + $0x510] sm:$0xff] }
 0x206   : > { %v2293_v14 = vld [vmem:[%s5966_s27 + $0x3c48] sm:$0xff]  ;;  %3068 = vmatpush.msrb.mxu2 %v2157_v13  ;;  %3093 = vmatpush.msra.mxu0 %v486_v15  ;;  %v646_v13 = vld [vmem:[%s5966_s27 + $0x8d0] sm:$0xff] }
 0x207   : > { %3087 = vmatpush.msrb.mxu3 %v2293_v14  ;;  %v2029_v17 = vld [vmem:[%s5966_s27 + $0x3408] sm:$0xff]  ;;  %3069 = vmatmul.f32.vlgmr.msrb.gmra.mxu2 %v5685_v20  ;;  %v782_v14 = vld [vmem:[%s5966_s27 + $0xd10] sm:$0xff] }
 0x208   : > { %v2285_v18 = vld [vmem:[%s5966_s27 + $0x3c08] sm:$0xff]  ;;  %3133 = vmatpush.msra.mxu2 %v742_v16  ;;  %3048 = vmatpush.msrb.mxu1 %v2029_v17  ;;  %v382_v15 = vld [vmem:[%s5966_s27 + $0x90] sm:$0xff] }
 0x209   : > { %v5684_v19 = vld.sshfl [vmem:[#allocation1 + $0x20] sm:$0xff pattern:$0x73625140]  ;;  %3088 = vmatpush.msrb.mxu3 %v2285_v18  ;;  %3049 = vmatmul.f32.vlgmr.msrb.gmra.mxu1 %v5686_v25  ;;  %v518_v16 = vld [vmem:[%s5966_s27 + $0x4d0] sm:$0xff] }
 0x20a   : > { %3029 = vmatmul.f32.vlgmr.msrb.gmra.mxu0 %v5684_v19  ;;  %3089 = vmatmul.f32.vlgmr.msrb.gmra.mxu3 %v5687_v26  ;;  %v638_v17 = vld [vmem:[%s5966_s27 + $0x890] sm:$0xff] }
 0x20b   : > { %3094 = vmatpush.msra.mxu0 %v478_v21  ;;  %3113 = vmatpush.msra.mxu1 %v614_v22  ;;  %v774_v18 = vld [vmem:[%s5966_s27 + $0xcd0] sm:$0xff] }
 0x20c   : > { %3134 = vmatpush.msra.mxu2 %v734_v23  ;;  %3153 = vmatpush.msra.mxu3 %v870_v24  ;;  %v374_v19 = vld [vmem:[%s5966_s27 + $0x50] sm:$0xff] }
 0x20d   : > { %3095 = vmatpush.msra.mxu0 %v470_v27  ;;  %3114 = vmatpush.msra.mxu1 %v606_v28  ;;  %v510_v20 = vld [vmem:[%s5966_s27 + $0x490] sm:$0xff] }
 0x20e   : > { %3135 = vmatpush.msra.mxu2 %v726_v29  ;;  %3154 = vmatpush.msra.mxu3 %v862_v30  ;;  %v630_v21 = vld [vmem:[%s5966_s27 + $0x850] sm:$0xff] }
 0x20f   : > { %3096 = vmatpush.msra.mxu0 %v462_v31  ;;  %3115 = vmatpush.msra.mxu1 %v598_v32  ;;  %v766_v22 = vld [vmem:[%s5966_s27 + $0xc90] sm:$0xff] }
 0x210   : > { %3136 = vmatpush.msra.mxu2 %v718_v33  ;;  %3155 = vmatpush.msra.mxu3 %v854_v34  ;;  %v366_v23 = vld [vmem:[%s5966_s27 + $0x10] sm:$0xff] }
 0x211   : > { %3097 = vmatpush.msra.mxu0 %v454_v35  ;;  %3116 = vmatpush.msra.mxu1 %v590_v36  ;;  %v502_v24 = vld [vmem:[%s5966_s27 + $0x450] sm:$0xff] }
 0x212   : > { %3137 = vmatpush.msra.mxu2 %v710_v37  ;;  %3156 = vmatpush.msra.mxu3 %v846_v38  ;;  %v622_v25 = vld [vmem:[%s5966_s27 + $0x810] sm:$0xff] }
 0x213   : > { %3098 = vmatpush.msra.mxu0 %v446_v39  ;;  %3117 = vmatpush.msra.mxu1 %v582_v40  ;;  %v758_v26 = vld [vmem:[%s5966_s27 + $0xc50] sm:$0xff] }
 0x214   : > { %3138 = vmatpush.msra.mxu2 %v702_v41  ;;  %3157 = vmatpush.msra.mxu3 %v838_v42  ;;  %v998_v27 = vld [vmem:[%s5966_s27 + $0x13d0] sm:$0xff] }
 0x215   : > { %3099 = vmatpush.msra.mxu0 %v438_v43  ;;  %3118 = vmatpush.msra.mxu1 %v574_v44  ;;  %v1254_v28 = vld [vmem:[%s5966_s27 + $0x1bd0] sm:$0xff] }
 0x216   : > { %3139 = vmatpush.msra.mxu2 %v694_v49  ;;  %3158 = vmatpush.msra.mxu3 %v830_v50  ;;  %v494_v29 = vld [vmem:[%s5966_s27 + $0x410] sm:$0xff] }
 0x217   : > { %3100 = vmatpush.msra.mxu0 %v430_v51  ;;  %3119 = vmatpush.msra.mxu1 %v566_v52  ;;  %v750_v30 = vld [vmem:[%s5966_s27 + $0xc10] sm:$0xff] }
 0x218   : > { %3140 = vmatpush.msra.mxu2 %v686_v53  ;;  %3159 = vmatpush.msra.mxu3 %v822_v54  ;;  %v990_v31 = vld [vmem:[%s5966_s27 + $0x1390] sm:$0xff] }
 0x219   : > { %3101 = vmatpush.msra.mxu0 %v422_v55  ;;  %3120 = vmatpush.msra.mxu1 %v558_v56  ;;  %v1126_v32 = vld [vmem:[%s5966_s27 + $0x17d0] sm:$0xff] }
 0x21a   : > { %3141 = vmatpush.msra.mxu2 %v678_v57  ;;  %3160 = vmatpush.msra.mxu3 %v814_v58  ;;  %v1246_v33 = vld [vmem:[%s5966_s27 + $0x1b90] sm:$0xff] }
 0x21b   : > { %3102 = vmatpush.msra.mxu0 %v414_v59  ;;  %3121 = vmatpush.msra.mxu1 %v550_v60  ;;  %v1382_v34 = vld [vmem:[%s5966_s27 + $0x1fd0] sm:$0xff] }
 0x21c   : > { %3142 = vmatpush.msra.mxu2 %v670_v1  ;;  %3161 = vmatpush.msra.mxu3 %v806_v2  ;;  %v982_v35 = vld [vmem:[%s5966_s27 + $0x1350] sm:$0xff] }
 0x21d   : > { %3103 = vmatpush.msra.mxu0 %v406_v3  ;;  %3122 = vmatpush.msra.mxu1 %v542_v4  ;;  %v1118_v36 = vld [vmem:[%s5966_s27 + $0x1790] sm:$0xff] }
 0x21e   : > { %3143 = vmatpush.msra.mxu2 %v662_v5  ;;  %3162 = vmatpush.msra.mxu3 %v798_v6  ;;  %v1238_v37 = vld [vmem:[%s5966_s27 + $0x1b50] sm:$0xff] }
 0x21f   : > { %3104 = vmatpush.msra.mxu0 %v398_v7  ;;  %3123 = vmatpush.msra.mxu1 %v534_v8  ;;  %v1374_v38 = vld [vmem:[%s5966_s27 + $0x1f90] sm:$0xff] }
 0x220   : > { %3144 = vmatpush.msra.mxu2 %v654_v9  ;;  %3163 = vmatpush.msra.mxu3 %v790_v10  ;;  %v974_v39 = vld [vmem:[%s5966_s27 + $0x1310] sm:$0xff] }
 0x221   : > { %3105 = vmatpush.msra.mxu0 %v390_v11  ;;  %3124 = vmatpush.msra.mxu1 %v526_v12  ;;  %v1110_v40 = vld [vmem:[%s5966_s27 + $0x1750] sm:$0xff] }
 0x222   : > { %3145 = vmatpush.msra.mxu2 %v646_v13  ;;  %3164 = vmatpush.msra.mxu3 %v782_v14  ;;  %v1230_v41 = vld [vmem:[%s5966_s27 + $0x1b10] sm:$0xff] }
 0x223   : > { %3106 = vmatpush.msra.mxu0 %v382_v15  ;;  %3125 = vmatpush.msra.mxu1 %v518_v16  ;;  %v1366_v42 = vld [vmem:[%s5966_s27 + $0x1f50] sm:$0xff] }
 0x224   : > { %3146 = vmatpush.msra.mxu2 %v638_v17  ;;  %3165 = vmatpush.msra.mxu3 %v774_v18  ;;  %v966_v43 = vld [vmem:[%s5966_s27 + $0x12d0] sm:$0xff] }
 0x225   : > { %3107 = vmatpush.msra.mxu0 %v374_v19  ;;  %3126 = vmatpush.msra.mxu1 %v510_v20  ;;  %v1102_v44 = vld [vmem:[%s5966_s27 + $0x1710] sm:$0xff] }
 0x226   : > { %3147 = vmatpush.msra.mxu2 %v630_v21  ;;  %3166 = vmatpush.msra.mxu3 %v766_v22  ;;  %v1222_v49 = vld [vmem:[%s5966_s27 + $0x1ad0] sm:$0xff] }
 0x227   : > { %3108 = vmatpush.msra.mxu0 %v366_v23  ;;  %3127 = vmatpush.msra.mxu1 %v502_v24  ;;  %v1358_v50 = vld [vmem:[%s5966_s27 + $0x1f10] sm:$0xff] }
 0x228   : > { %3148 = vmatpush.msra.mxu2 %v622_v25  ;;  %3167 = vmatpush.msra.mxu3 %v758_v26  ;;  %v958_v51 = vld [vmem:[%s5966_s27 + $0x1290] sm:$0xff] }
 0x229   : > { %3173 = vmatpush.msrb.mxu0 %v998_v27  ;;  %3128 = vmatpush.msra.mxu1 %v494_v29  ;;  %v1094_v52 = vld [vmem:[%s5966_s27 + $0x16d0] sm:$0xff] }
 0x22a   : > { %3213 = vmatpush.msrb.mxu2 %v1254_v28  ;;  %3168 = vmatpush.msra.mxu3 %v750_v30  ;;  %v1214_v53 = vld [vmem:[%s5966_s27 + $0x1a90] sm:$0xff] }
 0x22b   : > { %3174 = vmatpush.msrb.mxu0 %v990_v31  ;;  %3193 = vmatpush.msrb.mxu1 %v1126_v32  ;;  %v1350_v54 = vld [vmem:[%s5966_s27 + $0x1ed0] sm:$0xff] }
 0x22c   : > { %3214 = vmatpush.msrb.mxu2 %v1246_v33  ;;  %3233 = vmatpush.msrb.mxu3 %v1382_v34  ;;  %v950_v55 = vld [vmem:[%s5966_s27 + $0x1250] sm:$0xff] }
 0x22d   : > { %3175 = vmatpush.msrb.mxu0 %v982_v35  ;;  %3194 = vmatpush.msrb.mxu1 %v1118_v36  ;;  %v1086_v56 = vld [vmem:[%s5966_s27 + $0x1690] sm:$0xff] }
 0x22e   : > { %3215 = vmatpush.msrb.mxu2 %v1238_v37  ;;  %3234 = vmatpush.msrb.mxu3 %v1374_v38  ;;  %v1206_v57 = vld [vmem:[%s5966_s27 + $0x1a50] sm:$0xff] }
 0x22f   : > { %3176 = vmatpush.msrb.mxu0 %v974_v39  ;;  %3195 = vmatpush.msrb.mxu1 %v1110_v40  ;;  %v1342_v58 = vld [vmem:[%s5966_s27 + $0x1e90] sm:$0xff] }
 0x230   : > { %3216 = vmatpush.msrb.mxu2 %v1230_v41  ;;  %3235 = vmatpush.msrb.mxu3 %v1366_v42  ;;  %v942_v59 = vld [vmem:[%s5966_s27 + $0x1210] sm:$0xff] }
 0x231   : > { %3177 = vmatpush.msrb.mxu0 %v966_v43  ;;  %3196 = vmatpush.msrb.mxu1 %v1102_v44  ;;  %v1078_v60 = vld [vmem:[%s5966_s27 + $0x1650] sm:$0xff] }
 0x232   : > { %3217 = vmatpush.msrb.mxu2 %v1222_v49  ;;  %3236 = vmatpush.msrb.mxu3 %v1358_v50  ;;  %v1198_v1 = vld [vmem:[%s5966_s27 + $0x1a10] sm:$0xff] }
 0x233   : > { %3178 = vmatpush.msrb.mxu0 %v958_v51  ;;  %3197 = vmatpush.msrb.mxu1 %v1094_v52  ;;  %v1334_v2 = vld [vmem:[%s5966_s27 + $0x1e50] sm:$0xff] }
 0x234   : > { %3218 = vmatpush.msrb.mxu2 %v1214_v53  ;;  %3237 = vmatpush.msrb.mxu3 %v1350_v54  ;;  %v934_v3 = vld [vmem:[%s5966_s27 + $0x11d0] sm:$0xff] }
 0x235   : > { %3179 = vmatpush.msrb.mxu0 %v950_v55  ;;  %3198 = vmatpush.msrb.mxu1 %v1086_v56  ;;  %v1070_v4 = vld [vmem:[%s5966_s27 + $0x1610] sm:$0xff] }
 0x236   : > { %3219 = vmatpush.msrb.mxu2 %v1206_v57  ;;  %3238 = vmatpush.msrb.mxu3 %v1342_v58  ;;  %v1190_v5 = vld [vmem:[%s5966_s27 + $0x19d0] sm:$0xff] }
 0x237   : > { %3180 = vmatpush.msrb.mxu0 %v942_v59  ;;  %3199 = vmatpush.msrb.mxu1 %v1078_v60  ;;  %v1326_v6 = vld [vmem:[%s5966_s27 + $0x1e10] sm:$0xff] }
 0x238   : > { %3220 = vmatpush.msrb.mxu2 %v1198_v1  ;;  %3239 = vmatpush.msrb.mxu3 %v1334_v2  ;;  %v926_v7 = vld [vmem:[%s5966_s27 + $0x1190] sm:$0xff] }
 0x239   : > { %v1062_v8 = vld [vmem:[%s5966_s27 + $0x15d0] sm:$0xff]  ;;  %3181 = vmatpush.msrb.mxu0 %v934_v3  ;;  %3200 = vmatpush.msrb.mxu1 %v1070_v4 }
 0x23a   : > { %v1182_v9 = vld [vmem:[%s5966_s27 + $0x1990] sm:$0xff]  ;;  %3221 = vmatpush.msrb.mxu2 %v1190_v5  ;;  %3240 = vmatpush.msrb.mxu3 %v1326_v6 }
 0x23b   : > { %v1318_v10 = vld [vmem:[%s5966_s27 + $0x1dd0] sm:$0xff]  ;;  %3182 = vmatpush.msrb.mxu0 %v926_v7  ;;  %3201 = vmatpush.msrb.mxu1 %v1062_v8 }
 0x23c   : > { %v918_v11 = vld [vmem:[%s5966_s27 + $0x1150] sm:$0xff]  ;;  %3222 = vmatpush.msrb.mxu2 %v1182_v9  ;;  %3241 = vmatpush.msrb.mxu3 %v1318_v10 }
 0x23d   : > { %v1054_v12 = vld [vmem:[%s5966_s27 + $0x1590] sm:$0xff]  ;;  %3183 = vmatpush.msrb.mxu0 %v918_v11  ;;  %3149 = vmatmul.f32.vlgmr.msra.gmra.mxu2 %v6108_v45 }
 0x23e   : > { %v1174_v13 = vld [vmem:[%s5966_s27 + $0x1950] sm:$0xff]  ;;  %3202 = vmatpush.msrb.mxu1 %v1054_v12  ;;  %3109 = vmatmul.f32.vlgmr.msra.gmra.mxu0 %v6110_v46 }
 0x23f   : > { %v1310_v14 = vld [vmem:[%s5966_s27 + $0x1d90] sm:$0xff]  ;;  %3223 = vmatpush.msrb.mxu2 %v1174_v13  ;;  %3169 = vmatmul.f32.vlgmr.msra.gmra.mxu3 %v6112_v47 }
 0x240   : > { %v910_v15 = vld [vmem:[%s5966_s27 + $0x1110] sm:$0xff]  ;;  %3242 = vmatpush.msrb.mxu3 %v1310_v14  ;;  %3129 = vmatmul.f32.vlgmr.msra.gmra.mxu1 %v6114_v48 }
 0x241   : > { %v1046_v16 = vld [vmem:[%s5966_s27 + $0x1550] sm:$0xff]  ;;  %3184 = vmatpush.msrb.mxu0 %v910_v15 }
 0x242   : > { %v1166_v17 = vld [vmem:[%s5966_s27 + $0x1910] sm:$0xff]  ;;  %3203 = vmatpush.msrb.mxu1 %v1046_v16 }
 0x243   : > { %v1302_v18 = vld [vmem:[%s5966_s27 + $0x1d50] sm:$0xff]  ;;  %3224 = vmatpush.msrb.mxu2 %v1166_v17 }
 0x244   : > { %v902_v19 = vld [vmem:[%s5966_s27 + $0x10d0] sm:$0xff]  ;;  %3243 = vmatpush.msrb.mxu3 %v1302_v18 }
 0x245   : > { %v1038_v20 = vld [vmem:[%s5966_s27 + $0x1510] sm:$0xff]  ;;  %3185 = vmatpush.msrb.mxu0 %v902_v19 }
 0x246   : > { %v1158_v21 = vld [vmem:[%s5966_s27 + $0x18d0] sm:$0xff]  ;;  %3204 = vmatpush.msrb.mxu1 %v1038_v20 }
 0x247   : > { %v1294_v22 = vld [vmem:[%s5966_s27 + $0x1d10] sm:$0xff]  ;;  %3225 = vmatpush.msrb.mxu2 %v1158_v21 }
 0x248   : > { %v894_v23 = vld [vmem:[%s5966_s27 + $0x1090] sm:$0xff]  ;;  %3244 = vmatpush.msrb.mxu3 %v1294_v22 }
 0x249   : > { %v1030_v24 = vld [vmem:[%s5966_s27 + $0x14d0] sm:$0xff]  ;;  %3186 = vmatpush.msrb.mxu0 %v894_v23 }
 0x24a   : > { %v1150_v25 = vld [vmem:[%s5966_s27 + $0x1890] sm:$0xff]  ;;  %3205 = vmatpush.msrb.mxu1 %v1030_v24 }
 0x24b   : > { %v1286_v26 = vld [vmem:[%s5966_s27 + $0x1cd0] sm:$0xff]  ;;  %3226 = vmatpush.msrb.mxu2 %v1150_v25 }
 0x24c   : > { %v886_v27 = vld [vmem:[%s5966_s27 + $0x1050] sm:$0xff]  ;;  %3245 = vmatpush.msrb.mxu3 %v1286_v26 }
 0x24d   : > { %v1022_v28 = vld [vmem:[%s5966_s27 + $0x1490] sm:$0xff]  ;;  %3187 = vmatpush.msrb.mxu0 %v886_v27 }
 0x24e   : > { %v1142_v29 = vld [vmem:[%s5966_s27 + $0x1850] sm:$0xff]  ;;  %3206 = vmatpush.msrb.mxu1 %v1022_v28 }
 0x24f   : > { %v1278_v30 = vld [vmem:[%s5966_s27 + $0x1c90] sm:$0xff]  ;;  %3227 = vmatpush.msrb.mxu2 %v1142_v29 }
 0x250   : > { %v878_v31 = vld [vmem:[%s5966_s27 + $0x1010] sm:$0xff]  ;;  %3246 = vmatpush.msrb.mxu3 %v1278_v30 }
 0x251   : > { %v1014_v32 = vld [vmem:[%s5966_s27 + $0x1450] sm:$0xff]  ;;  %3188 = vmatpush.msrb.mxu0 %v878_v31 }
 0x252   : > { %v1134_v33 = vld [vmem:[%s5966_s27 + $0x1810] sm:$0xff]  ;;  %3207 = vmatpush.msrb.mxu1 %v1014_v32  ;;  %3189 = vmatmul.f32.vlgmr.msrb.gmra.mxu0 %v6130_v62 }
 0x253   : > { %v1270_v34 = vld [vmem:[%s5966_s27 + $0x1c50] sm:$0xff]  ;;  %3228 = vmatpush.msrb.mxu2 %v1134_v33 }
 0x254   : > { %v1510_v35 = vld [vmem:[%s5966_s27 + $0x23d0] sm:$0xff]  ;;  %3247 = vmatpush.msrb.mxu3 %v1270_v34  ;;  %3229 = vmatmul.f32.vlgmr.msrb.gmra.mxu2 %v6128_v61 }
 0x255   : > { %v1766_v36 = vld [vmem:[%s5966_s27 + $0x2bd0] sm:$0xff]  ;;  %3253 = vmatpush.msra.mxu0 %v1510_v35 }
 0x256   : > { %v1006_v37 = vld [vmem:[%s5966_s27 + $0x1410] sm:$0xff]  ;;  %3293 = vmatpush.msra.mxu2 %v1766_v36 }
 0x257   : > { %v1262_v38 = vld [vmem:[%s5966_s27 + $0x1c10] sm:$0xff]  ;;  %3208 = vmatpush.msrb.mxu1 %v1006_v37 }
 0x258   : > { %v1502_v39 = vld [vmem:[%s5966_s27 + $0x2390] sm:$0xff]  ;;  %3248 = vmatpush.msrb.mxu3 %v1262_v38  ;;  %3209 = vmatmul.f32.vlgmr.msrb.gmra.mxu1 %v6134_v0 }
 0x259   : > { %v1638_v40 = vld [vmem:[%s5966_s27 + $0x27d0] sm:$0xff]  ;;  %3254 = vmatpush.msra.mxu0 %v1502_v39  ;;  %3249 = vmatmul.f32.vlgmr.msrb.gmra.mxu3 %v6132_v63 }
 0x25a   : > { %v1758_v41 = vld [vmem:[%s5966_s27 + $0x2b90] sm:$0xff]  ;;  %3273 = vmatpush.msra.mxu1 %v1638_v40 }
 0x25b   : > { %v1894_v42 = vld [vmem:[%s5966_s27 + $0x2fd0] sm:$0xff]  ;;  %3294 = vmatpush.msra.mxu2 %v1758_v41 }
 0x25c   : > { %v1494_v43 = vld [vmem:[%s5966_s27 + $0x2350] sm:$0xff]  ;;  %3313 = vmatpush.msra.mxu3 %v1894_v42 }
 0x25d   : > { %v1630_v44 = vld [vmem:[%s5966_s27 + $0x2790] sm:$0xff]  ;;  %3255 = vmatpush.msra.mxu0 %v1494_v43 }
 0x25e   : > { %v1750_v49 = vld [vmem:[%s5966_s27 + $0x2b50] sm:$0xff]  ;;  %3274 = vmatpush.msra.mxu1 %v1630_v44 }
 0x25f   : > { %v1886_v50 = vld [vmem:[%s5966_s27 + $0x2f90] sm:$0xff]  ;;  %3295 = vmatpush.msra.mxu2 %v1750_v49 }
 0x260   : > { %v1486_v51 = vld [vmem:[%s5966_s27 + $0x2310] sm:$0xff]  ;;  %3314 = vmatpush.msra.mxu3 %v1886_v50 }
 0x261   : > { %v1622_v52 = vld [vmem:[%s5966_s27 + $0x2750] sm:$0xff]  ;;  %3256 = vmatpush.msra.mxu0 %v1486_v51  ;;  %v5688_v51 = vld.sshfl [vmem:[#allocation1] sm:$0xff pattern:$0x73625140] }
 0x262   : > { %v1742_v53 = vld [vmem:[%s5966_s27 + $0x2b10] sm:$0xff]  ;;  %3275 = vmatpush.msra.mxu1 %v1622_v52  ;;  %v5689_v52 = vld.sshfl [vmem:[#allocation1 + $0x10] sm:$0xff pattern:$0x73625140] }
 0x263   : > { %v1878_v54 = vld [vmem:[%s5966_s27 + $0x2f50] sm:$0xff]  ;;  %3296 = vmatpush.msra.mxu2 %v1742_v53 }
 0x264   : > { %v1478_v55 = vld [vmem:[%s5966_s27 + $0x22d0] sm:$0xff]  ;;  %3315 = vmatpush.msra.mxu3 %v1878_v54 }
 0x265   : > { %v1614_v56 = vld [vmem:[%s5966_s27 + $0x2710] sm:$0xff]  ;;  %3257 = vmatpush.msra.mxu0 %v1478_v55 }
 0x266   : > { %v1734_v57 = vld [vmem:[%s5966_s27 + $0x2ad0] sm:$0xff]  ;;  %3276 = vmatpush.msra.mxu1 %v1614_v56 }
 0x267   : > { %v1870_v58 = vld [vmem:[%s5966_s27 + $0x2f10] sm:$0xff]  ;;  %3297 = vmatpush.msra.mxu2 %v1734_v57 }
 0x268   : > { %v1470_v59 = vld [vmem:[%s5966_s27 + $0x2290] sm:$0xff]  ;;  %3316 = vmatpush.msra.mxu3 %v1870_v58  ;;  %v5691_v58 = vld.sshfl [vmem:[#allocation1 + $0x18] sm:$0xff pattern:$0x73625140] }
 0x269   : > { %v1606_v60 = vld [vmem:[%s5966_s27 + $0x26d0] sm:$0xff]  ;;  %3258 = vmatpush.msra.mxu0 %v1470_v59 }
 0x26a   : > { %v1726_v1 = vld [vmem:[%s5966_s27 + $0x2a90] sm:$0xff]  ;;  %3277 = vmatpush.msra.mxu1 %v1606_v60 }
 0x26b   : > { %v1862_v2 = vld [vmem:[%s5966_s27 + $0x2ed0] sm:$0xff]  ;;  %3298 = vmatpush.msra.mxu2 %v1726_v1 }
 0x26c   : > { %v1462_v3 = vld [vmem:[%s5966_s27 + $0x2250] sm:$0xff]  ;;  %3317 = vmatpush.msra.mxu3 %v1862_v2 }
 0x26d   : > { %v1598_v4 = vld [vmem:[%s5966_s27 + $0x2690] sm:$0xff]  ;;  %3259 = vmatpush.msra.mxu0 %v1462_v3 }
 0x26e   : > { %v1718_v5 = vld [vmem:[%s5966_s27 + $0x2a50] sm:$0xff]  ;;  %3278 = vmatpush.msra.mxu1 %v1598_v4 }
 0x26f   : > { %v1854_v6 = vld [vmem:[%s5966_s27 + $0x2e90] sm:$0xff]  ;;  %3299 = vmatpush.msra.mxu2 %v1718_v5 }
 0x270   : > { %v1454_v7 = vld [vmem:[%s5966_s27 + $0x2210] sm:$0xff]  ;;  %3318 = vmatpush.msra.mxu3 %v1854_v6 }
 0x271   : > { %v1590_v8 = vld [vmem:[%s5966_s27 + $0x2650] sm:$0xff]  ;;  %3260 = vmatpush.msra.mxu0 %v1454_v7 }
 0x272   : > { %v1710_v9 = vld [vmem:[%s5966_s27 + $0x2a10] sm:$0xff]  ;;  %3279 = vmatpush.msra.mxu1 %v1590_v8 }
 0x273   : > { %v1846_v10 = vld [vmem:[%s5966_s27 + $0x2e50] sm:$0xff]  ;;  %3300 = vmatpush.msra.mxu2 %v1710_v9 }
 0x274   : > { %v1446_v11 = vld [vmem:[%s5966_s27 + $0x21d0] sm:$0xff]  ;;  %3319 = vmatpush.msra.mxu3 %v1846_v10 }
 0x275   : > { %v1582_v12 = vld [vmem:[%s5966_s27 + $0x2610] sm:$0xff]  ;;  %3261 = vmatpush.msra.mxu0 %v1446_v11 }
 0x276   : > { %v1702_v13 = vld [vmem:[%s5966_s27 + $0x29d0] sm:$0xff]  ;;  %3280 = vmatpush.msra.mxu1 %v1582_v12 }
 0x277   : > { %v1838_v14 = vld [vmem:[%s5966_s27 + $0x2e10] sm:$0xff]  ;;  %3301 = vmatpush.msra.mxu2 %v1702_v13 }
 0x278   : > { %v1438_v15 = vld [vmem:[%s5966_s27 + $0x2190] sm:$0xff]  ;;  %3320 = vmatpush.msra.mxu3 %v1838_v14 }
 0x279   : > { %v1574_v16 = vld [vmem:[%s5966_s27 + $0x25d0] sm:$0xff]  ;;  %3262 = vmatpush.msra.mxu0 %v1438_v15 }
 0x27a   : > { %v1694_v17 = vld [vmem:[%s5966_s27 + $0x2990] sm:$0xff]  ;;  %3281 = vmatpush.msra.mxu1 %v1574_v16 }
 0x27b   : > { %v1830_v18 = vld [vmem:[%s5966_s27 + $0x2dd0] sm:$0xff]  ;;  %3302 = vmatpush.msra.mxu2 %v1694_v17 }
 0x27c   : > { %v1430_v19 = vld [vmem:[%s5966_s27 + $0x2150] sm:$0xff]  ;;  %3321 = vmatpush.msra.mxu3 %v1830_v18 }
 0x27d   : > { %v1566_v20 = vld [vmem:[%s5966_s27 + $0x2590] sm:$0xff]  ;;  %3263 = vmatpush.msra.mxu0 %v1430_v19 }
 0x27e   : > { %v1686_v21 = vld [vmem:[%s5966_s27 + $0x2950] sm:$0xff]  ;;  %3282 = vmatpush.msra.mxu1 %v1566_v20 }
 0x27f   : > { %v1822_v22 = vld [vmem:[%s5966_s27 + $0x2d90] sm:$0xff]  ;;  %3303 = vmatpush.msra.mxu2 %v1686_v21 }
 0x280   : > { %v1422_v23 = vld [vmem:[%s5966_s27 + $0x2110] sm:$0xff]  ;;  %3322 = vmatpush.msra.mxu3 %v1822_v22 }
 0x281   : > { %v1558_v24 = vld [vmem:[%s5966_s27 + $0x2550] sm:$0xff]  ;;  %3264 = vmatpush.msra.mxu0 %v1422_v23 }
 0x282   : > { %v1678_v25 = vld [vmem:[%s5966_s27 + $0x2910] sm:$0xff]  ;;  %3283 = vmatpush.msra.mxu1 %v1558_v24 }
 0x283   : > { %v1814_v26 = vld [vmem:[%s5966_s27 + $0x2d50] sm:$0xff]  ;;  %3304 = vmatpush.msra.mxu2 %v1678_v25 }
 0x284   : > { %v1414_v27 = vld [vmem:[%s5966_s27 + $0x20d0] sm:$0xff]  ;;  %3323 = vmatpush.msra.mxu3 %v1814_v26 }
 0x285   : > { %v1550_v28 = vld [vmem:[%s5966_s27 + $0x2510] sm:$0xff]  ;;  %3265 = vmatpush.msra.mxu0 %v1414_v27 }
 0x286   : > { %v1670_v29 = vld [vmem:[%s5966_s27 + $0x28d0] sm:$0xff]  ;;  %3284 = vmatpush.msra.mxu1 %v1550_v28 }
 0x287   : > { %v1806_v30 = vld [vmem:[%s5966_s27 + $0x2d10] sm:$0xff]  ;;  %3305 = vmatpush.msra.mxu2 %v1670_v29 }
 0x288   : > { %v1406_v31 = vld [vmem:[%s5966_s27 + $0x2090] sm:$0xff]  ;;  %3324 = vmatpush.msra.mxu3 %v1806_v30 }
 0x289   : > { %v1542_v32 = vld [vmem:[%s5966_s27 + $0x24d0] sm:$0xff]  ;;  %3266 = vmatpush.msra.mxu0 %v1406_v31 }
 0x28a   : > { %v1662_v33 = vld [vmem:[%s5966_s27 + $0x2890] sm:$0xff]  ;;  %3285 = vmatpush.msra.mxu1 %v1542_v32 }
 0x28b   : > { %v1798_v34 = vld [vmem:[%s5966_s27 + $0x2cd0] sm:$0xff]  ;;  %3306 = vmatpush.msra.mxu2 %v1662_v33 }
 0x28c   : > { %v1398_v35 = vld [vmem:[%s5966_s27 + $0x2050] sm:$0xff]  ;;  %3325 = vmatpush.msra.mxu3 %v1798_v34 }
 0x28d   : > { %v1534_v36 = vld [vmem:[%s5966_s27 + $0x2490] sm:$0xff]  ;;  %3267 = vmatpush.msra.mxu0 %v1398_v35 }
 0x28e   : > { %v1654_v37 = vld [vmem:[%s5966_s27 + $0x2850] sm:$0xff]  ;;  %3286 = vmatpush.msra.mxu1 %v1534_v36 }
 0x28f   : > { %v1790_v38 = vld [vmem:[%s5966_s27 + $0x2c90] sm:$0xff]  ;;  %3307 = vmatpush.msra.mxu2 %v1654_v37 }
 0x290   : > { %v1390_v39 = vld [vmem:[%s5966_s27 + $0x2010] sm:$0xff]  ;;  %3326 = vmatpush.msra.mxu3 %v1790_v38 }
 0x291   : > { %v1526_v40 = vld [vmem:[%s5966_s27 + $0x2450] sm:$0xff]  ;;  %3268 = vmatpush.msra.mxu0 %v1390_v39 }
 0x292   : > { %v1646_v41 = vld [vmem:[%s5966_s27 + $0x2810] sm:$0xff]  ;;  %3287 = vmatpush.msra.mxu1 %v1526_v40  ;;  %3269 = vmatmul.f32.vlgmr.msra.gmra.mxu0 %v5688_v51 }
 0x293   : > { %v1782_v42 = vld [vmem:[%s5966_s27 + $0x2c50] sm:$0xff]  ;;  %3308 = vmatpush.msra.mxu2 %v1646_v41 }
 0x294   : > { %v2022_v43 = vld [vmem:[%s5966_s27 + $0x33d0] sm:$0xff]  ;;  %3327 = vmatpush.msra.mxu3 %v1782_v42  ;;  %3309 = vmatmul.f32.vlgmr.msra.gmra.mxu2 %v5689_v52 }
 0x295   : > { %v2278_v44 = vld [vmem:[%s5966_s27 + $0x3bd0] sm:$0xff]  ;;  %3333 = vmatpush.msrb.mxu0 %v2022_v43 }
 0x296   : > { %v1518_v49 = vld [vmem:[%s5966_s27 + $0x2410] sm:$0xff]  ;;  %3373 = vmatpush.msrb.mxu2 %v2278_v44 }
 0x297   : > { %v1774_v50 = vld [vmem:[%s5966_s27 + $0x2c10] sm:$0xff]  ;;  %3288 = vmatpush.msra.mxu1 %v1518_v49 }
 0x298   : > { %v2014_v53 = vld [vmem:[%s5966_s27 + $0x3390] sm:$0xff]  ;;  %3328 = vmatpush.msra.mxu3 %v1774_v50 }
 0x299   : > { %v2150_v54 = vld [vmem:[%s5966_s27 + $0x37d0] sm:$0xff]  ;;  %3329 = vmatmul.f32.vlgmr.msra.gmra.mxu3 %v5691_v58  ;;  %3334 = vmatpush.msrb.mxu0 %v2014_v53 }
 0x29a   : > { %v2270_v55 = vld [vmem:[%s5966_s27 + $0x3b90] sm:$0xff]  ;;  %3353 = vmatpush.msrb.mxu1 %v2150_v54 }
 0x29b   : > { %v2406_v56 = vld [vmem:[%s5966_s27 + $0x3fd0] sm:$0xff]  ;;  %3374 = vmatpush.msrb.mxu2 %v2270_v55 }
 0x29c   : > { %v5690_v57 = vld.sshfl [vmem:[#allocation1 + $0x8] sm:$0xff pattern:$0x73625140]  ;;  %3393 = vmatpush.msrb.mxu3 %v2406_v56 }
 0x29d   : > { %3289 = vmatmul.f32.vlgmr.msra.gmra.mxu1 %v5690_v57  ;;  %v2006_v59 = vld [vmem:[%s5966_s27 + $0x3350] sm:$0xff] }
 0x29e   : > { %v2142_v60 = vld [vmem:[%s5966_s27 + $0x3790] sm:$0xff]  ;;  %3335 = vmatpush.msrb.mxu0 %v2006_v59  ;;  %v487_v59 = vld [vmem:[%s5966_s27 + $0x3d8] sm:$0xff] }
 0x29f   : > { %v2262_v1 = vld [vmem:[%s5966_s27 + $0x3b50] sm:$0xff]  ;;  %3354 = vmatpush.msrb.mxu1 %v2142_v60  ;;  %v743_v60 = vld [vmem:[%s5966_s27 + $0xbd8] sm:$0xff] }
 0x2a0   : > { %v2398_v2 = vld [vmem:[%s5966_s27 + $0x3f90] sm:$0xff]  ;;  %3375 = vmatpush.msrb.mxu2 %v2262_v1 }
 0x2a1   : > { %v1998_v3 = vld [vmem:[%s5966_s27 + $0x3310] sm:$0xff]  ;;  %3394 = vmatpush.msrb.mxu3 %v2398_v2 }
 0x2a2   : > { %v2134_v4 = vld [vmem:[%s5966_s27 + $0x3750] sm:$0xff]  ;;  %3336 = vmatpush.msrb.mxu0 %v1998_v3  ;;  %v5692_v3 = vld.sshfl [vmem:[#allocation1 + $0x20] sm:$0xff pattern:$0x73625140] }
 0x2a3   : > { %v2254_v5 = vld [vmem:[%s5966_s27 + $0x3b10] sm:$0xff]  ;;  %3355 = vmatpush.msrb.mxu1 %v2134_v4  ;;  %v5693_v4 = vld.sshfl [vmem:[#allocation1 + $0x30] sm:$0xff pattern:$0x73625140] }
 0x2a4   : > { %v2390_v6 = vld [vmem:[%s5966_s27 + $0x3f50] sm:$0xff]  ;;  %3376 = vmatpush.msrb.mxu2 %v2254_v5  ;;  %v479_v5 = vld [vmem:[%s5966_s27 + $0x398] sm:$0xff] }
 0x2a5   : > { %v1990_v7 = vld [vmem:[%s5966_s27 + $0x32d0] sm:$0xff]  ;;  %3395 = vmatpush.msrb.mxu3 %v2390_v6  ;;  %v615_v6 = vld [vmem:[%s5966_s27 + $0x7d8] sm:$0xff] }
 0x2a6   : > { %v2126_v8 = vld [vmem:[%s5966_s27 + $0x3710] sm:$0xff]  ;;  %3337 = vmatpush.msrb.mxu0 %v1990_v7  ;;  %v735_v7 = vld [vmem:[%s5966_s27 + $0xb98] sm:$0xff] }
 0x2a7   : > { %v2246_v9 = vld [vmem:[%s5966_s27 + $0x3ad0] sm:$0xff]  ;;  %3356 = vmatpush.msrb.mxu1 %v2126_v8  ;;  %v871_v8 = vld [vmem:[%s5966_s27 + $0xfd8] sm:$0xff] }
 0x2a8   : > { %v2382_v10 = vld [vmem:[%s5966_s27 + $0x3f10] sm:$0xff]  ;;  %3377 = vmatpush.msrb.mxu2 %v2246_v9 }
 0x2a9   : > { %v1982_v11 = vld [vmem:[%s5966_s27 + $0x3290] sm:$0xff]  ;;  %3396 = vmatpush.msrb.mxu3 %v2382_v10  ;;  %v5695_v10 = vld.sshfl [vmem:[#allocation1 + $0x38] sm:$0xff pattern:$0x73625140] }
 0x2aa   : > { %v2118_v12 = vld [vmem:[%s5966_s27 + $0x36d0] sm:$0xff]  ;;  %3338 = vmatpush.msrb.mxu0 %v1982_v11  ;;  %v471_v11 = vld [vmem:[%s5966_s27 + $0x358] sm:$0xff] }
 0x2ab   : > { %v2238_v13 = vld [vmem:[%s5966_s27 + $0x3a90] sm:$0xff]  ;;  %3357 = vmatpush.msrb.mxu1 %v2118_v12  ;;  %v607_v12 = vld [vmem:[%s5966_s27 + $0x798] sm:$0xff] }
 0x2ac   : > { %v2374_v14 = vld [vmem:[%s5966_s27 + $0x3ed0] sm:$0xff]  ;;  %3378 = vmatpush.msrb.mxu2 %v2238_v13  ;;  %v727_v13 = vld [vmem:[%s5966_s27 + $0xb58] sm:$0xff] }
 0x2ad   : > { %v1974_v15 = vld [vmem:[%s5966_s27 + $0x3250] sm:$0xff]  ;;  %3397 = vmatpush.msrb.mxu3 %v2374_v14  ;;  %v863_v14 = vld [vmem:[%s5966_s27 + $0xf98] sm:$0xff] }
 0x2ae   : > { %v2110_v16 = vld [vmem:[%s5966_s27 + $0x3690] sm:$0xff]  ;;  %3339 = vmatpush.msrb.mxu0 %v1974_v15  ;;  %v463_v15 = vld [vmem:[%s5966_s27 + $0x318] sm:$0xff] }
 0x2af   : > { %v2230_v17 = vld [vmem:[%s5966_s27 + $0x3a50] sm:$0xff]  ;;  %3358 = vmatpush.msrb.mxu1 %v2110_v16  ;;  %v599_v16 = vld [vmem:[%s5966_s27 + $0x758] sm:$0xff] }
 0x2b0   : > { %v2366_v18 = vld [vmem:[%s5966_s27 + $0x3e90] sm:$0xff]  ;;  %3379 = vmatpush.msrb.mxu2 %v2230_v17  ;;  %v719_v17 = vld [vmem:[%s5966_s27 + $0xb18] sm:$0xff] }
 0x2b1   : > { %v1966_v19 = vld [vmem:[%s5966_s27 + $0x3210] sm:$0xff]  ;;  %3398 = vmatpush.msrb.mxu3 %v2366_v18  ;;  %v855_v18 = vld [vmem:[%s5966_s27 + $0xf58] sm:$0xff] }
 0x2b2   : > { %v2102_v20 = vld [vmem:[%s5966_s27 + $0x3650] sm:$0xff]  ;;  %3340 = vmatpush.msrb.mxu0 %v1966_v19  ;;  %v455_v19 = vld [vmem:[%s5966_s27 + $0x2d8] sm:$0xff] }
 0x2b3   : > { %v2222_v21 = vld [vmem:[%s5966_s27 + $0x3a10] sm:$0xff]  ;;  %3359 = vmatpush.msrb.mxu1 %v2102_v20  ;;  %v591_v20 = vld [vmem:[%s5966_s27 + $0x718] sm:$0xff] }
 0x2b4   : > { %v2358_v22 = vld [vmem:[%s5966_s27 + $0x3e50] sm:$0xff]  ;;  %3380 = vmatpush.msrb.mxu2 %v2222_v21  ;;  %v711_v21 = vld [vmem:[%s5966_s27 + $0xad8] sm:$0xff] }
 0x2b5   : > { %v1958_v23 = vld [vmem:[%s5966_s27 + $0x31d0] sm:$0xff]  ;;  %3399 = vmatpush.msrb.mxu3 %v2358_v22  ;;  %v847_v22 = vld [vmem:[%s5966_s27 + $0xf18] sm:$0xff] }
 0x2b6   : > { %v2094_v24 = vld [vmem:[%s5966_s27 + $0x3610] sm:$0xff]  ;;  %3341 = vmatpush.msrb.mxu0 %v1958_v23  ;;  %v447_v23 = vld [vmem:[%s5966_s27 + $0x298] sm:$0xff] }
 0x2b7   : > { %v2214_v25 = vld [vmem:[%s5966_s27 + $0x39d0] sm:$0xff]  ;;  %3360 = vmatpush.msrb.mxu1 %v2094_v24  ;;  %v583_v24 = vld [vmem:[%s5966_s27 + $0x6d8] sm:$0xff] }
 0x2b8   : > { %v2350_v26 = vld [vmem:[%s5966_s27 + $0x3e10] sm:$0xff]  ;;  %3381 = vmatpush.msrb.mxu2 %v2214_v25  ;;  %v703_v25 = vld [vmem:[%s5966_s27 + $0xa98] sm:$0xff] }
 0x2b9   : > { %v1950_v27 = vld [vmem:[%s5966_s27 + $0x3190] sm:$0xff]  ;;  %3400 = vmatpush.msrb.mxu3 %v2350_v26  ;;  %v839_v26 = vld [vmem:[%s5966_s27 + $0xed8] sm:$0xff] }
 0x2ba   : > { %v2086_v28 = vld [vmem:[%s5966_s27 + $0x35d0] sm:$0xff]  ;;  %3342 = vmatpush.msrb.mxu0 %v1950_v27  ;;  %v439_v27 = vld [vmem:[%s5966_s27 + $0x258] sm:$0xff] }
 0x2bb   : > { %v2206_v29 = vld [vmem:[%s5966_s27 + $0x3990] sm:$0xff]  ;;  %3361 = vmatpush.msrb.mxu1 %v2086_v28  ;;  %v575_v28 = vld [vmem:[%s5966_s27 + $0x698] sm:$0xff] }
 0x2bc   : > { %v2342_v30 = vld [vmem:[%s5966_s27 + $0x3dd0] sm:$0xff]  ;;  %3382 = vmatpush.msrb.mxu2 %v2206_v29  ;;  %v695_v29 = vld [vmem:[%s5966_s27 + $0xa58] sm:$0xff] }
 0x2bd   : > { %v1942_v31 = vld [vmem:[%s5966_s27 + $0x3150] sm:$0xff]  ;;  %3401 = vmatpush.msrb.mxu3 %v2342_v30  ;;  %v831_v30 = vld [vmem:[%s5966_s27 + $0xe98] sm:$0xff] }
 0x2be   : > { %v2078_v32 = vld [vmem:[%s5966_s27 + $0x3590] sm:$0xff]  ;;  %3343 = vmatpush.msrb.mxu0 %v1942_v31  ;;  %v431_v31 = vld [vmem:[%s5966_s27 + $0x218] sm:$0xff] }
 0x2bf   : > { %v2198_v33 = vld [vmem:[%s5966_s27 + $0x3950] sm:$0xff]  ;;  %3362 = vmatpush.msrb.mxu1 %v2078_v32  ;;  %v567_v32 = vld [vmem:[%s5966_s27 + $0x658] sm:$0xff] }
 0x2c0   : > { %v2334_v34 = vld [vmem:[%s5966_s27 + $0x3d90] sm:$0xff]  ;;  %3383 = vmatpush.msrb.mxu2 %v2198_v33  ;;  %v687_v33 = vld [vmem:[%s5966_s27 + $0xa18] sm:$0xff] }
 0x2c1   : > { %v1934_v35 = vld [vmem:[%s5966_s27 + $0x3110] sm:$0xff]  ;;  %3402 = vmatpush.msrb.mxu3 %v2334_v34  ;;  %v823_v34 = vld [vmem:[%s5966_s27 + $0xe58] sm:$0xff] }
 0x2c2   : > { %v2070_v36 = vld [vmem:[%s5966_s27 + $0x3550] sm:$0xff]  ;;  %3344 = vmatpush.msrb.mxu0 %v1934_v35  ;;  %v423_v35 = vld [vmem:[%s5966_s27 + $0x1d8] sm:$0xff] }
 0x2c3   : > { %v2190_v37 = vld [vmem:[%s5966_s27 + $0x3910] sm:$0xff]  ;;  %3363 = vmatpush.msrb.mxu1 %v2070_v36  ;;  %v559_v36 = vld [vmem:[%s5966_s27 + $0x618] sm:$0xff] }
 0x2c4   : > { %v2326_v38 = vld [vmem:[%s5966_s27 + $0x3d50] sm:$0xff]  ;;  %3384 = vmatpush.msrb.mxu2 %v2190_v37  ;;  %v679_v37 = vld [vmem:[%s5966_s27 + $0x9d8] sm:$0xff] }
 0x2c5   : > { %v1926_v39 = vld [vmem:[%s5966_s27 + $0x30d0] sm:$0xff]  ;;  %3403 = vmatpush.msrb.mxu3 %v2326_v38  ;;  %v815_v38 = vld [vmem:[%s5966_s27 + $0xe18] sm:$0xff] }
 0x2c6   : > { %v2062_v40 = vld [vmem:[%s5966_s27 + $0x3510] sm:$0xff]  ;;  %3345 = vmatpush.msrb.mxu0 %v1926_v39  ;;  %v415_v39 = vld [vmem:[%s5966_s27 + $0x198] sm:$0xff] }
 0x2c7   : > { %v2182_v41 = vld [vmem:[%s5966_s27 + $0x38d0] sm:$0xff]  ;;  %3364 = vmatpush.msrb.mxu1 %v2062_v40  ;;  %v551_v40 = vld [vmem:[%s5966_s27 + $0x5d8] sm:$0xff] }
 0x2c8   : > { %v2318_v42 = vld [vmem:[%s5966_s27 + $0x3d10] sm:$0xff]  ;;  %3385 = vmatpush.msrb.mxu2 %v2182_v41  ;;  %v671_v41 = vld [vmem:[%s5966_s27 + $0x998] sm:$0xff] }
 0x2c9   : > { %v1918_v43 = vld [vmem:[%s5966_s27 + $0x3090] sm:$0xff]  ;;  %3404 = vmatpush.msrb.mxu3 %v2318_v42  ;;  %v807_v42 = vld [vmem:[%s5966_s27 + $0xdd8] sm:$0xff] }
 0x2ca   : > { %v2054_v44 = vld [vmem:[%s5966_s27 + $0x34d0] sm:$0xff]  ;;  %3346 = vmatpush.msrb.mxu0 %v1918_v43  ;;  %v407_v43 = vld [vmem:[%s5966_s27 + $0x158] sm:$0xff] }
 0x2cb   : > { %v2174_v49 = vld [vmem:[%s5966_s27 + $0x3890] sm:$0xff]  ;;  %3365 = vmatpush.msrb.mxu1 %v2054_v44  ;;  %v543_v44 = vld [vmem:[%s5966_s27 + $0x598] sm:$0xff] }
 0x2cc   : > { %v2310_v50 = vld [vmem:[%s5966_s27 + $0x3cd0] sm:$0xff]  ;;  %3386 = vmatpush.msrb.mxu2 %v2174_v49  ;;  %v663_v49 = vld [vmem:[%s5966_s27 + $0x958] sm:$0xff] }
 0x2cd   : > { %v1910_v51 = vld [vmem:[%s5966_s27 + $0x3050] sm:$0xff]  ;;  %3405 = vmatpush.msrb.mxu3 %v2310_v50  ;;  %v799_v50 = vld [vmem:[%s5966_s27 + $0xd98] sm:$0xff] }
 0x2ce   : > { %v2046_v52 = vld [vmem:[%s5966_s27 + $0x3490] sm:$0xff]  ;;  %3347 = vmatpush.msrb.mxu0 %v1910_v51  ;;  %v399_v51 = vld [vmem:[%s5966_s27 + $0x118] sm:$0xff] }
 0x2cf   : > { %v2166_v53 = vld [vmem:[%s5966_s27 + $0x3850] sm:$0xff]  ;;  %3366 = vmatpush.msrb.mxu1 %v2046_v52  ;;  %v535_v52 = vld [vmem:[%s5966_s27 + $0x558] sm:$0xff] }
 0x2d0   : > { %v2302_v54 = vld [vmem:[%s5966_s27 + $0x3c90] sm:$0xff]  ;;  %3387 = vmatpush.msrb.mxu2 %v2166_v53  ;;  %v655_v53 = vld [vmem:[%s5966_s27 + $0x918] sm:$0xff] }
 0x2d1   : > { %v1902_v55 = vld [vmem:[%s5966_s27 + $0x3010] sm:$0xff]  ;;  %3406 = vmatpush.msrb.mxu3 %v2302_v54  ;;  %v791_v54 = vld [vmem:[%s5966_s27 + $0xd58] sm:$0xff] }
 0x2d2   : > { %v2038_v56 = vld [vmem:[%s5966_s27 + $0x3450] sm:$0xff]  ;;  %3348 = vmatpush.msrb.mxu0 %v1902_v55  ;;  %v391_v55 = vld [vmem:[%s5966_s27 + $0xd8] sm:$0xff] }
 0x2d3   : > { %v2158_v57 = vld [vmem:[%s5966_s27 + $0x3810] sm:$0xff]  ;;  %3367 = vmatpush.msrb.mxu1 %v2038_v56  ;;  %3349 = vmatmul.f32.vlgmr.msrb.gmra.mxu0 %v5692_v3  ;;  %v527_v56 = vld [vmem:[%s5966_s27 + $0x518] sm:$0xff] }
 0x2d4   : > { %v2294_v58 = vld [vmem:[%s5966_s27 + $0x3c50] sm:$0xff]  ;;  %3388 = vmatpush.msrb.mxu2 %v2158_v57  ;;  %3413 = vmatpush.msra.mxu0 %v487_v59  ;;  %v647_v57 = vld [vmem:[%s5966_s27 + $0x8d8] sm:$0xff] }
 0x2d5   : > { %3407 = vmatpush.msrb.mxu3 %v2294_v58  ;;  %v2030_v1 = vld [vmem:[%s5966_s27 + $0x3410] sm:$0xff]  ;;  %3389 = vmatmul.f32.vlgmr.msrb.gmra.mxu2 %v5693_v4  ;;  %v783_v58 = vld [vmem:[%s5966_s27 + $0xd18] sm:$0xff] }
 0x2d6   : > { %v2286_v2 = vld [vmem:[%s5966_s27 + $0x3c10] sm:$0xff]  ;;  %3453 = vmatpush.msra.mxu2 %v743_v60  ;;  %3368 = vmatpush.msrb.mxu1 %v2030_v1  ;;  %v383_v59 = vld [vmem:[%s5966_s27 + $0x98] sm:$0xff] }
 0x2d7   : > { %3408 = vmatpush.msrb.mxu3 %v2286_v2  ;;  %v5694_v9 = vld.sshfl [vmem:[#allocation1 + $0x28] sm:$0xff pattern:$0x73625140]  ;;  %3414 = vmatpush.msra.mxu0 %v479_v5  ;;  %v519_v60 = vld [vmem:[%s5966_s27 + $0x4d8] sm:$0xff] }
 0x2d8   : > { %3369 = vmatmul.f32.vlgmr.msrb.gmra.mxu1 %v5694_v9  ;;  %3409 = vmatmul.f32.vlgmr.msrb.gmra.mxu3 %v5695_v10  ;;  %v639_v1 = vld [vmem:[%s5966_s27 + $0x898] sm:$0xff] }
 0x2d9   : > { %3433 = vmatpush.msra.mxu1 %v615_v6  ;;  %3454 = vmatpush.msra.mxu2 %v735_v7  ;;  %v775_v2 = vld [vmem:[%s5966_s27 + $0xcd8] sm:$0xff] }
 0x2da   : > { %3473 = vmatpush.msra.mxu3 %v871_v8  ;;  %3415 = vmatpush.msra.mxu0 %v471_v11  ;;  %v375_v3 = vld [vmem:[%s5966_s27 + $0x58] sm:$0xff] }
 0x2db   : > { %3434 = vmatpush.msra.mxu1 %v607_v12  ;;  %3455 = vmatpush.msra.mxu2 %v727_v13  ;;  %v511_v4 = vld [vmem:[%s5966_s27 + $0x498] sm:$0xff] }
 0x2dc   : > { %3474 = vmatpush.msra.mxu3 %v863_v14  ;;  %3416 = vmatpush.msra.mxu0 %v463_v15  ;;  %v631_v5 = vld [vmem:[%s5966_s27 + $0x858] sm:$0xff] }
 0x2dd   : > { %3435 = vmatpush.msra.mxu1 %v599_v16  ;;  %3456 = vmatpush.msra.mxu2 %v719_v17  ;;  %v767_v6 = vld [vmem:[%s5966_s27 + $0xc98] sm:$0xff] }
 0x2de   : > { %3475 = vmatpush.msra.mxu3 %v855_v18  ;;  %3417 = vmatpush.msra.mxu0 %v455_v19  ;;  %v367_v7 = vld [vmem:[%s5966_s27 + $0x18] sm:$0xff] }
 0x2df   : > { %3436 = vmatpush.msra.mxu1 %v591_v20  ;;  %3457 = vmatpush.msra.mxu2 %v711_v21  ;;  %v503_v8 = vld [vmem:[%s5966_s27 + $0x458] sm:$0xff] }
 0x2e0   : > { %3476 = vmatpush.msra.mxu3 %v847_v22  ;;  %3418 = vmatpush.msra.mxu0 %v447_v23  ;;  %v623_v9 = vld [vmem:[%s5966_s27 + $0x818] sm:$0xff] }
 0x2e1   : > { %3437 = vmatpush.msra.mxu1 %v583_v24  ;;  %3458 = vmatpush.msra.mxu2 %v703_v25  ;;  %v759_v10 = vld [vmem:[%s5966_s27 + $0xc58] sm:$0xff] }
 0x2e2   : > { %3477 = vmatpush.msra.mxu3 %v839_v26  ;;  %3419 = vmatpush.msra.mxu0 %v439_v27  ;;  %v999_v11 = vld [vmem:[%s5966_s27 + $0x13d8] sm:$0xff] }
 0x2e3   : > { %3438 = vmatpush.msra.mxu1 %v575_v28  ;;  %3459 = vmatpush.msra.mxu2 %v695_v29  ;;  %v1255_v12 = vld [vmem:[%s5966_s27 + $0x1bd8] sm:$0xff] }
 0x2e4   : > { %3478 = vmatpush.msra.mxu3 %v831_v30  ;;  %3420 = vmatpush.msra.mxu0 %v431_v31  ;;  %v495_v13 = vld [vmem:[%s5966_s27 + $0x418] sm:$0xff] }
 0x2e5   : > { %3439 = vmatpush.msra.mxu1 %v567_v32  ;;  %3460 = vmatpush.msra.mxu2 %v687_v33  ;;  %v751_v14 = vld [vmem:[%s5966_s27 + $0xc18] sm:$0xff] }
 0x2e6   : > { %3479 = vmatpush.msra.mxu3 %v823_v34  ;;  %3421 = vmatpush.msra.mxu0 %v423_v35  ;;  %v991_v15 = vld [vmem:[%s5966_s27 + $0x1398] sm:$0xff] }
 0x2e7   : > { %3440 = vmatpush.msra.mxu1 %v559_v36  ;;  %3461 = vmatpush.msra.mxu2 %v679_v37  ;;  %v1127_v16 = vld [vmem:[%s5966_s27 + $0x17d8] sm:$0xff] }
 0x2e8   : > { %3480 = vmatpush.msra.mxu3 %v815_v38  ;;  %3422 = vmatpush.msra.mxu0 %v415_v39  ;;  %v1247_v17 = vld [vmem:[%s5966_s27 + $0x1b98] sm:$0xff] }
 0x2e9   : > { %3441 = vmatpush.msra.mxu1 %v551_v40  ;;  %3462 = vmatpush.msra.mxu2 %v671_v41  ;;  %v1383_v18 = vld [vmem:[%s5966_s27 + $0x1fd8] sm:$0xff] }
 0x2ea   : > { %3481 = vmatpush.msra.mxu3 %v807_v42  ;;  %3423 = vmatpush.msra.mxu0 %v407_v43  ;;  %v983_v19 = vld [vmem:[%s5966_s27 + $0x1358] sm:$0xff] }
 0x2eb   : > { %3442 = vmatpush.msra.mxu1 %v543_v44  ;;  %3463 = vmatpush.msra.mxu2 %v663_v49  ;;  %v1119_v20 = vld [vmem:[%s5966_s27 + $0x1798] sm:$0xff] }
 0x2ec   : > { %3482 = vmatpush.msra.mxu3 %v799_v50  ;;  %3424 = vmatpush.msra.mxu0 %v399_v51  ;;  %v1239_v21 = vld [vmem:[%s5966_s27 + $0x1b58] sm:$0xff] }
 0x2ed   : > { %3443 = vmatpush.msra.mxu1 %v535_v52  ;;  %3464 = vmatpush.msra.mxu2 %v655_v53  ;;  %v1375_v22 = vld [vmem:[%s5966_s27 + $0x1f98] sm:$0xff] }
 0x2ee   : > { %3483 = vmatpush.msra.mxu3 %v791_v54  ;;  %3425 = vmatpush.msra.mxu0 %v391_v55  ;;  %v975_v23 = vld [vmem:[%s5966_s27 + $0x1318] sm:$0xff] }
 0x2ef   : > { %3444 = vmatpush.msra.mxu1 %v527_v56  ;;  %3465 = vmatpush.msra.mxu2 %v647_v57  ;;  %v1111_v24 = vld [vmem:[%s5966_s27 + $0x1758] sm:$0xff] }
 0x2f0   : > { %3484 = vmatpush.msra.mxu3 %v783_v58  ;;  %3426 = vmatpush.msra.mxu0 %v383_v59  ;;  %v1231_v25 = vld [vmem:[%s5966_s27 + $0x1b18] sm:$0xff] }
 0x2f1   : > { %3445 = vmatpush.msra.mxu1 %v519_v60  ;;  %3466 = vmatpush.msra.mxu2 %v639_v1  ;;  %v1367_v26 = vld [vmem:[%s5966_s27 + $0x1f58] sm:$0xff] }
 0x2f2   : > { %3485 = vmatpush.msra.mxu3 %v775_v2  ;;  %3427 = vmatpush.msra.mxu0 %v375_v3  ;;  %v967_v27 = vld [vmem:[%s5966_s27 + $0x12d8] sm:$0xff] }
 0x2f3   : > { %3446 = vmatpush.msra.mxu1 %v511_v4  ;;  %3467 = vmatpush.msra.mxu2 %v631_v5  ;;  %v1103_v28 = vld [vmem:[%s5966_s27 + $0x1718] sm:$0xff] }
 0x2f4   : > { %3486 = vmatpush.msra.mxu3 %v767_v6  ;;  %3428 = vmatpush.msra.mxu0 %v367_v7  ;;  %v1223_v29 = vld [vmem:[%s5966_s27 + $0x1ad8] sm:$0xff] }
 0x2f5   : > { %3447 = vmatpush.msra.mxu1 %v503_v8  ;;  %3468 = vmatpush.msra.mxu2 %v623_v9  ;;  %v1359_v30 = vld [vmem:[%s5966_s27 + $0x1f18] sm:$0xff] }
 0x2f6   : > { %3487 = vmatpush.msra.mxu3 %v759_v10  ;;  %3493 = vmatpush.msrb.mxu0 %v999_v11  ;;  %v959_v31 = vld [vmem:[%s5966_s27 + $0x1298] sm:$0xff] }
 0x2f7   : > { %3533 = vmatpush.msrb.mxu2 %v1255_v12  ;;  %3448 = vmatpush.msra.mxu1 %v495_v13  ;;  %v1095_v32 = vld [vmem:[%s5966_s27 + $0x16d8] sm:$0xff] }
 0x2f8   : > { %3488 = vmatpush.msra.mxu3 %v751_v14  ;;  %3494 = vmatpush.msrb.mxu0 %v991_v15  ;;  %v1215_v33 = vld [vmem:[%s5966_s27 + $0x1a98] sm:$0xff] }
 0x2f9   : > { %3513 = vmatpush.msrb.mxu1 %v1127_v16  ;;  %3534 = vmatpush.msrb.mxu2 %v1247_v17  ;;  %v1351_v34 = vld [vmem:[%s5966_s27 + $0x1ed8] sm:$0xff] }
 0x2fa   : > { %3553 = vmatpush.msrb.mxu3 %v1383_v18  ;;  %3495 = vmatpush.msrb.mxu0 %v983_v19  ;;  %v951_v35 = vld [vmem:[%s5966_s27 + $0x1258] sm:$0xff] }
 0x2fb   : > { %3514 = vmatpush.msrb.mxu1 %v1119_v20  ;;  %3535 = vmatpush.msrb.mxu2 %v1239_v21  ;;  %v1087_v36 = vld [vmem:[%s5966_s27 + $0x1698] sm:$0xff] }
 0x2fc   : > { %3554 = vmatpush.msrb.mxu3 %v1375_v22  ;;  %3496 = vmatpush.msrb.mxu0 %v975_v23  ;;  %v1207_v37 = vld [vmem:[%s5966_s27 + $0x1a58] sm:$0xff] }
 0x2fd   : > { %3515 = vmatpush.msrb.mxu1 %v1111_v24  ;;  %3536 = vmatpush.msrb.mxu2 %v1231_v25  ;;  %v1343_v38 = vld [vmem:[%s5966_s27 + $0x1e98] sm:$0xff] }
 0x2fe   : > { %3555 = vmatpush.msrb.mxu3 %v1367_v26  ;;  %3497 = vmatpush.msrb.mxu0 %v967_v27  ;;  %v943_v39 = vld [vmem:[%s5966_s27 + $0x1218] sm:$0xff] }
 0x2ff   : > { %3516 = vmatpush.msrb.mxu1 %v1103_v28  ;;  %3537 = vmatpush.msrb.mxu2 %v1223_v29  ;;  %v1079_v40 = vld [vmem:[%s5966_s27 + $0x1658] sm:$0xff] }
 0x300   : > { %3556 = vmatpush.msrb.mxu3 %v1359_v30  ;;  %3498 = vmatpush.msrb.mxu0 %v959_v31  ;;  %v1199_v41 = vld [vmem:[%s5966_s27 + $0x1a18] sm:$0xff] }
 0x301   : > { %3517 = vmatpush.msrb.mxu1 %v1095_v32  ;;  %3538 = vmatpush.msrb.mxu2 %v1215_v33  ;;  %v1335_v42 = vld [vmem:[%s5966_s27 + $0x1e58] sm:$0xff] }
 0x302   : > { %3557 = vmatpush.msrb.mxu3 %v1351_v34  ;;  %3499 = vmatpush.msrb.mxu0 %v951_v35  ;;  %v935_v43 = vld [vmem:[%s5966_s27 + $0x11d8] sm:$0xff] }
 0x303   : > { %3518 = vmatpush.msrb.mxu1 %v1087_v36  ;;  %3539 = vmatpush.msrb.mxu2 %v1207_v37  ;;  %v1071_v44 = vld [vmem:[%s5966_s27 + $0x1618] sm:$0xff] }
 0x304   : > { %3558 = vmatpush.msrb.mxu3 %v1343_v38  ;;  %3500 = vmatpush.msrb.mxu0 %v943_v39  ;;  %v1191_v49 = vld [vmem:[%s5966_s27 + $0x19d8] sm:$0xff] }
 0x305   : > { %3519 = vmatpush.msrb.mxu1 %v1079_v40  ;;  %v1327_v50 = vld [vmem:[%s5966_s27 + $0x1e18] sm:$0xff]  ;;  %3540 = vmatpush.msrb.mxu2 %v1199_v41 }
 0x306   : > { %3559 = vmatpush.msrb.mxu3 %v1335_v42  ;;  %v927_v51 = vld [vmem:[%s5966_s27 + $0x1198] sm:$0xff]  ;;  %3501 = vmatpush.msrb.mxu0 %v935_v43 }
 0x307   : > { %v1063_v52 = vld [vmem:[%s5966_s27 + $0x15d8] sm:$0xff]  ;;  %3520 = vmatpush.msrb.mxu1 %v1071_v44  ;;  %3541 = vmatpush.msrb.mxu2 %v1191_v49 }
 0x308   : > { %v1183_v53 = vld [vmem:[%s5966_s27 + $0x1998] sm:$0xff]  ;;  %3560 = vmatpush.msrb.mxu3 %v1327_v50  ;;  %3502 = vmatpush.msrb.mxu0 %v927_v51 }
 0x309   : > { %v1319_v54 = vld [vmem:[%s5966_s27 + $0x1dd8] sm:$0xff]  ;;  %3521 = vmatpush.msrb.mxu1 %v1063_v52  ;;  %3542 = vmatpush.msrb.mxu2 %v1183_v53 }
 0x30a   : > { %v919_v55 = vld [vmem:[%s5966_s27 + $0x1158] sm:$0xff]  ;;  %3561 = vmatpush.msrb.mxu3 %v1319_v54  ;;  %3469 = vmatmul.f32.vlgmr.msra.gmra.mxu2 %v6108_v45 }
 0x30b   : > { %v1055_v56 = vld [vmem:[%s5966_s27 + $0x1598] sm:$0xff]  ;;  %3503 = vmatpush.msrb.mxu0 %v919_v55  ;;  %3489 = vmatmul.f32.vlgmr.msra.gmra.mxu3 %v6112_v47 }
 0x30c   : > { %v1175_v57 = vld [vmem:[%s5966_s27 + $0x1958] sm:$0xff]  ;;  %3522 = vmatpush.msrb.mxu1 %v1055_v56  ;;  %3429 = vmatmul.f32.vlgmr.msra.gmra.mxu0 %v6110_v46 }
 0x30d   : > { %v1311_v58 = vld [vmem:[%s5966_s27 + $0x1d98] sm:$0xff]  ;;  %3543 = vmatpush.msrb.mxu2 %v1175_v57  ;;  %3449 = vmatmul.f32.vlgmr.msra.gmra.mxu1 %v6114_v48 }
 0x30e   : > { %v911_v59 = vld [vmem:[%s5966_s27 + $0x1118] sm:$0xff]  ;;  %3562 = vmatpush.msrb.mxu3 %v1311_v58 }
 0x30f   : > { %v1047_v60 = vld [vmem:[%s5966_s27 + $0x1558] sm:$0xff]  ;;  %3504 = vmatpush.msrb.mxu0 %v911_v59 }
 0x310   : > { %v1167_v1 = vld [vmem:[%s5966_s27 + $0x1918] sm:$0xff]  ;;  %3523 = vmatpush.msrb.mxu1 %v1047_v60 }
 0x311   : > { %v1303_v2 = vld [vmem:[%s5966_s27 + $0x1d58] sm:$0xff]  ;;  %3544 = vmatpush.msrb.mxu2 %v1167_v1 }
 0x312   : > { %v903_v3 = vld [vmem:[%s5966_s27 + $0x10d8] sm:$0xff]  ;;  %3563 = vmatpush.msrb.mxu3 %v1303_v2 }
 0x313   : > { %v1039_v4 = vld [vmem:[%s5966_s27 + $0x1518] sm:$0xff]  ;;  %3505 = vmatpush.msrb.mxu0 %v903_v3 }
 0x314   : > { %v1159_v5 = vld [vmem:[%s5966_s27 + $0x18d8] sm:$0xff]  ;;  %3524 = vmatpush.msrb.mxu1 %v1039_v4 }
 0x315   : > { %v1295_v6 = vld [vmem:[%s5966_s27 + $0x1d18] sm:$0xff]  ;;  %3545 = vmatpush.msrb.mxu2 %v1159_v5 }
 0x316   : > { %v895_v7 = vld [vmem:[%s5966_s27 + $0x1098] sm:$0xff]  ;;  %3564 = vmatpush.msrb.mxu3 %v1295_v6 }
 0x317   : > { %v1031_v8 = vld [vmem:[%s5966_s27 + $0x14d8] sm:$0xff]  ;;  %3506 = vmatpush.msrb.mxu0 %v895_v7 }
 0x318   : > { %v1151_v9 = vld [vmem:[%s5966_s27 + $0x1898] sm:$0xff]  ;;  %3525 = vmatpush.msrb.mxu1 %v1031_v8 }
 0x319   : > { %v1287_v10 = vld [vmem:[%s5966_s27 + $0x1cd8] sm:$0xff]  ;;  %3546 = vmatpush.msrb.mxu2 %v1151_v9 }
 0x31a   : > { %v887_v11 = vld [vmem:[%s5966_s27 + $0x1058] sm:$0xff]  ;;  %3565 = vmatpush.msrb.mxu3 %v1287_v10 }
 0x31b   : > { %v1023_v12 = vld [vmem:[%s5966_s27 + $0x1498] sm:$0xff]  ;;  %3507 = vmatpush.msrb.mxu0 %v887_v11 }
 0x31c   : > { %v1143_v13 = vld [vmem:[%s5966_s27 + $0x1858] sm:$0xff]  ;;  %3526 = vmatpush.msrb.mxu1 %v1023_v12 }
 0x31d   : > { %v1279_v14 = vld [vmem:[%s5966_s27 + $0x1c98] sm:$0xff]  ;;  %3547 = vmatpush.msrb.mxu2 %v1143_v13 }
 0x31e   : > { %v879_v15 = vld [vmem:[%s5966_s27 + $0x1018] sm:$0xff]  ;;  %3566 = vmatpush.msrb.mxu3 %v1279_v14 }
 0x31f   : > { %v1015_v16 = vld [vmem:[%s5966_s27 + $0x1458] sm:$0xff]  ;;  %3508 = vmatpush.msrb.mxu0 %v879_v15 }
 0x320   : > { %v1135_v17 = vld [vmem:[%s5966_s27 + $0x1818] sm:$0xff]  ;;  %3527 = vmatpush.msrb.mxu1 %v1015_v16  ;;  %3509 = vmatmul.f32.vlgmr.msrb.gmra.mxu0 %v6130_v62 }
 0x321   : > { %v1271_v18 = vld [vmem:[%s5966_s27 + $0x1c58] sm:$0xff]  ;;  %3548 = vmatpush.msrb.mxu2 %v1135_v17 }
 0x322   : > { %v1511_v19 = vld [vmem:[%s5966_s27 + $0x23d8] sm:$0xff]  ;;  %3567 = vmatpush.msrb.mxu3 %v1271_v18  ;;  %3549 = vmatmul.f32.vlgmr.msrb.gmra.mxu2 %v6128_v61 }
 0x323   : > { %v1767_v20 = vld [vmem:[%s5966_s27 + $0x2bd8] sm:$0xff]  ;;  %3573 = vmatpush.msra.mxu0 %v1511_v19 }
 0x324   : > { %v1007_v21 = vld [vmem:[%s5966_s27 + $0x1418] sm:$0xff]  ;;  %3613 = vmatpush.msra.mxu2 %v1767_v20 }
 0x325   : > { %v1263_v22 = vld [vmem:[%s5966_s27 + $0x1c18] sm:$0xff]  ;;  %3528 = vmatpush.msrb.mxu1 %v1007_v21 }
 0x326   : > { %v1503_v23 = vld [vmem:[%s5966_s27 + $0x2398] sm:$0xff]  ;;  %3568 = vmatpush.msrb.mxu3 %v1263_v22  ;;  %3529 = vmatmul.f32.vlgmr.msrb.gmra.mxu1 %v6134_v0 }
 0x327   : > { %v1639_v24 = vld [vmem:[%s5966_s27 + $0x27d8] sm:$0xff]  ;;  %3574 = vmatpush.msra.mxu0 %v1503_v23  ;;  %3569 = vmatmul.f32.vlgmr.msrb.gmra.mxu3 %v6132_v63 }
 0x328   : > { %v1759_v25 = vld [vmem:[%s5966_s27 + $0x2b98] sm:$0xff]  ;;  %3593 = vmatpush.msra.mxu1 %v1639_v24 }
 0x329   : > { %v1895_v26 = vld [vmem:[%s5966_s27 + $0x2fd8] sm:$0xff]  ;;  %3614 = vmatpush.msra.mxu2 %v1759_v25 }
 0x32a   : > { %v1495_v27 = vld [vmem:[%s5966_s27 + $0x2358] sm:$0xff]  ;;  %3633 = vmatpush.msra.mxu3 %v1895_v26 }
 0x32b   : > { %v1631_v28 = vld [vmem:[%s5966_s27 + $0x2798] sm:$0xff]  ;;  %3575 = vmatpush.msra.mxu0 %v1495_v27 }
 0x32c   : > { %v1751_v29 = vld [vmem:[%s5966_s27 + $0x2b58] sm:$0xff]  ;;  %3594 = vmatpush.msra.mxu1 %v1631_v28 }
 0x32d   : > { %v1887_v30 = vld [vmem:[%s5966_s27 + $0x2f98] sm:$0xff]  ;;  %3615 = vmatpush.msra.mxu2 %v1751_v29 }
 0x32e   : > { %v1487_v31 = vld [vmem:[%s5966_s27 + $0x2318] sm:$0xff]  ;;  %3634 = vmatpush.msra.mxu3 %v1887_v30 }
 0x32f   : > { %v1623_v32 = vld [vmem:[%s5966_s27 + $0x2758] sm:$0xff]  ;;  %3576 = vmatpush.msra.mxu0 %v1487_v31  ;;  %v5696_v31 = vld.sshfl [vmem:[#allocation1] sm:$0xff pattern:$0x73625140] }
 0x330   : > { %v1743_v33 = vld [vmem:[%s5966_s27 + $0x2b18] sm:$0xff]  ;;  %3595 = vmatpush.msra.mxu1 %v1623_v32 }
 0x331   : > { %v1879_v34 = vld [vmem:[%s5966_s27 + $0x2f58] sm:$0xff]  ;;  %3616 = vmatpush.msra.mxu2 %v1743_v33 }
 0x332   : > { %v1479_v35 = vld [vmem:[%s5966_s27 + $0x22d8] sm:$0xff]  ;;  %3635 = vmatpush.msra.mxu3 %v1879_v34 }
 0x333   : > { %v1615_v36 = vld [vmem:[%s5966_s27 + $0x2718] sm:$0xff]  ;;  %3577 = vmatpush.msra.mxu0 %v1479_v35 }
 0x334   : > { %v1735_v37 = vld [vmem:[%s5966_s27 + $0x2ad8] sm:$0xff]  ;;  %3596 = vmatpush.msra.mxu1 %v1615_v36 }
 0x335   : > { %v1871_v38 = vld [vmem:[%s5966_s27 + $0x2f18] sm:$0xff]  ;;  %3617 = vmatpush.msra.mxu2 %v1735_v37  ;;  %v5698_v37 = vld.sshfl [vmem:[#allocation1 + $0x8] sm:$0xff pattern:$0x73625140] }
 0x336   : > { %v1471_v39 = vld [vmem:[%s5966_s27 + $0x2298] sm:$0xff]  ;;  %3636 = vmatpush.msra.mxu3 %v1871_v38  ;;  %v5699_v38 = vld.sshfl [vmem:[#allocation1 + $0x18] sm:$0xff pattern:$0x73625140] }
 0x337   : > { %v1607_v40 = vld [vmem:[%s5966_s27 + $0x26d8] sm:$0xff]  ;;  %3578 = vmatpush.msra.mxu0 %v1471_v39 }
 0x338   : > { %v1727_v41 = vld [vmem:[%s5966_s27 + $0x2a98] sm:$0xff]  ;;  %3597 = vmatpush.msra.mxu1 %v1607_v40 }
 0x339   : > { %v1863_v42 = vld [vmem:[%s5966_s27 + $0x2ed8] sm:$0xff]  ;;  %3618 = vmatpush.msra.mxu2 %v1727_v41 }
 0x33a   : > { %v1463_v43 = vld [vmem:[%s5966_s27 + $0x2258] sm:$0xff]  ;;  %3637 = vmatpush.msra.mxu3 %v1863_v42 }
 0x33b   : > { %v1599_v44 = vld [vmem:[%s5966_s27 + $0x2698] sm:$0xff]  ;;  %3579 = vmatpush.msra.mxu0 %v1463_v43 }
 0x33c   : > { %v1719_v49 = vld [vmem:[%s5966_s27 + $0x2a58] sm:$0xff]  ;;  %3598 = vmatpush.msra.mxu1 %v1599_v44 }
 0x33d   : > { %v1855_v50 = vld [vmem:[%s5966_s27 + $0x2e98] sm:$0xff]  ;;  %3619 = vmatpush.msra.mxu2 %v1719_v49 }
 0x33e   : > { %v1455_v51 = vld [vmem:[%s5966_s27 + $0x2218] sm:$0xff]  ;;  %3638 = vmatpush.msra.mxu3 %v1855_v50 }
 0x33f   : > { %v1591_v52 = vld [vmem:[%s5966_s27 + $0x2658] sm:$0xff]  ;;  %3580 = vmatpush.msra.mxu0 %v1455_v51 }
 0x340   : > { %v1711_v53 = vld [vmem:[%s5966_s27 + $0x2a18] sm:$0xff]  ;;  %3599 = vmatpush.msra.mxu1 %v1591_v52 }
 0x341   : > { %v1847_v54 = vld [vmem:[%s5966_s27 + $0x2e58] sm:$0xff]  ;;  %3620 = vmatpush.msra.mxu2 %v1711_v53 }
 0x342   : > { %v1447_v55 = vld [vmem:[%s5966_s27 + $0x21d8] sm:$0xff]  ;;  %3639 = vmatpush.msra.mxu3 %v1847_v54 }
 0x343   : > { %v1583_v56 = vld [vmem:[%s5966_s27 + $0x2618] sm:$0xff]  ;;  %3581 = vmatpush.msra.mxu0 %v1447_v55 }
 0x344   : > { %v1703_v57 = vld [vmem:[%s5966_s27 + $0x29d8] sm:$0xff]  ;;  %3600 = vmatpush.msra.mxu1 %v1583_v56 }
 0x345   : > { %v1839_v58 = vld [vmem:[%s5966_s27 + $0x2e18] sm:$0xff]  ;;  %3621 = vmatpush.msra.mxu2 %v1703_v57 }
 0x346   : > { %v1439_v59 = vld [vmem:[%s5966_s27 + $0x2198] sm:$0xff]  ;;  %3640 = vmatpush.msra.mxu3 %v1839_v58 }
 0x347   : > { %v1575_v60 = vld [vmem:[%s5966_s27 + $0x25d8] sm:$0xff]  ;;  %3582 = vmatpush.msra.mxu0 %v1439_v59 }
 0x348   : > { %v1695_v1 = vld [vmem:[%s5966_s27 + $0x2998] sm:$0xff]  ;;  %3601 = vmatpush.msra.mxu1 %v1575_v60 }
 0x349   : > { %v1831_v2 = vld [vmem:[%s5966_s27 + $0x2dd8] sm:$0xff]  ;;  %3622 = vmatpush.msra.mxu2 %v1695_v1 }
 0x34a   : > { %v1431_v3 = vld [vmem:[%s5966_s27 + $0x2158] sm:$0xff]  ;;  %3641 = vmatpush.msra.mxu3 %v1831_v2 }
 0x34b   : > { %v1567_v4 = vld [vmem:[%s5966_s27 + $0x2598] sm:$0xff]  ;;  %3583 = vmatpush.msra.mxu0 %v1431_v3 }
 0x34c   : > { %v1687_v5 = vld [vmem:[%s5966_s27 + $0x2958] sm:$0xff]  ;;  %3602 = vmatpush.msra.mxu1 %v1567_v4 }
 0x34d   : > { %v1823_v6 = vld [vmem:[%s5966_s27 + $0x2d98] sm:$0xff]  ;;  %3623 = vmatpush.msra.mxu2 %v1687_v5 }
 0x34e   : > { %v1423_v7 = vld [vmem:[%s5966_s27 + $0x2118] sm:$0xff]  ;;  %3642 = vmatpush.msra.mxu3 %v1823_v6 }
 0x34f   : > { %v1559_v8 = vld [vmem:[%s5966_s27 + $0x2558] sm:$0xff]  ;;  %3584 = vmatpush.msra.mxu0 %v1423_v7 }
 0x350   : > { %v1679_v9 = vld [vmem:[%s5966_s27 + $0x2918] sm:$0xff]  ;;  %3603 = vmatpush.msra.mxu1 %v1559_v8 }
 0x351   : > { %v1815_v10 = vld [vmem:[%s5966_s27 + $0x2d58] sm:$0xff]  ;;  %3624 = vmatpush.msra.mxu2 %v1679_v9 }
 0x352   : > { %v1415_v11 = vld [vmem:[%s5966_s27 + $0x20d8] sm:$0xff]  ;;  %3643 = vmatpush.msra.mxu3 %v1815_v10 }
 0x353   : > { %v1551_v12 = vld [vmem:[%s5966_s27 + $0x2518] sm:$0xff]  ;;  %3585 = vmatpush.msra.mxu0 %v1415_v11  ;;  %v7046_v11 = vpop.f32.mrf.mxu1 }
 0x354   : > { %v1671_v13 = vld [vmem:[%s5966_s27 + $0x28d8] sm:$0xff]  ;;  %3604 = vmatpush.msra.mxu1 %v1551_v12 }
 0x355   : > { %v1807_v14 = vld [vmem:[%s5966_s27 + $0x2d18] sm:$0xff]  ;;  %3625 = vmatpush.msra.mxu2 %v1671_v13 }
 0x356   : > { %v1407_v15 = vld [vmem:[%s5966_s27 + $0x2098] sm:$0xff]  ;;  %3644 = vmatpush.msra.mxu3 %v1807_v14 }
 0x357   : > { %v1543_v16 = vld [vmem:[%s5966_s27 + $0x24d8] sm:$0xff]  ;;  %3586 = vmatpush.msra.mxu0 %v1407_v15 }
 0x358   : > { %v1663_v17 = vld [vmem:[%s5966_s27 + $0x2898] sm:$0xff]  ;;  %3605 = vmatpush.msra.mxu1 %v1543_v16  ;;  %v7052_v16 = vpop.f32.mrf.mxu0 }
 0x359   : > { %v1799_v18 = vld [vmem:[%s5966_s27 + $0x2cd8] sm:$0xff]  ;;  %3626 = vmatpush.msra.mxu2 %v1663_v17 }
 0x35a   : > { %v1399_v19 = vld [vmem:[%s5966_s27 + $0x2058] sm:$0xff]  ;;  %3645 = vmatpush.msra.mxu3 %v1799_v18 }
 0x35b   : > { %v1535_v20 = vld [vmem:[%s5966_s27 + $0x2498] sm:$0xff]  ;;  %3587 = vmatpush.msra.mxu0 %v1399_v19 }
 0x35c   : > { %v1655_v21 = vld [vmem:[%s5966_s27 + $0x2858] sm:$0xff]  ;;  %3606 = vmatpush.msra.mxu1 %v1535_v20 }
 0x35d   : > { %v1791_v22 = vld [vmem:[%s5966_s27 + $0x2c98] sm:$0xff]  ;;  %3627 = vmatpush.msra.mxu2 %v1655_v21  ;;  %v7058_v21 = vpop.f32.mrf.mxu2 }
 0x35e   : > { %v1391_v23 = vld [vmem:[%s5966_s27 + $0x2018] sm:$0xff]  ;;  %3646 = vmatpush.msra.mxu3 %v1791_v22 }
 0x35f   : > { %v1527_v24 = vld [vmem:[%s5966_s27 + $0x2458] sm:$0xff]  ;;  %3588 = vmatpush.msra.mxu0 %v1391_v23 }
 0x360   : > { %v1647_v25 = vld [vmem:[%s5966_s27 + $0x2818] sm:$0xff]  ;;  %3607 = vmatpush.msra.mxu1 %v1527_v24  ;;  %3589 = vmatmul.f32.vlgmr.msra.gmra.mxu0 %v5696_v31 }
 0x361   : > { %v1783_v26 = vld [vmem:[%s5966_s27 + $0x2c58] sm:$0xff]  ;;  %3628 = vmatpush.msra.mxu2 %v1647_v25 }
 0x362   : > { %v2023_v27 = vld [vmem:[%s5966_s27 + $0x33d8] sm:$0xff]  ;;  %3647 = vmatpush.msra.mxu3 %v1783_v26 }
 0x363   : > { %v2279_v28 = vld [vmem:[%s5966_s27 + $0x3bd8] sm:$0xff]  ;;  %3653 = vmatpush.msrb.mxu0 %v2023_v27 }
 0x364   : > { %v1519_v29 = vld [vmem:[%s5966_s27 + $0x2418] sm:$0xff]  ;;  %3693 = vmatpush.msrb.mxu2 %v2279_v28 }
 0x365   : > { %v1775_v30 = vld [vmem:[%s5966_s27 + $0x2c18] sm:$0xff]  ;;  %3608 = vmatpush.msra.mxu1 %v1519_v29 }
 0x366   : > { %v5697_v32 = vld.sshfl [vmem:[#allocation1 + $0x10] sm:$0xff pattern:$0x73625140]  ;;  %3648 = vmatpush.msra.mxu3 %v1775_v30  ;;  %3609 = vmatmul.f32.vlgmr.msra.gmra.mxu1 %v5698_v37  ;;  %v7068_v30 = vpop.f32.mrf.mxu3 }
 0x367   : > { %3629 = vmatmul.f32.vlgmr.msra.gmra.mxu2 %v5697_v32  ;;  %v2015_v33 = vld [vmem:[%s5966_s27 + $0x3398] sm:$0xff]  ;;  %3649 = vmatmul.f32.vlgmr.msra.gmra.mxu3 %v5699_v38 }
 0x368   : > { %v2151_v34 = vld [vmem:[%s5966_s27 + $0x37d8] sm:$0xff]  ;;  %3654 = vmatpush.msrb.mxu0 %v2015_v33 }
 0x369   : > { %v2271_v35 = vld [vmem:[%s5966_s27 + $0x3b98] sm:$0xff]  ;;  %3673 = vmatpush.msrb.mxu1 %v2151_v34 }
 0x36a   : > { %v2407_v36 = vld [vmem:[%s5966_s27 + $0x3fd8] sm:$0xff]  ;;  %3694 = vmatpush.msrb.mxu2 %v2271_v35  ;;  %v7074_v35 = vpop.f32.mrf.mxu1 }
 0x36b   : > { %v2007_v39 = vld [vmem:[%s5966_s27 + $0x3358] sm:$0xff]  ;;  %3713 = vmatpush.msrb.mxu3 %v2407_v36 }
 0x36c   : > { %v2143_v40 = vld [vmem:[%s5966_s27 + $0x3798] sm:$0xff]  ;;  %3655 = vmatpush.msrb.mxu0 %v2007_v39 }
 0x36d   : > { %v2263_v41 = vld [vmem:[%s5966_s27 + $0x3b58] sm:$0xff]  ;;  %3674 = vmatpush.msrb.mxu1 %v2143_v40  ;;  %v7080_v40 = vpop.f32.mrf.mxu0 }
 0x36e   : > { %v2399_v42 = vld [vmem:[%s5966_s27 + $0x3f98] sm:$0xff]  ;;  %3695 = vmatpush.msrb.mxu2 %v2263_v41 }
 0x36f   : > { %v1999_v43 = vld [vmem:[%s5966_s27 + $0x3318] sm:$0xff]  ;;  %3714 = vmatpush.msrb.mxu3 %v2399_v42 }
 0x370   : > { %v2135_v44 = vld [vmem:[%s5966_s27 + $0x3758] sm:$0xff]  ;;  %3656 = vmatpush.msrb.mxu0 %v1999_v43 }
 0x371   : > { %v2255_v49 = vld [vmem:[%s5966_s27 + $0x3b18] sm:$0xff]  ;;  %3675 = vmatpush.msrb.mxu1 %v2135_v44 }
 0x372   : > { %v2391_v50 = vld [vmem:[%s5966_s27 + $0x3f58] sm:$0xff]  ;;  %3696 = vmatpush.msrb.mxu2 %v2255_v49  ;;  %v7086_v49 = vpop.f32.mrf.mxu2 }
 0x373   : > { %v1991_v51 = vld [vmem:[%s5966_s27 + $0x32d8] sm:$0xff]  ;;  %3715 = vmatpush.msrb.mxu3 %v2391_v50  ;;  %v488_v50 = vld [vmem:[%s5966_s27 + $0x3e0] sm:$0xff] }
 0x374   : > { %v2127_v52 = vld [vmem:[%s5966_s27 + $0x3718] sm:$0xff]  ;;  %3657 = vmatpush.msrb.mxu0 %v1991_v51  ;;  %v744_v51 = vld [vmem:[%s5966_s27 + $0xbe0] sm:$0xff] }
 0x375   : > { %v2247_v53 = vld [vmem:[%s5966_s27 + $0x3ad8] sm:$0xff]  ;;  %3676 = vmatpush.msrb.mxu1 %v2127_v52 }
 0x376   : > { %v2383_v54 = vld [vmem:[%s5966_s27 + $0x3f18] sm:$0xff]  ;;  %3697 = vmatpush.msrb.mxu2 %v2247_v53 }
 0x377   : > { %v1983_v55 = vld [vmem:[%s5966_s27 + $0x3298] sm:$0xff]  ;;  %3716 = vmatpush.msrb.mxu3 %v2383_v54  ;;  %v5700_v54 = vld.sshfl [vmem:[#allocation1 + $0x20] sm:$0xff pattern:$0x73625140] }
 0x378   : > { %v2119_v56 = vld [vmem:[%s5966_s27 + $0x36d8] sm:$0xff]  ;;  %3658 = vmatpush.msrb.mxu0 %v1983_v55 }
 0x379   : > { %v2239_v57 = vld [vmem:[%s5966_s27 + $0x3a98] sm:$0xff]  ;;  %3677 = vmatpush.msrb.mxu1 %v2119_v56  ;;  %v7092_v56 = vpop.f32.mrf.mxu3 }
 0x37a   : > { %v2375_v58 = vld [vmem:[%s5966_s27 + $0x3ed8] sm:$0xff]  ;;  %3698 = vmatpush.msrb.mxu2 %v2239_v57  ;;  %v7094_v57 = vpop.f32.mrf.mxu1 }
 0x37b   : > { %v1975_v59 = vld [vmem:[%s5966_s27 + $0x3258] sm:$0xff]  ;;  %3717 = vmatpush.msrb.mxu3 %v2375_v58  ;;  %v480_v58 = vld [vmem:[%s5966_s27 + $0x3a0] sm:$0xff] }
 0x37c   : > { %v2111_v60 = vld [vmem:[%s5966_s27 + $0x3698] sm:$0xff]  ;;  %3659 = vmatpush.msrb.mxu0 %v1975_v59  ;;  %v616_v59 = vld [vmem:[%s5966_s27 + $0x7e0] sm:$0xff] }
 0x37d   : > { %v2231_v1 = vld [vmem:[%s5966_s27 + $0x3a58] sm:$0xff]  ;;  %3678 = vmatpush.msrb.mxu1 %v2111_v60  ;;  %v736_v60 = vld [vmem:[%s5966_s27 + $0xba0] sm:$0xff] }
 0x37e   : > { %v2367_v2 = vld [vmem:[%s5966_s27 + $0x3e98] sm:$0xff]  ;;  %3699 = vmatpush.msrb.mxu2 %v2231_v1  ;;  %v872_v1 = vld [vmem:[%s5966_s27 + $0xfe0] sm:$0xff] }
 0x37f   : > { %v1967_v3 = vld [vmem:[%s5966_s27 + $0x3218] sm:$0xff]  ;;  %3718 = vmatpush.msrb.mxu3 %v2367_v2  ;;  %v7100_v2 = vpop.f32.mrf.mxu0 }
 0x380   : > { %v2103_v4 = vld [vmem:[%s5966_s27 + $0x3658] sm:$0xff]  ;;  %3660 = vmatpush.msrb.mxu0 %v1967_v3  ;;  %v5702_v3 = vld.sshfl [vmem:[#allocation1 + $0x28] sm:$0xff pattern:$0x73625140] }
 0x381   : > { %v2223_v5 = vld [vmem:[%s5966_s27 + $0x3a18] sm:$0xff]  ;;  %3679 = vmatpush.msrb.mxu1 %v2103_v4  ;;  %v5703_v4 = vld.sshfl [vmem:[#allocation1 + $0x38] sm:$0xff pattern:$0x73625140] }
 0x382   : > { %v2359_v6 = vld [vmem:[%s5966_s27 + $0x3e58] sm:$0xff]  ;;  %3700 = vmatpush.msrb.mxu2 %v2223_v5  ;;  %v472_v5 = vld [vmem:[%s5966_s27 + $0x360] sm:$0xff] }
 0x383   : > { %v1959_v7 = vld [vmem:[%s5966_s27 + $0x31d8] sm:$0xff]  ;;  %3719 = vmatpush.msrb.mxu3 %v2359_v6  ;;  %v608_v6 = vld [vmem:[%s5966_s27 + $0x7a0] sm:$0xff] }
 0x384   : > { %v2095_v8 = vld [vmem:[%s5966_s27 + $0x3618] sm:$0xff]  ;;  %3661 = vmatpush.msrb.mxu0 %v1959_v7  ;;  %v728_v7 = vld [vmem:[%s5966_s27 + $0xb60] sm:$0xff] }
 0x385   : > { %v2215_v9 = vld [vmem:[%s5966_s27 + $0x39d8] sm:$0xff]  ;;  %3680 = vmatpush.msrb.mxu1 %v2095_v8  ;;  %v864_v8 = vld [vmem:[%s5966_s27 + $0xfa0] sm:$0xff] }
 0x386   : > { %v2351_v10 = vld [vmem:[%s5966_s27 + $0x3e18] sm:$0xff]  ;;  %3701 = vmatpush.msrb.mxu2 %v2215_v9  ;;  %v7106_v9 = vpop.f32.mrf.mxu2 }
 0x387   : > { %v1951_v12 = vld [vmem:[%s5966_s27 + $0x3198] sm:$0xff]  ;;  %3720 = vmatpush.msrb.mxu3 %v2351_v10  ;;  %v464_v10 = vld [vmem:[%s5966_s27 + $0x320] sm:$0xff] }
 0x388   : > { %v2087_v13 = vld [vmem:[%s5966_s27 + $0x35d8] sm:$0xff]  ;;  %3662 = vmatpush.msrb.mxu0 %v1951_v12  ;;  %v600_v12 = vld [vmem:[%s5966_s27 + $0x760] sm:$0xff] }
 0x389   : > { %v2207_v14 = vld [vmem:[%s5966_s27 + $0x3998] sm:$0xff]  ;;  %3681 = vmatpush.msrb.mxu1 %v2087_v13  ;;  %v720_v13 = vld [vmem:[%s5966_s27 + $0xb20] sm:$0xff] }
 0x38a   : > { %v2343_v15 = vld [vmem:[%s5966_s27 + $0x3dd8] sm:$0xff]  ;;  %3702 = vmatpush.msrb.mxu2 %v2207_v14  ;;  %v856_v14 = vld [vmem:[%s5966_s27 + $0xf60] sm:$0xff] }
 0x38b   : > { %v1943_v17 = vld [vmem:[%s5966_s27 + $0x3158] sm:$0xff]  ;;  %3721 = vmatpush.msrb.mxu3 %v2343_v15  ;;  %v456_v15 = vld [vmem:[%s5966_s27 + $0x2e0] sm:$0xff] }
 0x38c   : > { %v2079_v18 = vld [vmem:[%s5966_s27 + $0x3598] sm:$0xff]  ;;  %3663 = vmatpush.msrb.mxu0 %v1943_v17  ;;  %v592_v17 = vld [vmem:[%s5966_s27 + $0x720] sm:$0xff] }
 0x38d   : > { %v2199_v19 = vld [vmem:[%s5966_s27 + $0x3958] sm:$0xff]  ;;  %3682 = vmatpush.msrb.mxu1 %v2079_v18  ;;  %v712_v18 = vld [vmem:[%s5966_s27 + $0xae0] sm:$0xff] }
 0x38e   : > { %v2335_v20 = vld [vmem:[%s5966_s27 + $0x3d98] sm:$0xff]  ;;  %3703 = vmatpush.msrb.mxu2 %v2199_v19  ;;  %v848_v19 = vld [vmem:[%s5966_s27 + $0xf20] sm:$0xff] }
 0x38f   : > { %v1935_v22 = vld [vmem:[%s5966_s27 + $0x3118] sm:$0xff]  ;;  %3722 = vmatpush.msrb.mxu3 %v2335_v20  ;;  %v7116_v20 = vpop.f32.mrf.mxu3 }
 0x390   : > { %v2071_v23 = vld [vmem:[%s5966_s27 + $0x3558] sm:$0xff]  ;;  %3664 = vmatpush.msrb.mxu0 %v1935_v22  ;;  %v7118_v22 = vpop.f32.mrf.mxu1 }
 0x391   : > { %v2191_v24 = vld [vmem:[%s5966_s27 + $0x3918] sm:$0xff]  ;;  %3683 = vmatpush.msrb.mxu1 %v2071_v23  ;;  %v448_v23 = vld [vmem:[%s5966_s27 + $0x2a0] sm:$0xff] }
 0x392   : > { %v2327_v25 = vld [vmem:[%s5966_s27 + $0x3d58] sm:$0xff]  ;;  %3704 = vmatpush.msrb.mxu2 %v2191_v24  ;;  %v584_v24 = vld [vmem:[%s5966_s27 + $0x6e0] sm:$0xff] }
 0x393   : > { %v1927_v26 = vld [vmem:[%s5966_s27 + $0x30d8] sm:$0xff]  ;;  %3723 = vmatpush.msrb.mxu3 %v2327_v25  ;;  %v704_v25 = vld [vmem:[%s5966_s27 + $0xaa0] sm:$0xff] }
 0x394   : > { %v2063_v27 = vld [vmem:[%s5966_s27 + $0x3518] sm:$0xff]  ;;  %3665 = vmatpush.msrb.mxu0 %v1927_v26  ;;  %v840_v26 = vld [vmem:[%s5966_s27 + $0xee0] sm:$0xff] }
 0x395   : > { %v2183_v28 = vld [vmem:[%s5966_s27 + $0x38d8] sm:$0xff]  ;;  %3684 = vmatpush.msrb.mxu1 %v2063_v27  ;;  %v7124_v27 = vpop.f32.mrf.mxu0 }
 0x396   : > { %v2319_v29 = vld [vmem:[%s5966_s27 + $0x3d18] sm:$0xff]  ;;  %3705 = vmatpush.msrb.mxu2 %v2183_v28  ;;  %v440_v28 = vld [vmem:[%s5966_s27 + $0x260] sm:$0xff] }
 0x397   : > { %v1919_v31 = vld [vmem:[%s5966_s27 + $0x3098] sm:$0xff]  ;;  %3724 = vmatpush.msrb.mxu3 %v2319_v29  ;;  %v576_v29 = vld [vmem:[%s5966_s27 + $0x6a0] sm:$0xff] }
 0x398   : > { %v2055_v32 = vld [vmem:[%s5966_s27 + $0x34d8] sm:$0xff]  ;;  %3666 = vmatpush.msrb.mxu0 %v1919_v31  ;;  %v696_v31 = vld [vmem:[%s5966_s27 + $0xa60] sm:$0xff] }
 0x399   : > { %v2175_v33 = vld [vmem:[%s5966_s27 + $0x3898] sm:$0xff]  ;;  %3685 = vmatpush.msrb.mxu1 %v2055_v32  ;;  %v832_v32 = vld [vmem:[%s5966_s27 + $0xea0] sm:$0xff] }
 0x39a   : > { %v2311_v34 = vld [vmem:[%s5966_s27 + $0x3cd8] sm:$0xff]  ;;  %3706 = vmatpush.msrb.mxu2 %v2175_v33  ;;  %v7130_v33 = vpop.f32.mrf.mxu2 }
 0x39b   : > { %v1911_v36 = vld [vmem:[%s5966_s27 + $0x3058] sm:$0xff]  ;;  %3725 = vmatpush.msrb.mxu3 %v2311_v34  ;;  %v432_v34 = vld [vmem:[%s5966_s27 + $0x220] sm:$0xff] }
 0x39c   : > { %v2047_v37 = vld [vmem:[%s5966_s27 + $0x3498] sm:$0xff]  ;;  %3667 = vmatpush.msrb.mxu0 %v1911_v36  ;;  %v568_v36 = vld [vmem:[%s5966_s27 + $0x660] sm:$0xff] }
 0x39d   : > { %v2167_v38 = vld [vmem:[%s5966_s27 + $0x3858] sm:$0xff]  ;;  %3686 = vmatpush.msrb.mxu1 %v2047_v37  ;;  %v688_v37 = vld [vmem:[%s5966_s27 + $0xa20] sm:$0xff] }
 0x39e   : > { %v2303_v39 = vld [vmem:[%s5966_s27 + $0x3c98] sm:$0xff]  ;;  %3707 = vmatpush.msrb.mxu2 %v2167_v38  ;;  %v824_v38 = vld [vmem:[%s5966_s27 + $0xe60] sm:$0xff] }
 0x39f   : > { %v1903_v41 = vld [vmem:[%s5966_s27 + $0x3018] sm:$0xff]  ;;  %3726 = vmatpush.msrb.mxu3 %v2303_v39  ;;  %v424_v39 = vld [vmem:[%s5966_s27 + $0x1e0] sm:$0xff] }
 0x3a0   : > { %v2039_v42 = vld [vmem:[%s5966_s27 + $0x3458] sm:$0xff]  ;;  %3668 = vmatpush.msrb.mxu0 %v1903_v41  ;;  %v560_v41 = vld [vmem:[%s5966_s27 + $0x620] sm:$0xff] }
 0x3a1   : > { %v2159_v43 = vld [vmem:[%s5966_s27 + $0x3818] sm:$0xff]  ;;  %3687 = vmatpush.msrb.mxu1 %v2039_v42  ;;  %3669 = vmatmul.f32.vlgmr.msrb.gmra.mxu0 %v5700_v54  ;;  %v680_v42 = vld [vmem:[%s5966_s27 + $0x9e0] sm:$0xff] }
 0x3a2   : > { %v2295_v44 = vld [vmem:[%s5966_s27 + $0x3c58] sm:$0xff]  ;;  %3708 = vmatpush.msrb.mxu2 %v2159_v43  ;;  %3733 = vmatpush.msra.mxu0 %v488_v50  ;;  %v816_v43 = vld [vmem:[%s5966_s27 + $0xe20] sm:$0xff]  ;;  %v7142_v50 = vpop.f32.mrf.mxu1 }
 0x3a3   : > { %3727 = vmatpush.msrb.mxu3 %v2295_v44  ;;  %v2031_v52 = vld [vmem:[%s5966_s27 + $0x3418] sm:$0xff]  ;;  %v7140_v44 = vpop.f32.mrf.mxu3  ;;  %v808_v54 = vld [vmem:[%s5966_s27 + $0xde0] sm:$0xff] }
 0x3a4   : > { %v2287_v53 = vld [vmem:[%s5966_s27 + $0x3c18] sm:$0xff]  ;;  %3773 = vmatpush.msra.mxu2 %v744_v51  ;;  %3688 = vmatpush.msrb.mxu1 %v2031_v52  ;;  %v416_v51 = vld [vmem:[%s5966_s27 + $0x1a0] sm:$0xff] }
 0x3a5   : > { %v5701_v55 = vld.sshfl [vmem:[#allocation1 + $0x30] sm:$0xff pattern:$0x73625140]  ;;  %3728 = vmatpush.msrb.mxu3 %v2287_v53  ;;  %3689 = vmatmul.f32.vlgmr.msrb.gmra.mxu1 %v5702_v3  ;;  %v552_v52 = vld [vmem:[%s5966_s27 + $0x5e0] sm:$0xff]  ;;  %v7154_v3 = vpop.f32.mrf.mxu2 }
 0x3a6   : > { %3709 = vmatmul.f32.vlgmr.msrb.gmra.mxu2 %v5701_v55  ;;  %3729 = vmatmul.f32.vlgmr.msrb.gmra.mxu3 %v5703_v4  ;;  %v672_v53 = vld [vmem:[%s5966_s27 + $0x9a0] sm:$0xff]  ;;  %v7148_v55 = vpop.f32.mrf.mxu0 }
 0x3a7   : > { %3734 = vmatpush.msra.mxu0 %v480_v58  ;;  %3753 = vmatpush.msra.mxu1 %v616_v59  ;;  %v408_v58 = vld [vmem:[%s5966_s27 + $0x160] sm:$0xff] }
 0x3a8   : > { %3774 = vmatpush.msra.mxu2 %v736_v60  ;;  %3793 = vmatpush.msra.mxu3 %v872_v1  ;;  %v544_v59 = vld [vmem:[%s5966_s27 + $0x5a0] sm:$0xff] }
 0x3a9   : > { %3735 = vmatpush.msra.mxu0 %v472_v5  ;;  %3754 = vmatpush.msra.mxu1 %v608_v6  ;;  %v664_v60 = vld [vmem:[%s5966_s27 + $0x960] sm:$0xff] }
 0x3aa   : > { %3775 = vmatpush.msra.mxu2 %v728_v7  ;;  %3794 = vmatpush.msra.mxu3 %v864_v8  ;;  %v800_v1 = vld [vmem:[%s5966_s27 + $0xda0] sm:$0xff] }
 0x3ab   : > { %3736 = vmatpush.msra.mxu0 %v464_v10  ;;  %3755 = vmatpush.msra.mxu1 %v600_v12  ;;  %v400_v4 = vld [vmem:[%s5966_s27 + $0x120] sm:$0xff] }
 0x3ac   : > { %3776 = vmatpush.msra.mxu2 %v720_v13  ;;  %3795 = vmatpush.msra.mxu3 %v856_v14  ;;  %v536_v5 = vld [vmem:[%s5966_s27 + $0x560] sm:$0xff]  ;;  %v7164_v14 = vpop.f32.mrf.mxu3 }
 0x3ad   : > { %3737 = vmatpush.msra.mxu0 %v456_v15  ;;  %3756 = vmatpush.msra.mxu1 %v592_v17  ;;  %v656_v6 = vld [vmem:[%s5966_s27 + $0x920] sm:$0xff] }
 0x3ae   : > { %3777 = vmatpush.msra.mxu2 %v712_v18  ;;  %3796 = vmatpush.msra.mxu3 %v848_v19  ;;  %v792_v7 = vld [vmem:[%s5966_s27 + $0xd60] sm:$0xff] }
 0x3af   : > { %3738 = vmatpush.msra.mxu0 %v448_v23  ;;  %3757 = vmatpush.msra.mxu1 %v584_v24  ;;  %v392_v8 = vld [vmem:[%s5966_s27 + $0xe0] sm:$0xff]  ;;  %v7170_v23 = vpop.f32.mrf.mxu1 }
 0x3b0   : > { %3778 = vmatpush.msra.mxu2 %v704_v25  ;;  %3797 = vmatpush.msra.mxu3 %v840_v26  ;;  %v528_v10 = vld [vmem:[%s5966_s27 + $0x520] sm:$0xff] }
 0x3b1   : > { %3739 = vmatpush.msra.mxu0 %v440_v28  ;;  %3758 = vmatpush.msra.mxu1 %v576_v29  ;;  %v648_v12 = vld [vmem:[%s5966_s27 + $0x8e0] sm:$0xff]  ;;  %v7176_v29 = vpop.f32.mrf.mxu0 }
 0x3b2   : > { %3779 = vmatpush.msra.mxu2 %v696_v31  ;;  %3798 = vmatpush.msra.mxu3 %v832_v32  ;;  %v784_v13 = vld [vmem:[%s5966_s27 + $0xd20] sm:$0xff] }
 0x3b3   : > { %3740 = vmatpush.msra.mxu0 %v432_v34  ;;  %3759 = vmatpush.msra.mxu1 %v568_v36  ;;  %v384_v15 = vld [vmem:[%s5966_s27 + $0xa0] sm:$0xff] }
 0x3b4   : > { %3780 = vmatpush.msra.mxu2 %v688_v37  ;;  %3799 = vmatpush.msra.mxu3 %v824_v38  ;;  %v520_v17 = vld [vmem:[%s5966_s27 + $0x4e0] sm:$0xff]  ;;  %v7182_v37 = vpop.f32.mrf.mxu2 }
 0x3b5   : > { %3741 = vmatpush.msra.mxu0 %v424_v39  ;;  %3760 = vmatpush.msra.mxu1 %v560_v41  ;;  %v640_v18 = vld [vmem:[%s5966_s27 + $0x8a0] sm:$0xff] }
 0x3b6   : > { %3781 = vmatpush.msra.mxu2 %v680_v42  ;;  %3800 = vmatpush.msra.mxu3 %v816_v43  ;;  %v776_v19 = vld [vmem:[%s5966_s27 + $0xce0] sm:$0xff] }
 0x3b7   : > { %3742 = vmatpush.msra.mxu0 %v416_v51  ;;  %3761 = vmatpush.msra.mxu1 %v552_v52  ;;  %v376_v24 = vld [vmem:[%s5966_s27 + $0x60] sm:$0xff] }
 0x3b8   : > { %3782 = vmatpush.msra.mxu2 %v672_v53  ;;  %3801 = vmatpush.msra.mxu3 %v808_v54  ;;  %v512_v25 = vld [vmem:[%s5966_s27 + $0x4a0] sm:$0xff]  ;;  %v7192_v54 = vpop.f32.mrf.mxu3 }
 0x3b9   : > { %3743 = vmatpush.msra.mxu0 %v408_v58  ;;  %3762 = vmatpush.msra.mxu1 %v544_v59  ;;  %v632_v26 = vld [vmem:[%s5966_s27 + $0x860] sm:$0xff]  ;;  %v7194_v58 = vpop.f32.mrf.mxu1 }
 0x3ba   : > { %3783 = vmatpush.msra.mxu2 %v664_v60  ;;  %3802 = vmatpush.msra.mxu3 %v800_v1  ;;  %v768_v28 = vld [vmem:[%s5966_s27 + $0xca0] sm:$0xff] }
 0x3bb   : > { %3744 = vmatpush.msra.mxu0 %v400_v4  ;;  %3763 = vmatpush.msra.mxu1 %v536_v5  ;;  %v368_v31 = vld [vmem:[%s5966_s27 + $0x20] sm:$0xff]  ;;  %v7200_v5 = vpop.f32.mrf.mxu0 }
 0x3bc   : > { %3784 = vmatpush.msra.mxu2 %v656_v6  ;;  %3803 = vmatpush.msra.mxu3 %v792_v7  ;;  %v504_v32 = vld [vmem:[%s5966_s27 + $0x460] sm:$0xff] }
 0x3bd   : > { %3745 = vmatpush.msra.mxu0 %v392_v8  ;;  %3764 = vmatpush.msra.mxu1 %v528_v10  ;;  %v624_v34 = vld [vmem:[%s5966_s27 + $0x820] sm:$0xff] }
 0x3be   : > { %3785 = vmatpush.msra.mxu2 %v648_v12  ;;  %3804 = vmatpush.msra.mxu3 %v784_v13  ;;  %v760_v36 = vld [vmem:[%s5966_s27 + $0xc60] sm:$0xff]  ;;  %v7206_v12 = vpop.f32.mrf.mxu2 }
 0x3bf   : > { %3746 = vmatpush.msra.mxu0 %v384_v15  ;;  %3765 = vmatpush.msra.mxu1 %v520_v17  ;;  %v1000_v38 = vld [vmem:[%s5966_s27 + $0x13e0] sm:$0xff] }
 0x3c0   : > { %3786 = vmatpush.msra.mxu2 %v640_v18  ;;  %3805 = vmatpush.msra.mxu3 %v776_v19  ;;  %v1256_v39 = vld [vmem:[%s5966_s27 + $0x1be0] sm:$0xff] }
 0x3c1   : > { %3747 = vmatpush.msra.mxu0 %v376_v24  ;;  %3766 = vmatpush.msra.mxu1 %v512_v25  ;;  %v496_v41 = vld [vmem:[%s5966_s27 + $0x420] sm:$0xff] }
 0x3c2   : > { %3787 = vmatpush.msra.mxu2 %v632_v26  ;;  %3806 = vmatpush.msra.mxu3 %v768_v28  ;;  %v752_v42 = vld [vmem:[%s5966_s27 + $0xc20] sm:$0xff]  ;;  %v7216_v28 = vpop.f32.mrf.mxu3 }
 0x3c3   : > { %3748 = vmatpush.msra.mxu0 %v368_v31  ;;  %3767 = vmatpush.msra.mxu1 %v504_v32  ;;  %v992_v43 = vld [vmem:[%s5966_s27 + $0x13a0] sm:$0xff]  ;;  %v7218_v31 = vpop.f32.mrf.mxu1 }
 0x3c4   : > { %3788 = vmatpush.msra.mxu2 %v624_v34  ;;  %3807 = vmatpush.msra.mxu3 %v760_v36  ;;  %v1128_v51 = vld [vmem:[%s5966_s27 + $0x17e0] sm:$0xff] }
 0x3c5   : > { %3813 = vmatpush.msrb.mxu0 %v1000_v38  ;;  %v1248_v52 = vld [vmem:[%s5966_s27 + $0x1ba0] sm:$0xff]  ;;  %3768 = vmatpush.msra.mxu1 %v496_v41 }
 0x3c6   : > { %3853 = vmatpush.msrb.mxu2 %v1256_v39  ;;  %v1384_v53 = vld [vmem:[%s5966_s27 + $0x1fe0] sm:$0xff]  ;;  %3808 = vmatpush.msra.mxu3 %v752_v42  ;;  %v7224_v39 = vpop.f32.mrf.mxu0 }
 0x3c7   : > { %v984_v59 = vld [vmem:[%s5966_s27 + $0x1360] sm:$0xff]  ;;  %3814 = vmatpush.msrb.mxu0 %v992_v43  ;;  %3833 = vmatpush.msrb.mxu1 %v1128_v51 }
 0x3c8   : > { %v1120_v60 = vld [vmem:[%s5966_s27 + $0x17a0] sm:$0xff]  ;;  %3854 = vmatpush.msrb.mxu2 %v1248_v52  ;;  %3873 = vmatpush.msrb.mxu3 %v1384_v53  ;;  %v7230_v52 = vpop.f32.mrf.mxu2 }
 0x3c9   : > { %v1240_v1 = vld [vmem:[%s5966_s27 + $0x1b60] sm:$0xff]  ;;  %3815 = vmatpush.msrb.mxu0 %v984_v59  ;;  %3834 = vmatpush.msrb.mxu1 %v1120_v60 }
 0x3ca   : > { %v1376_v4 = vld [vmem:[%s5966_s27 + $0x1fa0] sm:$0xff]  ;;  %3855 = vmatpush.msrb.mxu2 %v1240_v1  ;;  %3749 = vmatmul.f32.vlgmr.msra.gmra.mxu0 %v6110_v46 }
 0x3cb   : > { %v976_v6 = vld [vmem:[%s5966_s27 + $0x1320] sm:$0xff]  ;;  %3874 = vmatpush.msrb.mxu3 %v1376_v4  ;;  %3789 = vmatmul.f32.vlgmr.msra.gmra.mxu2 %v6108_v45 }
 0x3cc   : > { %v1112_v7 = vld [vmem:[%s5966_s27 + $0x1760] sm:$0xff]  ;;  %3816 = vmatpush.msrb.mxu0 %v976_v6  ;;  %3809 = vmatmul.f32.vlgmr.msra.gmra.mxu3 %v6112_v47 }
 0x3cd   : > { %v1232_v8 = vld [vmem:[%s5966_s27 + $0x1b20] sm:$0xff]  ;;  %3835 = vmatpush.msrb.mxu1 %v1112_v7 }
 0x3ce   : > { %v1368_v10 = vld [vmem:[%s5966_s27 + $0x1f60] sm:$0xff]  ;;  %3856 = vmatpush.msrb.mxu2 %v1232_v8  ;;  %3769 = vmatmul.f32.vlgmr.msra.gmra.mxu1 %v6114_v48 }
 0x3cf   : > { %v968_v13 = vld [vmem:[%s5966_s27 + $0x12e0] sm:$0xff]  ;;  %3875 = vmatpush.msrb.mxu3 %v1368_v10  ;;  %v7240_v10 = vpop.f32.mrf.mxu3 }
 0x3d0   : > { %v1104_v15 = vld [vmem:[%s5966_s27 + $0x1720] sm:$0xff]  ;;  %3817 = vmatpush.msrb.mxu0 %v968_v13  ;;  %v7242_v13 = vpop.f32.mrf.mxu1 }
 0x3d1   : > { %v1224_v17 = vld [vmem:[%s5966_s27 + $0x1ae0] sm:$0xff]  ;;  %3836 = vmatpush.msrb.mxu1 %v1104_v15 }
 0x3d2   : > { %v1360_v18 = vld [vmem:[%s5966_s27 + $0x1f20] sm:$0xff]  ;;  %3857 = vmatpush.msrb.mxu2 %v1224_v17 }
 0x3d3   : > { %v960_v19 = vld [vmem:[%s5966_s27 + $0x12a0] sm:$0xff]  ;;  %3876 = vmatpush.msrb.mxu3 %v1360_v18 }
 0x3d4   : > { %v1096_v24 = vld [vmem:[%s5966_s27 + $0x16e0] sm:$0xff]  ;;  %3818 = vmatpush.msrb.mxu0 %v960_v19 }
 0x3d5   : > { %v1216_v25 = vld [vmem:[%s5966_s27 + $0x1aa0] sm:$0xff]  ;;  %3837 = vmatpush.msrb.mxu1 %v1096_v24  ;;  %v7248_v24 = vpop.f32.mrf.mxu0 }
 0x3d6   : > { %v1352_v26 = vld [vmem:[%s5966_s27 + $0x1ee0] sm:$0xff]  ;;  %3858 = vmatpush.msrb.mxu2 %v1216_v25 }
 0x3d7   : > { %v952_v32 = vld [vmem:[%s5966_s27 + $0x1260] sm:$0xff]  ;;  %3877 = vmatpush.msrb.mxu3 %v1352_v26 }
 0x3d8   : > { %v1088_v34 = vld [vmem:[%s5966_s27 + $0x16a0] sm:$0xff]  ;;  %3819 = vmatpush.msrb.mxu0 %v952_v32 }
 0x3d9   : > { %v1208_v36 = vld [vmem:[%s5966_s27 + $0x1a60] sm:$0xff]  ;;  %3838 = vmatpush.msrb.mxu1 %v1088_v34 }
 0x3da   : > { %v1344_v38 = vld [vmem:[%s5966_s27 + $0x1ea0] sm:$0xff]  ;;  %3859 = vmatpush.msrb.mxu2 %v1208_v36  ;;  %v7254_v36 = vpop.f32.mrf.mxu2 }
 0x3db   : > { %v944_v41 = vld [vmem:[%s5966_s27 + $0x1220] sm:$0xff]  ;;  %3878 = vmatpush.msrb.mxu3 %v1344_v38 }
 0x3dc   : > { %v1080_v42 = vld [vmem:[%s5966_s27 + $0x1660] sm:$0xff]  ;;  %3820 = vmatpush.msrb.mxu0 %v944_v41 }
 0x3dd   : > { %v1200_v43 = vld [vmem:[%s5966_s27 + $0x1a20] sm:$0xff]  ;;  %3839 = vmatpush.msrb.mxu1 %v1080_v42 }
 0x3de   : > { %v1336_v51 = vld [vmem:[%s5966_s27 + $0x1e60] sm:$0xff]  ;;  %3860 = vmatpush.msrb.mxu2 %v1200_v43 }
 0x3df   : > { %v936_v53 = vld [vmem:[%s5966_s27 + $0x11e0] sm:$0xff]  ;;  %3879 = vmatpush.msrb.mxu3 %v1336_v51 }
 0x3e0   : > { %v1072_v59 = vld [vmem:[%s5966_s27 + $0x1620] sm:$0xff]  ;;  %3821 = vmatpush.msrb.mxu0 %v936_v53 }
 0x3e1   : > { %v1192_v60 = vld [vmem:[%s5966_s27 + $0x19e0] sm:$0xff]  ;;  %3840 = vmatpush.msrb.mxu1 %v1072_v59 }
 0x3e2   : > { %v1328_v1 = vld [vmem:[%s5966_s27 + $0x1e20] sm:$0xff]  ;;  %3861 = vmatpush.msrb.mxu2 %v1192_v60 }
 0x3e3   : > { %v928_v4 = vld [vmem:[%s5966_s27 + $0x11a0] sm:$0xff]  ;;  %3880 = vmatpush.msrb.mxu3 %v1328_v1  ;;  %v7264_v1 = vpop.f32.mrf.mxu3 }
 0x3e4   : > { %v1064_v6 = vld [vmem:[%s5966_s27 + $0x15e0] sm:$0xff]  ;;  %3822 = vmatpush.msrb.mxu0 %v928_v4 }
 0x3e5   : > { %v1184_v7 = vld [vmem:[%s5966_s27 + $0x19a0] sm:$0xff]  ;;  %3841 = vmatpush.msrb.mxu1 %v1064_v6 }
 0x3e6   : > { %v1320_v8 = vld [vmem:[%s5966_s27 + $0x1de0] sm:$0xff]  ;;  %3862 = vmatpush.msrb.mxu2 %v1184_v7 }
 0x3e7   : > { %v920_v15 = vld [vmem:[%s5966_s27 + $0x1160] sm:$0xff]  ;;  %3881 = vmatpush.msrb.mxu3 %v1320_v8 }
 0x3e8   : > { %v1056_v17 = vld [vmem:[%s5966_s27 + $0x15a0] sm:$0xff]  ;;  %3823 = vmatpush.msrb.mxu0 %v920_v15  ;;  %v7270_v15 = vpop.f32.mrf.mxu1 }
 0x3e9   : > { %v1176_v18 = vld [vmem:[%s5966_s27 + $0x1960] sm:$0xff]  ;;  %3842 = vmatpush.msrb.mxu1 %v1056_v17 }
 0x3ea   : > { %v1312_v19 = vld [vmem:[%s5966_s27 + $0x1da0] sm:$0xff]  ;;  %3863 = vmatpush.msrb.mxu2 %v1176_v18 }
 0x3eb   : > { %v912_v25 = vld [vmem:[%s5966_s27 + $0x1120] sm:$0xff]  ;;  %3882 = vmatpush.msrb.mxu3 %v1312_v19 }
 0x3ec   : > { %v1048_v26 = vld [vmem:[%s5966_s27 + $0x1560] sm:$0xff]  ;;  %3824 = vmatpush.msrb.mxu0 %v912_v25  ;;  %v7275_v25 = vpop.f32.mrf.mxu0 }
 0x3ed   : > { %v1168_v32 = vld [vmem:[%s5966_s27 + $0x1920] sm:$0xff]  ;;  %3843 = vmatpush.msrb.mxu1 %v1048_v26 }
 0x3ee   : > { %v1304_v34 = vld [vmem:[%s5966_s27 + $0x1d60] sm:$0xff]  ;;  %3864 = vmatpush.msrb.mxu2 %v1168_v32 }
 0x3ef   : > { %v904_v38 = vld [vmem:[%s5966_s27 + $0x10e0] sm:$0xff]  ;;  %3883 = vmatpush.msrb.mxu3 %v1304_v34  ;;  %v7280_v34 = vpop.f32.mrf.mxu2 }
 0x3f0   : > { %v1040_v41 = vld [vmem:[%s5966_s27 + $0x1520] sm:$0xff]  ;;  %3825 = vmatpush.msrb.mxu0 %v904_v38 }
 0x3f1   : > { %v1160_v42 = vld [vmem:[%s5966_s27 + $0x18e0] sm:$0xff]  ;;  %3844 = vmatpush.msrb.mxu1 %v1040_v41 }
 0x3f2   : > { %v1296_v43 = vld [vmem:[%s5966_s27 + $0x1d20] sm:$0xff]  ;;  %3865 = vmatpush.msrb.mxu2 %v1160_v42 }
 0x3f3   : > { %v896_v51 = vld [vmem:[%s5966_s27 + $0x10a0] sm:$0xff]  ;;  %3884 = vmatpush.msrb.mxu3 %v1296_v43 }
 0x3f4   : > { %v1032_v53 = vld [vmem:[%s5966_s27 + $0x14e0] sm:$0xff]  ;;  %3826 = vmatpush.msrb.mxu0 %v896_v51 }
 0x3f5   : > { %v1152_v59 = vld [vmem:[%s5966_s27 + $0x18a0] sm:$0xff]  ;;  %3845 = vmatpush.msrb.mxu1 %v1032_v53 }
 0x3f6   : > { %v1288_v60 = vld [vmem:[%s5966_s27 + $0x1ce0] sm:$0xff]  ;;  %3866 = vmatpush.msrb.mxu2 %v1152_v59 }
 0x3f7   : > { %v888_v4 = vld [vmem:[%s5966_s27 + $0x1060] sm:$0xff]  ;;  %3885 = vmatpush.msrb.mxu3 %v1288_v60  ;;  %v7291_v60 = vpop.f32.mrf.mxu3 }
 0x3f8   : > { %v1024_v6 = vld [vmem:[%s5966_s27 + $0x14a0] sm:$0xff]  ;;  %3827 = vmatpush.msrb.mxu0 %v888_v4  ;;  %v7293_v4 = vpop.f32.mrf.mxu1 }
 0x3f9   : > { %v1144_v7 = vld [vmem:[%s5966_s27 + $0x1860] sm:$0xff]  ;;  %3846 = vmatpush.msrb.mxu1 %v1024_v6 }
 0x3fa   : > { %v1280_v8 = vld [vmem:[%s5966_s27 + $0x1ca0] sm:$0xff]  ;;  %3867 = vmatpush.msrb.mxu2 %v1144_v7 }
 0x3fb   : > { %v880_v17 = vld [vmem:[%s5966_s27 + $0x1020] sm:$0xff]  ;;  %3886 = vmatpush.msrb.mxu3 %v1280_v8 }
 0x3fc   : > { %v1016_v18 = vld [vmem:[%s5966_s27 + $0x1460] sm:$0xff]  ;;  %3828 = vmatpush.msrb.mxu0 %v880_v17 }
 0x3fd   : > { %v1136_v19 = vld [vmem:[%s5966_s27 + $0x1820] sm:$0xff]  ;;  %3847 = vmatpush.msrb.mxu1 %v1016_v18  ;;  %v7300_v18 = vpop.f32.mrf.mxu0  ;;  %3829 = vmatmul.f32.vlgmr.msrb.gmra.mxu0 %v6130_v62 }
 0x3fe   : > { %v1272_v26 = vld [vmem:[%s5966_s27 + $0x1c60] sm:$0xff]  ;;  %3868 = vmatpush.msrb.mxu2 %v1136_v19 }
 0x3ff   : > { %v1512_v32 = vld [vmem:[%s5966_s27 + $0x23e0] sm:$0xff]  ;;  %3887 = vmatpush.msrb.mxu3 %v1272_v26  ;;  %3869 = vmatmul.f32.vlgmr.msrb.gmra.mxu2 %v6128_v61 }
 0x400   : > { %v1768_v38 = vld [vmem:[%s5966_s27 + $0x2be0] sm:$0xff]  ;;  %3893 = vmatpush.msra.mxu0 %v1512_v32 }
 0x401   : > { %v1008_v41 = vld [vmem:[%s5966_s27 + $0x1420] sm:$0xff]  ;;  %3933 = vmatpush.msra.mxu2 %v1768_v38  ;;  %v7305_v38 = vpop.f32.mrf.mxu2 }
 0x402   : > { %v1264_v42 = vld [vmem:[%s5966_s27 + $0x1c20] sm:$0xff]  ;;  %3848 = vmatpush.msrb.mxu1 %v1008_v41 }
 0x403   : > { %v1504_v43 = vld [vmem:[%s5966_s27 + $0x23a0] sm:$0xff]  ;;  %3888 = vmatpush.msrb.mxu3 %v1264_v42  ;;  %3849 = vmatmul.f32.vlgmr.msrb.gmra.mxu1 %v6134_v0 }
 0x404   : > { %v1640_v51 = vld [vmem:[%s5966_s27 + $0x27e0] sm:$0xff]  ;;  %3894 = vmatpush.msra.mxu0 %v1504_v43  ;;  %3889 = vmatmul.f32.vlgmr.msrb.gmra.mxu3 %v6132_v63 }
 0x405   : > { %v1760_v53 = vld [vmem:[%s5966_s27 + $0x2ba0] sm:$0xff]  ;;  %3913 = vmatpush.msra.mxu1 %v1640_v51 }
 0x406   : > { %v1896_v59 = vld [vmem:[%s5966_s27 + $0x2fe0] sm:$0xff]  ;;  %3934 = vmatpush.msra.mxu2 %v1760_v53 }
 0x407   : > { %v1496_v6 = vld [vmem:[%s5966_s27 + $0x2360] sm:$0xff]  ;;  %3953 = vmatpush.msra.mxu3 %v1896_v59  ;;  %v7314_v59 = vpop.f32.mrf.mxu3 }
 0x408   : > { %v1632_v7 = vld [vmem:[%s5966_s27 + $0x27a0] sm:$0xff]  ;;  %3895 = vmatpush.msra.mxu0 %v1496_v6  ;;  %v7316_v6 = vpop.f32.mrf.mxu1 }
 0x409   : > { %v1752_v8 = vld [vmem:[%s5966_s27 + $0x2b60] sm:$0xff]  ;;  %3914 = vmatpush.msra.mxu1 %v1632_v7  ;;  %v7330_v63 = vpop.f32.mrf.mxu2 }
 0x40a   : > { %v1888_v17 = vld [vmem:[%s5966_s27 + $0x2fa0] sm:$0xff]  ;;  %3935 = vmatpush.msra.mxu2 %v1752_v8 }
 0x40b   : > { %v1488_v19 = vld [vmem:[%s5966_s27 + $0x2320] sm:$0xff]  ;;  %3954 = vmatpush.msra.mxu3 %v1888_v17 }
 0x40c   : > { %v1624_v26 = vld [vmem:[%s5966_s27 + $0x2760] sm:$0xff]  ;;  %3896 = vmatpush.msra.mxu0 %v1488_v19 }
 0x40d   : > { %v1744_v32 = vld [vmem:[%s5966_s27 + $0x2b20] sm:$0xff]  ;;  %3915 = vmatpush.msra.mxu1 %v1624_v26  ;;  %v7323_v26 = vpop.f32.mrf.mxu0 }
 0x40e   : > { %v1880_v41 = vld [vmem:[%s5966_s27 + $0x2f60] sm:$0xff]  ;;  %3936 = vmatpush.msra.mxu2 %v1744_v32 }
 0x40f   : > { %v1480_v42 = vld [vmem:[%s5966_s27 + $0x22e0] sm:$0xff]  ;;  %3955 = vmatpush.msra.mxu3 %v1880_v41 }
 0x410   : > { %v1616_v43 = vld [vmem:[%s5966_s27 + $0x2720] sm:$0xff]  ;;  %3897 = vmatpush.msra.mxu0 %v1480_v42  ;;  %v3450_v48 = vpop.f32.mrf.mxu1 }
 0x411   : > { %v1736_v51 = vld [vmem:[%s5966_s27 + $0x2ae0] sm:$0xff]  ;;  %3916 = vmatpush.msra.mxu1 %v1616_v43 }
 0x412   : > { %v1872_v53 = vld [vmem:[%s5966_s27 + $0x2f20] sm:$0xff]  ;;  %3937 = vmatpush.msra.mxu2 %v1736_v51 }
 0x413   : > { %v1472_v7 = vld [vmem:[%s5966_s27 + $0x22a0] sm:$0xff]  ;;  %3956 = vmatpush.msra.mxu3 %v1872_v53 }
 0x414   : > { %v1608_v8 = vld [vmem:[%s5966_s27 + $0x26e0] sm:$0xff]  ;;  %3898 = vmatpush.msra.mxu0 %v1472_v7  ;;  %v2811_v7 = vadd.f32 %v7142_v50, %v7148_v55 }
 0x415   : > { %v1728_v17 = vld [vmem:[%s5966_s27 + $0x2aa0] sm:$0xff]  ;;  %3917 = vmatpush.msra.mxu1 %v1608_v8 }
 0x416   : > { %v1864_v19 = vld [vmem:[%s5966_s27 + $0x2ee0] sm:$0xff]  ;;  %3938 = vmatpush.msra.mxu2 %v1728_v17 }
 0x417   : > { %v1464_v32 = vld [vmem:[%s5966_s27 + $0x2260] sm:$0xff]  ;;  %3957 = vmatpush.msra.mxu3 %v1864_v19 }
 0x418   : > { %v1600_v41 = vld [vmem:[%s5966_s27 + $0x26a0] sm:$0xff]  ;;  %3899 = vmatpush.msra.mxu0 %v1464_v32  ;;  %v3131_v32 = vadd.f32 %v7242_v13, %v7248_v24 }
 0x419   : > { %v1720_v42 = vld [vmem:[%s5966_s27 + $0x2a60] sm:$0xff]  ;;  %3918 = vmatpush.msra.mxu1 %v1600_v41  ;;  %v7344_v41 = vpop.f32.mrf.mxu3 }
 0x41a   : > { %v1856_v43 = vld [vmem:[%s5966_s27 + $0x2ea0] sm:$0xff]  ;;  %3939 = vmatpush.msra.mxu2 %v1720_v42 }
 0x41b   : > { %v1456_v51 = vld [vmem:[%s5966_s27 + $0x2220] sm:$0xff]  ;;  %3958 = vmatpush.msra.mxu3 %v1856_v43  ;;  %v2831_v43 = vadd.f32 %v7154_v3, %v2811_v7  ;;  %v3151_v3 = vadd.f32 %v7254_v36, %v3131_v32  ;;  %v3470_v7 = vpop.f32.mrf.mxu2 }
 0x41c   : > { %v1592_v62 = vld [vmem:[%s5966_s27 + $0x2660] sm:$0xff]  ;;  %3900 = vmatpush.msra.mxu0 %v1456_v51  ;;  %v3430_v51 = vpop.f32.mrf.mxu0 }
 0x41d   : > { %v1712_v53 = vld [vmem:[%s5966_s27 + $0x2a20] sm:$0xff]  ;;  %3919 = vmatpush.msra.mxu1 %v1592_v62 }
 0x41e   : > { %v1848_v0 = vld [vmem:[%s5966_s27 + $0x2e60] sm:$0xff]  ;;  %3940 = vmatpush.msra.mxu2 %v1712_v53 }
 0x41f   : > { %v1448_v8 = vld [vmem:[%s5966_s27 + $0x21e0] sm:$0xff]  ;;  %3959 = vmatpush.msra.mxu3 %v1848_v0  ;;  %v3451_v0 = vadd.f32 %v3450_v48, %v3430_v51  ;;  %v3171_v51 = vadd.f32 %v7264_v1, %v3151_v3 }
 0x420   : > { %v1584_v61 = vld [vmem:[%s5966_s27 + $0x2620] sm:$0xff]  ;;  %3901 = vmatpush.msra.mxu0 %v1448_v8 }
 0x421   : > { %v1704_v17 = vld [vmem:[%s5966_s27 + $0x29e0] sm:$0xff]  ;;  %3920 = vmatpush.msra.mxu1 %v1584_v61  ;;  %v2491_v61 = vadd.f32 %v7046_v11, %v7052_v16  ;;  %v3471_v36 = vadd.f32 %v3470_v7, %v3451_v0 }
 0x422   : > { %v1840_v19 = vld [vmem:[%s5966_s27 + $0x2e20] sm:$0xff]  ;;  %3941 = vmatpush.msra.mxu2 %v1704_v17 }
 0x423   : > { %v1440_v50 = vld [vmem:[%s5966_s27 + $0x21a0] sm:$0xff]  ;;  %3960 = vmatpush.msra.mxu3 %v1840_v19 }
 0x424   : > { %v1576_v55 = vld [vmem:[%s5966_s27 + $0x25e0] sm:$0xff]  ;;  %3902 = vmatpush.msra.mxu0 %v1440_v50 }
 0x425   : > { %v1696_v42 = vld [vmem:[%s5966_s27 + $0x29a0] sm:$0xff]  ;;  %3921 = vmatpush.msra.mxu1 %v1576_v55  ;;  %v2851_v55 = vadd.f32 %v7164_v14, %v2831_v43 }
 0x426   : > { %v1832_v62 = vld [vmem:[%s5966_s27 + $0x2de0] sm:$0xff]  ;;  %3942 = vmatpush.msra.mxu2 %v1696_v42 }
 0x427   : > { %v1432_v13 = vld [vmem:[%s5966_s27 + $0x2160] sm:$0xff]  ;;  %3961 = vmatpush.msra.mxu3 %v1832_v62  ;;  %v2511_v62 = vadd.f32 %v7058_v21, %v2491_v61 }
 0x428   : > { %v1568_v24 = vld [vmem:[%s5966_s27 + $0x25a0] sm:$0xff]  ;;  %3903 = vmatpush.msra.mxu0 %v1432_v13  ;;  %v3490_v13 = vpop.f32.mrf.mxu3 }
 0x429   : > { %v1688_v53 = vld [vmem:[%s5966_s27 + $0x2960] sm:$0xff]  ;;  %3922 = vmatpush.msra.mxu1 %v1568_v24  ;;  %v2531_v7 = vadd.f32 %v7068_v30, %v2511_v62 }
 0x42a   : > { %v1824_v8 = vld [vmem:[%s5966_s27 + $0x2da0] sm:$0xff]  ;;  %3943 = vmatpush.msra.mxu2 %v1688_v53  ;;  %v2871_v53 = vadd.f32 %v7176_v29, %v2851_v55 }
 0x42b   : > { %v1424_v17 = vld [vmem:[%s5966_s27 + $0x2120] sm:$0xff]  ;;  %3962 = vmatpush.msra.mxu3 %v1824_v8  ;;  %v3491_v8 = vadd.f32 %v3490_v13, %v3471_v36  ;;  %v2551_v36 = vadd.f32 %v7080_v40, %v2531_v7  ;;  %v5705_v13 = vld.sshfl [vmem:[#allocation1 + $0x10] sm:$0xff pattern:$0x73625140] }
 0x42c   : > { %v1560_v19 = vld [vmem:[%s5966_s27 + $0x2560] sm:$0xff]  ;;  %3904 = vmatpush.msra.mxu0 %v1424_v17  ;;  %v3191_v17 = vadd.f32 %v7275_v25, %v3171_v51  ;;  %v5704_v51 = vld.sshfl [vmem:[#allocation1] sm:$0xff pattern:$0x73625140] }
 0x42d   : > { %v1680_v48 = vld [vmem:[%s5966_s27 + $0x2920] sm:$0xff]  ;;  %3923 = vmatpush.msra.mxu1 %v1560_v19  ;;  %v3510_v19 = vpop.f32.mrf.mxu0 }
 0x42e   : > { %v1816_v50 = vld [vmem:[%s5966_s27 + $0x2d60] sm:$0xff]  ;;  %3944 = vmatpush.msra.mxu2 %v1680_v48  ;;  %v3511_v30 = vadd.f32 %v3510_v19, %v3491_v8 }
 0x42f   : > { %v1416_v11 = vld [vmem:[%s5966_s27 + $0x20e0] sm:$0xff]  ;;  %3963 = vmatpush.msra.mxu3 %v1816_v50 }
 0x430   : > { %v1552_v16 = vld [vmem:[%s5966_s27 + $0x2520] sm:$0xff]  ;;  %3905 = vmatpush.msra.mxu0 %v1416_v11  ;;  %v2891_v11 = vadd.f32 %v7170_v23, %v2871_v53  ;;  %v2571_v53 = vadd.f32 %v7074_v35, %v2551_v36 }
 0x431   : > { %v1672_v32 = vld [vmem:[%s5966_s27 + $0x28e0] sm:$0xff]  ;;  %3924 = vmatpush.msra.mxu1 %v1552_v16 }
 0x432   : > { %v1808_v42 = vld [vmem:[%s5966_s27 + $0x2d20] sm:$0xff]  ;;  %3945 = vmatpush.msra.mxu2 %v1672_v32  ;;  %v3211_v32 = vadd.f32 %v7270_v15, %v3191_v17 }
 0x433   : > { %v1408_v14 = vld [vmem:[%s5966_s27 + $0x20a0] sm:$0xff]  ;;  %3964 = vmatpush.msra.mxu3 %v1808_v42  ;;  %v3530_v42 = vpop.f32.mrf.mxu1 }
 0x434   : > { %v1544_v43 = vld [vmem:[%s5966_s27 + $0x24e0] sm:$0xff]  ;;  %3906 = vmatpush.msra.mxu0 %v1408_v14  ;;  %v2911_v14 = vadd.f32 %v7182_v37, %v2891_v11  ;;  %v3531_v15 = vadd.f32 %v3530_v42, %v3511_v30  ;;  %v3550_v37 = vpop.f32.mrf.mxu2  ;;  %v3570_v30 = vpop.f32.mrf.mxu3 }
 0x435   : > { %v1664_v24 = vld [vmem:[%s5966_s27 + $0x28a0] sm:$0xff]  ;;  %3925 = vmatpush.msra.mxu1 %v1544_v43  ;;  %v3590_v42 = vpop.f32.mrf.mxu0 }
 0x436   : > { %v1800_v0 = vld [vmem:[%s5966_s27 + $0x2ce0] sm:$0xff]  ;;  %3946 = vmatpush.msra.mxu2 %v1664_v24  ;;  %v2931_v19 = vadd.f32 %v7192_v54, %v2911_v14 }
 0x437   : > { %v1400_v21 = vld [vmem:[%s5966_s27 + $0x2060] sm:$0xff]  ;;  %3965 = vmatpush.msra.mxu3 %v1800_v0 }
 0x438   : > { %v1536_v1 = vld [vmem:[%s5966_s27 + $0x24a0] sm:$0xff]  ;;  %3907 = vmatpush.msra.mxu0 %v1400_v21  ;;  %v3231_v21 = vadd.f32 %v7280_v34, %v3211_v32  ;;  %v2951_v11 = vadd.f32 %v7200_v5, %v2931_v19 }
 0x439   : > { %v1656_v61 = vld [vmem:[%s5966_s27 + $0x2860] sm:$0xff]  ;;  %3926 = vmatpush.msra.mxu1 %v1536_v1  ;;  %v5706_v1 = vld.sshfl [vmem:[#allocation1 + $0x8] sm:$0xff pattern:$0x73625140] }
 0x43a   : > { %v1792_v3 = vld [vmem:[%s5966_s27 + $0x2ca0] sm:$0xff]  ;;  %3947 = vmatpush.msra.mxu2 %v1656_v61  ;;  %v3251_v54 = vadd.f32 %v7291_v60, %v3231_v21  ;;  %v2971_v14 = vadd.f32 %v7194_v58, %v2951_v11 }
 0x43b   : > { %v1392_v29 = vld [vmem:[%s5966_s27 + $0x2020] sm:$0xff]  ;;  %3966 = vmatpush.msra.mxu3 %v1792_v3 }
 0x43c   : > { %v1528_v48 = vld [vmem:[%s5966_s27 + $0x2460] sm:$0xff]  ;;  %3908 = vmatpush.msra.mxu0 %v1392_v29  ;;  %v3551_v29 = vadd.f32 %v3550_v37, %v3531_v15  ;;  %v3650_v11 = vpop.f32.mrf.mxu3 }
 0x43d   : > { %v1648_v50 = vld [vmem:[%s5966_s27 + $0x2820] sm:$0xff]  ;;  %3927 = vmatpush.msra.mxu1 %v1528_v48  ;;  %3909 = vmatmul.f32.vlgmr.msra.gmra.mxu0 %v5704_v51 }
 0x43e   : > { %v1784_v55 = vld [vmem:[%s5966_s27 + $0x2c60] sm:$0xff]  ;;  %3948 = vmatpush.msra.mxu2 %v1648_v50 }
 0x43f   : > { %v2024_v25 = vld [vmem:[%s5966_s27 + $0x33e0] sm:$0xff]  ;;  %3967 = vmatpush.msra.mxu3 %v1784_v55  ;;  %3949 = vmatmul.f32.vlgmr.msra.gmra.mxu2 %v5705_v13  ;;  %v2591_v55 = vadd.f32 %v7086_v49, %v2571_v53  ;;  %v3271_v49 = vadd.f32 %v7300_v18, %v3251_v54  ;;  %v3610_v53 = vpop.f32.mrf.mxu1 }
 0x440   : > { %v2280_v16 = vld [vmem:[%s5966_s27 + $0x3be0] sm:$0xff]  ;;  %3973 = vmatpush.msrb.mxu0 %v2024_v25 }
 0x441   : > { %v1520_v62 = vld [vmem:[%s5966_s27 + $0x2420] sm:$0xff]  ;;  %4013 = vmatpush.msrb.mxu2 %v2280_v16  ;;  %v2611_v13 = vadd.f32 %v7092_v56, %v2591_v55  ;;  %v2991_v56 = vadd.f32 %v7206_v12, %v2971_v14  ;;  %v3291_v58 = vadd.f32 %v7293_v4, %v3271_v49 }
 0x442   : > { %v1776_v23 = vld [vmem:[%s5966_s27 + $0x2c20] sm:$0xff]  ;;  %3928 = vmatpush.msra.mxu1 %v1520_v62  ;;  %v3571_v62 = vadd.f32 %v3570_v30, %v3551_v29 }
 0x443   : > { %v2016_v40 = vld [vmem:[%s5966_s27 + $0x33a0] sm:$0xff]  ;;  %3968 = vmatpush.msra.mxu3 %v1776_v23  ;;  %3929 = vmatmul.f32.vlgmr.msra.gmra.mxu1 %v5706_v1 }
 0x444   : > { %v2152_v43 = vld [vmem:[%s5966_s27 + $0x37e0] sm:$0xff]  ;;  %3974 = vmatpush.msrb.mxu0 %v2016_v40 }
 0x445   : > { %v2272_v24 = vld [vmem:[%s5966_s27 + $0x3ba0] sm:$0xff]  ;;  %3993 = vmatpush.msrb.mxu1 %v2152_v43  ;;  %v3591_v43 = vadd.f32 %v3590_v42, %v3571_v62  ;;  %v3670_v62 = vpop.f32.mrf.mxu0 }
 0x446   : > { %v2408_v0 = vld [vmem:[%s5966_s27 + $0x3fe0] sm:$0xff]  ;;  %4014 = vmatpush.msrb.mxu2 %v2272_v24 }
 0x447   : > { %v5707_v8 = vld.sshfl [vmem:[#allocation1 + $0x18] sm:$0xff pattern:$0x73625140]  ;;  %4033 = vmatpush.msrb.mxu3 %v2408_v0  ;;  %v2631_v0 = vadd.f32 %v7100_v2, %v2611_v13  ;;  %v3311_v2 = vadd.f32 %v7305_v38, %v3291_v58 }
 0x448   : > { %3969 = vmatmul.f32.vlgmr.msra.gmra.mxu3 %v5707_v8  ;;  %v2008_v61 = vld [vmem:[%s5966_s27 + $0x3360] sm:$0xff] }
 0x449   : > { %v2144_v3 = vld [vmem:[%s5966_s27 + $0x37a0] sm:$0xff]  ;;  %3975 = vmatpush.msrb.mxu0 %v2008_v61  ;;  %v3630_v61 = vpop.f32.mrf.mxu2  ;;  %v2651_v19 = vadd.f32 %v7094_v57, %v2631_v0 }
 0x44a   : > { %v2264_v7 = vld [vmem:[%s5966_s27 + $0x3b60] sm:$0xff]  ;;  %3994 = vmatpush.msrb.mxu1 %v2144_v3  ;;  %v3611_v3 = vadd.f32 %v3610_v53, %v3591_v43 }
 0x44b   : > { %v2400_v17 = vld [vmem:[%s5966_s27 + $0x3fa0] sm:$0xff]  ;;  %4015 = vmatpush.msrb.mxu2 %v2264_v7  ;;  %v2671_v55 = vadd.f32 %v7106_v9, %v2651_v19 }
 0x44c   : > { %v2000_v35 = vld [vmem:[%s5966_s27 + $0x3320] sm:$0xff]  ;;  %4034 = vmatpush.msrb.mxu3 %v2400_v17  ;;  %v3631_v29 = vadd.f32 %v3630_v61, %v3611_v3  ;;  %v3730_v3 = vpop.f32.mrf.mxu3 }
 0x44d   : > { %v2136_v34 = vld [vmem:[%s5966_s27 + $0x3760] sm:$0xff]  ;;  %3976 = vmatpush.msrb.mxu0 %v2000_v35  ;;  %v3011_v35 = vadd.f32 %v7216_v28, %v2991_v56  ;;  %v3331_v28 = vadd.f32 %v7314_v59, %v3311_v2  ;;  %v2691_v42 = vadd.f32 %v7116_v20, %v2671_v55  ;;  %v737_v55 = vld [vmem:[%s5966_s27 + $0xba8] sm:$0xff] }
 0x44e   : > { %v2256_v48 = vld [vmem:[%s5966_s27 + $0x3b20] sm:$0xff]  ;;  %3995 = vmatpush.msrb.mxu1 %v2136_v34 }
 0x44f   : > { %v2392_v50 = vld [vmem:[%s5966_s27 + $0x3f60] sm:$0xff]  ;;  %4016 = vmatpush.msrb.mxu2 %v2256_v48  ;;  %v3031_v57 = vadd.f32 %v7224_v39, %v3011_v35  ;;  %v3351_v9 = vadd.f32 %v7323_v26, %v3331_v28  ;;  %v2711_v14 = vadd.f32 %v7124_v27, %v2691_v42  ;;  %v358_v28 = vld [vmem:[#allocation2] sm:$0xff]  ;;  %v721_v42 = vld [vmem:[%s5966_s27 + $0xb28] sm:$0xff] }
 0x450   : > { %v1992_v25 = vld [vmem:[%s5966_s27 + $0x32e0] sm:$0xff]  ;;  %4035 = vmatpush.msrb.mxu3 %v2392_v50 }
 0x451   : > { %v2128_v16 = vld [vmem:[%s5966_s27 + $0x3720] sm:$0xff]  ;;  %3977 = vmatpush.msrb.mxu0 %v1992_v25  ;;  %v2731_v53 = vadd.f32 %v7118_v22, %v2711_v14  ;;  %v705_v14 = vld [vmem:[%s5966_s27 + $0xaa8] sm:$0xff] }
 0x452   : > { %v2248_v36 = vld [vmem:[%s5966_s27 + $0x3ae0] sm:$0xff]  ;;  %3996 = vmatpush.msrb.mxu1 %v2128_v16 }
 0x453   : > { %v2384_v32 = vld [vmem:[%s5966_s27 + $0x3f20] sm:$0xff]  ;;  %4017 = vmatpush.msrb.mxu2 %v2248_v36  ;;  %v3651_v36 = vadd.f32 %v3650_v11, %v3631_v29  ;;  %v481_v29 = vld [vmem:[%s5966_s27 + $0x3a8] sm:$0xff] }
 0x454   : > { %v1984_v5 = vld [vmem:[%s5966_s27 + $0x32a0] sm:$0xff]  ;;  %4036 = vmatpush.msrb.mxu3 %v2384_v32 }
 0x455   : > { %v2120_v60 = vld [vmem:[%s5966_s27 + $0x36e0] sm:$0xff]  ;;  %3978 = vmatpush.msrb.mxu0 %v1984_v5  ;;  %v3051_v5 = vadd.f32 %v7218_v31, %v3031_v57  ;;  %v3671_v13 = vadd.f32 %v3670_v62, %v3651_v36  ;;  %v3371_v31 = vadd.f32 %v7316_v6, %v3351_v9  ;;  %v873_v57 = vld [vmem:[%s5966_s27 + $0xfe8] sm:$0xff] }
 0x456   : > { %v2240_v23 = vld [vmem:[%s5966_s27 + $0x3aa0] sm:$0xff]  ;;  %3997 = vmatpush.msrb.mxu1 %v2120_v60  ;;  %v729_v9 = vld [vmem:[%s5966_s27 + $0xb68] sm:$0xff] }
 0x457   : > { %v2376_v51 = vld [vmem:[%s5966_s27 + $0x3ee0] sm:$0xff]  ;;  %4018 = vmatpush.msrb.mxu2 %v2240_v23  ;;  %v3071_v20 = vadd.f32 %v7230_v52, %v3051_v5  ;;  %v3391_v27 = vadd.f32 %v7330_v63, %v3371_v31  ;;  %v465_v36 = vld [vmem:[%s5966_s27 + $0x328] sm:$0xff] }
 0x458   : > { %v1976_v18 = vld [vmem:[%s5966_s27 + $0x3260] sm:$0xff]  ;;  %4037 = vmatpush.msrb.mxu3 %v2376_v51  ;;  %v857_v5 = vld [vmem:[%s5966_s27 + $0xf68] sm:$0xff] }
 0x459   : > { %v2112_v40 = vld [vmem:[%s5966_s27 + $0x36a0] sm:$0xff]  ;;  %3979 = vmatpush.msrb.mxu0 %v1976_v18  ;;  %v3411_v22 = vadd.f32 %v7344_v41, %v3391_v27  ;;  %v5709_v41 = vld.sshfl [vmem:[#allocation1 + $0x30] sm:$0xff pattern:$0x73625140]  ;;  %v713_v62 = vld [vmem:[%s5966_s27 + $0xae8] sm:$0xff] }
 0x45a   : > { %v2232_v15 = vld [vmem:[%s5966_s27 + $0x3a60] sm:$0xff]  ;;  %3998 = vmatpush.msrb.mxu1 %v2112_v40  ;;  %v441_v31 = vld [vmem:[%s5966_s27 + $0x268] sm:$0xff] }
 0x45b   : > { %v2368_v24 = vld [vmem:[%s5966_s27 + $0x3ea0] sm:$0xff]  ;;  %4019 = vmatpush.msrb.mxu2 %v2232_v15  ;;  %v689_v27 = vld [vmem:[%s5966_s27 + $0xa28] sm:$0xff] }
 0x45c   : > { %v1968_v21 = vld [vmem:[%s5966_s27 + $0x3220] sm:$0xff]  ;;  %4038 = vmatpush.msrb.mxu3 %v2368_v24  ;;  %v3690_v24 = vpop.f32.mrf.mxu1 }
 0x45d   : > { %v2104_v37 = vld [vmem:[%s5966_s27 + $0x3660] sm:$0xff]  ;;  %3980 = vmatpush.msrb.mxu0 %v1968_v21  ;;  %v3691_v58 = vadd.f32 %v3690_v24, %v3671_v13  ;;  %v3091_v21 = vadd.f32 %v7240_v10, %v3071_v20  ;;  %v489_v10 = vld [vmem:[%s5966_s27 + $0x3e8] sm:$0xff] }
 0x45e   : > { %v2224_v1 = vld [vmem:[%s5966_s27 + $0x3a20] sm:$0xff]  ;;  %3999 = vmatpush.msrb.mxu1 %v2104_v37  ;;  %v585_v13 = vld [vmem:[%s5966_s27 + $0x6e8] sm:$0xff] }
 0x45f   : > { %v2360_v8 = vld [vmem:[%s5966_s27 + $0x3e60] sm:$0xff]  ;;  %4020 = vmatpush.msrb.mxu2 %v2224_v1  ;;  %v3710_v1 = vpop.f32.mrf.mxu2  ;;  %v841_v20 = vld [vmem:[%s5966_s27 + $0xee8] sm:$0xff] }
 0x460   : > { %v1960_v12 = vld [vmem:[%s5966_s27 + $0x31e0] sm:$0xff]  ;;  %4039 = vmatpush.msrb.mxu3 %v2360_v8  ;;  %v3711_v61 = vadd.f32 %v3710_v1, %v3691_v58  ;;  %v569_v24 = vld [vmem:[%s5966_s27 + $0x668] sm:$0xff] }
 0x461   : > { %v2096_v4 = vld [vmem:[%s5966_s27 + $0x3620] sm:$0xff]  ;;  %3981 = vmatpush.msrb.mxu0 %v1960_v12  ;;  %v2751_v12 = vadd.f32 %v7130_v33, %v2731_v53  ;;  %v5708_v33 = vld.sshfl [vmem:[#allocation1 + $0x20] sm:$0xff pattern:$0x73625140] }
 0x462   : > { %v2216_v7 = vld [vmem:[%s5966_s27 + $0x39e0] sm:$0xff]  ;;  %4000 = vmatpush.msrb.mxu1 %v2096_v4  ;;  %v745_v4 = vld [vmem:[%s5966_s27 + $0xbe8] sm:$0xff]  ;;  %v3731_v35 = vadd.f32 %v3730_v3, %v3711_v61 }
 0x463   : > { %v2352_v17 = vld [vmem:[%s5966_s27 + $0x3e20] sm:$0xff]  ;;  %4021 = vmatpush.msrb.mxu2 %v2216_v7  ;;  %v5021_v7 = vrot.slane %v3091_v21, 6  ;;  %v817_v58 = vld [vmem:[%s5966_s27 + $0xe28] sm:$0xff] }
 0x464   : > { %v1952_v38 = vld [vmem:[%s5966_s27 + $0x31a0] sm:$0xff]  ;;  %4040 = vmatpush.msrb.mxu3 %v2352_v17  ;;  %v417_v53 = vld [vmem:[%s5966_s27 + $0x1a8] sm:$0xff] }
 0x465   : > { %v2088_v34 = vld [vmem:[%s5966_s27 + $0x35e0] sm:$0xff]  ;;  %3982 = vmatpush.msrb.mxu0 %v1952_v38  ;;  %v2771_v38 = vadd.f32 %v7140_v44, %v2751_v12  ;;  %v5710_v44 = vld.sshfl [vmem:[#allocation1 + $0x28] sm:$0xff pattern:$0x73625140]  ;;  %v553_v21 = vld [vmem:[%s5966_s27 + $0x5e8] sm:$0xff] }
 0x466   : > { %v2208_v48 = vld [vmem:[%s5966_s27 + $0x39a0] sm:$0xff]  ;;  %4001 = vmatpush.msrb.mxu1 %v2088_v34  ;;  %v5022_v34 = vrot.slane %v3411_v22, 4  ;;  %v409_v1 = vld [vmem:[%s5966_s27 + $0x168] sm:$0xff] }
 0x467   : > { %v2344_v50 = vld [vmem:[%s5966_s27 + $0x3de0] sm:$0xff]  ;;  %4022 = vmatpush.msrb.mxu2 %v2208_v48  ;;  %v617_v48 = vld [vmem:[%s5966_s27 + $0x7e8] sm:$0xff]  ;;  %v5028_v11 = vsel %vm5027_vm0, %v2771_v38, %v5021_v7 }
 0x468   : > { %v1944_v54 = vld [vmem:[%s5966_s27 + $0x3160] sm:$0xff]  ;;  %4041 = vmatpush.msrb.mxu3 %v2344_v50  ;;  %v5023_v50 = vrot.slane %v3731_v35, 2  ;;  %v801_v61 = vld [vmem:[%s5966_s27 + $0xda8] sm:$0xff] }
 0x469   : > { %v2080_v30 = vld [vmem:[%s5966_s27 + $0x35a0] sm:$0xff]  ;;  %3983 = vmatpush.msrb.mxu0 %v1944_v54  ;;  %v401_v12 = vld [vmem:[%s5966_s27 + $0x128] sm:$0xff] }
 0x46a   : > { %v2200_v25 = vld [vmem:[%s5966_s27 + $0x3960] sm:$0xff]  ;;  %4002 = vmatpush.msrb.mxu1 %v2080_v30  ;;  %v473_v30 = vld [vmem:[%s5966_s27 + $0x368] sm:$0xff] }
 0x46b   : > { %v2336_v16 = vld [vmem:[%s5966_s27 + $0x3da0] sm:$0xff]  ;;  %4023 = vmatpush.msrb.mxu2 %v2200_v25  ;;  %v609_v25 = vld [vmem:[%s5966_s27 + $0x7a8] sm:$0xff] }
 0x46c   : > { %v1936_v39 = vld [vmem:[%s5966_s27 + $0x3120] sm:$0xff]  ;;  %4042 = vmatpush.msrb.mxu3 %v2336_v16  ;;  %v5030_v16 = vsel %vm5029_vm1, %v5022_v34, %v5023_v50  ;;  %v537_v22 = vld [vmem:[%s5966_s27 + $0x568] sm:$0xff] }
 0x46d   : > { %v2072_v59 = vld [vmem:[%s5966_s27 + $0x3560] sm:$0xff]  ;;  %3984 = vmatpush.msrb.mxu0 %v1936_v39  ;;  %v865_v39 = vld [vmem:[%s5966_s27 + $0xfa8] sm:$0xff] }
 0x46e   : > { %v2192_v32 = vld [vmem:[%s5966_s27 + $0x3920] sm:$0xff]  ;;  %4003 = vmatpush.msrb.mxu1 %v2072_v59  ;;  %v5032_v59 = vsel %vm5031_vm2, %v5028_v11, %v5030_v16  ;;  %v393_v3 = vld [vmem:[%s5966_s27 + $0xe8] sm:$0xff] }
 0x46f   : > { %v2328_v49 = vld [vmem:[%s5966_s27 + $0x3d60] sm:$0xff]  ;;  %4024 = vmatpush.msrb.mxu2 %v2192_v32  ;;  %v601_v32 = vld [vmem:[%s5966_s27 + $0x768] sm:$0xff] }
 0x470   : > { %v1928_v26 = vld [vmem:[%s5966_s27 + $0x30e0] sm:$0xff]  ;;  %4043 = vmatpush.msrb.mxu3 %v2328_v49  ;;  %v5038_v49 = vadd.f32 %v5032_v59, %v358_v28  ;;  %v529_v7 = vld [vmem:[%s5966_s27 + $0x528] sm:$0xff] }
 0x471   : > { %v2064_v60 = vld [vmem:[%s5966_s27 + $0x3520] sm:$0xff]  ;;  %3985 = vmatpush.msrb.mxu0 %v1928_v26  ;;  %v457_v26 = vld [vmem:[%s5966_s27 + $0x2e8] sm:$0xff] }
 0x472   : > { %v2184_v23 = vld [vmem:[%s5966_s27 + $0x38e0] sm:$0xff]  ;;  %4004 = vmatpush.msrb.mxu1 %v2064_v60  ;;  %v593_v60 = vld [vmem:[%s5966_s27 + $0x728] sm:$0xff]  ;;  %5040 = vst [vmem:[#allocation2] sm:$0xff] %v5038_v49 }
 0x473   : > { %v2320_v51 = vld [vmem:[%s5966_s27 + $0x3d20] sm:$0xff]  ;;  %4025 = vmatpush.msrb.mxu2 %v2184_v23  ;;  %v849_v23 = vld [vmem:[%s5966_s27 + $0xf28] sm:$0xff] }
 0x474   : > { %v1920_v18 = vld [vmem:[%s5966_s27 + $0x30a0] sm:$0xff]  ;;  %4044 = vmatpush.msrb.mxu3 %v2320_v51  ;;  %v449_v51 = vld [vmem:[%s5966_s27 + $0x2a8] sm:$0xff] }
 0x475   : > { %v2056_v40 = vld [vmem:[%s5966_s27 + $0x34e0] sm:$0xff]  ;;  %3986 = vmatpush.msrb.mxu0 %v1920_v18  ;;  %v577_v18 = vld [vmem:[%s5966_s27 + $0x6a8] sm:$0xff] }
 0x476   : > { %v2176_v43 = vld [vmem:[%s5966_s27 + $0x38a0] sm:$0xff]  ;;  %4005 = vmatpush.msrb.mxu1 %v2056_v40  ;;  %v697_v40 = vld [vmem:[%s5966_s27 + $0xa68] sm:$0xff] }
 0x477   : > { %v2312_v15 = vld [vmem:[%s5966_s27 + $0x3ce0] sm:$0xff]  ;;  %4026 = vmatpush.msrb.mxu2 %v2176_v43  ;;  %v833_v43 = vld [vmem:[%s5966_s27 + $0xea8] sm:$0xff] }
 0x478   : > { %v1912_v52 = vld [vmem:[%s5966_s27 + $0x3060] sm:$0xff]  ;;  %4045 = vmatpush.msrb.mxu3 %v2312_v15  ;;  %v433_v15 = vld [vmem:[%s5966_s27 + $0x228] sm:$0xff] }
 0x479   : > { %v2048_v6 = vld [vmem:[%s5966_s27 + $0x34a0] sm:$0xff]  ;;  %3987 = vmatpush.msrb.mxu0 %v1912_v52  ;;  %v825_v52 = vld [vmem:[%s5966_s27 + $0xe68] sm:$0xff] }
 0x47a   : > { %v2168_v0 = vld [vmem:[%s5966_s27 + $0x3860] sm:$0xff]  ;;  %4006 = vmatpush.msrb.mxu1 %v2048_v6  ;;  %v425_v6 = vld [vmem:[%s5966_s27 + $0x1e8] sm:$0xff] }
 0x47b   : > { %v2304_v56 = vld [vmem:[%s5966_s27 + $0x3ca0] sm:$0xff]  ;;  %4027 = vmatpush.msrb.mxu2 %v2168_v0  ;;  %v561_v0 = vld [vmem:[%s5966_s27 + $0x628] sm:$0xff] }
 0x47c   : > { %v1904_v63 = vld [vmem:[%s5966_s27 + $0x3020] sm:$0xff]  ;;  %4046 = vmatpush.msrb.mxu3 %v2304_v56  ;;  %v681_v56 = vld [vmem:[%s5966_s27 + $0x9e8] sm:$0xff] }
 0x47d   : > { %v2040_v37 = vld [vmem:[%s5966_s27 + $0x3460] sm:$0xff]  ;;  %3988 = vmatpush.msrb.mxu0 %v1904_v63  ;;  %v673_v63 = vld [vmem:[%s5966_s27 + $0x9a8] sm:$0xff] }
 0x47e   : > { %v2160_v8 = vld [vmem:[%s5966_s27 + $0x3820] sm:$0xff]  ;;  %4007 = vmatpush.msrb.mxu1 %v2040_v37  ;;  %3989 = vmatmul.f32.vlgmr.msrb.gmra.mxu0 %v5708_v33  ;;  %v809_v37 = vld [vmem:[%s5966_s27 + $0xde8] sm:$0xff] }
 0x47f   : > { %v2296_v2 = vld [vmem:[%s5966_s27 + $0x3c60] sm:$0xff]  ;;  %4028 = vmatpush.msrb.mxu2 %v2160_v8  ;;  %4053 = vmatpush.msra.mxu0 %v489_v10  ;;  %v545_v8 = vld [vmem:[%s5966_s27 + $0x5a8] sm:$0xff] }
 0x480   : > { %4047 = vmatpush.msrb.mxu3 %v2296_v2  ;;  %v2032_v17 = vld [vmem:[%s5966_s27 + $0x3420] sm:$0xff]  ;;  %4029 = vmatmul.f32.vlgmr.msrb.gmra.mxu2 %v5709_v41  ;;  %v665_v2 = vld [vmem:[%s5966_s27 + $0x968] sm:$0xff] }
 0x481   : > { %v2288_v19 = vld [vmem:[%s5966_s27 + $0x3c20] sm:$0xff]  ;;  %4093 = vmatpush.msra.mxu2 %v745_v4  ;;  %4008 = vmatpush.msrb.mxu1 %v2032_v17  ;;  %v657_v10 = vld [vmem:[%s5966_s27 + $0x928] sm:$0xff] }
 0x482   : > { %4048 = vmatpush.msrb.mxu3 %v2288_v19  ;;  %4009 = vmatmul.f32.vlgmr.msrb.gmra.mxu1 %v5710_v44  ;;  %v5711_v54 = vld.sshfl [vmem:[#allocation1 + $0x38] sm:$0xff pattern:$0x73625140]  ;;  %v793_v4 = vld [vmem:[%s5966_s27 + $0xd68] sm:$0xff] }
 0x483   : > { %4049 = vmatmul.f32.vlgmr.msrb.gmra.mxu3 %v5711_v54  ;;  %4054 = vmatpush.msra.mxu0 %v481_v29  ;;  %v649_v17 = vld [vmem:[%s5966_s27 + $0x8e8] sm:$0xff] }
 0x484   : > { %4073 = vmatpush.msra.mxu1 %v617_v48  ;;  %4094 = vmatpush.msra.mxu2 %v737_v55  ;;  %v785_v19 = vld [vmem:[%s5966_s27 + $0xd28] sm:$0xff] }
 0x485   : > { %4113 = vmatpush.msra.mxu3 %v873_v57  ;;  %4055 = vmatpush.msra.mxu0 %v473_v30  ;;  %v385_v35 = vld [vmem:[%s5966_s27 + $0xa8] sm:$0xff] }
 0x486   : > { %4074 = vmatpush.msra.mxu1 %v609_v25  ;;  %4095 = vmatpush.msra.mxu2 %v729_v9  ;;  %v521_v33 = vld [vmem:[%s5966_s27 + $0x4e8] sm:$0xff] }
 0x487   : > { %4114 = vmatpush.msra.mxu3 %v865_v39  ;;  %4056 = vmatpush.msra.mxu0 %v465_v36  ;;  %v641_v41 = vld [vmem:[%s5966_s27 + $0x8a8] sm:$0xff] }
 0x488   : > { %4075 = vmatpush.msra.mxu1 %v601_v32  ;;  %4096 = vmatpush.msra.mxu2 %v721_v42  ;;  %v777_v38 = vld [vmem:[%s5966_s27 + $0xce8] sm:$0xff] }
 0x489   : > { %4115 = vmatpush.msra.mxu3 %v857_v5  ;;  %4057 = vmatpush.msra.mxu0 %v457_v26  ;;  %v377_v34 = vld [vmem:[%s5966_s27 + $0x68] sm:$0xff] }
 0x48a   : > { %4076 = vmatpush.msra.mxu1 %v593_v60  ;;  %4097 = vmatpush.msra.mxu2 %v713_v62  ;;  %v513_v29 = vld [vmem:[%s5966_s27 + $0x4a8] sm:$0xff] }
 0x48b   : > { %4116 = vmatpush.msra.mxu3 %v849_v23  ;;  %4058 = vmatpush.msra.mxu0 %v449_v51  ;;  %v633_v48 = vld [vmem:[%s5966_s27 + $0x868] sm:$0xff] }
 0x48c   : > { %4077 = vmatpush.msra.mxu1 %v585_v13  ;;  %4098 = vmatpush.msra.mxu2 %v705_v14  ;;  %v769_v50 = vld [vmem:[%s5966_s27 + $0xca8] sm:$0xff] }
 0x48d   : > { %4117 = vmatpush.msra.mxu3 %v841_v20  ;;  %4059 = vmatpush.msra.mxu0 %v441_v31  ;;  %v369_v55 = vld [vmem:[%s5966_s27 + $0x28] sm:$0xff] }
 0x48e   : > { %4078 = vmatpush.msra.mxu1 %v577_v18  ;;  %4099 = vmatpush.msra.mxu2 %v697_v40  ;;  %v505_v57 = vld [vmem:[%s5966_s27 + $0x468] sm:$0xff] }
 0x48f   : > { %4118 = vmatpush.msra.mxu3 %v833_v43  ;;  %4060 = vmatpush.msra.mxu0 %v433_v15  ;;  %v625_v28 = vld [vmem:[%s5966_s27 + $0x828] sm:$0xff] }
 0x490   : > { %4079 = vmatpush.msra.mxu1 %v569_v24  ;;  %4100 = vmatpush.msra.mxu2 %v689_v27  ;;  %v761_v11 = vld [vmem:[%s5966_s27 + $0xc68] sm:$0xff] }
 0x491   : > { %4119 = vmatpush.msra.mxu3 %v825_v52  ;;  %4061 = vmatpush.msra.mxu0 %v425_v6  ;;  %v1001_v44 = vld [vmem:[%s5966_s27 + $0x13e8] sm:$0xff] }
 0x492   : > { %4080 = vmatpush.msra.mxu1 %v561_v0  ;;  %4101 = vmatpush.msra.mxu2 %v681_v56  ;;  %v1257_v54 = vld [vmem:[%s5966_s27 + $0x1be8] sm:$0xff] }
 0x493   : > { %4120 = vmatpush.msra.mxu3 %v817_v58  ;;  %4062 = vmatpush.msra.mxu0 %v417_v53  ;;  %v497_v30 = vld [vmem:[%s5966_s27 + $0x428] sm:$0xff] }
 0x494   : > { %4081 = vmatpush.msra.mxu1 %v553_v21  ;;  %4102 = vmatpush.msra.mxu2 %v673_v63  ;;  %v753_v25 = vld [vmem:[%s5966_s27 + $0xc28] sm:$0xff] }
 0x495   : > { %4121 = vmatpush.msra.mxu3 %v809_v37  ;;  %4063 = vmatpush.msra.mxu0 %v409_v1  ;;  %v993_v16 = vld [vmem:[%s5966_s27 + $0x13a8] sm:$0xff] }
 0x496   : > { %4082 = vmatpush.msra.mxu1 %v545_v8  ;;  %4103 = vmatpush.msra.mxu2 %v665_v2  ;;  %v1129_v9 = vld [vmem:[%s5966_s27 + $0x17e8] sm:$0xff] }
 0x497   : > { %4122 = vmatpush.msra.mxu3 %v801_v61  ;;  %4064 = vmatpush.msra.mxu0 %v401_v12  ;;  %v1249_v39 = vld [vmem:[%s5966_s27 + $0x1ba8] sm:$0xff] }
 0x498   : > { %4083 = vmatpush.msra.mxu1 %v537_v22  ;;  %4104 = vmatpush.msra.mxu2 %v657_v10  ;;  %v1385_v59 = vld [vmem:[%s5966_s27 + $0x1fe8] sm:$0xff] }
 0x499   : > { %4123 = vmatpush.msra.mxu3 %v793_v4  ;;  %4065 = vmatpush.msra.mxu0 %v393_v3  ;;  %v985_v36 = vld [vmem:[%s5966_s27 + $0x1368] sm:$0xff] }
 0x49a   : > { %4084 = vmatpush.msra.mxu1 %v529_v7  ;;  %4105 = vmatpush.msra.mxu2 %v649_v17  ;;  %v1121_v32 = vld [vmem:[%s5966_s27 + $0x17a8] sm:$0xff] }
 0x49b   : > { %4124 = vmatpush.msra.mxu3 %v785_v19  ;;  %4066 = vmatpush.msra.mxu0 %v385_v35  ;;  %v1241_v49 = vld [vmem:[%s5966_s27 + $0x1b68] sm:$0xff] }
 0x49c   : > { %4085 = vmatpush.msra.mxu1 %v521_v33  ;;  %4106 = vmatpush.msra.mxu2 %v641_v41  ;;  %v1377_v42 = vld [vmem:[%s5966_s27 + $0x1fa8] sm:$0xff]  ;;  %v3750_v33 = vpop.f32.mrf.mxu0 }
 0x49d   : > { %4125 = vmatpush.msra.mxu3 %v777_v38  ;;  %4067 = vmatpush.msra.mxu0 %v377_v34  ;;  %v977_v5 = vld [vmem:[%s5966_s27 + $0x1328] sm:$0xff] }
 0x49e   : > { %4086 = vmatpush.msra.mxu1 %v513_v29  ;;  %4107 = vmatpush.msra.mxu2 %v633_v48  ;;  %v1113_v26 = vld [vmem:[%s5966_s27 + $0x1768] sm:$0xff] }
 0x49f   : > { %4126 = vmatpush.msra.mxu3 %v769_v50  ;;  %4068 = vmatpush.msra.mxu0 %v369_v55  ;;  %v1233_v60 = vld [vmem:[%s5966_s27 + $0x1b28] sm:$0xff]  ;;  %v3770_v55 = vpop.f32.mrf.mxu1 }
 0x4a0   : > { %4087 = vmatpush.msra.mxu1 %v505_v57  ;;  %4108 = vmatpush.msra.mxu2 %v625_v28  ;;  %v1369_v62 = vld [vmem:[%s5966_s27 + $0x1f68] sm:$0xff] }
 0x4a1   : > { %4127 = vmatpush.msra.mxu3 %v761_v11  ;;  %4133 = vmatpush.msrb.mxu0 %v1001_v44  ;;  %v969_v23 = vld [vmem:[%s5966_s27 + $0x12e8] sm:$0xff]  ;;  %v3771_v11 = vadd.f32 %v3770_v55, %v3750_v33  ;;  %v3790_v44 = vpop.f32.mrf.mxu2 }
 0x4a2   : > { %4173 = vmatpush.msrb.mxu2 %v1257_v54  ;;  %4088 = vmatpush.msra.mxu1 %v497_v30  ;;  %v1105_v51 = vld [vmem:[%s5966_s27 + $0x1728] sm:$0xff] }
 0x4a3   : > { %4128 = vmatpush.msra.mxu3 %v753_v25  ;;  %4134 = vmatpush.msrb.mxu0 %v993_v16  ;;  %v1225_v13 = vld [vmem:[%s5966_s27 + $0x1ae8] sm:$0xff]  ;;  %v3791_v16 = vadd.f32 %v3790_v44, %v3771_v11 }
 0x4a4   : > { %4153 = vmatpush.msrb.mxu1 %v1129_v9  ;;  %4174 = vmatpush.msrb.mxu2 %v1249_v39  ;;  %v1361_v14 = vld [vmem:[%s5966_s27 + $0x1f28] sm:$0xff] }
 0x4a5   : > { %4193 = vmatpush.msrb.mxu3 %v1385_v59  ;;  %4135 = vmatpush.msrb.mxu0 %v985_v36  ;;  %v961_v20 = vld [vmem:[%s5966_s27 + $0x12a8] sm:$0xff]  ;;  %v3810_v59 = vpop.f32.mrf.mxu3 }
 0x4a6   : > { %4154 = vmatpush.msrb.mxu1 %v1121_v32  ;;  %4175 = vmatpush.msrb.mxu2 %v1241_v49  ;;  %v1097_v31 = vld [vmem:[%s5966_s27 + $0x16e8] sm:$0xff]  ;;  %v3811_v32 = vadd.f32 %v3810_v59, %v3791_v16 }
 0x4a7   : > { %4194 = vmatpush.msrb.mxu3 %v1377_v42  ;;  %4136 = vmatpush.msrb.mxu0 %v977_v5  ;;  %v1217_v18 = vld [vmem:[%s5966_s27 + $0x1aa8] sm:$0xff] }
 0x4a8   : > { %4155 = vmatpush.msrb.mxu1 %v1113_v26  ;;  %4176 = vmatpush.msrb.mxu2 %v1233_v60  ;;  %v1353_v40 = vld [vmem:[%s5966_s27 + $0x1ee8] sm:$0xff]  ;;  %v3830_v26 = vpop.f32.mrf.mxu0 }
 0x4a9   : > { %4195 = vmatpush.msrb.mxu3 %v1369_v62  ;;  %4137 = vmatpush.msrb.mxu0 %v969_v23  ;;  %v953_v43 = vld [vmem:[%s5966_s27 + $0x1268] sm:$0xff]  ;;  %v3831_v62 = vadd.f32 %v3830_v26, %v3811_v32 }
 0x4aa   : > { %4156 = vmatpush.msrb.mxu1 %v1105_v51  ;;  %4177 = vmatpush.msrb.mxu2 %v1225_v13  ;;  %v1089_v15 = vld [vmem:[%s5966_s27 + $0x16a8] sm:$0xff] }
 0x4ab   : > { %4196 = vmatpush.msrb.mxu3 %v1361_v14  ;;  %4138 = vmatpush.msrb.mxu0 %v961_v20  ;;  %v1209_v24 = vld [vmem:[%s5966_s27 + $0x1a68] sm:$0xff]  ;;  %v3850_v20 = vpop.f32.mrf.mxu1 }
 0x4ac   : > { %4157 = vmatpush.msrb.mxu1 %v1097_v31  ;;  %v1345_v27 = vld [vmem:[%s5966_s27 + $0x1ea8] sm:$0xff]  ;;  %4178 = vmatpush.msrb.mxu2 %v1217_v18  ;;  %v8557_v31 = vld [vmem:[#allocation9_spill] sm:$0xff] }
 0x4ad   : > { %4197 = vmatpush.msrb.mxu3 %v1353_v40  ;;  %v945_v52 = vld [vmem:[%s5966_s27 + $0x1228] sm:$0xff]  ;;  %4139 = vmatpush.msrb.mxu0 %v953_v43  ;;  %v3851_v43 = vadd.f32 %v3850_v20, %v3831_v62 }
 0x4ae   : > { %v1081_v6 = vld [vmem:[%s5966_s27 + $0x1668] sm:$0xff]  ;;  %4158 = vmatpush.msrb.mxu1 %v1089_v15  ;;  %4179 = vmatpush.msrb.mxu2 %v1209_v24  ;;  %v3870_v15 = vpop.f32.mrf.mxu2 }
 0x4af   : > { %v1201_v0 = vld [vmem:[%s5966_s27 + $0x1a28] sm:$0xff]  ;;  %4198 = vmatpush.msrb.mxu3 %v1345_v27  ;;  %4140 = vmatpush.msrb.mxu0 %v945_v52 }
 0x4b0   : > { %v1337_v56 = vld [vmem:[%s5966_s27 + $0x1e68] sm:$0xff]  ;;  %4159 = vmatpush.msrb.mxu1 %v1081_v6  ;;  %4180 = vmatpush.msrb.mxu2 %v1201_v0  ;;  %v3871_v6 = vadd.f32 %v3870_v15, %v3851_v43 }
 0x4b1   : > { %v937_v58 = vld [vmem:[%s5966_s27 + $0x11e8] sm:$0xff]  ;;  %4199 = vmatpush.msrb.mxu3 %v1337_v56  ;;  %4109 = vmatmul.f32.vlgmr.msra.gmra.mxu2 %v6108_v45 }
 0x4b2   : > { %v1073_v53 = vld [vmem:[%s5966_s27 + $0x1628] sm:$0xff]  ;;  %4141 = vmatpush.msrb.mxu0 %v937_v58  ;;  %4129 = vmatmul.f32.vlgmr.msra.gmra.mxu3 %v6112_v47  ;;  %v3890_v58 = vpop.f32.mrf.mxu3 }
 0x4b3   : > { %v1193_v21 = vld [vmem:[%s5966_s27 + $0x19e8] sm:$0xff]  ;;  %4160 = vmatpush.msrb.mxu1 %v1073_v53  ;;  %4069 = vmatmul.f32.vlgmr.msra.gmra.mxu0 %v6110_v46 }
 0x4b4   : > { %v1329_v63 = vld [vmem:[%s5966_s27 + $0x1e28] sm:$0xff]  ;;  %4181 = vmatpush.msrb.mxu2 %v1193_v21  ;;  %4089 = vmatmul.f32.vlgmr.msra.gmra.mxu1 %v8557_v31  ;;  %v7633_v21 = vadd.f32 %v3890_v58, %v3871_v6 }
 0x4b5   : > { %v929_v37 = vld [vmem:[%s5966_s27 + $0x11a8] sm:$0xff]  ;;  %4200 = vmatpush.msrb.mxu3 %v1329_v63 }
 0x4b6   : > { %v1065_v1 = vld [vmem:[%s5966_s27 + $0x15e8] sm:$0xff]  ;;  %4142 = vmatpush.msrb.mxu0 %v929_v37 }
 0x4b7   : > { %v1185_v8 = vld [vmem:[%s5966_s27 + $0x19a8] sm:$0xff]  ;;  %4161 = vmatpush.msrb.mxu1 %v1065_v1 }
 0x4b8   : > { %v1321_v2 = vld [vmem:[%s5966_s27 + $0x1de8] sm:$0xff]  ;;  %4182 = vmatpush.msrb.mxu2 %v1185_v8 }
 0x4b9   : > { %v921_v61 = vld [vmem:[%s5966_s27 + $0x1168] sm:$0xff]  ;;  %4201 = vmatpush.msrb.mxu3 %v1321_v2  ;;  %v8559_v2 = vld [vmem:[#allocation11_spill] sm:$0xff] }
 0x4ba   : > { %v1057_v12 = vld [vmem:[%s5966_s27 + $0x15a8] sm:$0xff]  ;;  %4143 = vmatpush.msrb.mxu0 %v921_v61 }
 0x4bb   : > { %v1177_v22 = vld [vmem:[%s5966_s27 + $0x1968] sm:$0xff]  ;;  %4162 = vmatpush.msrb.mxu1 %v1057_v12  ;;  %v8560_v12 = vld [vmem:[#allocation12_spill] sm:$0xff] }
 0x4bc   : > { %v1313_v10 = vld [vmem:[%s5966_s27 + $0x1da8] sm:$0xff]  ;;  %4183 = vmatpush.msrb.mxu2 %v1177_v22 }
 0x4bd   : > { %v913_v4 = vld [vmem:[%s5966_s27 + $0x1128] sm:$0xff]  ;;  %4202 = vmatpush.msrb.mxu3 %v1313_v10 }
 0x4be   : > { %v1049_v3 = vld [vmem:[%s5966_s27 + $0x1568] sm:$0xff]  ;;  %4144 = vmatpush.msrb.mxu0 %v913_v4 }
 0x4bf   : > { %v1169_v7 = vld [vmem:[%s5966_s27 + $0x1928] sm:$0xff]  ;;  %4163 = vmatpush.msrb.mxu1 %v1049_v3 }
 0x4c0   : > { %v1305_v17 = vld [vmem:[%s5966_s27 + $0x1d68] sm:$0xff]  ;;  %4184 = vmatpush.msrb.mxu2 %v1169_v7  ;;  %v8561_v7 = vld [vmem:[#allocation13_spill] sm:$0xff]  ;;  %v3930_v20 = vpop.f32.mrf.mxu1 }
 0x4c1   : > { %v905_v19 = vld [vmem:[%s5966_s27 + $0x10e8] sm:$0xff]  ;;  %4203 = vmatpush.msrb.mxu3 %v1305_v17 }
 0x4c2   : > { %v1041_v35 = vld [vmem:[%s5966_s27 + $0x1528] sm:$0xff]  ;;  %4145 = vmatpush.msrb.mxu0 %v905_v19  ;;  %v3950_v6 = vpop.f32.mrf.mxu2 }
 0x4c3   : > { %v1161_v41 = vld [vmem:[%s5966_s27 + $0x18e8] sm:$0xff]  ;;  %4164 = vmatpush.msrb.mxu1 %v1041_v35 }
 0x4c4   : > { %v1297_v38 = vld [vmem:[%s5966_s27 + $0x1d28] sm:$0xff]  ;;  %4185 = vmatpush.msrb.mxu2 %v1161_v41 }
 0x4c5   : > { %v897_v34 = vld [vmem:[%s5966_s27 + $0x10a8] sm:$0xff]  ;;  %4204 = vmatpush.msrb.mxu3 %v1297_v38 }
 0x4c6   : > { %v1033_v29 = vld [vmem:[%s5966_s27 + $0x14e8] sm:$0xff]  ;;  %4146 = vmatpush.msrb.mxu0 %v897_v34 }
 0x4c7   : > { %v1153_v48 = vld [vmem:[%s5966_s27 + $0x18a8] sm:$0xff]  ;;  %4165 = vmatpush.msrb.mxu1 %v1033_v29 }
 0x4c8   : > { %v1289_v50 = vld [vmem:[%s5966_s27 + $0x1ce8] sm:$0xff]  ;;  %4186 = vmatpush.msrb.mxu2 %v1153_v48 }
 0x4c9   : > { %v889_v57 = vld [vmem:[%s5966_s27 + $0x1068] sm:$0xff]  ;;  %4205 = vmatpush.msrb.mxu3 %v1289_v50 }
 0x4ca   : > { %v1025_v28 = vld [vmem:[%s5966_s27 + $0x14a8] sm:$0xff]  ;;  %4147 = vmatpush.msrb.mxu0 %v889_v57 }
 0x4cb   : > { %v1145_v54 = vld [vmem:[%s5966_s27 + $0x1868] sm:$0xff]  ;;  %4166 = vmatpush.msrb.mxu1 %v1025_v28 }
 0x4cc   : > { %v1281_v30 = vld [vmem:[%s5966_s27 + $0x1ca8] sm:$0xff]  ;;  %4187 = vmatpush.msrb.mxu2 %v1145_v54 }
 0x4cd   : > { %v881_v25 = vld [vmem:[%s5966_s27 + $0x1028] sm:$0xff]  ;;  %4206 = vmatpush.msrb.mxu3 %v1281_v30 }
 0x4ce   : > { %v1017_v9 = vld [vmem:[%s5966_s27 + $0x1468] sm:$0xff]  ;;  %4148 = vmatpush.msrb.mxu0 %v881_v25 }
 0x4cf   : > { %v1137_v39 = vld [vmem:[%s5966_s27 + $0x1828] sm:$0xff]  ;;  %4167 = vmatpush.msrb.mxu1 %v1017_v9  ;;  %4149 = vmatmul.f32.vlgmr.msrb.gmra.mxu0 %v8559_v2 }
 0x4d0   : > { %v1273_v36 = vld [vmem:[%s5966_s27 + $0x1c68] sm:$0xff]  ;;  %4188 = vmatpush.msrb.mxu2 %v1137_v39 }
 0x4d1   : > { %v1513_v49 = vld [vmem:[%s5966_s27 + $0x23e8] sm:$0xff]  ;;  %4207 = vmatpush.msrb.mxu3 %v1273_v36 }
 0x4d2   : > { %v1769_v42 = vld [vmem:[%s5966_s27 + $0x2be8] sm:$0xff]  ;;  %4213 = vmatpush.msra.mxu0 %v1513_v49 }
 0x4d3   : > { %v1009_v5 = vld [vmem:[%s5966_s27 + $0x1428] sm:$0xff]  ;;  %4253 = vmatpush.msra.mxu2 %v1769_v42 }
 0x4d4   : > { %v1265_v60 = vld [vmem:[%s5966_s27 + $0x1c28] sm:$0xff]  ;;  %4168 = vmatpush.msrb.mxu1 %v1009_v5  ;;  %v3910_v5 = vpop.f32.mrf.mxu0 }
 0x4d5   : > { %v1505_v23 = vld [vmem:[%s5966_s27 + $0x23a8] sm:$0xff]  ;;  %4208 = vmatpush.msrb.mxu3 %v1265_v60  ;;  %4169 = vmatmul.f32.vlgmr.msrb.gmra.mxu1 %v8561_v7  ;;  %v3911_v62 = vadd.f32 %v3910_v5, %v7633_v21 }
 0x4d6   : > { %v1641_v51 = vld [vmem:[%s5966_s27 + $0x27e8] sm:$0xff]  ;;  %4214 = vmatpush.msra.mxu0 %v1505_v23  ;;  %4209 = vmatmul.f32.vlgmr.msrb.gmra.mxu3 %v8560_v12 }
 0x4d7   : > { %v1761_v13 = vld [vmem:[%s5966_s27 + $0x2ba8] sm:$0xff]  ;;  %4233 = vmatpush.msra.mxu1 %v1641_v51  ;;  %v3931_v43 = vadd.f32 %v3930_v20, %v3911_v62 }
 0x4d8   : > { %v1897_v14 = vld [vmem:[%s5966_s27 + $0x2fe8] sm:$0xff]  ;;  %4254 = vmatpush.msra.mxu2 %v1761_v13 }
 0x4d9   : > { %v1497_v18 = vld [vmem:[%s5966_s27 + $0x2368] sm:$0xff]  ;;  %4273 = vmatpush.msra.mxu3 %v1897_v14  ;;  %v3951_v58 = vadd.f32 %v3950_v6, %v3931_v43 }
 0x4da   : > { %v1633_v40 = vld [vmem:[%s5966_s27 + $0x27a8] sm:$0xff]  ;;  %4215 = vmatpush.msra.mxu0 %v1497_v18 }
 0x4db   : > { %v1753_v24 = vld [vmem:[%s5966_s27 + $0x2b68] sm:$0xff]  ;;  %4234 = vmatpush.msra.mxu1 %v1633_v40 }
 0x4dc   : > { %v1889_v27 = vld [vmem:[%s5966_s27 + $0x2fa8] sm:$0xff]  ;;  %4255 = vmatpush.msra.mxu2 %v1753_v24 }
 0x4dd   : > { %v1489_v52 = vld [vmem:[%s5966_s27 + $0x2328] sm:$0xff]  ;;  %4274 = vmatpush.msra.mxu3 %v1889_v27 }
 0x4de   : > { %v1625_v0 = vld [vmem:[%s5966_s27 + $0x2768] sm:$0xff]  ;;  %4216 = vmatpush.msra.mxu0 %v1489_v52 }
 0x4df   : > { %v1745_v56 = vld [vmem:[%s5966_s27 + $0x2b28] sm:$0xff]  ;;  %4235 = vmatpush.msra.mxu1 %v1625_v0 }
 0x4e0   : > { %v1881_v53 = vld [vmem:[%s5966_s27 + $0x2f68] sm:$0xff]  ;;  %4256 = vmatpush.msra.mxu2 %v1745_v56 }
 0x4e1   : > { %v8558_v63 = vld [vmem:[#allocation10_spill] sm:$0xff]  ;;  %4275 = vmatpush.msra.mxu3 %v1881_v53 }
 0x4e2   : > { %4189 = vmatmul.f32.vlgmr.msrb.gmra.mxu2 %v8558_v63  ;;  %v1481_v37 = vld [vmem:[%s5966_s27 + $0x22e8] sm:$0xff] }
 0x4e3   : > { %v1617_v1 = vld [vmem:[%s5966_s27 + $0x2728] sm:$0xff]  ;;  %4217 = vmatpush.msra.mxu0 %v1481_v37  ;;  %v3970_v37 = vpop.f32.mrf.mxu3 }
 0x4e4   : > { %v1737_v8 = vld [vmem:[%s5966_s27 + $0x2ae8] sm:$0xff]  ;;  %4236 = vmatpush.msra.mxu1 %v1617_v1 }
 0x4e5   : > { %v1873_v61 = vld [vmem:[%s5966_s27 + $0x2f28] sm:$0xff]  ;;  %4257 = vmatpush.msra.mxu2 %v1737_v8 }
 0x4e6   : > { %v1473_v22 = vld [vmem:[%s5966_s27 + $0x22a8] sm:$0xff]  ;;  %4276 = vmatpush.msra.mxu3 %v1873_v61  ;;  %v7692_v61 = vadd.f32 %v3970_v37, %v3951_v58 }
 0x4e7   : > { %v1609_v10 = vld [vmem:[%s5966_s27 + $0x26e8] sm:$0xff]  ;;  %4218 = vmatpush.msra.mxu0 %v1473_v22 }
 0x4e8   : > { %v1729_v4 = vld [vmem:[%s5966_s27 + $0x2aa8] sm:$0xff]  ;;  %4237 = vmatpush.msra.mxu1 %v1609_v10  ;;  %v5713_v10 = vld.sshfl [vmem:[#allocation1 + $0x10] sm:$0xff pattern:$0x73625140] }
 0x4e9   : > { %v1865_v3 = vld [vmem:[%s5966_s27 + $0x2ee8] sm:$0xff]  ;;  %4258 = vmatpush.msra.mxu2 %v1729_v4 }
 0x4ea   : > { %v1465_v17 = vld [vmem:[%s5966_s27 + $0x2268] sm:$0xff]  ;;  %4277 = vmatpush.msra.mxu3 %v1865_v3 }
 0x4eb   : > { %v1601_v19 = vld [vmem:[%s5966_s27 + $0x26a8] sm:$0xff]  ;;  %4219 = vmatpush.msra.mxu0 %v1465_v17 }
 0x4ec   : > { %v1721_v35 = vld [vmem:[%s5966_s27 + $0x2a68] sm:$0xff]  ;;  %4238 = vmatpush.msra.mxu1 %v1601_v19 }
 0x4ed   : > { %v1857_v33 = vld [vmem:[%s5966_s27 + $0x2ea8] sm:$0xff]  ;;  %4259 = vmatpush.msra.mxu2 %v1721_v35  ;;  %v5714_v35 = vld.sshfl [vmem:[#allocation1 + $0x8] sm:$0xff pattern:$0x73625140] }
 0x4ee   : > { %v1457_v41 = vld [vmem:[%s5966_s27 + $0x2228] sm:$0xff]  ;;  %4278 = vmatpush.msra.mxu3 %v1857_v33  ;;  %v5715_v33 = vld.sshfl [vmem:[#allocation1 + $0x18] sm:$0xff pattern:$0x73625140] }
 0x4ef   : > { %v1593_v38 = vld [vmem:[%s5966_s27 + $0x2668] sm:$0xff]  ;;  %4220 = vmatpush.msra.mxu0 %v1457_v41 }
 0x4f0   : > { %v1713_v34 = vld [vmem:[%s5966_s27 + $0x2a28] sm:$0xff]  ;;  %4239 = vmatpush.msra.mxu1 %v1593_v38 }
 0x4f1   : > { %v1849_v29 = vld [vmem:[%s5966_s27 + $0x2e68] sm:$0xff]  ;;  %4260 = vmatpush.msra.mxu2 %v1713_v34 }
 0x4f2   : > { %v1449_v48 = vld [vmem:[%s5966_s27 + $0x21e8] sm:$0xff]  ;;  %4279 = vmatpush.msra.mxu3 %v1849_v29 }
 0x4f3   : > { %v1585_v50 = vld [vmem:[%s5966_s27 + $0x2628] sm:$0xff]  ;;  %4221 = vmatpush.msra.mxu0 %v1449_v48 }
 0x4f4   : > { %v1705_v55 = vld [vmem:[%s5966_s27 + $0x29e8] sm:$0xff]  ;;  %4240 = vmatpush.msra.mxu1 %v1585_v50 }
 0x4f5   : > { %v1841_v57 = vld [vmem:[%s5966_s27 + $0x2e28] sm:$0xff]  ;;  %4261 = vmatpush.msra.mxu2 %v1705_v55 }
 0x4f6   : > { %v1441_v28 = vld [vmem:[%s5966_s27 + $0x21a8] sm:$0xff]  ;;  %4280 = vmatpush.msra.mxu3 %v1841_v57 }
 0x4f7   : > { %v1577_v11 = vld [vmem:[%s5966_s27 + $0x25e8] sm:$0xff]  ;;  %4222 = vmatpush.msra.mxu0 %v1441_v28 }
 0x4f8   : > { %v1697_v44 = vld [vmem:[%s5966_s27 + $0x29a8] sm:$0xff]  ;;  %4241 = vmatpush.msra.mxu1 %v1577_v11 }
 0x4f9   : > { %v1833_v54 = vld [vmem:[%s5966_s27 + $0x2de8] sm:$0xff]  ;;  %4262 = vmatpush.msra.mxu2 %v1697_v44 }
 0x4fa   : > { %v1433_v30 = vld [vmem:[%s5966_s27 + $0x2168] sm:$0xff]  ;;  %4281 = vmatpush.msra.mxu3 %v1833_v54 }
 0x4fb   : > { %v1569_v25 = vld [vmem:[%s5966_s27 + $0x25a8] sm:$0xff]  ;;  %4223 = vmatpush.msra.mxu0 %v1433_v30 }
 0x4fc   : > { %v1689_v16 = vld [vmem:[%s5966_s27 + $0x2968] sm:$0xff]  ;;  %4242 = vmatpush.msra.mxu1 %v1569_v25 }
 0x4fd   : > { %v1825_v9 = vld [vmem:[%s5966_s27 + $0x2da8] sm:$0xff]  ;;  %4263 = vmatpush.msra.mxu2 %v1689_v16 }
 0x4fe   : > { %v1425_v39 = vld [vmem:[%s5966_s27 + $0x2128] sm:$0xff]  ;;  %4282 = vmatpush.msra.mxu3 %v1825_v9 }
 0x4ff   : > { %v1561_v59 = vld [vmem:[%s5966_s27 + $0x2568] sm:$0xff]  ;;  %4224 = vmatpush.msra.mxu0 %v1425_v39 }
 0x500   : > { %v1681_v36 = vld [vmem:[%s5966_s27 + $0x2928] sm:$0xff]  ;;  %4243 = vmatpush.msra.mxu1 %v1561_v59 }
 0x501   : > { %v1817_v32 = vld [vmem:[%s5966_s27 + $0x2d68] sm:$0xff]  ;;  %4264 = vmatpush.msra.mxu2 %v1681_v36 }
 0x502   : > { %v1417_v49 = vld [vmem:[%s5966_s27 + $0x20e8] sm:$0xff]  ;;  %4283 = vmatpush.msra.mxu3 %v1817_v32 }
 0x503   : > { %v1553_v42 = vld [vmem:[%s5966_s27 + $0x2528] sm:$0xff]  ;;  %4225 = vmatpush.msra.mxu0 %v1417_v49 }
 0x504   : > { %v1673_v26 = vld [vmem:[%s5966_s27 + $0x28e8] sm:$0xff]  ;;  %4244 = vmatpush.msra.mxu1 %v1553_v42 }
 0x505   : > { %v1809_v60 = vld [vmem:[%s5966_s27 + $0x2d28] sm:$0xff]  ;;  %4265 = vmatpush.msra.mxu2 %v1673_v26 }
 0x506   : > { %v1409_v23 = vld [vmem:[%s5966_s27 + $0x20a8] sm:$0xff]  ;;  %4284 = vmatpush.msra.mxu3 %v1809_v60 }
 0x507   : > { %v1545_v51 = vld [vmem:[%s5966_s27 + $0x24e8] sm:$0xff]  ;;  %4226 = vmatpush.msra.mxu0 %v1409_v23 }
 0x508   : > { %v1665_v13 = vld [vmem:[%s5966_s27 + $0x28a8] sm:$0xff]  ;;  %4245 = vmatpush.msra.mxu1 %v1545_v51 }
 0x509   : > { %v1801_v14 = vld [vmem:[%s5966_s27 + $0x2ce8] sm:$0xff]  ;;  %4266 = vmatpush.msra.mxu2 %v1665_v13 }
 0x50a   : > { %v1401_v18 = vld [vmem:[%s5966_s27 + $0x2068] sm:$0xff]  ;;  %4285 = vmatpush.msra.mxu3 %v1801_v14 }
 0x50b   : > { %v1537_v40 = vld [vmem:[%s5966_s27 + $0x24a8] sm:$0xff]  ;;  %4227 = vmatpush.msra.mxu0 %v1401_v18 }
 0x50c   : > { %v1657_v15 = vld [vmem:[%s5966_s27 + $0x2868] sm:$0xff]  ;;  %4246 = vmatpush.msra.mxu1 %v1537_v40 }
 0x50d   : > { %v1793_v24 = vld [vmem:[%s5966_s27 + $0x2ca8] sm:$0xff]  ;;  %4267 = vmatpush.msra.mxu2 %v1657_v15 }
 0x50e   : > { %v1393_v27 = vld [vmem:[%s5966_s27 + $0x2028] sm:$0xff]  ;;  %4286 = vmatpush.msra.mxu3 %v1793_v24 }
 0x50f   : > { %v1529_v52 = vld [vmem:[%s5966_s27 + $0x2468] sm:$0xff]  ;;  %4228 = vmatpush.msra.mxu0 %v1393_v27 }
 0x510   : > { %v1649_v0 = vld [vmem:[%s5966_s27 + $0x2828] sm:$0xff]  ;;  %4247 = vmatpush.msra.mxu1 %v1529_v52 }
 0x511   : > { %v1785_v56 = vld [vmem:[%s5966_s27 + $0x2c68] sm:$0xff]  ;;  %4268 = vmatpush.msra.mxu2 %v1649_v0 }
 0x512   : > { %v2025_v53 = vld [vmem:[%s5966_s27 + $0x33e8] sm:$0xff]  ;;  %4287 = vmatpush.msra.mxu3 %v1785_v56  ;;  %4269 = vmatmul.f32.vlgmr.msra.gmra.mxu2 %v5713_v10 }
 0x513   : > { %v2281_v21 = vld [vmem:[%s5966_s27 + $0x3be8] sm:$0xff]  ;;  %4293 = vmatpush.msrb.mxu0 %v2025_v53  ;;  %v3990_v53 = vpop.f32.mrf.mxu0 }
 0x514   : > { %v1521_v1 = vld [vmem:[%s5966_s27 + $0x2428] sm:$0xff]  ;;  %4333 = vmatpush.msrb.mxu2 %v2281_v21 }
 0x515   : > { %v1777_v8 = vld [vmem:[%s5966_s27 + $0x2c28] sm:$0xff]  ;;  %4248 = vmatpush.msra.mxu1 %v1521_v1  ;;  %v3991_v1 = vadd.f32 %v3990_v53, %v7692_v61  ;;  %v690_v53 = vld [vmem:[%s5966_s27 + $0xa30] sm:$0xff] }
 0x516   : > { %v5712_v22 = vld.sshfl [vmem:[#allocation1] sm:$0xff pattern:$0x73625140]  ;;  %4288 = vmatpush.msra.mxu3 %v1777_v8  ;;  %4249 = vmatmul.f32.vlgmr.msra.gmra.mxu1 %v5714_v35 }
 0x517   : > { %4229 = vmatmul.f32.vlgmr.msra.gmra.mxu0 %v5712_v22  ;;  %v2017_v4 = vld [vmem:[%s5966_s27 + $0x33a8] sm:$0xff]  ;;  %4289 = vmatmul.f32.vlgmr.msra.gmra.mxu3 %v5715_v33 }
 0x518   : > { %v2153_v3 = vld [vmem:[%s5966_s27 + $0x37e8] sm:$0xff]  ;;  %4294 = vmatpush.msrb.mxu0 %v2017_v4 }
 0x519   : > { %v2273_v17 = vld [vmem:[%s5966_s27 + $0x3ba8] sm:$0xff]  ;;  %4313 = vmatpush.msrb.mxu1 %v2153_v3  ;;  %v4010_v3 = vpop.f32.mrf.mxu1 }
 0x51a   : > { %v2409_v19 = vld [vmem:[%s5966_s27 + $0x3fe8] sm:$0xff]  ;;  %4334 = vmatpush.msrb.mxu2 %v2273_v17  ;;  %v4011_v33 = vadd.f32 %v4010_v3, %v3991_v1  ;;  %v562_v1 = vld [vmem:[%s5966_s27 + $0x630] sm:$0xff] }
 0x51b   : > { %v2009_v41 = vld [vmem:[%s5966_s27 + $0x3368] sm:$0xff]  ;;  %4353 = vmatpush.msrb.mxu3 %v2409_v19  ;;  %v674_v3 = vld [vmem:[%s5966_s27 + $0x9b0] sm:$0xff] }
 0x51c   : > { %v2145_v38 = vld [vmem:[%s5966_s27 + $0x37a8] sm:$0xff]  ;;  %4295 = vmatpush.msrb.mxu0 %v2009_v41 }
 0x51d   : > { %v2265_v34 = vld [vmem:[%s5966_s27 + $0x3b68] sm:$0xff]  ;;  %4314 = vmatpush.msrb.mxu1 %v2145_v38 }
 0x51e   : > { %v2401_v29 = vld [vmem:[%s5966_s27 + $0x3fa8] sm:$0xff]  ;;  %4335 = vmatpush.msrb.mxu2 %v2265_v34  ;;  %v4030_v34 = vpop.f32.mrf.mxu2 }
 0x51f   : > { %v2001_v48 = vld [vmem:[%s5966_s27 + $0x3328] sm:$0xff]  ;;  %4354 = vmatpush.msrb.mxu3 %v2401_v29 }
 0x520   : > { %v2137_v50 = vld [vmem:[%s5966_s27 + $0x3768] sm:$0xff]  ;;  %4296 = vmatpush.msrb.mxu0 %v2001_v48 }
 0x521   : > { %v2257_v55 = vld [vmem:[%s5966_s27 + $0x3b28] sm:$0xff]  ;;  %4315 = vmatpush.msrb.mxu1 %v2137_v50  ;;  %v4031_v50 = vadd.f32 %v4030_v34, %v4011_v33  ;;  %v802_v33 = vld [vmem:[%s5966_s27 + $0xdb0] sm:$0xff] }
 0x522   : > { %v2393_v57 = vld [vmem:[%s5966_s27 + $0x3f68] sm:$0xff]  ;;  %4336 = vmatpush.msrb.mxu2 %v2257_v55  ;;  %v490_v55 = vld [vmem:[%s5966_s27 + $0x3f0] sm:$0xff] }
 0x523   : > { %v1993_v28 = vld [vmem:[%s5966_s27 + $0x32e8] sm:$0xff]  ;;  %4355 = vmatpush.msrb.mxu3 %v2393_v57  ;;  %v746_v57 = vld [vmem:[%s5966_s27 + $0xbf0] sm:$0xff] }
 0x524   : > { %v2129_v11 = vld [vmem:[%s5966_s27 + $0x3728] sm:$0xff]  ;;  %4297 = vmatpush.msrb.mxu0 %v1993_v28  ;;  %v4050_v28 = vpop.f32.mrf.mxu3  ;;  %v658_v34 = vld [vmem:[%s5966_s27 + $0x930] sm:$0xff] }
 0x525   : > { %v2249_v44 = vld [vmem:[%s5966_s27 + $0x3ae8] sm:$0xff]  ;;  %4316 = vmatpush.msrb.mxu1 %v2129_v11 }
 0x526   : > { %v2385_v54 = vld [vmem:[%s5966_s27 + $0x3f28] sm:$0xff]  ;;  %4337 = vmatpush.msrb.mxu2 %v2249_v44 }
 0x527   : > { %v1985_v30 = vld [vmem:[%s5966_s27 + $0x32a8] sm:$0xff]  ;;  %4356 = vmatpush.msrb.mxu3 %v2385_v54  ;;  %v7759_v54 = vadd.f32 %v4050_v28, %v4031_v50  ;;  %v530_v50 = vld [vmem:[%s5966_s27 + $0x530] sm:$0xff] }
 0x528   : > { %v2121_v25 = vld [vmem:[%s5966_s27 + $0x36e8] sm:$0xff]  ;;  %4298 = vmatpush.msrb.mxu0 %v1985_v30  ;;  %v386_v28 = vld [vmem:[%s5966_s27 + $0xb0] sm:$0xff] }
 0x529   : > { %v2241_v16 = vld [vmem:[%s5966_s27 + $0x3aa8] sm:$0xff]  ;;  %4317 = vmatpush.msrb.mxu1 %v2121_v25  ;;  %v5717_v25 = vld.sshfl [vmem:[#allocation1 + $0x30] sm:$0xff pattern:$0x73625140] }
 0x52a   : > { %v2377_v9 = vld [vmem:[%s5966_s27 + $0x3ee8] sm:$0xff]  ;;  %4338 = vmatpush.msrb.mxu2 %v2241_v16  ;;  %v482_v16 = vld [vmem:[%s5966_s27 + $0x3b0] sm:$0xff] }
 0x52b   : > { %v1977_v39 = vld [vmem:[%s5966_s27 + $0x3268] sm:$0xff]  ;;  %4357 = vmatpush.msrb.mxu3 %v2377_v9  ;;  %v618_v9 = vld [vmem:[%s5966_s27 + $0x7f0] sm:$0xff] }
 0x52c   : > { %v2113_v59 = vld [vmem:[%s5966_s27 + $0x36a8] sm:$0xff]  ;;  %4299 = vmatpush.msrb.mxu0 %v1977_v39  ;;  %v738_v39 = vld [vmem:[%s5966_s27 + $0xbb0] sm:$0xff] }
 0x52d   : > { %v2233_v36 = vld [vmem:[%s5966_s27 + $0x3a68] sm:$0xff]  ;;  %4318 = vmatpush.msrb.mxu1 %v2113_v59  ;;  %v874_v59 = vld [vmem:[%s5966_s27 + $0xff0] sm:$0xff] }
 0x52e   : > { %v2369_v32 = vld [vmem:[%s5966_s27 + $0x3ea8] sm:$0xff]  ;;  %4339 = vmatpush.msrb.mxu2 %v2233_v36  ;;  %v5718_v36 = vld.sshfl [vmem:[#allocation1 + $0x28] sm:$0xff pattern:$0x73625140] }
 0x52f   : > { %v1969_v49 = vld [vmem:[%s5966_s27 + $0x3228] sm:$0xff]  ;;  %4358 = vmatpush.msrb.mxu3 %v2369_v32  ;;  %v5719_v32 = vld.sshfl [vmem:[#allocation1 + $0x38] sm:$0xff pattern:$0x73625140] }
 0x530   : > { %v2105_v42 = vld [vmem:[%s5966_s27 + $0x3668] sm:$0xff]  ;;  %4300 = vmatpush.msrb.mxu0 %v1969_v49  ;;  %v474_v49 = vld [vmem:[%s5966_s27 + $0x370] sm:$0xff] }
 0x531   : > { %v2225_v5 = vld [vmem:[%s5966_s27 + $0x3a28] sm:$0xff]  ;;  %4319 = vmatpush.msrb.mxu1 %v2105_v42  ;;  %v610_v42 = vld [vmem:[%s5966_s27 + $0x7b0] sm:$0xff] }
 0x532   : > { %v2361_v26 = vld [vmem:[%s5966_s27 + $0x3e68] sm:$0xff]  ;;  %4340 = vmatpush.msrb.mxu2 %v2225_v5  ;;  %v730_v5 = vld [vmem:[%s5966_s27 + $0xb70] sm:$0xff] }
 0x533   : > { %v1961_v60 = vld [vmem:[%s5966_s27 + $0x31e8] sm:$0xff]  ;;  %4359 = vmatpush.msrb.mxu3 %v2361_v26  ;;  %v866_v26 = vld [vmem:[%s5966_s27 + $0xfb0] sm:$0xff] }
 0x534   : > { %v2097_v62 = vld [vmem:[%s5966_s27 + $0x3628] sm:$0xff]  ;;  %4301 = vmatpush.msrb.mxu0 %v1961_v60  ;;  %v466_v60 = vld [vmem:[%s5966_s27 + $0x330] sm:$0xff] }
 0x535   : > { %v2217_v23 = vld [vmem:[%s5966_s27 + $0x39e8] sm:$0xff]  ;;  %4320 = vmatpush.msrb.mxu1 %v2097_v62  ;;  %v602_v62 = vld [vmem:[%s5966_s27 + $0x770] sm:$0xff] }
 0x536   : > { %v2353_v51 = vld [vmem:[%s5966_s27 + $0x3e28] sm:$0xff]  ;;  %4341 = vmatpush.msrb.mxu2 %v2217_v23  ;;  %v722_v23 = vld [vmem:[%s5966_s27 + $0xb30] sm:$0xff] }
 0x537   : > { %v1953_v13 = vld [vmem:[%s5966_s27 + $0x31a8] sm:$0xff]  ;;  %4360 = vmatpush.msrb.mxu3 %v2353_v51  ;;  %v858_v51 = vld [vmem:[%s5966_s27 + $0xf70] sm:$0xff] }
 0x538   : > { %v2089_v14 = vld [vmem:[%s5966_s27 + $0x35e8] sm:$0xff]  ;;  %4302 = vmatpush.msrb.mxu0 %v1953_v13  ;;  %v458_v13 = vld [vmem:[%s5966_s27 + $0x2f0] sm:$0xff] }
 0x539   : > { %v2209_v20 = vld [vmem:[%s5966_s27 + $0x39a8] sm:$0xff]  ;;  %4321 = vmatpush.msrb.mxu1 %v2089_v14  ;;  %v594_v14 = vld [vmem:[%s5966_s27 + $0x730] sm:$0xff] }
 0x53a   : > { %v2345_v18 = vld [vmem:[%s5966_s27 + $0x3de8] sm:$0xff]  ;;  %4342 = vmatpush.msrb.mxu2 %v2209_v20  ;;  %v714_v20 = vld [vmem:[%s5966_s27 + $0xaf0] sm:$0xff] }
 0x53b   : > { %v1945_v40 = vld [vmem:[%s5966_s27 + $0x3168] sm:$0xff]  ;;  %4361 = vmatpush.msrb.mxu3 %v2345_v18  ;;  %v850_v18 = vld [vmem:[%s5966_s27 + $0xf30] sm:$0xff] }
 0x53c   : > { %v2081_v43 = vld [vmem:[%s5966_s27 + $0x35a8] sm:$0xff]  ;;  %4303 = vmatpush.msrb.mxu0 %v1945_v40  ;;  %v450_v40 = vld [vmem:[%s5966_s27 + $0x2b0] sm:$0xff] }
 0x53d   : > { %v2201_v15 = vld [vmem:[%s5966_s27 + $0x3968] sm:$0xff]  ;;  %4322 = vmatpush.msrb.mxu1 %v2081_v43  ;;  %v586_v43 = vld [vmem:[%s5966_s27 + $0x6f0] sm:$0xff] }
 0x53e   : > { %v2337_v24 = vld [vmem:[%s5966_s27 + $0x3da8] sm:$0xff]  ;;  %4343 = vmatpush.msrb.mxu2 %v2201_v15  ;;  %v706_v15 = vld [vmem:[%s5966_s27 + $0xab0] sm:$0xff] }
 0x53f   : > { %v1937_v27 = vld [vmem:[%s5966_s27 + $0x3128] sm:$0xff]  ;;  %4362 = vmatpush.msrb.mxu3 %v2337_v24  ;;  %v842_v24 = vld [vmem:[%s5966_s27 + $0xef0] sm:$0xff] }
 0x540   : > { %v2073_v52 = vld [vmem:[%s5966_s27 + $0x3568] sm:$0xff]  ;;  %4304 = vmatpush.msrb.mxu0 %v1937_v27  ;;  %v442_v27 = vld [vmem:[%s5966_s27 + $0x270] sm:$0xff] }
 0x541   : > { %v2193_v6 = vld [vmem:[%s5966_s27 + $0x3928] sm:$0xff]  ;;  %4323 = vmatpush.msrb.mxu1 %v2073_v52  ;;  %v578_v52 = vld [vmem:[%s5966_s27 + $0x6b0] sm:$0xff] }
 0x542   : > { %v2329_v0 = vld [vmem:[%s5966_s27 + $0x3d68] sm:$0xff]  ;;  %4344 = vmatpush.msrb.mxu2 %v2193_v6  ;;  %v698_v6 = vld [vmem:[%s5966_s27 + $0xa70] sm:$0xff] }
 0x543   : > { %v1929_v56 = vld [vmem:[%s5966_s27 + $0x30e8] sm:$0xff]  ;;  %4363 = vmatpush.msrb.mxu3 %v2329_v0  ;;  %v834_v0 = vld [vmem:[%s5966_s27 + $0xeb0] sm:$0xff] }
 0x544   : > { %v2065_v58 = vld [vmem:[%s5966_s27 + $0x3528] sm:$0xff]  ;;  %4305 = vmatpush.msrb.mxu0 %v1929_v56  ;;  %v434_v56 = vld [vmem:[%s5966_s27 + $0x230] sm:$0xff] }
 0x545   : > { %v2185_v21 = vld [vmem:[%s5966_s27 + $0x38e8] sm:$0xff]  ;;  %4324 = vmatpush.msrb.mxu1 %v2065_v58  ;;  %v570_v58 = vld [vmem:[%s5966_s27 + $0x670] sm:$0xff] }
 0x546   : > { %v2321_v37 = vld [vmem:[%s5966_s27 + $0x3d28] sm:$0xff]  ;;  %4345 = vmatpush.msrb.mxu2 %v2185_v21  ;;  %v826_v21 = vld [vmem:[%s5966_s27 + $0xe70] sm:$0xff] }
 0x547   : > { %v1921_v8 = vld [vmem:[%s5966_s27 + $0x30a8] sm:$0xff]  ;;  %4364 = vmatpush.msrb.mxu3 %v2321_v37  ;;  %v426_v37 = vld [vmem:[%s5966_s27 + $0x1f0] sm:$0xff] }
 0x548   : > { %v2057_v22 = vld [vmem:[%s5966_s27 + $0x34e8] sm:$0xff]  ;;  %4306 = vmatpush.msrb.mxu0 %v1921_v8  ;;  %v682_v8 = vld [vmem:[%s5966_s27 + $0x9f0] sm:$0xff] }
 0x549   : > { %v2177_v10 = vld [vmem:[%s5966_s27 + $0x38a8] sm:$0xff]  ;;  %4325 = vmatpush.msrb.mxu1 %v2057_v22  ;;  %v818_v22 = vld [vmem:[%s5966_s27 + $0xe30] sm:$0xff] }
 0x54a   : > { %v2313_v4 = vld [vmem:[%s5966_s27 + $0x3ce8] sm:$0xff]  ;;  %4346 = vmatpush.msrb.mxu2 %v2177_v10  ;;  %v418_v10 = vld [vmem:[%s5966_s27 + $0x1b0] sm:$0xff] }
 0x54b   : > { %v1913_v17 = vld [vmem:[%s5966_s27 + $0x3068] sm:$0xff]  ;;  %4365 = vmatpush.msrb.mxu3 %v2313_v4  ;;  %v554_v4 = vld [vmem:[%s5966_s27 + $0x5f0] sm:$0xff] }
 0x54c   : > { %v2049_v19 = vld [vmem:[%s5966_s27 + $0x34a8] sm:$0xff]  ;;  %4307 = vmatpush.msrb.mxu0 %v1913_v17  ;;  %v810_v17 = vld [vmem:[%s5966_s27 + $0xdf0] sm:$0xff] }
 0x54d   : > { %v2169_v61 = vld [vmem:[%s5966_s27 + $0x3868] sm:$0xff]  ;;  %4326 = vmatpush.msrb.mxu1 %v2049_v19  ;;  %v410_v19 = vld [vmem:[%s5966_s27 + $0x170] sm:$0xff] }
 0x54e   : > { %v2305_v35 = vld [vmem:[%s5966_s27 + $0x3ca8] sm:$0xff]  ;;  %4347 = vmatpush.msrb.mxu2 %v2169_v61  ;;  %v546_v61 = vld [vmem:[%s5966_s27 + $0x5b0] sm:$0xff] }
 0x54f   : > { %v1905_v41 = vld [vmem:[%s5966_s27 + $0x3028] sm:$0xff]  ;;  %4366 = vmatpush.msrb.mxu3 %v2305_v35  ;;  %v666_v35 = vld [vmem:[%s5966_s27 + $0x970] sm:$0xff] }
 0x550   : > { %v2041_v38 = vld [vmem:[%s5966_s27 + $0x3468] sm:$0xff]  ;;  %4308 = vmatpush.msrb.mxu0 %v1905_v41  ;;  %v402_v41 = vld [vmem:[%s5966_s27 + $0x130] sm:$0xff] }
 0x551   : > { %v2161_v29 = vld [vmem:[%s5966_s27 + $0x3828] sm:$0xff]  ;;  %4327 = vmatpush.msrb.mxu1 %v2041_v38  ;;  %v538_v38 = vld [vmem:[%s5966_s27 + $0x570] sm:$0xff] }
 0x552   : > { %v2297_v48 = vld [vmem:[%s5966_s27 + $0x3c68] sm:$0xff]  ;;  %4348 = vmatpush.msrb.mxu2 %v2161_v29  ;;  %4373 = vmatpush.msra.mxu0 %v490_v55  ;;  %v794_v29 = vld [vmem:[%s5966_s27 + $0xd70] sm:$0xff] }
 0x553   : > { %4367 = vmatpush.msrb.mxu3 %v2297_v48  ;;  %v2033_v11 = vld [vmem:[%s5966_s27 + $0x3428] sm:$0xff]  ;;  %4349 = vmatmul.f32.vlgmr.msrb.gmra.mxu2 %v5717_v25  ;;  %v394_v48 = vld [vmem:[%s5966_s27 + $0xf0] sm:$0xff] }
 0x554   : > { %v2289_v44 = vld [vmem:[%s5966_s27 + $0x3c28] sm:$0xff]  ;;  %4413 = vmatpush.msra.mxu2 %v746_v57  ;;  %4328 = vmatpush.msrb.mxu1 %v2033_v11  ;;  %v650_v55 = vld [vmem:[%s5966_s27 + $0x8f0] sm:$0xff] }
 0x555   : > { %v5716_v30 = vld.sshfl [vmem:[#allocation1 + $0x20] sm:$0xff pattern:$0x73625140]  ;;  %4368 = vmatpush.msrb.mxu3 %v2289_v44  ;;  %4329 = vmatmul.f32.vlgmr.msrb.gmra.mxu1 %v5718_v36  ;;  %v786_v57 = vld [vmem:[%s5966_s27 + $0xd30] sm:$0xff] }
 0x556   : > { %4309 = vmatmul.f32.vlgmr.msrb.gmra.mxu0 %v5716_v30  ;;  %4369 = vmatmul.f32.vlgmr.msrb.gmra.mxu3 %v5719_v32  ;;  %v522_v11 = vld [vmem:[%s5966_s27 + $0x4f0] sm:$0xff] }
 0x557   : > { %4374 = vmatpush.msra.mxu0 %v482_v16  ;;  %4393 = vmatpush.msra.mxu1 %v618_v9  ;;  %v642_v44 = vld [vmem:[%s5966_s27 + $0x8b0] sm:$0xff] }
 0x558   : > { %4414 = vmatpush.msra.mxu2 %v738_v39  ;;  %4433 = vmatpush.msra.mxu3 %v874_v59  ;;  %v778_v30 = vld [vmem:[%s5966_s27 + $0xcf0] sm:$0xff] }
 0x559   : > { %4375 = vmatpush.msra.mxu0 %v474_v49  ;;  %4394 = vmatpush.msra.mxu1 %v610_v42  ;;  %v378_v25 = vld [vmem:[%s5966_s27 + $0x70] sm:$0xff] }
 0x55a   : > { %4415 = vmatpush.msra.mxu2 %v730_v5  ;;  %4434 = vmatpush.msra.mxu3 %v866_v26  ;;  %v514_v16 = vld [vmem:[%s5966_s27 + $0x4b0] sm:$0xff] }
 0x55b   : > { %4376 = vmatpush.msra.mxu0 %v466_v60  ;;  %4395 = vmatpush.msra.mxu1 %v602_v62  ;;  %v634_v9 = vld [vmem:[%s5966_s27 + $0x870] sm:$0xff] }
 0x55c   : > { %4416 = vmatpush.msra.mxu2 %v722_v23  ;;  %4435 = vmatpush.msra.mxu3 %v858_v51  ;;  %v770_v39 = vld [vmem:[%s5966_s27 + $0xcb0] sm:$0xff] }
 0x55d   : > { %4377 = vmatpush.msra.mxu0 %v458_v13  ;;  %4396 = vmatpush.msra.mxu1 %v594_v14  ;;  %v370_v59 = vld [vmem:[%s5966_s27 + $0x30] sm:$0xff] }
 0x55e   : > { %4417 = vmatpush.msra.mxu2 %v714_v20  ;;  %4436 = vmatpush.msra.mxu3 %v850_v18  ;;  %v506_v36 = vld [vmem:[%s5966_s27 + $0x470] sm:$0xff] }
 0x55f   : > { %4378 = vmatpush.msra.mxu0 %v450_v40  ;;  %4397 = vmatpush.msra.mxu1 %v586_v43  ;;  %v626_v32 = vld [vmem:[%s5966_s27 + $0x830] sm:$0xff] }
 0x560   : > { %4418 = vmatpush.msra.mxu2 %v706_v15  ;;  %4437 = vmatpush.msra.mxu3 %v842_v24  ;;  %v762_v49 = vld [vmem:[%s5966_s27 + $0xc70] sm:$0xff] }
 0x561   : > { %4379 = vmatpush.msra.mxu0 %v442_v27  ;;  %4398 = vmatpush.msra.mxu1 %v578_v52  ;;  %v1002_v42 = vld [vmem:[%s5966_s27 + $0x13f0] sm:$0xff] }
 0x562   : > { %4419 = vmatpush.msra.mxu2 %v698_v6  ;;  %4438 = vmatpush.msra.mxu3 %v834_v0  ;;  %v1258_v5 = vld [vmem:[%s5966_s27 + $0x1bf0] sm:$0xff] }
 0x563   : > { %4380 = vmatpush.msra.mxu0 %v434_v56  ;;  %4399 = vmatpush.msra.mxu1 %v570_v58  ;;  %v498_v26 = vld [vmem:[%s5966_s27 + $0x430] sm:$0xff] }
 0x564   : > { %4420 = vmatpush.msra.mxu2 %v690_v53  ;;  %4439 = vmatpush.msra.mxu3 %v826_v21  ;;  %v754_v60 = vld [vmem:[%s5966_s27 + $0xc30] sm:$0xff] }
 0x565   : > { %4381 = vmatpush.msra.mxu0 %v426_v37  ;;  %4400 = vmatpush.msra.mxu1 %v562_v1  ;;  %v994_v62 = vld [vmem:[%s5966_s27 + $0x13b0] sm:$0xff] }
 0x566   : > { %4421 = vmatpush.msra.mxu2 %v682_v8  ;;  %4440 = vmatpush.msra.mxu3 %v818_v22  ;;  %v1130_v23 = vld [vmem:[%s5966_s27 + $0x17f0] sm:$0xff] }
 0x567   : > { %4382 = vmatpush.msra.mxu0 %v418_v10  ;;  %4401 = vmatpush.msra.mxu1 %v554_v4  ;;  %v1250_v51 = vld [vmem:[%s5966_s27 + $0x1bb0] sm:$0xff] }
 0x568   : > { %4422 = vmatpush.msra.mxu2 %v674_v3  ;;  %4441 = vmatpush.msra.mxu3 %v810_v17  ;;  %v1386_v13 = vld [vmem:[%s5966_s27 + $0x1ff0] sm:$0xff] }
 0x569   : > { %4383 = vmatpush.msra.mxu0 %v410_v19  ;;  %4402 = vmatpush.msra.mxu1 %v546_v61  ;;  %v986_v14 = vld [vmem:[%s5966_s27 + $0x1370] sm:$0xff] }
 0x56a   : > { %4423 = vmatpush.msra.mxu2 %v666_v35  ;;  %4442 = vmatpush.msra.mxu3 %v802_v33  ;;  %v1122_v20 = vld [vmem:[%s5966_s27 + $0x17b0] sm:$0xff] }
 0x56b   : > { %4384 = vmatpush.msra.mxu0 %v402_v41  ;;  %4403 = vmatpush.msra.mxu1 %v538_v38  ;;  %v1242_v18 = vld [vmem:[%s5966_s27 + $0x1b70] sm:$0xff] }
 0x56c   : > { %4424 = vmatpush.msra.mxu2 %v658_v34  ;;  %4443 = vmatpush.msra.mxu3 %v794_v29  ;;  %v1378_v40 = vld [vmem:[%s5966_s27 + $0x1fb0] sm:$0xff] }
 0x56d   : > { %4385 = vmatpush.msra.mxu0 %v394_v48  ;;  %4404 = vmatpush.msra.mxu1 %v530_v50  ;;  %v978_v43 = vld [vmem:[%s5966_s27 + $0x1330] sm:$0xff] }
 0x56e   : > { %4425 = vmatpush.msra.mxu2 %v650_v55  ;;  %4444 = vmatpush.msra.mxu3 %v786_v57  ;;  %v1114_v15 = vld [vmem:[%s5966_s27 + $0x1770] sm:$0xff] }
 0x56f   : > { %4386 = vmatpush.msra.mxu0 %v386_v28  ;;  %4405 = vmatpush.msra.mxu1 %v522_v11  ;;  %v1234_v24 = vld [vmem:[%s5966_s27 + $0x1b30] sm:$0xff] }
 0x570   : > { %4426 = vmatpush.msra.mxu2 %v642_v44  ;;  %4445 = vmatpush.msra.mxu3 %v778_v30  ;;  %v1370_v27 = vld [vmem:[%s5966_s27 + $0x1f70] sm:$0xff] }
 0x571   : > { %4387 = vmatpush.msra.mxu0 %v378_v25  ;;  %4406 = vmatpush.msra.mxu1 %v514_v16  ;;  %v970_v52 = vld [vmem:[%s5966_s27 + $0x12f0] sm:$0xff] }
 0x572   : > { %4427 = vmatpush.msra.mxu2 %v634_v9  ;;  %4446 = vmatpush.msra.mxu3 %v770_v39  ;;  %v1106_v6 = vld [vmem:[%s5966_s27 + $0x1730] sm:$0xff]  ;;  %v4070_v39 = vpop.f32.mrf.mxu0 }
 0x573   : > { %4388 = vmatpush.msra.mxu0 %v370_v59  ;;  %4407 = vmatpush.msra.mxu1 %v506_v36  ;;  %v1226_v0 = vld [vmem:[%s5966_s27 + $0x1af0] sm:$0xff] }
 0x574   : > { %4428 = vmatpush.msra.mxu2 %v626_v32  ;;  %4447 = vmatpush.msra.mxu3 %v762_v49  ;;  %v1362_v56 = vld [vmem:[%s5966_s27 + $0x1f30] sm:$0xff] }
 0x575   : > { %4453 = vmatpush.msrb.mxu0 %v1002_v42  ;;  %4408 = vmatpush.msra.mxu1 %v498_v26  ;;  %v962_v58 = vld [vmem:[%s5966_s27 + $0x12b0] sm:$0xff]  ;;  %v4090_v26 = vpop.f32.mrf.mxu1 }
 0x576   : > { %4493 = vmatpush.msrb.mxu2 %v1258_v5  ;;  %4448 = vmatpush.msra.mxu3 %v754_v60  ;;  %v1098_v53 = vld [vmem:[%s5966_s27 + $0x16f0] sm:$0xff] }
 0x577   : > { %4454 = vmatpush.msrb.mxu0 %v994_v62  ;;  %4473 = vmatpush.msrb.mxu1 %v1130_v23  ;;  %v1218_v21 = vld [vmem:[%s5966_s27 + $0x1ab0] sm:$0xff]  ;;  %v4091_v23 = vadd.f32 %v4090_v26, %v4070_v39 }
 0x578   : > { %4494 = vmatpush.msrb.mxu2 %v1250_v51  ;;  %4513 = vmatpush.msrb.mxu3 %v1386_v13  ;;  %v1354_v37 = vld [vmem:[%s5966_s27 + $0x1ef0] sm:$0xff]  ;;  %v4110_v51 = vpop.f32.mrf.mxu2 }
 0x579   : > { %4455 = vmatpush.msrb.mxu0 %v986_v14  ;;  %4474 = vmatpush.msrb.mxu1 %v1122_v20  ;;  %v954_v1 = vld [vmem:[%s5966_s27 + $0x1270] sm:$0xff] }
 0x57a   : > { %4495 = vmatpush.msrb.mxu2 %v1242_v18  ;;  %4514 = vmatpush.msrb.mxu3 %v1378_v40  ;;  %v1090_v8 = vld [vmem:[%s5966_s27 + $0x16b0] sm:$0xff]  ;;  %v4111_v18 = vadd.f32 %v4110_v51, %v4091_v23 }
 0x57b   : > { %4456 = vmatpush.msrb.mxu0 %v978_v43  ;;  %4475 = vmatpush.msrb.mxu1 %v1114_v15  ;;  %v1210_v22 = vld [vmem:[%s5966_s27 + $0x1a70] sm:$0xff]  ;;  %v4130_v15 = vpop.f32.mrf.mxu3 }
 0x57c   : > { %4496 = vmatpush.msrb.mxu2 %v1234_v24  ;;  %4515 = vmatpush.msrb.mxu3 %v1370_v27  ;;  %v1346_v10 = vld [vmem:[%s5966_s27 + $0x1eb0] sm:$0xff]  ;;  %v4131_v27 = vadd.f32 %v4130_v15, %v4111_v18 }
 0x57d   : > { %4457 = vmatpush.msrb.mxu0 %v970_v52  ;;  %4476 = vmatpush.msrb.mxu1 %v1106_v6  ;;  %v946_v4 = vld [vmem:[%s5966_s27 + $0x1230] sm:$0xff] }
 0x57e   : > { %4497 = vmatpush.msrb.mxu2 %v1226_v0  ;;  %4516 = vmatpush.msrb.mxu3 %v1362_v56  ;;  %v1082_v3 = vld [vmem:[%s5966_s27 + $0x1670] sm:$0xff]  ;;  %v4150_v56 = vpop.f32.mrf.mxu0 }
 0x57f   : > { %4458 = vmatpush.msrb.mxu0 %v962_v58  ;;  %4477 = vmatpush.msrb.mxu1 %v1098_v53  ;;  %v1202_v17 = vld [vmem:[%s5966_s27 + $0x1a30] sm:$0xff]  ;;  %v4151_v53 = vadd.f32 %v4150_v56, %v4131_v27 }
 0x580   : > { %4498 = vmatpush.msrb.mxu2 %v1218_v21  ;;  %4517 = vmatpush.msrb.mxu3 %v1354_v37  ;;  %v1338_v19 = vld [vmem:[%s5966_s27 + $0x1e70] sm:$0xff] }
 0x581   : > { %4459 = vmatpush.msrb.mxu0 %v954_v1  ;;  %4478 = vmatpush.msrb.mxu1 %v1090_v8  ;;  %v938_v61 = vld [vmem:[%s5966_s27 + $0x11f0] sm:$0xff] }
 0x582   : > { %4499 = vmatpush.msrb.mxu2 %v1210_v22  ;;  %4518 = vmatpush.msrb.mxu3 %v1346_v10  ;;  %v1074_v35 = vld [vmem:[%s5966_s27 + $0x1630] sm:$0xff]  ;;  %v4170_v22 = vpop.f32.mrf.mxu1 }
 0x583   : > { %4460 = vmatpush.msrb.mxu0 %v946_v4  ;;  %4479 = vmatpush.msrb.mxu1 %v1082_v3  ;;  %v1194_v33 = vld [vmem:[%s5966_s27 + $0x19f0] sm:$0xff]  ;;  %v4171_v3 = vadd.f32 %v4170_v22, %v4151_v53 }
 0x584   : > { %v1330_v41 = vld [vmem:[%s5966_s27 + $0x1e30] sm:$0xff]  ;;  %4500 = vmatpush.msrb.mxu2 %v1202_v17  ;;  %4519 = vmatpush.msrb.mxu3 %v1338_v19  ;;  %v4190_v17 = vpop.f32.mrf.mxu2 }
 0x585   : > { %v930_v38 = vld [vmem:[%s5966_s27 + $0x11b0] sm:$0xff]  ;;  %4461 = vmatpush.msrb.mxu0 %v938_v61  ;;  %4480 = vmatpush.msrb.mxu1 %v1074_v35 }
 0x586   : > { %v1066_v34 = vld [vmem:[%s5966_s27 + $0x15f0] sm:$0xff]  ;;  %4501 = vmatpush.msrb.mxu2 %v1194_v33  ;;  %4520 = vmatpush.msrb.mxu3 %v1330_v41  ;;  %v4191_v33 = vadd.f32 %v4190_v17, %v4171_v3 }
 0x587   : > { %v1186_v29 = vld [vmem:[%s5966_s27 + $0x19b0] sm:$0xff]  ;;  %4462 = vmatpush.msrb.mxu0 %v930_v38  ;;  %4481 = vmatpush.msrb.mxu1 %v1066_v34  ;;  %v4210_v34 = vpop.f32.mrf.mxu3 }
 0x588   : > { %v1322_v48 = vld [vmem:[%s5966_s27 + $0x1df0] sm:$0xff]  ;;  %4502 = vmatpush.msrb.mxu2 %v1186_v29  ;;  %4389 = vmatmul.f32.vlgmr.msra.gmra.mxu0 %v6110_v46 }
 0x589   : > { %v922_v50 = vld [vmem:[%s5966_s27 + $0x1170] sm:$0xff]  ;;  %4521 = vmatpush.msrb.mxu3 %v1322_v48  ;;  %4429 = vmatmul.f32.vlgmr.msra.gmra.mxu2 %v6108_v45  ;;  %v7905_v48 = vadd.f32 %v4210_v34, %v4191_v33 }
 0x58a   : > { %v1058_v55 = vld [vmem:[%s5966_s27 + $0x15b0] sm:$0xff]  ;;  %4463 = vmatpush.msrb.mxu0 %v922_v50  ;;  %4449 = vmatmul.f32.vlgmr.msra.gmra.mxu3 %v6112_v47 }
 0x58b   : > { %v1178_v57 = vld [vmem:[%s5966_s27 + $0x1970] sm:$0xff]  ;;  %4482 = vmatpush.msrb.mxu1 %v1058_v55 }
 0x58c   : > { %v1314_v28 = vld [vmem:[%s5966_s27 + $0x1db0] sm:$0xff]  ;;  %4503 = vmatpush.msrb.mxu2 %v1178_v57  ;;  %4409 = vmatmul.f32.vlgmr.msra.gmra.mxu1 %v8557_v31 }
 0x58d   : > { %v914_v11 = vld [vmem:[%s5966_s27 + $0x1130] sm:$0xff]  ;;  %4522 = vmatpush.msrb.mxu3 %v1314_v28 }
 0x58e   : > { %v1050_v44 = vld [vmem:[%s5966_s27 + $0x1570] sm:$0xff]  ;;  %4464 = vmatpush.msrb.mxu0 %v914_v11 }
 0x58f   : > { %v1170_v30 = vld [vmem:[%s5966_s27 + $0x1930] sm:$0xff]  ;;  %4483 = vmatpush.msrb.mxu1 %v1050_v44 }
 0x590   : > { %v1306_v25 = vld [vmem:[%s5966_s27 + $0x1d70] sm:$0xff]  ;;  %4504 = vmatpush.msrb.mxu2 %v1170_v30 }
 0x591   : > { %v906_v16 = vld [vmem:[%s5966_s27 + $0x10f0] sm:$0xff]  ;;  %4523 = vmatpush.msrb.mxu3 %v1306_v25 }
 0x592   : > { %v1042_v9 = vld [vmem:[%s5966_s27 + $0x1530] sm:$0xff]  ;;  %4465 = vmatpush.msrb.mxu0 %v906_v16 }
 0x593   : > { %v1162_v59 = vld [vmem:[%s5966_s27 + $0x18f0] sm:$0xff]  ;;  %4484 = vmatpush.msrb.mxu1 %v1042_v9 }
 0x594   : > { %v1298_v36 = vld [vmem:[%s5966_s27 + $0x1d30] sm:$0xff]  ;;  %4505 = vmatpush.msrb.mxu2 %v1162_v59  ;;  %v4230_v56 = vpop.f32.mrf.mxu0 }
 0x595   : > { %v898_v32 = vld [vmem:[%s5966_s27 + $0x10b0] sm:$0xff]  ;;  %4524 = vmatpush.msrb.mxu3 %v1298_v36 }
 0x596   : > { %v1034_v49 = vld [vmem:[%s5966_s27 + $0x14f0] sm:$0xff]  ;;  %4466 = vmatpush.msrb.mxu0 %v898_v32 }
 0x597   : > { %v1154_v42 = vld [vmem:[%s5966_s27 + $0x18b0] sm:$0xff]  ;;  %4485 = vmatpush.msrb.mxu1 %v1034_v49 }
 0x598   : > { %v1290_v5 = vld [vmem:[%s5966_s27 + $0x1cf0] sm:$0xff]  ;;  %4506 = vmatpush.msrb.mxu2 %v1154_v42 }
 0x599   : > { %v890_v60 = vld [vmem:[%s5966_s27 + $0x1070] sm:$0xff]  ;;  %4525 = vmatpush.msrb.mxu3 %v1290_v5 }
 0x59a   : > { %v1026_v62 = vld [vmem:[%s5966_s27 + $0x14b0] sm:$0xff]  ;;  %4467 = vmatpush.msrb.mxu0 %v890_v60 }
 0x59b   : > { %v1146_v13 = vld [vmem:[%s5966_s27 + $0x1870] sm:$0xff]  ;;  %4486 = vmatpush.msrb.mxu1 %v1026_v62 }
 0x59c   : > { %v1282_v14 = vld [vmem:[%s5966_s27 + $0x1cb0] sm:$0xff]  ;;  %4507 = vmatpush.msrb.mxu2 %v1146_v13 }
 0x59d   : > { %v882_v20 = vld [vmem:[%s5966_s27 + $0x1030] sm:$0xff]  ;;  %4526 = vmatpush.msrb.mxu3 %v1282_v14 }
 0x59e   : > { %v1018_v40 = vld [vmem:[%s5966_s27 + $0x1470] sm:$0xff]  ;;  %4468 = vmatpush.msrb.mxu0 %v882_v20 }
 0x59f   : > { %v1138_v43 = vld [vmem:[%s5966_s27 + $0x1830] sm:$0xff]  ;;  %4487 = vmatpush.msrb.mxu1 %v1018_v40  ;;  %4469 = vmatmul.f32.vlgmr.msrb.gmra.mxu0 %v8559_v2 }
 0x5a0   : > { %v1274_v24 = vld [vmem:[%s5966_s27 + $0x1c70] sm:$0xff]  ;;  %4508 = vmatpush.msrb.mxu2 %v1138_v43 }
 0x5a1   : > { %v1514_v52 = vld [vmem:[%s5966_s27 + $0x23f0] sm:$0xff]  ;;  %4527 = vmatpush.msrb.mxu3 %v1274_v24  ;;  %4509 = vmatmul.f32.vlgmr.msrb.gmra.mxu2 %v8558_v63 }
 0x5a2   : > { %v1770_v6 = vld [vmem:[%s5966_s27 + $0x2bf0] sm:$0xff]  ;;  %4533 = vmatpush.msra.mxu0 %v1514_v52 }
 0x5a3   : > { %v1010_v0 = vld [vmem:[%s5966_s27 + $0x1430] sm:$0xff]  ;;  %4573 = vmatpush.msra.mxu2 %v1770_v6 }
 0x5a4   : > { %v1266_v58 = vld [vmem:[%s5966_s27 + $0x1c30] sm:$0xff]  ;;  %4488 = vmatpush.msrb.mxu1 %v1010_v0 }
 0x5a5   : > { %v1506_v21 = vld [vmem:[%s5966_s27 + $0x23b0] sm:$0xff]  ;;  %4528 = vmatpush.msrb.mxu3 %v1266_v58  ;;  %4489 = vmatmul.f32.vlgmr.msrb.gmra.mxu1 %v8561_v7 }
 0x5a6   : > { %v1642_v37 = vld [vmem:[%s5966_s27 + $0x27f0] sm:$0xff]  ;;  %4534 = vmatpush.msra.mxu0 %v1506_v21  ;;  %4529 = vmatmul.f32.vlgmr.msrb.gmra.mxu3 %v8560_v12  ;;  %v4231_v21 = vadd.f32 %v4230_v56, %v7905_v48 }
 0x5a7   : > { %v1762_v1 = vld [vmem:[%s5966_s27 + $0x2bb0] sm:$0xff]  ;;  %4553 = vmatpush.msra.mxu1 %v1642_v37 }
 0x5a8   : > { %v1898_v8 = vld [vmem:[%s5966_s27 + $0x2ff0] sm:$0xff]  ;;  %4574 = vmatpush.msra.mxu2 %v1762_v1 }
 0x5a9   : > { %v1498_v10 = vld [vmem:[%s5966_s27 + $0x2370] sm:$0xff]  ;;  %4593 = vmatpush.msra.mxu3 %v1898_v8 }
 0x5aa   : > { %v1634_v4 = vld [vmem:[%s5966_s27 + $0x27b0] sm:$0xff]  ;;  %4535 = vmatpush.msra.mxu0 %v1498_v10  ;;  %v4250_v10 = vpop.f32.mrf.mxu1 }
 0x5ab   : > { %v1754_v19 = vld [vmem:[%s5966_s27 + $0x2b70] sm:$0xff]  ;;  %4554 = vmatpush.msra.mxu1 %v1634_v4  ;;  %v4251_v17 = vadd.f32 %v4250_v10, %v4231_v21 }
 0x5ac   : > { %v1890_v61 = vld [vmem:[%s5966_s27 + $0x2fb0] sm:$0xff]  ;;  %4575 = vmatpush.msra.mxu2 %v1754_v19 }
 0x5ad   : > { %v1490_v35 = vld [vmem:[%s5966_s27 + $0x2330] sm:$0xff]  ;;  %4594 = vmatpush.msra.mxu3 %v1890_v61 }
 0x5ae   : > { %v1626_v41 = vld [vmem:[%s5966_s27 + $0x2770] sm:$0xff]  ;;  %4536 = vmatpush.msra.mxu0 %v1490_v35 }
 0x5af   : > { %v1746_v38 = vld [vmem:[%s5966_s27 + $0x2b30] sm:$0xff]  ;;  %4555 = vmatpush.msra.mxu1 %v1626_v41  ;;  %v4270_v41 = vpop.f32.mrf.mxu2 }
 0x5b0   : > { %v1882_v29 = vld [vmem:[%s5966_s27 + $0x2f70] sm:$0xff]  ;;  %4576 = vmatpush.msra.mxu2 %v1746_v38 }
 0x5b1   : > { %v1482_v50 = vld [vmem:[%s5966_s27 + $0x22f0] sm:$0xff]  ;;  %4595 = vmatpush.msra.mxu3 %v1882_v29  ;;  %v4271_v29 = vadd.f32 %v4270_v41, %v4251_v17 }
 0x5b2   : > { %v1618_v55 = vld [vmem:[%s5966_s27 + $0x2730] sm:$0xff]  ;;  %4537 = vmatpush.msra.mxu0 %v1482_v50 }
 0x5b3   : > { %v1738_v57 = vld [vmem:[%s5966_s27 + $0x2af0] sm:$0xff]  ;;  %4556 = vmatpush.msra.mxu1 %v1618_v55  ;;  %v4290_v55 = vpop.f32.mrf.mxu3 }
 0x5b4   : > { %v1874_v28 = vld [vmem:[%s5966_s27 + $0x2f30] sm:$0xff]  ;;  %4577 = vmatpush.msra.mxu2 %v1738_v57 }
 0x5b5   : > { %v1474_v11 = vld [vmem:[%s5966_s27 + $0x22b0] sm:$0xff]  ;;  %4596 = vmatpush.msra.mxu3 %v1874_v28 }
 0x5b6   : > { %v1610_v44 = vld [vmem:[%s5966_s27 + $0x26f0] sm:$0xff]  ;;  %4538 = vmatpush.msra.mxu0 %v1474_v11  ;;  %v7964_v11 = vadd.f32 %v4290_v55, %v4271_v29 }
 0x5b7   : > { %v1730_v30 = vld [vmem:[%s5966_s27 + $0x2ab0] sm:$0xff]  ;;  %4557 = vmatpush.msra.mxu1 %v1610_v44  ;;  %v5720_v44 = vld.sshfl [vmem:[#allocation1] sm:$0xff pattern:$0x73625140] }
 0x5b8   : > { %v1866_v25 = vld [vmem:[%s5966_s27 + $0x2ef0] sm:$0xff]  ;;  %4578 = vmatpush.msra.mxu2 %v1730_v30  ;;  %v5721_v30 = vld.sshfl [vmem:[#allocation1 + $0x10] sm:$0xff pattern:$0x73625140] }
 0x5b9   : > { %v1466_v16 = vld [vmem:[%s5966_s27 + $0x2270] sm:$0xff]  ;;  %4597 = vmatpush.msra.mxu3 %v1866_v25 }
 0x5ba   : > { %v1602_v9 = vld [vmem:[%s5966_s27 + $0x26b0] sm:$0xff]  ;;  %4539 = vmatpush.msra.mxu0 %v1466_v16 }
 0x5bb   : > { %v1722_v39 = vld [vmem:[%s5966_s27 + $0x2a70] sm:$0xff]  ;;  %4558 = vmatpush.msra.mxu1 %v1602_v9 }
 0x5bc   : > { %v1858_v59 = vld [vmem:[%s5966_s27 + $0x2eb0] sm:$0xff]  ;;  %4579 = vmatpush.msra.mxu2 %v1722_v39 }
 0x5bd   : > { %v1458_v36 = vld [vmem:[%s5966_s27 + $0x2230] sm:$0xff]  ;;  %4598 = vmatpush.msra.mxu3 %v1858_v59 }
 0x5be   : > { %v1594_v32 = vld [vmem:[%s5966_s27 + $0x2670] sm:$0xff]  ;;  %4540 = vmatpush.msra.mxu0 %v1458_v36  ;;  %v5723_v36 = vld.sshfl [vmem:[#allocation1 + $0x18] sm:$0xff pattern:$0x73625140] }
 0x5bf   : > { %v1714_v49 = vld [vmem:[%s5966_s27 + $0x2a30] sm:$0xff]  ;;  %4559 = vmatpush.msra.mxu1 %v1594_v32 }
 0x5c0   : > { %v1850_v42 = vld [vmem:[%s5966_s27 + $0x2e70] sm:$0xff]  ;;  %4580 = vmatpush.msra.mxu2 %v1714_v49 }
 0x5c1   : > { %v1450_v5 = vld [vmem:[%s5966_s27 + $0x21f0] sm:$0xff]  ;;  %4599 = vmatpush.msra.mxu3 %v1850_v42 }
 0x5c2   : > { %v1586_v26 = vld [vmem:[%s5966_s27 + $0x2630] sm:$0xff]  ;;  %4541 = vmatpush.msra.mxu0 %v1450_v5 }
 0x5c3   : > { %v1706_v60 = vld [vmem:[%s5966_s27 + $0x29f0] sm:$0xff]  ;;  %4560 = vmatpush.msra.mxu1 %v1586_v26 }
 0x5c4   : > { %v1842_v62 = vld [vmem:[%s5966_s27 + $0x2e30] sm:$0xff]  ;;  %4581 = vmatpush.msra.mxu2 %v1706_v60 }
 0x5c5   : > { %v1442_v23 = vld [vmem:[%s5966_s27 + $0x21b0] sm:$0xff]  ;;  %4600 = vmatpush.msra.mxu3 %v1842_v62 }
 0x5c6   : > { %v1578_v51 = vld [vmem:[%s5966_s27 + $0x25f0] sm:$0xff]  ;;  %4542 = vmatpush.msra.mxu0 %v1442_v23 }
 0x5c7   : > { %v1698_v13 = vld [vmem:[%s5966_s27 + $0x29b0] sm:$0xff]  ;;  %4561 = vmatpush.msra.mxu1 %v1578_v51 }
 0x5c8   : > { %v1834_v14 = vld [vmem:[%s5966_s27 + $0x2df0] sm:$0xff]  ;;  %4582 = vmatpush.msra.mxu2 %v1698_v13 }
 0x5c9   : > { %v1434_v20 = vld [vmem:[%s5966_s27 + $0x2170] sm:$0xff]  ;;  %4601 = vmatpush.msra.mxu3 %v1834_v14 }
 0x5ca   : > { %v1570_v18 = vld [vmem:[%s5966_s27 + $0x25b0] sm:$0xff]  ;;  %4543 = vmatpush.msra.mxu0 %v1434_v20 }
 0x5cb   : > { %v1690_v40 = vld [vmem:[%s5966_s27 + $0x2970] sm:$0xff]  ;;  %4562 = vmatpush.msra.mxu1 %v1570_v18 }
 0x5cc   : > { %v1826_v43 = vld [vmem:[%s5966_s27 + $0x2db0] sm:$0xff]  ;;  %4583 = vmatpush.msra.mxu2 %v1690_v40 }
 0x5cd   : > { %v1426_v15 = vld [vmem:[%s5966_s27 + $0x2130] sm:$0xff]  ;;  %4602 = vmatpush.msra.mxu3 %v1826_v43 }
 0x5ce   : > { %v1562_v24 = vld [vmem:[%s5966_s27 + $0x2570] sm:$0xff]  ;;  %4544 = vmatpush.msra.mxu0 %v1426_v15 }
 0x5cf   : > { %v1682_v27 = vld [vmem:[%s5966_s27 + $0x2930] sm:$0xff]  ;;  %4563 = vmatpush.msra.mxu1 %v1562_v24 }
 0x5d0   : > { %v1818_v52 = vld [vmem:[%s5966_s27 + $0x2d70] sm:$0xff]  ;;  %4584 = vmatpush.msra.mxu2 %v1682_v27 }
 0x5d1   : > { %v1418_v6 = vld [vmem:[%s5966_s27 + $0x20f0] sm:$0xff]  ;;  %4603 = vmatpush.msra.mxu3 %v1818_v52 }
 0x5d2   : > { %v1554_v0 = vld [vmem:[%s5966_s27 + $0x2530] sm:$0xff]  ;;  %4545 = vmatpush.msra.mxu0 %v1418_v6 }
 0x5d3   : > { %v1674_v58 = vld [vmem:[%s5966_s27 + $0x28f0] sm:$0xff]  ;;  %4564 = vmatpush.msra.mxu1 %v1554_v0 }
 0x5d4   : > { %v1810_v53 = vld [vmem:[%s5966_s27 + $0x2d30] sm:$0xff]  ;;  %4585 = vmatpush.msra.mxu2 %v1674_v58 }
 0x5d5   : > { %v1410_v37 = vld [vmem:[%s5966_s27 + $0x20b0] sm:$0xff]  ;;  %4604 = vmatpush.msra.mxu3 %v1810_v53 }
 0x5d6   : > { %v1546_v1 = vld [vmem:[%s5966_s27 + $0x24f0] sm:$0xff]  ;;  %4546 = vmatpush.msra.mxu0 %v1410_v37 }
 0x5d7   : > { %v1666_v8 = vld [vmem:[%s5966_s27 + $0x28b0] sm:$0xff]  ;;  %4565 = vmatpush.msra.mxu1 %v1546_v1 }
 0x5d8   : > { %v1802_v22 = vld [vmem:[%s5966_s27 + $0x2cf0] sm:$0xff]  ;;  %4586 = vmatpush.msra.mxu2 %v1666_v8 }
 0x5d9   : > { %v1402_v4 = vld [vmem:[%s5966_s27 + $0x2070] sm:$0xff]  ;;  %4605 = vmatpush.msra.mxu3 %v1802_v22 }
 0x5da   : > { %v1538_v3 = vld [vmem:[%s5966_s27 + $0x24b0] sm:$0xff]  ;;  %4547 = vmatpush.msra.mxu0 %v1402_v4 }
 0x5db   : > { %v1658_v19 = vld [vmem:[%s5966_s27 + $0x2870] sm:$0xff]  ;;  %4566 = vmatpush.msra.mxu1 %v1538_v3 }
 0x5dc   : > { %v1794_v61 = vld [vmem:[%s5966_s27 + $0x2cb0] sm:$0xff]  ;;  %4587 = vmatpush.msra.mxu2 %v1658_v19 }
 0x5dd   : > { %v1394_v35 = vld [vmem:[%s5966_s27 + $0x2030] sm:$0xff]  ;;  %4606 = vmatpush.msra.mxu3 %v1794_v61 }
 0x5de   : > { %v1530_v33 = vld [vmem:[%s5966_s27 + $0x2470] sm:$0xff]  ;;  %4548 = vmatpush.msra.mxu0 %v1394_v35 }
 0x5df   : > { %v1650_v38 = vld [vmem:[%s5966_s27 + $0x2830] sm:$0xff]  ;;  %4567 = vmatpush.msra.mxu1 %v1530_v33  ;;  %4549 = vmatmul.f32.vlgmr.msra.gmra.mxu0 %v5720_v44 }
 0x5e0   : > { %v1786_v34 = vld [vmem:[%s5966_s27 + $0x2c70] sm:$0xff]  ;;  %4588 = vmatpush.msra.mxu2 %v1650_v38 }
 0x5e1   : > { %v2026_v48 = vld [vmem:[%s5966_s27 + $0x33f0] sm:$0xff]  ;;  %4607 = vmatpush.msra.mxu3 %v1786_v34  ;;  %4589 = vmatmul.f32.vlgmr.msra.gmra.mxu2 %v5721_v30 }
 0x5e2   : > { %v2282_v50 = vld [vmem:[%s5966_s27 + $0x3bf0] sm:$0xff]  ;;  %4613 = vmatpush.msrb.mxu0 %v2026_v48 }
 0x5e3   : > { %v1522_v57 = vld [vmem:[%s5966_s27 + $0x2430] sm:$0xff]  ;;  %4653 = vmatpush.msrb.mxu2 %v2282_v50  ;;  %v4310_v50 = vpop.f32.mrf.mxu0 }
 0x5e4   : > { %v1778_v28 = vld [vmem:[%s5966_s27 + $0x2c30] sm:$0xff]  ;;  %4568 = vmatpush.msra.mxu1 %v1522_v57 }
 0x5e5   : > { %v2018_v25 = vld [vmem:[%s5966_s27 + $0x33b0] sm:$0xff]  ;;  %4608 = vmatpush.msra.mxu3 %v1778_v28  ;;  %v4311_v28 = vadd.f32 %v4310_v50, %v7964_v11  ;;  %v435_v50 = vld [vmem:[%s5966_s27 + $0x238] sm:$0xff] }
 0x5e6   : > { %v2154_v16 = vld [vmem:[%s5966_s27 + $0x37f0] sm:$0xff]  ;;  %4609 = vmatmul.f32.vlgmr.msra.gmra.mxu3 %v5723_v36  ;;  %4614 = vmatpush.msrb.mxu0 %v2018_v25 }
 0x5e7   : > { %v2274_v9 = vld [vmem:[%s5966_s27 + $0x3bb0] sm:$0xff]  ;;  %4633 = vmatpush.msrb.mxu1 %v2154_v16 }
 0x5e8   : > { %v2410_v39 = vld [vmem:[%s5966_s27 + $0x3ff0] sm:$0xff]  ;;  %4654 = vmatpush.msrb.mxu2 %v2274_v9  ;;  %v4330_v9 = vpop.f32.mrf.mxu1 }
 0x5e9   : > { %v5722_v59 = vld.sshfl [vmem:[#allocation1 + $0x8] sm:$0xff pattern:$0x73625140]  ;;  %4673 = vmatpush.msrb.mxu3 %v2410_v39  ;;  %v4331_v11 = vadd.f32 %v4330_v9, %v4311_v28  ;;  %v827_v28 = vld [vmem:[%s5966_s27 + $0xe78] sm:$0xff] }
 0x5ea   : > { %4569 = vmatmul.f32.vlgmr.msra.gmra.mxu1 %v5722_v59  ;;  %v2010_v32 = vld [vmem:[%s5966_s27 + $0x3370] sm:$0xff]  ;;  %v419_v9 = vld [vmem:[%s5966_s27 + $0x1b8] sm:$0xff] }
 0x5eb   : > { %v2146_v49 = vld [vmem:[%s5966_s27 + $0x37b0] sm:$0xff]  ;;  %4615 = vmatpush.msrb.mxu0 %v2010_v32 }
 0x5ec   : > { %v2266_v42 = vld [vmem:[%s5966_s27 + $0x3b70] sm:$0xff]  ;;  %4634 = vmatpush.msrb.mxu1 %v2146_v49 }
 0x5ed   : > { %v2402_v5 = vld [vmem:[%s5966_s27 + $0x3fb0] sm:$0xff]  ;;  %4655 = vmatpush.msrb.mxu2 %v2266_v42 }
 0x5ee   : > { %v2002_v26 = vld [vmem:[%s5966_s27 + $0x3330] sm:$0xff]  ;;  %4674 = vmatpush.msrb.mxu3 %v2402_v5  ;;  %v4350_v5 = vpop.f32.mrf.mxu2 }
 0x5ef   : > { %v2138_v60 = vld [vmem:[%s5966_s27 + $0x3770] sm:$0xff]  ;;  %4616 = vmatpush.msrb.mxu0 %v2002_v26 }
 0x5f0   : > { %v2258_v62 = vld [vmem:[%s5966_s27 + $0x3b30] sm:$0xff]  ;;  %4635 = vmatpush.msrb.mxu1 %v2138_v60 }
 0x5f1   : > { %v2394_v23 = vld [vmem:[%s5966_s27 + $0x3f70] sm:$0xff]  ;;  %4656 = vmatpush.msrb.mxu2 %v2258_v62  ;;  %v4351_v62 = vadd.f32 %v4350_v5, %v4331_v11  ;;  %v811_v11 = vld [vmem:[%s5966_s27 + $0xdf8] sm:$0xff] }
 0x5f2   : > { %v1994_v51 = vld [vmem:[%s5966_s27 + $0x32f0] sm:$0xff]  ;;  %4675 = vmatpush.msrb.mxu3 %v2394_v23  ;;  %v491_v23 = vld [vmem:[%s5966_s27 + $0x3f8] sm:$0xff] }
 0x5f3   : > { %v2130_v13 = vld [vmem:[%s5966_s27 + $0x3730] sm:$0xff]  ;;  %4617 = vmatpush.msrb.mxu0 %v1994_v51  ;;  %v747_v51 = vld [vmem:[%s5966_s27 + $0xbf8] sm:$0xff] }
 0x5f4   : > { %v2250_v14 = vld [vmem:[%s5966_s27 + $0x3af0] sm:$0xff]  ;;  %4636 = vmatpush.msrb.mxu1 %v2130_v13  ;;  %v4370_v13 = vpop.f32.mrf.mxu3  ;;  %v403_v5 = vld [vmem:[%s5966_s27 + $0x138] sm:$0xff] }
 0x5f5   : > { %v2386_v20 = vld [vmem:[%s5966_s27 + $0x3f30] sm:$0xff]  ;;  %4657 = vmatpush.msrb.mxu2 %v2250_v14 }
 0x5f6   : > { %v1986_v18 = vld [vmem:[%s5966_s27 + $0x32b0] sm:$0xff]  ;;  %4676 = vmatpush.msrb.mxu3 %v2386_v20 }
 0x5f7   : > { %v2122_v40 = vld [vmem:[%s5966_s27 + $0x36f0] sm:$0xff]  ;;  %4618 = vmatpush.msrb.mxu0 %v1986_v18  ;;  %v4371_v18 = vadd.f32 %v4370_v13, %v4351_v62  ;;  %v795_v62 = vld [vmem:[%s5966_s27 + $0xd78] sm:$0xff] }
 0x5f8   : > { %v2242_v43 = vld [vmem:[%s5966_s27 + $0x3ab0] sm:$0xff]  ;;  %4637 = vmatpush.msrb.mxu1 %v2122_v40  ;;  %v5724_v40 = vld.sshfl [vmem:[#allocation1 + $0x20] sm:$0xff pattern:$0x73625140]  ;;  %v651_v13 = vld [vmem:[%s5966_s27 + $0x8f8] sm:$0xff] }
 0x5f9   : > { %v2378_v15 = vld [vmem:[%s5966_s27 + $0x3ef0] sm:$0xff]  ;;  %4658 = vmatpush.msrb.mxu2 %v2242_v43  ;;  %v5725_v43 = vld.sshfl [vmem:[#allocation1 + $0x30] sm:$0xff pattern:$0x73625140] }
 0x5fa   : > { %v1978_v24 = vld [vmem:[%s5966_s27 + $0x3270] sm:$0xff]  ;;  %4677 = vmatpush.msrb.mxu3 %v2378_v15  ;;  %v483_v15 = vld [vmem:[%s5966_s27 + $0x3b8] sm:$0xff] }
 0x5fb   : > { %v2114_v27 = vld [vmem:[%s5966_s27 + $0x36b0] sm:$0xff]  ;;  %4619 = vmatpush.msrb.mxu0 %v1978_v24  ;;  %v619_v24 = vld [vmem:[%s5966_s27 + $0x7f8] sm:$0xff] }
 0x5fc   : > { %v2234_v52 = vld [vmem:[%s5966_s27 + $0x3a70] sm:$0xff]  ;;  %4638 = vmatpush.msrb.mxu1 %v2114_v27  ;;  %v5024_v27 = vrot.slane %v4371_v18, 6  ;;  %v523_v18 = vld [vmem:[%s5966_s27 + $0x4f8] sm:$0xff] }
 0x5fd   : > { %v2370_v6 = vld [vmem:[%s5966_s27 + $0x3eb0] sm:$0xff]  ;;  %4659 = vmatpush.msrb.mxu2 %v2234_v52  ;;  %v739_v52 = vld [vmem:[%s5966_s27 + $0xbb8] sm:$0xff] }
 0x5fe   : > { %v1970_v0 = vld [vmem:[%s5966_s27 + $0x3230] sm:$0xff]  ;;  %4678 = vmatpush.msrb.mxu3 %v2370_v6  ;;  %v875_v6 = vld [vmem:[%s5966_s27 + $0xff8] sm:$0xff] }
 0x5ff   : > { %v2106_v56 = vld [vmem:[%s5966_s27 + $0x3670] sm:$0xff]  ;;  %4620 = vmatpush.msrb.mxu0 %v1970_v0 }
 0x600   : > { %v2226_v58 = vld [vmem:[%s5966_s27 + $0x3a30] sm:$0xff]  ;;  %4639 = vmatpush.msrb.mxu1 %v2106_v56  ;;  %v5727_v56 = vld.sshfl [vmem:[#allocation1 + $0x38] sm:$0xff pattern:$0x73625140] }
 0x601   : > { %v2362_v53 = vld [vmem:[%s5966_s27 + $0x3e70] sm:$0xff]  ;;  %4660 = vmatpush.msrb.mxu2 %v2226_v58  ;;  %v475_v58 = vld [vmem:[%s5966_s27 + $0x378] sm:$0xff] }
 0x602   : > { %v1962_v21 = vld [vmem:[%s5966_s27 + $0x31f0] sm:$0xff]  ;;  %4679 = vmatpush.msrb.mxu3 %v2362_v53  ;;  %v611_v53 = vld [vmem:[%s5966_s27 + $0x7b8] sm:$0xff] }
 0x603   : > { %v2098_v37 = vld [vmem:[%s5966_s27 + $0x3630] sm:$0xff]  ;;  %4621 = vmatpush.msrb.mxu0 %v1962_v21  ;;  %v8039_v21 = vsel %vm5027_vm0, %v7759_v54, %v5024_v27  ;;  %v459_v54 = vld [vmem:[%s5966_s27 + $0x2f8] sm:$0xff] }
 0x604   : > { %v2218_v1 = vld [vmem:[%s5966_s27 + $0x39f0] sm:$0xff]  ;;  %4640 = vmatpush.msrb.mxu1 %v2098_v37  ;;  %v731_v37 = vld [vmem:[%s5966_s27 + $0xb78] sm:$0xff] }
 0x605   : > { %v2354_v8 = vld [vmem:[%s5966_s27 + $0x3e30] sm:$0xff]  ;;  %4661 = vmatpush.msrb.mxu2 %v2218_v1  ;;  %v867_v1 = vld [vmem:[%s5966_s27 + $0xfb8] sm:$0xff] }
 0x606   : > { %v1954_v22 = vld [vmem:[%s5966_s27 + $0x31b0] sm:$0xff]  ;;  %4680 = vmatpush.msrb.mxu3 %v2354_v8  ;;  %v467_v8 = vld [vmem:[%s5966_s27 + $0x338] sm:$0xff] }
 0x607   : > { %v2090_v10 = vld [vmem:[%s5966_s27 + $0x35f0] sm:$0xff]  ;;  %4622 = vmatpush.msrb.mxu0 %v1954_v22  ;;  %v603_v22 = vld [vmem:[%s5966_s27 + $0x778] sm:$0xff] }
 0x608   : > { %v2210_v4 = vld [vmem:[%s5966_s27 + $0x39b0] sm:$0xff]  ;;  %4641 = vmatpush.msrb.mxu1 %v2090_v10  ;;  %v723_v10 = vld [vmem:[%s5966_s27 + $0xb38] sm:$0xff] }
 0x609   : > { %v2346_v3 = vld [vmem:[%s5966_s27 + $0x3df0] sm:$0xff]  ;;  %4662 = vmatpush.msrb.mxu2 %v2210_v4  ;;  %v859_v4 = vld [vmem:[%s5966_s27 + $0xf78] sm:$0xff] }
 0x60a   : > { %v1946_v17 = vld [vmem:[%s5966_s27 + $0x3170] sm:$0xff]  ;;  %4681 = vmatpush.msrb.mxu3 %v2346_v3  ;;  %v595_v3 = vld [vmem:[%s5966_s27 + $0x738] sm:$0xff] }
 0x60b   : > { %v2082_v19 = vld [vmem:[%s5966_s27 + $0x35b0] sm:$0xff]  ;;  %4623 = vmatpush.msrb.mxu0 %v1946_v17  ;;  %v715_v17 = vld [vmem:[%s5966_s27 + $0xaf8] sm:$0xff] }
 0x60c   : > { %v2202_v61 = vld [vmem:[%s5966_s27 + $0x3970] sm:$0xff]  ;;  %4642 = vmatpush.msrb.mxu1 %v2082_v19  ;;  %v851_v19 = vld [vmem:[%s5966_s27 + $0xf38] sm:$0xff] }
 0x60d   : > { %v2338_v35 = vld [vmem:[%s5966_s27 + $0x3db0] sm:$0xff]  ;;  %4663 = vmatpush.msrb.mxu2 %v2202_v61  ;;  %v451_v61 = vld [vmem:[%s5966_s27 + $0x2b8] sm:$0xff] }
 0x60e   : > { %v1938_v33 = vld [vmem:[%s5966_s27 + $0x3130] sm:$0xff]  ;;  %4682 = vmatpush.msrb.mxu3 %v2338_v35  ;;  %v587_v35 = vld [vmem:[%s5966_s27 + $0x6f8] sm:$0xff] }
 0x60f   : > { %v2074_v41 = vld [vmem:[%s5966_s27 + $0x3570] sm:$0xff]  ;;  %4624 = vmatpush.msrb.mxu0 %v1938_v33  ;;  %v707_v33 = vld [vmem:[%s5966_s27 + $0xab8] sm:$0xff] }
 0x610   : > { %v2194_v38 = vld [vmem:[%s5966_s27 + $0x3930] sm:$0xff]  ;;  %4643 = vmatpush.msrb.mxu1 %v2074_v41  ;;  %v843_v41 = vld [vmem:[%s5966_s27 + $0xef8] sm:$0xff] }
 0x611   : > { %v2330_v34 = vld [vmem:[%s5966_s27 + $0x3d70] sm:$0xff]  ;;  %4664 = vmatpush.msrb.mxu2 %v2194_v38  ;;  %v443_v38 = vld [vmem:[%s5966_s27 + $0x278] sm:$0xff] }
 0x612   : > { %v1930_v29 = vld [vmem:[%s5966_s27 + $0x30f0] sm:$0xff]  ;;  %4683 = vmatpush.msrb.mxu3 %v2330_v34  ;;  %v579_v34 = vld [vmem:[%s5966_s27 + $0x6b8] sm:$0xff] }
 0x613   : > { %v2066_v48 = vld [vmem:[%s5966_s27 + $0x3530] sm:$0xff]  ;;  %4625 = vmatpush.msrb.mxu0 %v1930_v29  ;;  %v699_v29 = vld [vmem:[%s5966_s27 + $0xa78] sm:$0xff] }
 0x614   : > { %v2186_v55 = vld [vmem:[%s5966_s27 + $0x38f0] sm:$0xff]  ;;  %4644 = vmatpush.msrb.mxu1 %v2066_v48  ;;  %v835_v48 = vld [vmem:[%s5966_s27 + $0xeb8] sm:$0xff] }
 0x615   : > { %v2322_v57 = vld [vmem:[%s5966_s27 + $0x3d30] sm:$0xff]  ;;  %4665 = vmatpush.msrb.mxu2 %v2186_v55  ;;  %v571_v55 = vld [vmem:[%s5966_s27 + $0x678] sm:$0xff] }
 0x616   : > { %v1922_v44 = vld [vmem:[%s5966_s27 + $0x30b0] sm:$0xff]  ;;  %4684 = vmatpush.msrb.mxu3 %v2322_v57  ;;  %v691_v57 = vld [vmem:[%s5966_s27 + $0xa38] sm:$0xff] }
 0x617   : > { %v2058_v30 = vld [vmem:[%s5966_s27 + $0x34f0] sm:$0xff]  ;;  %4626 = vmatpush.msrb.mxu0 %v1922_v44  ;;  %v427_v44 = vld [vmem:[%s5966_s27 + $0x1f8] sm:$0xff] }
 0x618   : > { %v2178_v25 = vld [vmem:[%s5966_s27 + $0x38b0] sm:$0xff]  ;;  %4645 = vmatpush.msrb.mxu1 %v2058_v30  ;;  %v563_v30 = vld [vmem:[%s5966_s27 + $0x638] sm:$0xff] }
 0x619   : > { %v2314_v16 = vld [vmem:[%s5966_s27 + $0x3cf0] sm:$0xff]  ;;  %4666 = vmatpush.msrb.mxu2 %v2178_v25  ;;  %v683_v25 = vld [vmem:[%s5966_s27 + $0x9f8] sm:$0xff] }
 0x61a   : > { %v1914_v39 = vld [vmem:[%s5966_s27 + $0x3070] sm:$0xff]  ;;  %4685 = vmatpush.msrb.mxu3 %v2314_v16  ;;  %v819_v16 = vld [vmem:[%s5966_s27 + $0xe38] sm:$0xff] }
 0x61b   : > { %v2050_v59 = vld [vmem:[%s5966_s27 + $0x34b0] sm:$0xff]  ;;  %4627 = vmatpush.msrb.mxu0 %v1914_v39  ;;  %v555_v39 = vld [vmem:[%s5966_s27 + $0x5f8] sm:$0xff] }
 0x61c   : > { %v2170_v36 = vld [vmem:[%s5966_s27 + $0x3870] sm:$0xff]  ;;  %4646 = vmatpush.msrb.mxu1 %v2050_v59  ;;  %v675_v59 = vld [vmem:[%s5966_s27 + $0x9b8] sm:$0xff] }
 0x61d   : > { %v2306_v32 = vld [vmem:[%s5966_s27 + $0x3cb0] sm:$0xff]  ;;  %4667 = vmatpush.msrb.mxu2 %v2170_v36  ;;  %v411_v36 = vld [vmem:[%s5966_s27 + $0x178] sm:$0xff] }
 0x61e   : > { %v1906_v49 = vld [vmem:[%s5966_s27 + $0x3030] sm:$0xff]  ;;  %4686 = vmatpush.msrb.mxu3 %v2306_v32  ;;  %v547_v32 = vld [vmem:[%s5966_s27 + $0x5b8] sm:$0xff] }
 0x61f   : > { %v2042_v42 = vld [vmem:[%s5966_s27 + $0x3470] sm:$0xff]  ;;  %4628 = vmatpush.msrb.mxu0 %v1906_v49  ;;  %v667_v49 = vld [vmem:[%s5966_s27 + $0x978] sm:$0xff] }
 0x620   : > { %v2162_v26 = vld [vmem:[%s5966_s27 + $0x3830] sm:$0xff]  ;;  %4647 = vmatpush.msrb.mxu1 %v2042_v42  ;;  %4629 = vmatmul.f32.vlgmr.msrb.gmra.mxu0 %v5724_v40  ;;  %v803_v42 = vld [vmem:[%s5966_s27 + $0xdb8] sm:$0xff] }
 0x621   : > { %v2298_v60 = vld [vmem:[%s5966_s27 + $0x3c70] sm:$0xff]  ;;  %4668 = vmatpush.msrb.mxu2 %v2162_v26  ;;  %4693 = vmatpush.msra.mxu0 %v491_v23  ;;  %v539_v26 = vld [vmem:[%s5966_s27 + $0x578] sm:$0xff] }
 0x622   : > { %4687 = vmatpush.msrb.mxu3 %v2298_v60  ;;  %v2034_v14 = vld [vmem:[%s5966_s27 + $0x3430] sm:$0xff]  ;;  %4669 = vmatmul.f32.vlgmr.msrb.gmra.mxu2 %v5725_v43  ;;  %v659_v60 = vld [vmem:[%s5966_s27 + $0x938] sm:$0xff] }
 0x623   : > { %v2290_v20 = vld [vmem:[%s5966_s27 + $0x3c30] sm:$0xff]  ;;  %4733 = vmatpush.msra.mxu2 %v747_v51  ;;  %4648 = vmatpush.msrb.mxu1 %v2034_v14  ;;  %v395_v23 = vld [vmem:[%s5966_s27 + $0xf8] sm:$0xff] }
 0x624   : > { %4688 = vmatpush.msrb.mxu3 %v2290_v20  ;;  %v5726_v0 = vld.sshfl [vmem:[#allocation1 + $0x28] sm:$0xff pattern:$0x73625140]  ;;  %4694 = vmatpush.msra.mxu0 %v483_v15  ;;  %v531_v51 = vld [vmem:[%s5966_s27 + $0x538] sm:$0xff] }
 0x625   : > { %4649 = vmatmul.f32.vlgmr.msrb.gmra.mxu1 %v5726_v0  ;;  %4689 = vmatmul.f32.vlgmr.msrb.gmra.mxu3 %v5727_v56  ;;  %v787_v14 = vld [vmem:[%s5966_s27 + $0xd38] sm:$0xff] }
 0x626   : > { %4713 = vmatpush.msra.mxu1 %v619_v24  ;;  %4734 = vmatpush.msra.mxu2 %v739_v52  ;;  %v387_v20 = vld [vmem:[%s5966_s27 + $0xb8] sm:$0xff] }
 0x627   : > { %4753 = vmatpush.msra.mxu3 %v875_v6  ;;  %4695 = vmatpush.msra.mxu0 %v475_v58  ;;  %v643_v40 = vld [vmem:[%s5966_s27 + $0x8b8] sm:$0xff] }
 0x628   : > { %4714 = vmatpush.msra.mxu1 %v611_v53  ;;  %4735 = vmatpush.msra.mxu2 %v731_v37  ;;  %v779_v43 = vld [vmem:[%s5966_s27 + $0xcf8] sm:$0xff] }
 0x629   : > { %4754 = vmatpush.msra.mxu3 %v867_v1  ;;  %4696 = vmatpush.msra.mxu0 %v467_v8  ;;  %v379_v15 = vld [vmem:[%s5966_s27 + $0x78] sm:$0xff] }
 0x62a   : > { %4715 = vmatpush.msra.mxu1 %v603_v22  ;;  %4736 = vmatpush.msra.mxu2 %v723_v10  ;;  %v515_v24 = vld [vmem:[%s5966_s27 + $0x4b8] sm:$0xff] }
 0x62b   : > { %4755 = vmatpush.msra.mxu3 %v859_v4  ;;  %4697 = vmatpush.msra.mxu0 %v459_v54  ;;  %v635_v27 = vld [vmem:[%s5966_s27 + $0x878] sm:$0xff] }
 0x62c   : > { %4716 = vmatpush.msra.mxu1 %v595_v3  ;;  %4737 = vmatpush.msra.mxu2 %v715_v17  ;;  %v771_v52 = vld [vmem:[%s5966_s27 + $0xcb8] sm:$0xff] }
 0x62d   : > { %4756 = vmatpush.msra.mxu3 %v851_v19  ;;  %4698 = vmatpush.msra.mxu0 %v451_v61  ;;  %v371_v6 = vld [vmem:[%s5966_s27 + $0x38] sm:$0xff] }
 0x62e   : > { %4717 = vmatpush.msra.mxu1 %v587_v35  ;;  %4738 = vmatpush.msra.mxu2 %v707_v33  ;;  %v507_v0 = vld [vmem:[%s5966_s27 + $0x478] sm:$0xff] }
 0x62f   : > { %4757 = vmatpush.msra.mxu3 %v843_v41  ;;  %4699 = vmatpush.msra.mxu0 %v443_v38  ;;  %v627_v56 = vld [vmem:[%s5966_s27 + $0x838] sm:$0xff] }
 0x630   : > { %4718 = vmatpush.msra.mxu1 %v579_v34  ;;  %4739 = vmatpush.msra.mxu2 %v699_v29  ;;  %v763_v58 = vld [vmem:[%s5966_s27 + $0xc78] sm:$0xff] }
 0x631   : > { %4758 = vmatpush.msra.mxu3 %v835_v48  ;;  %4700 = vmatpush.msra.mxu0 %v435_v50  ;;  %v1003_v53 = vld [vmem:[%s5966_s27 + $0x13f8] sm:$0xff] }
 0x632   : > { %4719 = vmatpush.msra.mxu1 %v571_v55  ;;  %4740 = vmatpush.msra.mxu2 %v691_v57  ;;  %v1259_v37 = vld [vmem:[%s5966_s27 + $0x1bf8] sm:$0xff] }
 0x633   : > { %4759 = vmatpush.msra.mxu3 %v827_v28  ;;  %4701 = vmatpush.msra.mxu0 %v427_v44  ;;  %v499_v1 = vld [vmem:[%s5966_s27 + $0x438] sm:$0xff] }
 0x634   : > { %4720 = vmatpush.msra.mxu1 %v563_v30  ;;  %4741 = vmatpush.msra.mxu2 %v683_v25  ;;  %v755_v8 = vld [vmem:[%s5966_s27 + $0xc38] sm:$0xff] }
 0x635   : > { %4760 = vmatpush.msra.mxu3 %v819_v16  ;;  %4702 = vmatpush.msra.mxu0 %v419_v9  ;;  %v995_v22 = vld [vmem:[%s5966_s27 + $0x13b8] sm:$0xff] }
 0x636   : > { %4721 = vmatpush.msra.mxu1 %v555_v39  ;;  %4742 = vmatpush.msra.mxu2 %v675_v59  ;;  %v1131_v10 = vld [vmem:[%s5966_s27 + $0x17f8] sm:$0xff] }
 0x637   : > { %4761 = vmatpush.msra.mxu3 %v811_v11  ;;  %4703 = vmatpush.msra.mxu0 %v411_v36  ;;  %v1251_v4 = vld [vmem:[%s5966_s27 + $0x1bb8] sm:$0xff] }
 0x638   : > { %4722 = vmatpush.msra.mxu1 %v547_v32  ;;  %4743 = vmatpush.msra.mxu2 %v667_v49  ;;  %v1387_v54 = vld [vmem:[%s5966_s27 + $0x1ff8] sm:$0xff] }
 0x639   : > { %4762 = vmatpush.msra.mxu3 %v803_v42  ;;  %4704 = vmatpush.msra.mxu0 %v403_v5  ;;  %v987_v3 = vld [vmem:[%s5966_s27 + $0x1378] sm:$0xff] }
 0x63a   : > { %4723 = vmatpush.msra.mxu1 %v539_v26  ;;  %4744 = vmatpush.msra.mxu2 %v659_v60  ;;  %v1123_v17 = vld [vmem:[%s5966_s27 + $0x17b8] sm:$0xff] }
 0x63b   : > { %4763 = vmatpush.msra.mxu3 %v795_v62  ;;  %4705 = vmatpush.msra.mxu0 %v395_v23  ;;  %v1243_v19 = vld [vmem:[%s5966_s27 + $0x1b78] sm:$0xff] }
 0x63c   : > { %4724 = vmatpush.msra.mxu1 %v531_v51  ;;  %4745 = vmatpush.msra.mxu2 %v651_v13  ;;  %v1379_v61 = vld [vmem:[%s5966_s27 + $0x1fb8] sm:$0xff] }
 0x63d   : > { %4764 = vmatpush.msra.mxu3 %v787_v14  ;;  %4706 = vmatpush.msra.mxu0 %v387_v20  ;;  %v979_v35 = vld [vmem:[%s5966_s27 + $0x1338] sm:$0xff] }
 0x63e   : > { %4725 = vmatpush.msra.mxu1 %v523_v18  ;;  %4746 = vmatpush.msra.mxu2 %v643_v40  ;;  %v1115_v33 = vld [vmem:[%s5966_s27 + $0x1778] sm:$0xff] }
 0x63f   : > { %4765 = vmatpush.msra.mxu3 %v779_v43  ;;  %4707 = vmatpush.msra.mxu0 %v379_v15  ;;  %v1235_v41 = vld [vmem:[%s5966_s27 + $0x1b38] sm:$0xff] }
 0x640   : > { %4726 = vmatpush.msra.mxu1 %v515_v24  ;;  %4747 = vmatpush.msra.mxu2 %v635_v27  ;;  %v1371_v38 = vld [vmem:[%s5966_s27 + $0x1f78] sm:$0xff] }
 0x641   : > { %4766 = vmatpush.msra.mxu3 %v771_v52  ;;  %4708 = vmatpush.msra.mxu0 %v371_v6  ;;  %v971_v34 = vld [vmem:[%s5966_s27 + $0x12f8] sm:$0xff] }
 0x642   : > { %4727 = vmatpush.msra.mxu1 %v507_v0  ;;  %4748 = vmatpush.msra.mxu2 %v627_v56  ;;  %v1107_v29 = vld [vmem:[%s5966_s27 + $0x1738] sm:$0xff] }
 0x643   : > { %4767 = vmatpush.msra.mxu3 %v763_v58  ;;  %4773 = vmatpush.msrb.mxu0 %v1003_v53  ;;  %v1227_v48 = vld [vmem:[%s5966_s27 + $0x1af8] sm:$0xff] }
 0x644   : > { %4813 = vmatpush.msrb.mxu2 %v1259_v37  ;;  %4728 = vmatpush.msra.mxu1 %v499_v1  ;;  %v1363_v50 = vld [vmem:[%s5966_s27 + $0x1f38] sm:$0xff] }
 0x645   : > { %4768 = vmatpush.msra.mxu3 %v755_v8  ;;  %4774 = vmatpush.msrb.mxu0 %v995_v22  ;;  %v963_v55 = vld [vmem:[%s5966_s27 + $0x12b8] sm:$0xff] }
 0x646   : > { %4793 = vmatpush.msrb.mxu1 %v1131_v10  ;;  %4814 = vmatpush.msrb.mxu2 %v1251_v4  ;;  %v1099_v57 = vld [vmem:[%s5966_s27 + $0x16f8] sm:$0xff] }
 0x647   : > { %4833 = vmatpush.msrb.mxu3 %v1387_v54  ;;  %4775 = vmatpush.msrb.mxu0 %v987_v3  ;;  %v1219_v28 = vld [vmem:[%s5966_s27 + $0x1ab8] sm:$0xff] }
 0x648   : > { %4794 = vmatpush.msrb.mxu1 %v1123_v17  ;;  %4815 = vmatpush.msrb.mxu2 %v1243_v19  ;;  %v1355_v44 = vld [vmem:[%s5966_s27 + $0x1ef8] sm:$0xff] }
 0x649   : > { %4834 = vmatpush.msrb.mxu3 %v1379_v61  ;;  %4776 = vmatpush.msrb.mxu0 %v979_v35  ;;  %v955_v30 = vld [vmem:[%s5966_s27 + $0x1278] sm:$0xff] }
 0x64a   : > { %4795 = vmatpush.msrb.mxu1 %v1115_v33  ;;  %4816 = vmatpush.msrb.mxu2 %v1235_v41  ;;  %v1091_v25 = vld [vmem:[%s5966_s27 + $0x16b8] sm:$0xff] }
 0x64b   : > { %4835 = vmatpush.msrb.mxu3 %v1371_v38  ;;  %4777 = vmatpush.msrb.mxu0 %v971_v34  ;;  %v1211_v16 = vld [vmem:[%s5966_s27 + $0x1a78] sm:$0xff] }
 0x64c   : > { %4796 = vmatpush.msrb.mxu1 %v1107_v29  ;;  %4817 = vmatpush.msrb.mxu2 %v1227_v48  ;;  %v1347_v9 = vld [vmem:[%s5966_s27 + $0x1eb8] sm:$0xff] }
 0x64d   : > { %4836 = vmatpush.msrb.mxu3 %v1363_v50  ;;  %4778 = vmatpush.msrb.mxu0 %v963_v55  ;;  %v947_v39 = vld [vmem:[%s5966_s27 + $0x1238] sm:$0xff] }
 0x64e   : > { %4797 = vmatpush.msrb.mxu1 %v1099_v57  ;;  %4818 = vmatpush.msrb.mxu2 %v1219_v28  ;;  %v1083_v59 = vld [vmem:[%s5966_s27 + $0x1678] sm:$0xff] }
 0x64f   : > { %4837 = vmatpush.msrb.mxu3 %v1355_v44  ;;  %4779 = vmatpush.msrb.mxu0 %v955_v30  ;;  %v1203_v11 = vld [vmem:[%s5966_s27 + $0x1a38] sm:$0xff] }
 0x650   : > { %4798 = vmatpush.msrb.mxu1 %v1091_v25  ;;  %v1339_v36 = vld [vmem:[%s5966_s27 + $0x1e78] sm:$0xff]  ;;  %4819 = vmatpush.msrb.mxu2 %v1211_v16 }
 0x651   : > { %4838 = vmatpush.msrb.mxu3 %v1347_v9  ;;  %v939_v32 = vld [vmem:[%s5966_s27 + $0x11f8] sm:$0xff]  ;;  %4780 = vmatpush.msrb.mxu0 %v947_v39 }
 0x652   : > { %v1075_v49 = vld [vmem:[%s5966_s27 + $0x1638] sm:$0xff]  ;;  %4799 = vmatpush.msrb.mxu1 %v1083_v59  ;;  %4820 = vmatpush.msrb.mxu2 %v1203_v11 }
 0x653   : > { %v1195_v42 = vld [vmem:[%s5966_s27 + $0x19f8] sm:$0xff]  ;;  %4839 = vmatpush.msrb.mxu3 %v1339_v36  ;;  %4781 = vmatpush.msrb.mxu0 %v939_v32 }
 0x654   : > { %v1331_v5 = vld [vmem:[%s5966_s27 + $0x1e38] sm:$0xff]  ;;  %4800 = vmatpush.msrb.mxu1 %v1075_v49  ;;  %4821 = vmatpush.msrb.mxu2 %v1195_v42 }
 0x655   : > { %v931_v26 = vld [vmem:[%s5966_s27 + $0x11b8] sm:$0xff]  ;;  %4840 = vmatpush.msrb.mxu3 %v1331_v5  ;;  %4749 = vmatmul.f32.vlgmr.msra.gmra.mxu2 %v6108_v45 }
 0x656   : > { %v1067_v60 = vld [vmem:[%s5966_s27 + $0x15f8] sm:$0xff]  ;;  %4782 = vmatpush.msrb.mxu0 %v931_v26  ;;  %4769 = vmatmul.f32.vlgmr.msra.gmra.mxu3 %v6112_v47 }
 0x657   : > { %v1187_v62 = vld [vmem:[%s5966_s27 + $0x19b8] sm:$0xff]  ;;  %4801 = vmatpush.msrb.mxu1 %v1067_v60  ;;  %4709 = vmatmul.f32.vlgmr.msra.gmra.mxu0 %v6110_v46 }
 0x658   : > { %v1323_v23 = vld [vmem:[%s5966_s27 + $0x1df8] sm:$0xff]  ;;  %4822 = vmatpush.msrb.mxu2 %v1187_v62  ;;  %4729 = vmatmul.f32.vlgmr.msra.gmra.mxu1 %v8557_v31 }
 0x659   : > { %v923_v51 = vld [vmem:[%s5966_s27 + $0x1178] sm:$0xff]  ;;  %4841 = vmatpush.msrb.mxu3 %v1323_v23 }
 0x65a   : > { %v1059_v13 = vld [vmem:[%s5966_s27 + $0x15b8] sm:$0xff]  ;;  %4783 = vmatpush.msrb.mxu0 %v923_v51 }
 0x65b   : > { %v1179_v14 = vld [vmem:[%s5966_s27 + $0x1978] sm:$0xff]  ;;  %4802 = vmatpush.msrb.mxu1 %v1059_v13 }
 0x65c   : > { %v1315_v20 = vld [vmem:[%s5966_s27 + $0x1db8] sm:$0xff]  ;;  %4823 = vmatpush.msrb.mxu2 %v1179_v14 }
 0x65d   : > { %v915_v18 = vld [vmem:[%s5966_s27 + $0x1138] sm:$0xff]  ;;  %4842 = vmatpush.msrb.mxu3 %v1315_v20 }
 0x65e   : > { %v1051_v40 = vld [vmem:[%s5966_s27 + $0x1578] sm:$0xff]  ;;  %4784 = vmatpush.msrb.mxu0 %v915_v18 }
 0x65f   : > { %v1171_v43 = vld [vmem:[%s5966_s27 + $0x1938] sm:$0xff]  ;;  %4803 = vmatpush.msrb.mxu1 %v1051_v40 }
 0x660   : > { %v1307_v15 = vld [vmem:[%s5966_s27 + $0x1d78] sm:$0xff]  ;;  %4824 = vmatpush.msrb.mxu2 %v1171_v43 }
 0x661   : > { %v907_v24 = vld [vmem:[%s5966_s27 + $0x10f8] sm:$0xff]  ;;  %4843 = vmatpush.msrb.mxu3 %v1307_v15 }
 0x662   : > { %v1043_v27 = vld [vmem:[%s5966_s27 + $0x1538] sm:$0xff]  ;;  %4785 = vmatpush.msrb.mxu0 %v907_v24 }
 0x663   : > { %v1163_v52 = vld [vmem:[%s5966_s27 + $0x18f8] sm:$0xff]  ;;  %4804 = vmatpush.msrb.mxu1 %v1043_v27 }
 0x664   : > { %v1299_v6 = vld [vmem:[%s5966_s27 + $0x1d38] sm:$0xff]  ;;  %4825 = vmatpush.msrb.mxu2 %v1163_v52 }
 0x665   : > { %v899_v0 = vld [vmem:[%s5966_s27 + $0x10b8] sm:$0xff]  ;;  %4844 = vmatpush.msrb.mxu3 %v1299_v6 }
 0x666   : > { %v1035_v56 = vld [vmem:[%s5966_s27 + $0x14f8] sm:$0xff]  ;;  %4786 = vmatpush.msrb.mxu0 %v899_v0 }
 0x667   : > { %v1155_v58 = vld [vmem:[%s5966_s27 + $0x18b8] sm:$0xff]  ;;  %4805 = vmatpush.msrb.mxu1 %v1035_v56 }
 0x668   : > { %v1291_v53 = vld [vmem:[%s5966_s27 + $0x1cf8] sm:$0xff]  ;;  %4826 = vmatpush.msrb.mxu2 %v1155_v58 }
 0x669   : > { %v891_v37 = vld [vmem:[%s5966_s27 + $0x1078] sm:$0xff]  ;;  %4845 = vmatpush.msrb.mxu3 %v1291_v53 }
 0x66a   : > { %v1027_v1 = vld [vmem:[%s5966_s27 + $0x14b8] sm:$0xff]  ;;  %4787 = vmatpush.msrb.mxu0 %v891_v37 }
 0x66b   : > { %v1147_v8 = vld [vmem:[%s5966_s27 + $0x1878] sm:$0xff]  ;;  %4806 = vmatpush.msrb.mxu1 %v1027_v1 }
 0x66c   : > { %v1283_v22 = vld [vmem:[%s5966_s27 + $0x1cb8] sm:$0xff]  ;;  %4827 = vmatpush.msrb.mxu2 %v1147_v8 }
 0x66d   : > { %v883_v10 = vld [vmem:[%s5966_s27 + $0x1038] sm:$0xff]  ;;  %4846 = vmatpush.msrb.mxu3 %v1283_v22 }
 0x66e   : > { %v1019_v4 = vld [vmem:[%s5966_s27 + $0x1478] sm:$0xff]  ;;  %4788 = vmatpush.msrb.mxu0 %v883_v10 }
 0x66f   : > { %v1139_v54 = vld [vmem:[%s5966_s27 + $0x1838] sm:$0xff]  ;;  %4807 = vmatpush.msrb.mxu1 %v1019_v4  ;;  %4789 = vmatmul.f32.vlgmr.msrb.gmra.mxu0 %v8559_v2 }
 0x670   : > { %v1275_v3 = vld [vmem:[%s5966_s27 + $0x1c78] sm:$0xff]  ;;  %4828 = vmatpush.msrb.mxu2 %v1139_v54 }
 0x671   : > { %v1515_v17 = vld [vmem:[%s5966_s27 + $0x23f8] sm:$0xff]  ;;  %4847 = vmatpush.msrb.mxu3 %v1275_v3  ;;  %4829 = vmatmul.f32.vlgmr.msrb.gmra.mxu2 %v8558_v63 }
 0x672   : > { %v1771_v19 = vld [vmem:[%s5966_s27 + $0x2bf8] sm:$0xff]  ;;  %4853 = vmatpush.msra.mxu0 %v1515_v17 }
 0x673   : > { %v1011_v61 = vld [vmem:[%s5966_s27 + $0x1438] sm:$0xff]  ;;  %4893 = vmatpush.msra.mxu2 %v1771_v19 }
 0x674   : > { %v1267_v35 = vld [vmem:[%s5966_s27 + $0x1c38] sm:$0xff]  ;;  %4808 = vmatpush.msrb.mxu1 %v1011_v61 }
 0x675   : > { %v1507_v45 = vld [vmem:[%s5966_s27 + $0x23b8] sm:$0xff]  ;;  %4848 = vmatpush.msrb.mxu3 %v1267_v35  ;;  %4809 = vmatmul.f32.vlgmr.msrb.gmra.mxu1 %v8561_v7 }
 0x676   : > { %v1643_v33 = vld [vmem:[%s5966_s27 + $0x27f8] sm:$0xff]  ;;  %4854 = vmatpush.msra.mxu0 %v1507_v45  ;;  %4849 = vmatmul.f32.vlgmr.msrb.gmra.mxu3 %v8560_v12 }
 0x677   : > { %v1763_v41 = vld [vmem:[%s5966_s27 + $0x2bb8] sm:$0xff]  ;;  %4873 = vmatpush.msra.mxu1 %v1643_v33  ;;  %v5728_v33 = vld.sshfl [vmem:[#allocation1] sm:$0xff pattern:$0x73625140] }
 0x678   : > { %v1899_v38 = vld [vmem:[%s5966_s27 + $0x2ff8] sm:$0xff]  ;;  %4894 = vmatpush.msra.mxu2 %v1763_v41 }
 0x679   : > { %v1499_v46 = vld [vmem:[%s5966_s27 + $0x2378] sm:$0xff]  ;;  %4913 = vmatpush.msra.mxu3 %v1899_v38 }
 0x67a   : > { %v1635_v34 = vld [vmem:[%s5966_s27 + $0x27b8] sm:$0xff]  ;;  %4855 = vmatpush.msra.mxu0 %v1499_v46 }
 0x67b   : > { %v1755_v47 = vld [vmem:[%s5966_s27 + $0x2b78] sm:$0xff]  ;;  %4874 = vmatpush.msra.mxu1 %v1635_v34 }
 0x67c   : > { %v1891_v29 = vld [vmem:[%s5966_s27 + $0x2fb8] sm:$0xff]  ;;  %4895 = vmatpush.msra.mxu2 %v1755_v47 }
 0x67d   : > { %v1491_v48 = vld [vmem:[%s5966_s27 + $0x2338] sm:$0xff]  ;;  %4914 = vmatpush.msra.mxu3 %v1891_v29  ;;  %v5730_v29 = vld.sshfl [vmem:[#allocation1 + $0x8] sm:$0xff pattern:$0x73625140] }
 0x67e   : > { %v1627_v50 = vld [vmem:[%s5966_s27 + $0x2778] sm:$0xff]  ;;  %4856 = vmatpush.msra.mxu0 %v1491_v48  ;;  %v5731_v48 = vld.sshfl [vmem:[#allocation1 + $0x18] sm:$0xff pattern:$0x73625140] }
 0x67f   : > { %v1747_v55 = vld [vmem:[%s5966_s27 + $0x2b38] sm:$0xff]  ;;  %4875 = vmatpush.msra.mxu1 %v1627_v50 }
 0x680   : > { %v1883_v31 = vld [vmem:[%s5966_s27 + $0x2f78] sm:$0xff]  ;;  %4896 = vmatpush.msra.mxu2 %v1747_v55 }
 0x681   : > { %v1483_v57 = vld [vmem:[%s5966_s27 + $0x22f8] sm:$0xff]  ;;  %4915 = vmatpush.msra.mxu3 %v1883_v31 }
 0x682   : > { %v1619_v28 = vld [vmem:[%s5966_s27 + $0x2738] sm:$0xff]  ;;  %4857 = vmatpush.msra.mxu0 %v1483_v57 }
 0x683   : > { %v1739_v44 = vld [vmem:[%s5966_s27 + $0x2af8] sm:$0xff]  ;;  %4876 = vmatpush.msra.mxu1 %v1619_v28 }
 0x684   : > { %v1875_v30 = vld [vmem:[%s5966_s27 + $0x2f38] sm:$0xff]  ;;  %4897 = vmatpush.msra.mxu2 %v1739_v44 }
 0x685   : > { %v1475_v63 = vld [vmem:[%s5966_s27 + $0x22b8] sm:$0xff]  ;;  %4916 = vmatpush.msra.mxu3 %v1875_v30 }
 0x686   : > { %v1611_v25 = vld [vmem:[%s5966_s27 + $0x26f8] sm:$0xff]  ;;  %4858 = vmatpush.msra.mxu0 %v1475_v63 }
 0x687   : > { %v1731_v16 = vld [vmem:[%s5966_s27 + $0x2ab8] sm:$0xff]  ;;  %4877 = vmatpush.msra.mxu1 %v1611_v25 }
 0x688   : > { %v1867_v9 = vld [vmem:[%s5966_s27 + $0x2ef8] sm:$0xff]  ;;  %4898 = vmatpush.msra.mxu2 %v1731_v16 }
 0x689   : > { %v1467_v2 = vld [vmem:[%s5966_s27 + $0x2278] sm:$0xff]  ;;  %4917 = vmatpush.msra.mxu3 %v1867_v9 }
 0x68a   : > { %v1603_v39 = vld [vmem:[%s5966_s27 + $0x26b8] sm:$0xff]  ;;  %4859 = vmatpush.msra.mxu0 %v1467_v2 }
 0x68b   : > { %v1723_v12 = vld [vmem:[%s5966_s27 + $0x2a78] sm:$0xff]  ;;  %4878 = vmatpush.msra.mxu1 %v1603_v39 }
 0x68c   : > { %v1859_v59 = vld [vmem:[%s5966_s27 + $0x2eb8] sm:$0xff]  ;;  %4899 = vmatpush.msra.mxu2 %v1723_v12 }
 0x68d   : > { %v1459_v11 = vld [vmem:[%s5966_s27 + $0x2238] sm:$0xff]  ;;  %4918 = vmatpush.msra.mxu3 %v1859_v59 }
 0x68e   : > { %v1595_v36 = vld [vmem:[%s5966_s27 + $0x2678] sm:$0xff]  ;;  %4860 = vmatpush.msra.mxu0 %v1459_v11 }
 0x68f   : > { %v1715_v32 = vld [vmem:[%s5966_s27 + $0x2a38] sm:$0xff]  ;;  %4879 = vmatpush.msra.mxu1 %v1595_v36 }
 0x690   : > { %v1851_v7 = vld [vmem:[%s5966_s27 + $0x2e78] sm:$0xff]  ;;  %4900 = vmatpush.msra.mxu2 %v1715_v32 }
 0x691   : > { %v1451_v49 = vld [vmem:[%s5966_s27 + $0x21f8] sm:$0xff]  ;;  %4919 = vmatpush.msra.mxu3 %v1851_v7 }
 0x692   : > { %v1587_v42 = vld [vmem:[%s5966_s27 + $0x2638] sm:$0xff]  ;;  %4861 = vmatpush.msra.mxu0 %v1451_v49 }
 0x693   : > { %v1707_v5 = vld [vmem:[%s5966_s27 + $0x29f8] sm:$0xff]  ;;  %4880 = vmatpush.msra.mxu1 %v1587_v42 }
 0x694   : > { %v1843_v26 = vld [vmem:[%s5966_s27 + $0x2e38] sm:$0xff]  ;;  %4901 = vmatpush.msra.mxu2 %v1707_v5 }
 0x695   : > { %v1443_v60 = vld [vmem:[%s5966_s27 + $0x21b8] sm:$0xff]  ;;  %4920 = vmatpush.msra.mxu3 %v1843_v26 }
 0x696   : > { %v1579_v62 = vld [vmem:[%s5966_s27 + $0x25f8] sm:$0xff]  ;;  %4862 = vmatpush.msra.mxu0 %v1443_v60 }
 0x697   : > { %v1699_v23 = vld [vmem:[%s5966_s27 + $0x29b8] sm:$0xff]  ;;  %4881 = vmatpush.msra.mxu1 %v1579_v62 }
 0x698   : > { %v1835_v51 = vld [vmem:[%s5966_s27 + $0x2df8] sm:$0xff]  ;;  %4902 = vmatpush.msra.mxu2 %v1699_v23 }
 0x699   : > { %v1435_v13 = vld [vmem:[%s5966_s27 + $0x2178] sm:$0xff]  ;;  %4921 = vmatpush.msra.mxu3 %v1835_v51 }
 0x69a   : > { %v1571_v14 = vld [vmem:[%s5966_s27 + $0x25b8] sm:$0xff]  ;;  %4863 = vmatpush.msra.mxu0 %v1435_v13 }
 0x69b   : > { %v1691_v20 = vld [vmem:[%s5966_s27 + $0x2978] sm:$0xff]  ;;  %4882 = vmatpush.msra.mxu1 %v1571_v14 }
 0x69c   : > { %v1827_v18 = vld [vmem:[%s5966_s27 + $0x2db8] sm:$0xff]  ;;  %4903 = vmatpush.msra.mxu2 %v1691_v20 }
 0x69d   : > { %v1427_v40 = vld [vmem:[%s5966_s27 + $0x2138] sm:$0xff]  ;;  %4922 = vmatpush.msra.mxu3 %v1827_v18 }
 0x69e   : > { %v1563_v43 = vld [vmem:[%s5966_s27 + $0x2578] sm:$0xff]  ;;  %4864 = vmatpush.msra.mxu0 %v1427_v40 }
 0x69f   : > { %v1683_v15 = vld [vmem:[%s5966_s27 + $0x2938] sm:$0xff]  ;;  %4883 = vmatpush.msra.mxu1 %v1563_v43 }
 0x6a0   : > { %v1819_v24 = vld [vmem:[%s5966_s27 + $0x2d78] sm:$0xff]  ;;  %4904 = vmatpush.msra.mxu2 %v1683_v15 }
 0x6a1   : > { %v1419_v27 = vld [vmem:[%s5966_s27 + $0x20f8] sm:$0xff]  ;;  %4923 = vmatpush.msra.mxu3 %v1819_v24 }
 0x6a2   : > { %v1555_v52 = vld [vmem:[%s5966_s27 + $0x2538] sm:$0xff]  ;;  %4865 = vmatpush.msra.mxu0 %v1419_v27 }
 0x6a3   : > { %v1675_v6 = vld [vmem:[%s5966_s27 + $0x28f8] sm:$0xff]  ;;  %4884 = vmatpush.msra.mxu1 %v1555_v52 }
 0x6a4   : > { %v1811_v0 = vld [vmem:[%s5966_s27 + $0x2d38] sm:$0xff]  ;;  %4905 = vmatpush.msra.mxu2 %v1675_v6 }
 0x6a5   : > { %v1411_v56 = vld [vmem:[%s5966_s27 + $0x20b8] sm:$0xff]  ;;  %4924 = vmatpush.msra.mxu3 %v1811_v0 }
 0x6a6   : > { %v1547_v58 = vld [vmem:[%s5966_s27 + $0x24f8] sm:$0xff]  ;;  %4866 = vmatpush.msra.mxu0 %v1411_v56 }
 0x6a7   : > { %v1667_v53 = vld [vmem:[%s5966_s27 + $0x28b8] sm:$0xff]  ;;  %4885 = vmatpush.msra.mxu1 %v1547_v58 }
 0x6a8   : > { %v1803_v37 = vld [vmem:[%s5966_s27 + $0x2cf8] sm:$0xff]  ;;  %4906 = vmatpush.msra.mxu2 %v1667_v53 }
 0x6a9   : > { %v1403_v1 = vld [vmem:[%s5966_s27 + $0x2078] sm:$0xff]  ;;  %4925 = vmatpush.msra.mxu3 %v1803_v37 }
 0x6aa   : > { %v1539_v8 = vld [vmem:[%s5966_s27 + $0x24b8] sm:$0xff]  ;;  %4867 = vmatpush.msra.mxu0 %v1403_v1 }
 0x6ab   : > { %v1659_v22 = vld [vmem:[%s5966_s27 + $0x2878] sm:$0xff]  ;;  %4886 = vmatpush.msra.mxu1 %v1539_v8 }
 0x6ac   : > { %v1795_v10 = vld [vmem:[%s5966_s27 + $0x2cb8] sm:$0xff]  ;;  %4907 = vmatpush.msra.mxu2 %v1659_v22 }
 0x6ad   : > { %v1395_v4 = vld [vmem:[%s5966_s27 + $0x2038] sm:$0xff]  ;;  %4926 = vmatpush.msra.mxu3 %v1795_v10 }
 0x6ae   : > { %v1531_v54 = vld [vmem:[%s5966_s27 + $0x2478] sm:$0xff]  ;;  %4868 = vmatpush.msra.mxu0 %v1395_v4 }
 0x6af   : > { %v1651_v3 = vld [vmem:[%s5966_s27 + $0x2838] sm:$0xff]  ;;  %4887 = vmatpush.msra.mxu1 %v1531_v54  ;;  %4869 = vmatmul.f32.vlgmr.msra.gmra.mxu0 %v5728_v33 }
 0x6b0   : > { %v1787_v17 = vld [vmem:[%s5966_s27 + $0x2c78] sm:$0xff]  ;;  %4908 = vmatpush.msra.mxu2 %v1651_v3 }
 0x6b1   : > { %v2027_v19 = vld [vmem:[%s5966_s27 + $0x33f8] sm:$0xff]  ;;  %4927 = vmatpush.msra.mxu3 %v1787_v17 }
 0x6b2   : > { %v2283_v61 = vld [vmem:[%s5966_s27 + $0x3bf8] sm:$0xff]  ;;  %4933 = vmatpush.msrb.mxu0 %v2027_v19 }
 0x6b3   : > { %v1523_v35 = vld [vmem:[%s5966_s27 + $0x2438] sm:$0xff]  ;;  %4973 = vmatpush.msrb.mxu2 %v2283_v61 }
 0x6b4   : > { %v1779_v45 = vld [vmem:[%s5966_s27 + $0x2c38] sm:$0xff]  ;;  %4888 = vmatpush.msra.mxu1 %v1523_v35 }
 0x6b5   : > { %v5729_v41 = vld.sshfl [vmem:[#allocation1 + $0x10] sm:$0xff pattern:$0x73625140]  ;;  %4928 = vmatpush.msra.mxu3 %v1779_v45  ;;  %4889 = vmatmul.f32.vlgmr.msra.gmra.mxu1 %v5730_v29  ;;  %v5735_v29 = vld.sshfl [vmem:[#allocation1 + $0x38] sm:$0xff pattern:$0x73625140] }
 0x6b6   : > { %4909 = vmatmul.f32.vlgmr.msra.gmra.mxu2 %v5729_v41  ;;  %v2019_v38 = vld [vmem:[%s5966_s27 + $0x33b8] sm:$0xff]  ;;  %4929 = vmatmul.f32.vlgmr.msra.gmra.mxu3 %v5731_v48  ;;  %v4410_v48 = vpop.f32.mrf.mxu1 }
 0x6b7   : > { %v2155_v46 = vld [vmem:[%s5966_s27 + $0x37f8] sm:$0xff]  ;;  %4934 = vmatpush.msrb.mxu0 %v2019_v38 }
 0x6b8   : > { %v2275_v34 = vld [vmem:[%s5966_s27 + $0x3bb8] sm:$0xff]  ;;  %4953 = vmatpush.msrb.mxu1 %v2155_v46  ;;  %v5732_v46 = vld.sshfl [vmem:[#allocation1 + $0x20] sm:$0xff pattern:$0x73625140] }
 0x6b9   : > { %v2411_v47 = vld [vmem:[%s5966_s27 + $0x3ff8] sm:$0xff]  ;;  %4974 = vmatpush.msrb.mxu2 %v2275_v34 }
 0x6ba   : > { %v2011_v50 = vld [vmem:[%s5966_s27 + $0x3378] sm:$0xff]  ;;  %4993 = vmatpush.msrb.mxu3 %v2411_v47  ;;  %v5734_v47 = vld.sshfl [vmem:[#allocation1 + $0x28] sm:$0xff pattern:$0x73625140] }
 0x6bb   : > { %v2147_v55 = vld [vmem:[%s5966_s27 + $0x37b8] sm:$0xff]  ;;  %4935 = vmatpush.msrb.mxu0 %v2011_v50  ;;  %v4390_v50 = vpop.f32.mrf.mxu0 }
 0x6bc   : > { %v2267_v31 = vld [vmem:[%s5966_s27 + $0x3b78] sm:$0xff]  ;;  %4954 = vmatpush.msrb.mxu1 %v2147_v55  ;;  %v4430_v55 = vpop.f32.mrf.mxu2 }
 0x6bd   : > { %v2403_v57 = vld [vmem:[%s5966_s27 + $0x3fb8] sm:$0xff]  ;;  %4975 = vmatpush.msrb.mxu2 %v2267_v31  ;;  %v4450_v31 = vpop.f32.mrf.mxu3 }
 0x6be   : > { %v2003_v28 = vld [vmem:[%s5966_s27 + $0x3338] sm:$0xff]  ;;  %4994 = vmatpush.msrb.mxu3 %v2403_v57  ;;  %v4490_v57 = vpop.f32.mrf.mxu1 }
 0x6bf   : > { %v2139_v44 = vld [vmem:[%s5966_s27 + $0x3778] sm:$0xff]  ;;  %4936 = vmatpush.msrb.mxu0 %v2003_v28 }
 0x6c0   : > { %v2259_v30 = vld [vmem:[%s5966_s27 + $0x3b38] sm:$0xff]  ;;  %4955 = vmatpush.msrb.mxu1 %v2139_v44 }
 0x6c1   : > { %v2395_v63 = vld [vmem:[%s5966_s27 + $0x3f78] sm:$0xff]  ;;  %4976 = vmatpush.msrb.mxu2 %v2259_v30 }
 0x6c2   : > { %v1995_v25 = vld [vmem:[%s5966_s27 + $0x32f8] sm:$0xff]  ;;  %4995 = vmatpush.msrb.mxu3 %v2395_v63 }
 0x6c3   : > { %v2131_v16 = vld [vmem:[%s5966_s27 + $0x3738] sm:$0xff]  ;;  %4937 = vmatpush.msrb.mxu0 %v1995_v25  ;;  %v4470_v28 = vpop.f32.mrf.mxu0 }
 0x6c4   : > { %v2251_v9 = vld [vmem:[%s5966_s27 + $0x3af8] sm:$0xff]  ;;  %4956 = vmatpush.msrb.mxu1 %v2131_v16  ;;  %v4510_v44 = vpop.f32.mrf.mxu2 }
 0x6c5   : > { %v2387_v2 = vld [vmem:[%s5966_s27 + $0x3f38] sm:$0xff]  ;;  %4977 = vmatpush.msrb.mxu2 %v2251_v9  ;;  %v4530_v30 = vpop.f32.mrf.mxu3 }
 0x6c6   : > { %v1987_v39 = vld [vmem:[%s5966_s27 + $0x32b8] sm:$0xff]  ;;  %4996 = vmatpush.msrb.mxu3 %v2387_v2  ;;  %v4570_v63 = vpop.f32.mrf.mxu1 }
 0x6c7   : > { %v2123_v12 = vld [vmem:[%s5966_s27 + $0x36f8] sm:$0xff]  ;;  %4938 = vmatpush.msrb.mxu0 %v1987_v39 }
 0x6c8   : > { %v2243_v59 = vld [vmem:[%s5966_s27 + $0x3ab8] sm:$0xff]  ;;  %4957 = vmatpush.msrb.mxu1 %v2123_v12 }
 0x6c9   : > { %v2379_v11 = vld [vmem:[%s5966_s27 + $0x3ef8] sm:$0xff]  ;;  %4978 = vmatpush.msrb.mxu2 %v2243_v59  ;;  %v4411_v59 = vadd.f32 %v4410_v48, %v4390_v50 }
 0x6ca   : > { %v1979_v36 = vld [vmem:[%s5966_s27 + $0x3278] sm:$0xff]  ;;  %4997 = vmatpush.msrb.mxu3 %v2379_v11 }
 0x6cb   : > { %v2115_v32 = vld [vmem:[%s5966_s27 + $0x36b8] sm:$0xff]  ;;  %4939 = vmatpush.msrb.mxu0 %v1979_v36  ;;  %v4550_v25 = vpop.f32.mrf.mxu0 }
 0x6cc   : > { %v2235_v7 = vld [vmem:[%s5966_s27 + $0x3a78] sm:$0xff]  ;;  %4958 = vmatpush.msrb.mxu1 %v2115_v32  ;;  %v4590_v16 = vpop.f32.mrf.mxu2 }
 0x6cd   : > { %v2371_v49 = vld [vmem:[%s5966_s27 + $0x3eb8] sm:$0xff]  ;;  %4979 = vmatpush.msrb.mxu2 %v2235_v7  ;;  %v4610_v9 = vpop.f32.mrf.mxu3  ;;  %v4431_v7 = vadd.f32 %v4430_v55, %v4411_v59 }
 0x6ce   : > { %v1971_v42 = vld [vmem:[%s5966_s27 + $0x3238] sm:$0xff]  ;;  %4998 = vmatpush.msrb.mxu3 %v2371_v49  ;;  %v4650_v2 = vpop.f32.mrf.mxu1 }
 0x6cf   : > { %v2107_v5 = vld [vmem:[%s5966_s27 + $0x3678] sm:$0xff]  ;;  %4940 = vmatpush.msrb.mxu0 %v1971_v42 }
 0x6d0   : > { %v2227_v26 = vld [vmem:[%s5966_s27 + $0x3a38] sm:$0xff]  ;;  %4959 = vmatpush.msrb.mxu1 %v2107_v5  ;;  %v4451_v5 = vadd.f32 %v4450_v31, %v4431_v7 }
 0x6d1   : > { %v2363_v60 = vld [vmem:[%s5966_s27 + $0x3e78] sm:$0xff]  ;;  %4980 = vmatpush.msrb.mxu2 %v2227_v26 }
 0x6d2   : > { %v1963_v62 = vld [vmem:[%s5966_s27 + $0x31f8] sm:$0xff]  ;;  %4999 = vmatpush.msrb.mxu3 %v2363_v60 }
 0x6d3   : > { %v2099_v23 = vld [vmem:[%s5966_s27 + $0x3638] sm:$0xff]  ;;  %4941 = vmatpush.msrb.mxu0 %v1963_v62  ;;  %v4630_v39 = vpop.f32.mrf.mxu0  ;;  %v4471_v62 = vadd.f32 %v4470_v28, %v4451_v5 }
 0x6d4   : > { %v2219_v51 = vld [vmem:[%s5966_s27 + $0x39f8] sm:$0xff]  ;;  %4960 = vmatpush.msrb.mxu1 %v2099_v23  ;;  %v4670_v12 = vpop.f32.mrf.mxu2 }
 0x6d5   : > { %v2355_v13 = vld [vmem:[%s5966_s27 + $0x3e38] sm:$0xff]  ;;  %4981 = vmatpush.msrb.mxu2 %v2219_v51  ;;  %v4690_v11 = vpop.f32.mrf.mxu3 }
 0x6d6   : > { %v1955_v14 = vld [vmem:[%s5966_s27 + $0x31b8] sm:$0xff]  ;;  %5000 = vmatpush.msrb.mxu3 %v2355_v13  ;;  %v4730_v36 = vpop.f32.mrf.mxu1  ;;  %v4491_v13 = vadd.f32 %v4490_v57, %v4471_v62 }
 0x6d7   : > { %v2091_v20 = vld [vmem:[%s5966_s27 + $0x35f8] sm:$0xff]  ;;  %4942 = vmatpush.msrb.mxu0 %v1955_v14 }
 0x6d8   : > { %v2211_v18 = vld [vmem:[%s5966_s27 + $0x39b8] sm:$0xff]  ;;  %4961 = vmatpush.msrb.mxu1 %v2091_v20 }
 0x6d9   : > { %v2347_v40 = vld [vmem:[%s5966_s27 + $0x3df8] sm:$0xff]  ;;  %4982 = vmatpush.msrb.mxu2 %v2211_v18  ;;  %v4511_v18 = vadd.f32 %v4510_v44, %v4491_v13 }
 0x6da   : > { %v1947_v43 = vld [vmem:[%s5966_s27 + $0x3178] sm:$0xff]  ;;  %5001 = vmatpush.msrb.mxu3 %v2347_v40 }
 0x6db   : > { %v2083_v15 = vld [vmem:[%s5966_s27 + $0x35b8] sm:$0xff]  ;;  %4943 = vmatpush.msrb.mxu0 %v1947_v43  ;;  %v4710_v32 = vpop.f32.mrf.mxu0 }
 0x6dc   : > { %v2203_v24 = vld [vmem:[%s5966_s27 + $0x3978] sm:$0xff]  ;;  %4962 = vmatpush.msrb.mxu1 %v2083_v15  ;;  %v4731_v49 = vadd.f32 %v4730_v36, %v4710_v32  ;;  %v4750_v42 = vpop.f32.mrf.mxu2  ;;  %v4531_v15 = vadd.f32 %v4530_v30, %v4511_v18 }
 0x6dd   : > { %v2339_v27 = vld [vmem:[%s5966_s27 + $0x3db8] sm:$0xff]  ;;  %4983 = vmatpush.msrb.mxu2 %v2203_v24  ;;  %v4770_v60 = vpop.f32.mrf.mxu3 }
 0x6de   : > { %v1939_v52 = vld [vmem:[%s5966_s27 + $0x3138] sm:$0xff]  ;;  %5002 = vmatpush.msrb.mxu3 %v2339_v27  ;;  %v4751_v26 = vadd.f32 %v4750_v42, %v4731_v49 }
 0x6df   : > { %v2075_v6 = vld [vmem:[%s5966_s27 + $0x3578] sm:$0xff]  ;;  %4944 = vmatpush.msrb.mxu0 %v1939_v52  ;;  %v4551_v52 = vadd.f32 %v4550_v25, %v4531_v15 }
 0x6e0   : > { %v2195_v0 = vld [vmem:[%s5966_s27 + $0x3938] sm:$0xff]  ;;  %4963 = vmatpush.msrb.mxu1 %v2075_v6  ;;  %v4771_v23 = vadd.f32 %v4770_v60, %v4751_v26 }
 0x6e1   : > { %v2331_v56 = vld [vmem:[%s5966_s27 + $0x3d78] sm:$0xff]  ;;  %4984 = vmatpush.msrb.mxu2 %v2195_v0 }
 0x6e2   : > { %v1931_v58 = vld [vmem:[%s5966_s27 + $0x30f8] sm:$0xff]  ;;  %5003 = vmatpush.msrb.mxu3 %v2331_v56  ;;  %v4571_v56 = vadd.f32 %v4570_v63, %v4551_v52 }
 0x6e3   : > { %v2067_v53 = vld [vmem:[%s5966_s27 + $0x3538] sm:$0xff]  ;;  %4945 = vmatpush.msrb.mxu0 %v1931_v58 }
 0x6e4   : > { %v2187_v37 = vld [vmem:[%s5966_s27 + $0x38f8] sm:$0xff]  ;;  %4964 = vmatpush.msrb.mxu1 %v2067_v53 }
 0x6e5   : > { %v2323_v1 = vld [vmem:[%s5966_s27 + $0x3d38] sm:$0xff]  ;;  %4985 = vmatpush.msrb.mxu2 %v2187_v37  ;;  %v4591_v37 = vadd.f32 %v4590_v16, %v4571_v56 }
 0x6e6   : > { %v1923_v8 = vld [vmem:[%s5966_s27 + $0x30b8] sm:$0xff]  ;;  %5004 = vmatpush.msrb.mxu3 %v2323_v1 }
 0x6e7   : > { %v2059_v22 = vld [vmem:[%s5966_s27 + $0x34f8] sm:$0xff]  ;;  %4946 = vmatpush.msrb.mxu0 %v1923_v8 }
 0x6e8   : > { %v2179_v10 = vld [vmem:[%s5966_s27 + $0x38b8] sm:$0xff]  ;;  %4965 = vmatpush.msrb.mxu1 %v2059_v22  ;;  %v4611_v22 = vadd.f32 %v4610_v9, %v4591_v37 }
 0x6e9   : > { %v2315_v4 = vld [vmem:[%s5966_s27 + $0x3cf8] sm:$0xff]  ;;  %4986 = vmatpush.msrb.mxu2 %v2179_v10 }
 0x6ea   : > { %v1915_v54 = vld [vmem:[%s5966_s27 + $0x3078] sm:$0xff]  ;;  %5005 = vmatpush.msrb.mxu3 %v2315_v4 }
 0x6eb   : > { %v2051_v3 = vld [vmem:[%s5966_s27 + $0x34b8] sm:$0xff]  ;;  %4947 = vmatpush.msrb.mxu0 %v1915_v54  ;;  %v4631_v54 = vadd.f32 %v4630_v39, %v4611_v22 }
 0x6ec   : > { %v2171_v17 = vld [vmem:[%s5966_s27 + $0x3878] sm:$0xff]  ;;  %4966 = vmatpush.msrb.mxu1 %v2051_v3  ;;  %v4790_v51 = vpop.f32.mrf.mxu0 }
 0x6ed   : > { %v2307_v19 = vld [vmem:[%s5966_s27 + $0x3cb8] sm:$0xff]  ;;  %4987 = vmatpush.msrb.mxu2 %v2171_v17  ;;  %v4791_v14 = vadd.f32 %v4790_v51, %v4771_v23 }
 0x6ee   : > { %v1907_v61 = vld [vmem:[%s5966_s27 + $0x3038] sm:$0xff]  ;;  %5006 = vmatpush.msrb.mxu3 %v2307_v19  ;;  %v4651_v19 = vadd.f32 %v4650_v2, %v4631_v54 }
 0x6ef   : > { %v2043_v35 = vld [vmem:[%s5966_s27 + $0x3478] sm:$0xff]  ;;  %4948 = vmatpush.msrb.mxu0 %v1907_v61 }
 0x6f0   : > { %v2163_v45 = vld [vmem:[%s5966_s27 + $0x3838] sm:$0xff]  ;;  %4967 = vmatpush.msrb.mxu1 %v2043_v35  ;;  %4949 = vmatmul.f32.vlgmr.msrb.gmra.mxu0 %v5732_v46 }
 0x6f1   : > { %v2299_v33 = vld [vmem:[%s5966_s27 + $0x3c78] sm:$0xff]  ;;  %4988 = vmatpush.msrb.mxu2 %v2163_v45  ;;  %v4671_v45 = vadd.f32 %v4670_v12, %v4651_v19 }
 0x6f2   : > { %v2035_v41 = vld [vmem:[%s5966_s27 + $0x3438] sm:$0xff]  ;;  %5007 = vmatpush.msrb.mxu3 %v2299_v33  ;;  %v4810_v20 = vpop.f32.mrf.mxu1 }
 0x6f3   : > { %v2291_v38 = vld [vmem:[%s5966_s27 + $0x3c38] sm:$0xff]  ;;  %4968 = vmatpush.msrb.mxu1 %v2035_v41  ;;  %v4811_v40 = vadd.f32 %v4810_v20, %v4791_v14 }
 0x6f4   : > { %v5733_v34 = vld.sshfl [vmem:[#allocation1 + $0x30] sm:$0xff pattern:$0x73625140]  ;;  %5008 = vmatpush.msrb.mxu3 %v2291_v38  ;;  %4969 = vmatmul.f32.vlgmr.msrb.gmra.mxu1 %v5734_v47  ;;  %v4830_v43 = vpop.f32.mrf.mxu2  ;;  %v4691_v38 = vadd.f32 %v4690_v11, %v4671_v45 }
 0x6f5   : > { %4989 = vmatmul.f32.vlgmr.msrb.gmra.mxu2 %v5733_v34  ;;  %5009 = vmatmul.f32.vlgmr.msrb.gmra.mxu3 %v5735_v29  ;;  %v4831_v24 = vadd.f32 %v4830_v43, %v4811_v40  ;;  %v359_v50 = vld [vmem:[#allocation2 + $0x8] sm:$0xff] }
 0x6f6   : > { %v5025_v29 = vrot.slane %v4691_v38, 4 }
 0x6f9   : > { %v4850_v27 = vpop.f32.mrf.mxu3 }
 0x6fa   : > { %v4851_v0 = vadd.f32 %v4850_v27, %v4831_v24 }
 0x72c   : > { %v4870_v6 = vpop.f32.mrf.mxu0 }
 0x72d   : > { %v4871_v58 = vadd.f32 %v4870_v6, %v4851_v0 }
 0x732   : > { %v4890_v53 = vpop.f32.mrf.mxu1 }
 0x733   : > { %v4891_v8 = vadd.f32 %v4890_v53, %v4871_v58 }
 0x739   : > { %v4910_v1 = vpop.f32.mrf.mxu2  ;;  %v4930_v4 = vpop.f32.mrf.mxu3 }
 0x73a   : > { %v4911_v10 = vadd.f32 %v4910_v1, %v4891_v8 }
 0x73c   : > { %v4931_v3 = vadd.f32 %v4930_v4, %v4911_v10 }
 0x76d   : > { %v4950_v17 = vpop.f32.mrf.mxu0 }
 0x76e   : > { %v4951_v61 = vadd.f32 %v4950_v17, %v4931_v3 }
 0x771   : > { %v4970_v35 = vpop.f32.mrf.mxu1 }
 0x772   : > { %v4971_v33 = vadd.f32 %v4970_v35, %v4951_v61 }
 0x778   : > { %v4990_v41 = vpop.f32.mrf.mxu2  ;;  %v5010_v34 = vpop.f32.mrf.mxu3 }
 0x779   : > { %v4991_v46 = vadd.f32 %v4990_v41, %v4971_v33 }
 0x77b   : > { %v5011_v47 = vadd.f32 %v5010_v34, %v4991_v46 }
 0x77d   : > { %v5026_v48 = vrot.slane %v5011_v47, 2 }
 0x77f   : > { %v5034_v55 = vsel %vm5029_vm1, %v5025_v29, %v5026_v48  ;;  %5045 = sbr.rel (%p5600_p3) target bundleno = 2044 (0x7fc), region = 52 }
 0x780   : > { %v5035_v31 = vsel %vm5031_vm2, %v8039_v21, %v5034_v55 }
 0x781   : > { %v5039_v57 = vadd.f32 %v5035_v31, %v359_v50 }
 0x783   : > { %5041 = vst [vmem:[#allocation2 + $0x8] sm:$0xff] %v5039_v57 }
 0x784   : > { %v5048_v28 = vld [vmem:[%s338_s7] sm:$0xff]  ;;  %v5855_v16 = vmov 2.0   ;;  %v5046_v36 = vld [vmem:[#allocation2] sm:$0xff] }
 0x785   : > { %v5050_v44 = vperm.slane %v5048_v28, 0  ;;  %v5051_v30 = vperm.slane %v5048_v28, 1  ;;  %v5052_v63 = vperm.slane %v5048_v28, 2  ;;  %v5053_v25 = vperm.slane %v5048_v28, 3 }
 0x786   : > { %5736 = vrcp.f32 %v5855_v16  ;;  %v5054_v9 = vperm.slane %v5048_v28, 4  ;;  %v5055_v2 = vperm.slane %v5048_v28, 5  ;;  %v5056_v21 = vperm.slane %v5048_v28, 6 }
 0x787   : > { %v5058_v39 = vrot.slane %v5051_v30, 6  ;;  %v5059_v12 = vrot.slane %v5052_v63, 4  ;;  %v5060_v59 = vrot.slane %v5053_v25, 2  ;;  %v5057_v11 = vperm.slane %v5048_v28, 7 }
 0x788   : > { %v5061_v32 = vrot.slane %v5055_v2, 6  ;;  %v5062_v7 = vrot.slane %v5056_v21, 4 }
 0x789   : > { %v5064_v49 = vsel %vm5027_vm0, %v5050_v44, %v5058_v39  ;;  %v5065_v42 = vsel %vm5029_vm1, %v5059_v12, %v5060_v59  ;;  %v5063_v5 = vrot.slane %v5057_v11, 2 }
 0x78a   : > { %v5066_v26 = vsel %vm5031_vm2, %v5064_v49, %v5065_v42  ;;  %v5047_v60 = vld [vmem:[#allocation2 + $0x8] sm:$0xff]  ;;  %v5067_v62 = vsel %vm5027_vm0, %v5054_v9, %v5061_v32 }
 0x78b   : > { %v8310_v23 = vadd.f32 %v5066_v26, %v5046_v36  ;;  %v5068_v51 = vsel %vm5029_vm1, %v5062_v7, %v5063_v5 }
 0x78c   : > { %v5737_v13 = vpop.eup %5736  ;;  %v5069_v14 = vsel %vm5031_vm2, %v5067_v62, %v5068_v51 }
 0x78d   : > { %5076 = vst [vmem:[#allocation1] ss:$4 sm:$0xff] %v8310_v23  ;;  %v5152_v20 = vmul.f32 2.0, %v5737_v13  ;;  %v8315_v18 = vadd.f32 %v5069_v14, %v5047_v60  ;;  %vm5156_vm3 = vweird.f32 %v5737_v13 }
 0x78f   : > { %v5153_v40 = vsub.f32 1.0, %v5152_v20  ;;  %5078 = vst [vmem:[#allocation1 + $0x20] ss:$4 sm:$0xff] %v8315_v18 }
 0x791   : > { %v5154_v43 = vmul.f32 %v5737_v13, %v5153_v40 }
 0x793   : > { %v5155_v27 = vadd.f32 %v5737_v13, %v5154_v43 }
 0x794   : > { %v5079_v15 = vld.sshfl [vmem:[#allocation1] sm:$0xff pattern:$0x73625140]  ;;  %v5080_v24 = vld.sshfl [vmem:[#allocation1 + $0x8] sm:$0xff pattern:$0x73625140] }
 0x795   : > { %v5081_v52 = vld.sshfl [vmem:[#allocation1 + $0x10] sm:$0xff pattern:$0x73625140]  ;;  %v5082_v6 = vld.sshfl [vmem:[#allocation1 + $0x18] sm:$0xff pattern:$0x73625140]  ;;  %v8322_v10 = vsel %vm5156_vm3, %v5737_v13, %v5155_v27 }
 0x796   : > { %v5095_v0 = vsel %vm5027_vm0, %v5079_v15, 0.0  ;;  %v5102_v56 = vsel %vm5027_vm0, %v5080_v24, 0.0  ;;  %v5109_v58 = vsel %vm5027_vm0, %v5081_v52, 0.0  ;;  %v5116_v53 = vsel %vm5027_vm0, %v5082_v6, 0.0 }
 0x797   : > { %v5096_v37 = vrot.slane %v5095_v0, 4  ;;  %v5103_v1 = vrot.slane %v5102_v56, 4  ;;  %v5110_v8 = vrot.slane %v5109_v58, 4  ;;  %v5117_v22 = vrot.slane %v5116_v53, 4 }
 0x798   : > { %v5083_v4 = vld.sshfl [vmem:[#allocation1 + $0x20] sm:$0xff pattern:$0x73625140]  ;;  %v5084_v54 = vld.sshfl [vmem:[#allocation1 + $0x28] sm:$0xff pattern:$0x73625140] }
 0x799   : > { %v5097_v3 = vadd.f32 %v5096_v37, %v5095_v0  ;;  %v5104_v17 = vadd.f32 %v5103_v1, %v5102_v56  ;;  %v5111_v19 = vadd.f32 %v5110_v8, %v5109_v58  ;;  %v5118_v61 = vadd.f32 %v5117_v22, %v5116_v53  ;;  %v5085_v35 = vld.sshfl [vmem:[#allocation1 + $0x30] sm:$0xff pattern:$0x73625140]  ;;  %v5086_v45 = vld.sshfl [vmem:[#allocation1 + $0x38] sm:$0xff pattern:$0x73625140] }
 0x79a   : > { %v5123_v33 = vsel %vm5027_vm0, %v5083_v4, 0.0  ;;  %v5130_v41 = vsel %vm5027_vm0, %v5084_v54, 0.0  ;;  %v5137_v38 = vsel %vm5027_vm0, %v5085_v35, 0.0  ;;  %v5144_v46 = vsel %vm5027_vm0, %v5086_v45, 0.0 }
 0x79b   : > { %v5098_v34 = vrot.slane %v5097_v3, 2  ;;  %v5105_v47 = vrot.slane %v5104_v17, 2  ;;  %v5112_v29 = vrot.slane %v5111_v19, 2  ;;  %v5119_v48 = vrot.slane %v5118_v61, 2 }
 0x79c   : > { %v5124_v50 = vrot.slane %v5123_v33, 4  ;;  %v5131_v55 = vrot.slane %v5130_v41, 4  ;;  %v5138_v31 = vrot.slane %v5137_v38, 4  ;;  %v5145_v57 = vrot.slane %v5144_v46, 4 }
 0x79d   : > { %v5099_v28 = vadd.f32 %v5098_v34, %v5097_v3  ;;  %v5106_v44 = vadd.f32 %v5105_v47, %v5104_v17  ;;  %v5113_v30 = vadd.f32 %v5112_v29, %v5111_v19  ;;  %v5120_v63 = vadd.f32 %v5119_v48, %v5118_v61 }
 0x79e   : > { %v5125_v25 = vadd.f32 %v5124_v50, %v5123_v33  ;;  %v5132_v16 = vadd.f32 %v5131_v55, %v5130_v41  ;;  %v5139_v9 = vadd.f32 %v5138_v31, %v5137_v38  ;;  %v5146_v2 = vadd.f32 %v5145_v57, %v5144_v46 }
 0x79f   : > { %v5100_v21 = vrot.slane %v5099_v28, 1  ;;  %v5107_v39 = vrot.slane %v5106_v44, 1  ;;  %v5114_v12 = vrot.slane %v5113_v30, 1  ;;  %v5121_v59 = vrot.slane %v5120_v63, 1 }
 0x7a0   : > { %v5126_v11 = vrot.slane %v5125_v25, 2  ;;  %v5133_v36 = vrot.slane %v5132_v16, 2  ;;  %v5140_v32 = vrot.slane %v5139_v9, 2  ;;  %v5147_v7 = vrot.slane %v5146_v2, 2 }
 0x7a1   : > { %v5101_v49 = vadd.f32 %v5100_v21, %v5099_v28  ;;  %v5108_v42 = vadd.f32 %v5107_v39, %v5106_v44  ;;  %v5115_v5 = vadd.f32 %v5114_v12, %v5113_v30  ;;  %v5122_v26 = vadd.f32 %v5121_v59, %v5120_v63 }
 0x7a2   : > { %v5127_v60 = vadd.f32 %v5126_v11, %v5125_v25  ;;  %v5134_v62 = vadd.f32 %v5133_v36, %v5132_v16  ;;  %v5141_v51 = vadd.f32 %v5140_v32, %v5139_v9  ;;  %v5148_v13 = vadd.f32 %v5147_v7, %v5146_v2 }
 0x7a3   : > { %v5159_v14 = vmul.f32 %v8322_v10, %v5108_v42  ;;  %v5160_v20 = vmul.f32 %v8322_v10, %v5115_v5  ;;  %v5161_v40 = vmul.f32 %v8322_v10, %v5122_v26  ;;  %v5158_v52 = vmul.f32 %v8322_v10, %v5101_v49 }
 0x7a4   : > { %v5128_v43 = vrot.slane %v5127_v60, 1  ;;  %v5135_v15 = vrot.slane %v5134_v62, 1  ;;  %v5142_v24 = vrot.slane %v5141_v51, 1  ;;  %v5149_v27 = vrot.slane %v5148_v13, 1 }
 0x7a5   : > { %v5174_v6 = vrot.slane %v5159_v14, 6  ;;  %v5175_v0 = vrot.slane %v5160_v20, 4  ;;  %v5176_v56 = vrot.slane %v5161_v40, 2 }
 0x7a6   : > { %v5129_v58 = vadd.f32 %v5128_v43, %v5127_v60  ;;  %v5136_v53 = vadd.f32 %v5135_v15, %v5134_v62  ;;  %v5143_v37 = vadd.f32 %v5142_v24, %v5141_v51  ;;  %v5150_v1 = vadd.f32 %v5149_v27, %v5148_v13  ;;  %v8361_v62 = vld [vmem:[%s342_s8] sm:$0xff] }
 0x7a7   : > { %v5180_v8 = vsel %vm5027_vm0, %v5158_v52, %v5174_v6  ;;  %v5181_v22 = vsel %vm5029_vm1, %v5175_v0, %v5176_v56  ;;  %v5392_v43 = vperm.slane %v8361_v62, 1  ;;  %v8373_v6 = vld [vmem:[%s346_s1] sm:$0xff] }
 0x7a8   : > { %v5182_v4 = vsel %vm5031_vm2, %v5180_v8, %v5181_v22  ;;  %v5163_v54 = vmul.f32 %v8322_v10, %v5136_v53  ;;  %v5164_v3 = vmul.f32 %v8322_v10, %v5143_v37  ;;  %v5165_v19 = vmul.f32 %v8322_v10, %v5150_v1 }
 0x7a9   : > { %v8338_v17 = vsub.f32 %v8310_v23, %v5182_v4  ;;  %v5162_v61 = vmul.f32 %v8322_v10, %v5129_v58  ;;  %v5393_v8 = vperm.slane %v8361_v62, 2  ;;  %v5391_v4 = vperm.slane %v8361_v62, 0 }
 0x7aa   : > { %v5177_v35 = vrot.slane %v5163_v54, 6  ;;  %v5178_v45 = vrot.slane %v5164_v3, 4  ;;  %v5179_v41 = vrot.slane %v5165_v19, 2  ;;  %v5394_v54 = vperm.slane %v8361_v62, 3 }
 0x7ab   : > { %v5190_v33 = vmul.f32 %v8338_v17, %v8338_v17  ;;  %v5399_v3 = vrot.slane %v5392_v43, 6  ;;  %v5418_v19 = vperm.slane %v8373_v6, 1 }
 0x7ac   : > { %v5183_v38 = vsel %vm5027_vm0, %v5162_v61, %v5177_v35  ;;  %v5184_v46 = vsel %vm5029_vm1, %v5178_v45, %v5179_v41  ;;  %v5419_v61 = vperm.slane %v8373_v6, 2 }
 0x7ad   : > { %5194 = vst [vmem:[#allocation1] ss:$4 sm:$0xff] %v5190_v33  ;;  %v5185_v34 = vsel %vm5031_vm2, %v5183_v38, %v5184_v46  ;;  %v5420_v33 = vperm.slane %v8373_v6, 3 }
 0x7ae   : > { %v8348_v23 = vsub.f32 %v8315_v18, %v5185_v34 }
 0x7b0   : > { %v5191_v47 = vmul.f32 %v8348_v23, %v8348_v23 }
 0x7b2   : > { %5196 = vst [vmem:[#allocation1 + $0x20] ss:$4 sm:$0xff] %v5191_v47 }
 0x7b4   : > { %v5197_v29 = vld.sshfl [vmem:[#allocation1] sm:$0xff pattern:$0x73625140]  ;;  %v5198_v48 = vld.sshfl [vmem:[#allocation1 + $0x8] sm:$0xff pattern:$0x73625140] }
 0x7b5   : > { %v5199_v50 = vld.sshfl [vmem:[#allocation1 + $0x10] sm:$0xff pattern:$0x73625140]  ;;  %v5200_v55 = vld.sshfl [vmem:[#allocation1 + $0x18] sm:$0xff pattern:$0x73625140] }
 0x7b6   : > { %v5213_v31 = vsel %vm5027_vm0, %v5197_v29, 0.0  ;;  %v5220_v57 = vsel %vm5027_vm0, %v5198_v48, 0.0  ;;  %v5227_v28 = vsel %vm5027_vm0, %v5199_v50, 0.0  ;;  %v5234_v44 = vsel %vm5027_vm0, %v5200_v55, 0.0 }
 0x7b7   : > { %v5214_v30 = vrot.slane %v5213_v31, 4  ;;  %v5221_v63 = vrot.slane %v5220_v57, 4  ;;  %v5228_v18 = vrot.slane %v5227_v28, 4  ;;  %v5235_v25 = vrot.slane %v5234_v44, 4 }
 0x7b8   : > { %v8396_v29 = vrot.slane %v5393_v8, 4  ;;  %v8398_v48 = vrot.slane %v5394_v54, 2  ;;  %v8401_v50 = vsel %vm5027_vm0, %v5391_v4, %v5399_v3 }
 0x7b9   : > { %v5215_v16 = vadd.f32 %v5214_v30, %v5213_v31  ;;  %v5222_v9 = vadd.f32 %v5221_v63, %v5220_v57  ;;  %v5229_v2 = vadd.f32 %v5228_v18, %v5227_v28  ;;  %v5236_v21 = vadd.f32 %v5235_v25, %v5234_v44  ;;  %v5201_v40 = vld.sshfl [vmem:[#allocation1 + $0x20] sm:$0xff pattern:$0x73625140]  ;;  %v5202_v0 = vld.sshfl [vmem:[#allocation1 + $0x28] sm:$0xff pattern:$0x73625140] }
 0x7ba   : > { %v5241_v56 = vsel %vm5027_vm0, %v5201_v40, 0.0  ;;  %v5203_v22 = vld.sshfl [vmem:[#allocation1 + $0x30] sm:$0xff pattern:$0x73625140]  ;;  %v5248_v41 = vsel %vm5027_vm0, %v5202_v0, 0.0  ;;  %v5417_v63 = vperm.slane %v8373_v6, 0 }
 0x7bb   : > { %v5216_v39 = vrot.slane %v5215_v16, 2  ;;  %v5223_v12 = vrot.slane %v5222_v9, 2  ;;  %v5230_v59 = vrot.slane %v5229_v2, 2  ;;  %v5237_v11 = vrot.slane %v5236_v21, 2 }
 0x7bc   : > { %v5204_v35 = vld.sshfl [vmem:[#allocation1 + $0x38] sm:$0xff pattern:$0x73625140]  ;;  %v5242_v45 = vrot.slane %v5241_v56, 4  ;;  %v5255_v38 = vsel %vm5027_vm0, %v5203_v22, 0.0  ;;  %v5249_v34 = vrot.slane %v5248_v41, 4 }
 0x7bd   : > { %v5217_v36 = vadd.f32 %v5216_v39, %v5215_v16  ;;  %v5224_v32 = vadd.f32 %v5223_v12, %v5222_v9  ;;  %v5231_v7 = vadd.f32 %v5230_v59, %v5229_v2  ;;  %v5238_v49 = vadd.f32 %v5237_v11, %v5236_v21 }
 0x7be   : > { %v5243_v46 = vadd.f32 %v5242_v45, %v5241_v56  ;;  %v5256_v47 = vrot.slane %v5255_v38, 4  ;;  %v5262_v55 = vsel %vm5027_vm0, %v5204_v35, 0.0  ;;  %v5250_v57 = vadd.f32 %v5249_v34, %v5248_v41 }
 0x7bf   : > { %v5218_v42 = vrot.slane %v5217_v36, 1  ;;  %v5225_v5 = vrot.slane %v5224_v32, 1  ;;  %v5232_v26 = vrot.slane %v5231_v7, 1  ;;  %v5239_v60 = vrot.slane %v5238_v49, 1 }
 0x7c0   : > { %v5244_v31 = vrot.slane %v5243_v46, 2  ;;  %v5257_v28 = vadd.f32 %v5256_v47, %v5255_v38  ;;  %v5263_v44 = vrot.slane %v5262_v55, 4  ;;  %v8407_v18 = vrot.slane %v5418_v19, 6 }
 0x7c1   : > { %v5219_v51 = vadd.f32 %v5218_v42, %v5217_v36  ;;  %v5226_v13 = vadd.f32 %v5225_v5, %v5224_v32  ;;  %v5233_v14 = vadd.f32 %v5232_v26, %v5231_v7  ;;  %v5240_v20 = vadd.f32 %v5239_v60, %v5238_v49 }
 0x7c2   : > { %v8409_v25 = vrot.slane %v5419_v61, 4  ;;  %v8411_v16 = vrot.slane %v5420_v33, 2  ;;  %v5245_v21 = vadd.f32 %v5244_v31, %v5243_v46  ;;  %v5251_v39 = vrot.slane %v5250_v57, 2 }
 0x7c3   : > { %v5269_v15 = vmul.f32 %v5219_v51, %v8322_v10  ;;  %v5270_v24 = vmul.f32 %v5226_v13, %v8322_v10  ;;  %v5271_v27 = vmul.f32 %v5233_v14, %v8322_v10  ;;  %v5272_v52 = vmul.f32 %v5240_v20, %v8322_v10 }
 0x7c4   : > { %v5258_v11 = vrot.slane %v5257_v28, 2  ;;  %v5264_v36 = vadd.f32 %v5263_v44, %v5262_v55  ;;  %v5246_v42 = vrot.slane %v5245_v21, 1  ;;  %v5252_v60 = vadd.f32 %v5251_v39, %v5250_v57 }
 0x7c5   : > { %v8376_v58 = vadd.f32 1e-05, %v5269_v15  ;;  %v8378_v53 = vadd.f32 1e-05, %v5270_v24  ;;  %v8380_v37 = vadd.f32 1e-05, %v5271_v27 }
 0x7c6   : > { %v8382_v1 = vadd.f32 1e-05, %v5272_v52  ;;  %v5247_v14 = vadd.f32 %v5246_v42, %v5245_v21  ;;  %v5259_v20 = vadd.f32 %v5258_v11, %v5257_v28  ;;  %v5253_v15 = vrot.slane %v5252_v60, 1 }
 0x7c7   : > { %5738 = vrsqrt.f32 %v8376_v58  ;;  %vm5291_vm4 = vweird.f32 %v8376_v58  ;;  %vm5301_vm6 = vweird.f32 %v8378_v53  ;;  %vm5311_vm8 = vweird.f32 %v8380_v37 }
 0x7c8   : > { %5740 = vrsqrt.f32 %v8378_v53  ;;  %v5265_v24 = vrot.slane %v5264_v36, 2  ;;  %v5260_v0 = vrot.slane %v5259_v20, 1  ;;  %v5273_v56 = vmul.f32 %v5247_v14, %v8322_v10 }
 0x7c9   : > { %5742 = vrsqrt.f32 %v8380_v37  ;;  %v5254_v4 = vadd.f32 %v5253_v15, %v5252_v60  ;;  %vm5321_vm13 = vweird.f32 %v8382_v1  ;;  %v5395_v15 = vperm.slane %v8361_v62, 4 }
 0x7ca   : > { %5744 = vrsqrt.f32 %v8382_v1  ;;  %v5266_v54 = vadd.f32 %v5265_v24, %v5264_v36  ;;  %v5261_v61 = vadd.f32 %v5260_v0, %v5259_v20  ;;  %v8425_v35 = vadd.f32 1e-05, %v5273_v56 }
 0x7cb   : > { %v5274_v46 = vmul.f32 %v5254_v4, %v8322_v10  ;;  %v5431_v36 = vsel %vm5027_vm0, %v5417_v63, %v8407_v18  ;;  %v5397_v56 = vperm.slane %v8361_v62, 6  ;;  %v5424_v45 = vperm.slane %v8373_v6, 7 }
 0x7cc   : > { %v5267_v38 = vrot.slane %v5266_v54, 1  ;;  %v5275_v47 = vmul.f32 %v5261_v61, %v8322_v10  ;;  %5746 = vrsqrt.f32 %v8425_v35  ;;  %vm5331_vm3 = vweird.f32 %v8425_v35 }
 0x7cd   : > { %v8404_v30 = vpop.eup %5738  ;;  %v5282_v57 = vadd.f32 1e-05, %v5274_v46  ;;  %v5423_v61 = vperm.slane %v8373_v6, 6 }
 0x7ce   : > { %v5741_v9 = vpop.eup %5740  ;;  %v5286_v2 = vmul.f32 %v8404_v30, %v8376_v58  ;;  %vm5292_vm5 = vweird.f32 %v8404_v30  ;;  %v5268_v31 = vadd.f32 %v5267_v38, %v5266_v54  ;;  %v5283_v44 = vadd.f32 1e-05, %v5275_v47 }
 0x7cf   : > { %v5743_v12 = vpop.eup %5742  ;;  %v5296_v59 = vmul.f32 %v5741_v9, %v8378_v53  ;;  %vm5302_vm7 = vweird.f32 %v5741_v9  ;;  %vm8431_vm11 = vmor %vm5291_vm4, %vm5292_vm5  ;;  %5748 = vrsqrt.f32 %v5282_v57  ;;  %vm5341_vm4 = vweird.f32 %v5282_v57 }
 0x7d0   : > { %v5745_v32 = vpop.eup %5744  ;;  %v5287_v7 = vmul.f32 %v8404_v30, %v5286_v2  ;;  %v5306_v49 = vmul.f32 %v5743_v12, %v8380_v37  ;;  %vm5312_vm9 = vweird.f32 %v5743_v12  ;;  %vm5303_vm12 = vmor %vm5301_vm6, %vm5302_vm7  ;;  %5750 = vrsqrt.f32 %v5283_v44 }
 0x7d1   : > { %v5297_v5 = vmul.f32 %v5741_v9, %v5296_v59  ;;  %v5316_v26 = vmul.f32 %v5745_v32, %v8382_v1  ;;  %vm5322_vm10 = vweird.f32 %v5745_v32  ;;  %vm5313_vm14 = vmor %vm5311_vm8, %vm5312_vm9  ;;  %v5406_v59 = vsel %vm5029_vm1, %v8396_v29, %v8398_v48 }
 0x7d2   : > { %v5288_v51 = vmul.f32 0.5, %v5287_v7  ;;  %v5307_v13 = vmul.f32 %v5743_v12, %v5306_v49  ;;  %vm5323_vm15 = vmor %vm5321_vm13, %vm5322_vm10  ;;  %v5407_v29 = vsel %vm5031_vm2, %v8401_v50, %v5406_v59  ;;  %vm5351_vm5 = vweird.f32 %v5283_v44 }
 0x7d3   : > { %v5298_v40 = vmul.f32 0.5, %v5297_v5  ;;  %v5317_v43 = vmul.f32 %v5745_v32, %v5316_v26 }
 0x7d4   : > { %v5289_v27 = vsub.f32 1.5, %v5288_v51  ;;  %v5308_v52 = vmul.f32 0.5, %v5307_v13 }
 0x7d5   : > { %v5299_v8 = vsub.f32 1.5, %v5298_v40  ;;  %v5318_v22 = vmul.f32 0.5, %v5317_v43  ;;  %v5396_v40 = vperm.slane %v8361_v62, 5 }
 0x7d6   : > { %v5290_v3 = vmul.f32 %v8404_v30, %v5289_v27  ;;  %v5309_v19 = vsub.f32 1.5, %v5308_v52 }
 0x7d7   : > { %v5300_v33 = vmul.f32 %v5741_v9, %v5299_v8  ;;  %v5319_v41 = vsub.f32 1.5, %v5318_v22  ;;  %v5398_v8 = vperm.slane %v8361_v62, 7  ;;  %v5402_v54 = vrot.slane %v5396_v40, 6 }
 0x7d8   : > { %v5310_v34 = vmul.f32 %v5743_v12, %v5309_v19  ;;  %v5294_v53 = vsel %vm8431_vm11, %v8404_v30, %v5290_v3  ;;  %v8454_v30 = vpop.eup %5746  ;;  %v5422_v19 = vperm.slane %v8373_v6, 5 }
 0x7d9   : > { %v5304_v58 = vsel %vm5303_vm12, %v5741_v9, %v5300_v33  ;;  %v5320_v55 = vmul.f32 %v5745_v32, %v5319_v41  ;;  %v5276_v9 = vmul.f32 %v5268_v31, %v8322_v10  ;;  %v5432_v10 = vsel %vm5029_vm1, %v8409_v25, %v8411_v16  ;;  %v5749_v49 = vpop.eup %5748 }
 0x7da   : > { %v5314_v28 = vsel %vm5313_vm14, %v5743_v12, %v5310_v34  ;;  %v5373_v1 = vrot.slane %v5304_v58, 6  ;;  %v5326_v48 = vmul.f32 %v8454_v30, %v8425_v35  ;;  %v5433_v42 = vsel %vm5031_vm2, %v5431_v36, %v5432_v10  ;;  %v5751_v18 = vpop.eup %5750 }
 0x7db   : > { %v5324_v2 = vsel %vm5323_vm15, %v5745_v32, %v5320_v55  ;;  %v5374_v21 = vrot.slane %v5314_v28, 4  ;;  %v5284_v11 = vadd.f32 1e-05, %v5276_v9  ;;  %v5336_v26 = vmul.f32 %v5749_v49, %v5282_v57 }
 0x7dc   : > { %v5375_v39 = vrot.slane %v5324_v2, 2  ;;  %v5379_v37 = vsel %vm5027_vm0, %v5294_v53, %v5373_v1  ;;  %v5327_v63 = vmul.f32 %v8454_v30, %v5326_v48  ;;  %v5346_v25 = vmul.f32 %v5751_v18, %v5283_v44 }
 0x7dd   : > { %5752 = vrsqrt.f32 %v5284_v11  ;;  %v5337_v51 = vmul.f32 %v5749_v49, %v5336_v26  ;;  %vm5342_vm6 = vweird.f32 %v5749_v49  ;;  %vm5352_vm7 = vweird.f32 %v5751_v18 }
 0x7de   : > { %v5380_v12 = vsel %vm5029_vm1, %v5374_v21, %v5375_v39  ;;  %v5328_v60 = vmul.f32 0.5, %v5327_v63  ;;  %v5347_v13 = vmul.f32 %v5751_v18, %v5346_v25  ;;  %vm5332_vm8 = vweird.f32 %v8454_v30  ;;  %vm5343_vm9 = vmor %vm5341_vm4, %vm5342_vm6 }
 0x7df   : > { %v5381_v32 = vsel %vm5031_vm2, %v5379_v37, %v5380_v12  ;;  %v5338_v20 = vmul.f32 0.5, %v5337_v51  ;;  %vm5353_vm10 = vmor %vm5351_vm5, %vm5352_vm7  ;;  %v5403_v34 = vrot.slane %v5397_v56, 4  ;;  %v5404_v47 = vrot.slane %v5398_v8, 2 }
 0x7e0   : > { %v5387_v7 = vmul.f32 %v5381_v32, %v8338_v17  ;;  %v5348_v43 = vmul.f32 0.5, %v5347_v13  ;;  %v5329_v24 = vsub.f32 1.5, %v5328_v60  ;;  %vm5333_vm12 = vmor %vm5331_vm3, %vm5332_vm8  ;;  %vm5361_vm13 = vweird.f32 %v5284_v11 }
 0x7e1   : > { %v5339_v27 = vsub.f32 1.5, %v5338_v20  ;;  %v5421_v55 = vperm.slane %v8373_v6, 4  ;;  %v5428_v57 = vrot.slane %v5422_v19, 6  ;;  %v5429_v53 = vrot.slane %v5423_v61, 4 }
 0x7e2   : > { %v5413_v5 = vmul.f32 %v5407_v29, %v5387_v7  ;;  %v5349_v0 = vsub.f32 1.5, %v5348_v43  ;;  %v5330_v33 = vmul.f32 %v8454_v30, %v5329_v24  ;;  %v5430_v28 = vrot.slane %v5424_v45, 2 }
 0x7e3   : > { %v5753_v50 = vpop.eup %5752  ;;  %v5340_v22 = vmul.f32 %v5749_v49, %v5339_v27  ;;  %v5408_v9 = vsel %vm5027_vm0, %v5395_v15, %v5402_v54  ;;  %v5409_v35 = vsel %vm5029_vm1, %v5403_v34, %v5404_v47  ;;  %v5434_v6 = vsel %vm5027_vm0, %v5421_v55, %v5428_v57 }
 0x7e4   : > { %v5439_v16 = vadd.f32 %v5433_v42, %v5413_v5  ;;  %v5356_v17 = vmul.f32 %v5753_v50, %v5284_v11  ;;  %v5350_v3 = vmul.f32 %v5751_v18, %v5349_v0  ;;  %vm5362_vm11 = vweird.f32 %v5753_v50 }
 0x7e5   : > { %v5344_v41 = vsel %vm5343_vm9, %v5749_v49, %v5340_v22  ;;  %vm5363_vm14 = vmor %vm5361_vm13, %vm5362_vm11  ;;  %v5334_v1 = vsel %vm5333_vm12, %v8454_v30, %v5330_v33  ;;  %v5435_v37 = vsel %vm5029_vm1, %v5429_v53, %v5430_v28  ;;  %v5410_v11 = vsel %vm5031_vm2, %v5408_v9, %v5409_v35 }
 0x7e6   : > { %v5441_v14 = vmax.f32 %v5439_v16, 0.0  ;;  %v5357_v52 = vmul.f32 %v5753_v50, %v5356_v17  ;;  %v5354_v38 = vsel %vm5353_vm10, %v5751_v18, %v5350_v3  ;;  %v5376_v46 = vrot.slane %v5344_v41, 6 }
 0x7e7   : > { %v5377_v31 = vrot.slane %v5354_v38, 4  ;;  %v5436_v12 = vsel %vm5031_vm2, %v5434_v6, %v5435_v37 }
 0x7e8   : > { %5443 = vst [vmem:[%s5997_s16] sm:$0xff] %v5441_v14  ;;  %v5358_v4 = vmul.f32 0.5, %v5357_v52  ;;  %v5382_v21 = vsel %vm5027_vm0, %v5334_v1, %v5376_v46 }
 0x7ea   : > { %v5359_v62 = vsub.f32 1.5, %v5358_v4 }
 0x7ec   : > { %v5360_v58 = vmul.f32 %v5753_v50, %v5359_v62 }
 0x7ee   : > { %v5364_v44 = vsel %vm5363_vm14, %v5753_v50, %v5360_v58 }
 0x7ef   : > { %v5378_v2 = vrot.slane %v5364_v44, 2 }
 0x7f1   : > { %v5383_v39 = vsel %vm5029_vm1, %v5377_v31, %v5378_v2 }
 0x7f2   : > { %v5384_v59 = vsel %vm5031_vm2, %v5382_v21, %v5383_v39 }
 0x7f3   : > { %v5388_v30 = vmul.f32 %v5384_v59, %v8348_v23 }
 0x7f5   : > { %v5414_v36 = vmul.f32 %v5410_v11, %v5388_v30 }
 0x7f7   : > { %v5440_v10 = vadd.f32 %v5436_v12, %v5414_v36 }
 0x7f9   : > { %v5442_v32 = vmax.f32 %v5440_v10, 0.0 }
 0x7fb   : > { %5444 = vst [vmem:[%s5997_s16 + $0x8] sm:$0xff] %v5442_v32 }
 0x7fc PF: > { %s18_s25 = sadd.s32 1, %s5850_s25   ;;  %s8564_s22 = sld [smem:[#allocation6_spill]] }
 0x7fd   : > { %p15_p4 = scmp.ge.s32.totalorder %s18_s25, 10   ;;  %s8565_s1 = sld [smem:[#allocation7_spill]] }
 0x7fe   : > { %s8566_s24 = sld [smem:[#allocation8_spill]]  ;;  %s8567_s18 = smov %s5826_s19 }
 0x7ff   : > { %s8568_s19 = smov %s5830_s20  ;;  %s8569_s20 = smov %s5953_s13 }
 0x800   : > { %s8570_s21 = smov %s5842_s23  ;;  %17 = sbr.rel (!%p15_p4) target bundleno = 7 (0x7), region = 103 }
 0x803   : > { %s8571_s23 = smov %s8565_s1 }
 0x805   :  { %5466 = vsyncpa [#allocation4], 1 }
 0x806   :  { %5468 = vsyncpa [#allocation4 + $0x1], 1 }

</bundles_post_ra>
